<compile_context>
chip_gen: v5e
topology: v5e:2x2
jax: 0.10.0
libtpu: 0.0.40
codegen_flags: <defaults>
</compile_context>

<pallas_src>
import functools

import jax
import jax.numpy as jnp
from jax.experimental import pallas as pl
from jax.experimental.pallas import tpu as pltpu

BN_EPS = 1e-5
LRELU_SLOPE = 0.2


# ----------------------------------------------------------------------------
# Kernel 1: generic "tap matmul" convolution kernel (per-image grid).
#   y[n]  = sum_t shift_t(x[n]) @ w[t]  (+ bias)
#   stats = per-channel sum / sum-of-squares of y (f32) for the fused BatchNorm.
# Used for:
#   * 3x3 conv, pad 1   : 9 taps over an H-padded, flattened image (no im2col)
#   * ConvTranspose(k,k): 1 tap, output columns = Cout*k*k
# ----------------------------------------------------------------------------
def _conv_taps_kernel(x_ref, w_ref, b_ref, y_ref, s_ref, q_ref,
                      *, taps, img_w, n_rows, add_bias):
    x = x_ref[0]                                       # (P, Cin)
    need_mask = any(m != 0 for _, m in taps)
    if need_mask:
        col = jax.lax.broadcasted_iota(jnp.int32, (n_rows, 1), 0) % img_w
        not_left = col != 0                            # w == 0 invalid for dw == 0 taps
        not_right = col != (img_w - 1)                 # w == W-1 invalid for dw == 2 taps
    acc = None
    for t, (d, m) in enumerate(taps):
        xs = x[d:d + n_rows, :]                        # static shifted tap view
        if m == 1:
            xs = jnp.where(not_left, xs, jnp.zeros_like(xs))
        elif m == 2:
            xs = jnp.where(not_right, xs, jnp.zeros_like(xs))
        part = jnp.dot(xs, w_ref[t], preferred_element_type=jnp.float32)
        acc = part if acc is None else acc + part
    if add_bias:
        acc = acc + b_ref[0]
    y_ref[0] = acc.astype(y_ref.dtype)
    # fused BatchNorm statistics (per image; reduced across images in the wrapper)
    s_ref[0] = jnp.sum(acc, axis=0, keepdims=True)
    q_ref[0] = jnp.sum(acc * acc, axis=0, keepdims=True)


def _conv_taps(xf, wt, bias, *, taps, img_w, n_rows, add_bias, out_dtype):
    """xf: (N, P, Cin), wt: (T, Cin, OC), bias: (1, 1, OC) f32."""
    N, P, Cin = xf.shape
    T, _, OC = wt.shape
    kern = functools.partial(_conv_taps_kernel, taps=tuple(taps), img_w=img_w,
                             n_rows=n_rows, add_bias=add_bias)
    return pl.pallas_call(
        kern,
        out_shape=(jax.ShapeDtypeStruct((N, n_rows, OC), out_dtype),
                   jax.ShapeDtypeStruct((N, 1, OC), jnp.float32),
                   jax.ShapeDtypeStruct((N, 1, OC), jnp.float32)),
        grid=(N,),
        in_specs=[pl.BlockSpec((1, P, Cin), lambda n: (n, 0, 0)),
                  pl.BlockSpec((T, Cin, OC), lambda n: (0, 0, 0)),
                  pl.BlockSpec((1, 1, OC), lambda n: (0, 0, 0))],
        out_specs=(pl.BlockSpec((1, n_rows, OC), lambda n: (n, 0, 0)),
                   pl.BlockSpec((1, 1, OC), lambda n: (n, 0, 0)),
                   pl.BlockSpec((1, 1, OC), lambda n: (n, 0, 0))),
        compiler_params=pltpu.CompilerParams(
            dimension_semantics=("parallel",),
            vmem_limit_bytes=32 * 1024 * 1024),
    )(xf, wt, bias)


# ----------------------------------------------------------------------------
# Conv wrappers (pad / re-layout glue in JAX, all FLOPs + BN stats in Pallas)
# ----------------------------------------------------------------------------
def conv3x3(x_nhwc, w, b=None, *, dtype, out_dtype=None):
    """3x3 conv, stride 1, pad 1.  w: (Cout, Cin, 3, 3) (PyTorch layout).
    Returns raw conv output (NHWC) plus fused per-channel (sum, sumsq, count)."""
    N, H, W, C = x_nhwc.shape
    Cout = w.shape[0]
    # Pad H by one row top/bottom, flatten (h, w) per image, then pad one extra row at
    # both ends so every 3x3 tap becomes a STATIC row shift of the same buffer.
    xp = jnp.pad(x_nhwc.astype(dtype), ((0, 0), (1, 1), (0, 0), (0, 0)))
    xf = jnp.pad(xp.reshape(N, (H + 2) * W, C), ((0, 0), (1, 1), (0, 0)))
    wt = jnp.transpose(w, (2, 3, 1, 0)).reshape(9, C, Cout).astype(dtype)
    # tap (dh, dw): row shift dh*W + dw ; dw==0 -> mask w==0, dw==2 -> mask w==W-1
    taps = [(dh * W + dw, 0 if dw == 1 else (1 if dw == 0 else 2))
            for dh in range(3) for dw in range(3)]
    bias = (b if b is not None else jnp.zeros((Cout,))).reshape(1, 1, Cout)
    y, s, q = _conv_taps(xf, wt, bias.astype(jnp.float32), taps=taps, img_w=W,
                         n_rows=H * W, add_bias=(b is not None),
                         out_dtype=(out_dtype or dtype))
    return (y.reshape(N, H, W, Cout),
            jnp.sum(s, axis=(0, 1)), jnp.sum(q, axis=(0, 1)), N * H * W)


def conv_transpose_k(x_nhwc, w, *, dtype):
    """ConvTranspose2d, kernel (k,k), stride (k,k), pad 0.  w: (Cin, Cout, k, k).
    Bias is omitted (always followed by training-mode BatchNorm -> cancelled)."""
    N, H, W, C = x_nhwc.shape
    Cin, Cout, k, _ = w.shape
    xf = x_nhwc.astype(dtype).reshape(N, H * W, C)
    wt = w.reshape(1, Cin, Cout * k * k).astype(dtype)
    bias = jnp.zeros((1, 1, Cout * k * k), jnp.float32)
    y, s, q = _conv_taps(xf, wt, bias, taps=[(0, 0)], img_w=W, n_rows=H * W,
                         add_bias=False, out_dtype=dtype)
    # TODO(synk): this 6-D re-layout is XLA glue (bf16); it could be folded into the
    # following normalize kernel's output index_map to save one HBM round trip.
    y = y.reshape(N, H, W, Cout, k, k)
    y = jnp.transpose(y, (0, 1, 4, 2, 5, 3)).reshape(N, H * k, W * k, Cout)
    sum_c = jnp.sum(s, axis=(0, 1)).reshape(Cout, k * k).sum(-1)
    sq_c = jnp.sum(q, axis=(0, 1)).reshape(Cout, k * k).sum(-1)
    return y, sum_c, sq_c, N * H * W * k * k


# ----------------------------------------------------------------------------
# Kernel 2: BatchNorm(apply) + LeakyReLU (+ fused residual add), row-tiled and
# lane-packed (g spatial rows folded into lanes so the last dim is ~128 wide).
# ----------------------------------------------------------------------------
def _bn_act_kernel(y_ref, s_ref, t_ref, o_ref, *, slope):
    v = y_ref[...].astype(jnp.float32) * s_ref[...] + t_ref[...]
    o_ref[...] = jnp.where(v >= 0.0, v, slope * v).astype(o_ref.dtype)


def _bn_act_add_kernel(y_ref, s_ref, t_ref, r_ref, o_ref, *, slope):
    v = y_ref[...].astype(jnp.float32) * s_ref[...] + t_ref[...]
    v = jnp.where(v >= 0.0, v, slope * v)
    o_ref[...] = (v + r_ref[...].astype(jnp.float32)).astype(o_ref.dtype)


def _row_tile(m):
    for t in (2048, 1024, 512, 256, 128, 64, 32, 16, 8):
        if m % t == 0:
            return t
    return m


def batchnorm_lrelu(y_nhwc, gamma, beta, sum_c, sq_c, count, *, residual=None, dtype):
    """Training-mode BatchNorm2d (batch stats, eps=1e-5) + LeakyReLU(0.2) [+ residual].
    Per-channel sums come fused out of the conv kernel, so the activation is read
    exactly once here."""
    N, H, W, C = y_nhwc.shape
    M = N * H * W
    mean = sum_c / count
    var = jnp.maximum(sq_c / count - mean * mean, 0.0)          # biased (training BN)
    scale = gamma.astype(jnp.float32) * jax.lax.rsqrt(var + BN_EPS)
    shift = beta.astype(jnp.float32) - mean * scale

    # lane packing: fold g spatial rows into the lane axis (dense 128-wide stores).
    g = 1
    if C < 128:
        g = 128 // C
        while g > 1 and M % g:
            g //= 2
    M2, L = M // g, g * C

    y2 = y_nhwc.reshape(M2, L)
    s2 = jnp.tile(scale, g).reshape(1, L)
    t2 = jnp.tile(shift, g).reshape(1, L)
    tm = _row_tile(M2)
    grid = (M2 // tm,)
    row_spec = pl.BlockSpec((tm, L), lambda i: (i, 0))
    vec_spec = pl.BlockSpec((1, L), lambda i: (0, 0))
    cparams = pltpu.CompilerParams(dimension_semantics=("parallel",))
    if residual is None:
        out = pl.pallas_call(
            functools.partial(_bn_act_kernel, slope=LRELU_SLOPE),
            out_shape=jax.ShapeDtypeStruct((M2, L), dtype),
            grid=grid, in_specs=[row_spec, vec_spec, vec_spec],
            out_specs=row_spec, compiler_params=cparams,
        )(y2, s2, t2)
    else:
        r2 = residual.astype(dtype).reshape(M2, L)
        out = pl.pallas_call(
            functools.partial(_bn_act_add_kernel, slope=LRELU_SLOPE),
            out_shape=jax.ShapeDtypeStruct((M2, L), dtype),
            grid=grid, in_specs=[row_spec, vec_spec, vec_spec, row_spec],
            out_specs=row_spec, compiler_params=cparams,
        )(y2, s2, t2, r2)
    return out.reshape(N, H, W, C)


# ----------------------------------------------------------------------------
# ResNetDecoder: parameters + forward
# ----------------------------------------------------------------------------
def init_params(key, config):
    n_res = config['n_ResidualBlock']
    n_levels = config['n_levels']
    z_dim = config['z_dim']
    out_ch = config['output_channels']
    use_skips = config['bUseMultiResSkips']
    max_filters = 2 ** (n_levels + 3)

    keys = iter(jax.random.split(key, 4096))

    def nrm(shape, scale=0.1):
        return scale * jax.random.normal(next(keys), shape, dtype=jnp.float32)

    def conv_p(cin, cout, kh, kw):
        return {'w': nrm((cout, cin, kh, kw)), 'b': nrm((cout,), 0.05)}

    def convT_p(cin, cout, k):
        return {'w': nrm((cin, cout, k, k)), 'b': nrm((cout,), 0.05)}

    def bn_p(c):
        return {'gamma': 1.0 + nrm((c,), 0.1), 'beta': nrm((c,), 0.05)}

    params = {'input_conv': {'conv': conv_p(z_dim, max_filters, 3, 3),
                             'bn': bn_p(max_filters)}}
    levels = []
    nf1 = None
    for i in range(n_levels):
        nf0 = 2 ** (n_levels - i + 3)
        nf1 = 2 ** (n_levels - i + 2)
        ks = 2 ** (i + 1)
        lvl = {'up': {'convT': convT_p(nf0, nf1, 2), 'bn': bn_p(nf1)}}
        lvl['res'] = [{'conv1': conv_p(nf1, nf1, 3, 3), 'bn1': bn_p(nf1),
                       'conv2': conv_p(nf1, nf1, 3, 3), 'bn2': bn_p(nf1)}
                      for _ in range(n_res)]
        if use_skips:
            lvl['skip'] = {'convT': convT_p(max_filters, nf1, ks), 'bn': bn_p(nf1)}
        levels.append(lvl)
    params['levels'] = levels
    params['output_conv'] = conv_p(nf1, out_ch, 3, 3)
    return params


def resnet_decoder_forward(params, z_nchw, config, *, dtype=jnp.bfloat16):
    n_levels = config['n_levels']
    use_skips = config['bUseMultiResSkips']

    x = jnp.transpose(z_nchw, (0, 2, 3, 1)).astype(dtype)        # NCHW -> NHWC

    # input_conv: Conv3x3 -> BN -> LeakyReLU  (conv bias dropped: cancelled by BN)
    p = params['input_conv']
    y, s, q, cnt = conv3x3(x, p['conv']['w'], dtype=dtype)
    z = batchnorm_lrelu(y, p['bn']['gamma'], p['bn']['beta'], s, q, cnt, dtype=dtype)
    z_top = z

    for i in range(n_levels):
        lp = params['levels'][i]

        # conv_list[i]: ConvTranspose(2,2) -> BN -> LeakyReLU
        up = lp['up']
        y, s, q, cnt = conv_transpose_k(z, up['convT']['w'], dtype=dtype)
        z = batchnorm_lrelu(y, up['bn']['gamma'], up['bn']['beta'], s, q, cnt, dtype=dtype)

        # res_blk_list[i]: n_ResidualBlock x (x + LReLU(BN(conv2(LReLU(BN(conv1(x)))))))
        for rb in lp['res']:
            y, s, q, cnt = conv3x3(z, rb['conv1']['w'], dtype=dtype)
            h = batchnorm_lrelu(y, rb['bn1']['gamma'], rb['bn1']['beta'], s, q, cnt,
                                dtype=dtype)
            y, s, q, cnt = conv3x3(h, rb['conv2']['w'], dtype=dtype)
            z = batchnorm_lrelu(y, rb['bn2']['gamma'], rb['bn2']['beta'], s, q, cnt,
                                residual=z, dtype=dtype)

        # multi-res skip: z += LReLU(BN(convT_ks(z_top)))   (add fused in BN kernel)
        if use_skips:
            sk = lp['skip']
            y, s, q, cnt = conv_transpose_k(z_top, sk['convT']['w'], dtype=dtype)
            z = batchnorm_lrelu(y, sk['bn']['gamma'], sk['bn']['beta'], s, q, cnt,
                                residual=z, dtype=dtype)

    # output_conv: plain Conv3x3 with bias (no BN / activation), f32 output
    p = params['output_conv']
    y, _, _, _ = conv3x3(z, p['w'], p['b'], dtype=dtype, out_dtype=jnp.float32)
    return jnp.transpose(y, (0, 3, 1, 2))                        # NHWC -> NCHW


# ----------------------------------------------------------------------------
# Pure-JAX reference (structural correctness check only)
# ----------------------------------------------------------------------------
def _ref_forward(params, z_nchw, config):
    hi = jax.lax.Precision.HIGHEST

    def conv3(x, p):
        y = jax.lax.conv_general_dilated(
            x, jnp.transpose(p['w'], (2, 3, 1, 0)), (1, 1), ((1, 1), (1, 1)),
            dimension_numbers=('NHWC', 'HWIO', 'NHWC'), precision=hi)
        return y + p['b']

    def convT(x, p):
        N, H, W, C = x.shape
        Cin, Cout, k, _ = p['w'].shape
        y = jnp.einsum('nhwc,coij->nhiwjo', x, p['w'], precision=hi)
        return y.reshape(N, H * k, W * k, Cout) + p['b']

    def bn_act(x, p, residual=None):
        mean = jnp.mean(x, axis=(0, 1, 2))
        var = jnp.var(x, axis=(0, 1, 2))
        y = (x - mean) * jax.lax.rsqrt(var + BN_EPS) * p['gamma'] + p['beta']
        y = jnp.where(y >= 0.0, y, LRELU_SLOPE * y)
        return y if residual is None else y + residual

    x = jnp.transpose(z_nchw, (0, 2, 3, 1)).astype(jnp.float32)
    z = bn_act(conv3(x, params['input_conv']['conv']), params['input_conv']['bn'])
    z_top = z
    for i in range(config['n_levels']):
        lp = params['levels'][i]
        z = bn_act(convT(z, lp['up']['convT']), lp['up']['bn'])
        for rb in lp['res']:
            h = bn_act(conv3(z, rb['conv1']), rb['bn1'])
            z = bn_act(conv3(h, rb['conv2']), rb['bn2'], residual=z)
        if config['bUseMultiResSkips']:
            z = bn_act(convT(z_top, lp['skip']['convT']), lp['skip']['bn'], residual=z)
    y = conv3(z, params['output_conv'])
    return jnp.transpose(y, (0, 3, 1, 2))


if __name__ == "__main__":
    config = dict(
        n_ResidualBlock=1,
        n_levels=2,
        z_dim=8,
        output_channels=3,
        bUseMultiResSkips=True,
    )
    key = jax.random.PRNGKey(0)
    kp, kz = jax.random.split(key)
    params = init_params(kp, config)

    # latent z: (batch=2, z_dim=8, 4, 4) in PyTorch NCHW convention
    z = jax.random.normal(kz, (2, config['z_dim'], 4, 4), dtype=jnp.float32)

    # Structural check: Pallas path run in f32 vs pure-JAX reference (the conv-bias
    # drop before training-mode BN is mathematically exact, so results must match).
    out_f32 = jax.jit(lambda p, zz: resnet_decoder_forward(p, zz, config,
                                                           dtype=jnp.float32))(params, z)
    ref = jax.jit(lambda p, zz: _ref_forward(p, zz, config))(params, z)
    err = float(jnp.max(jnp.abs(out_f32 - ref)))
    assert err < 1e-1, f"mismatch vs reference: {err}"

    # Performance path: bf16 MXU inputs / activations, f32 accumulation + BN stats.
    fwd = jax.jit(lambda p, zz: resnet_decoder_forward(p, zz, config))
    out = jax.block_until_ready(fwd(params, z))

    # spatial upsampled by 2**n_levels = 4x : 4 -> 16
    assert out.shape == (2, config['output_channels'], 16, 16), out.shape
    assert bool(jnp.all(jnp.isfinite(out)))
    print("KERNEL_OK")
</pallas_src>

<mosaic_0001>
module attributes {stable_mosaic.version = 11 : i64} {
  func.func @_conv_taps_kernel(%arg0: i32, %arg1: memref<1x26x8xf32, #tpu.memory_space<vmem>>, %arg2: memref<9x8x32xf32, #tpu.memory_space<vmem>>, %arg3: memref<1x1x32xf32, #tpu.memory_space<vmem>>, %arg4: memref<1x16x32xf32, #tpu.memory_space<vmem>>, %arg5: memref<1x1x32xf32, #tpu.memory_space<vmem>>, %arg6: memref<1x1x32xf32, #tpu.memory_space<vmem>>) attributes {dimension_semantics = [#tpu.dimension_semantics<parallel>], iteration_bounds = array<i64: 2>, scalar_prefetch = 0 : i64, scratch_operands = 0 : i64, tpu.core_type = #tpu.core_type<tc>, window_params = [{transform_indices = @transform_0, window_bounds = array<i64: 1, 26, 8>}, {pipeline_mode = #tpu.pipeline_mode<synchronous>, transform_indices = @transform_1, window_bounds = array<i64: 9, 8, 32>}, {pipeline_mode = #tpu.pipeline_mode<synchronous>, transform_indices = @transform_2, window_bounds = array<i64: 1, 1, 32>}, {transform_indices = @transform_3, window_bounds = array<i64: 1, 16, 32>}, {transform_indices = @transform_4, window_bounds = array<i64: 1, 1, 32>}, {transform_indices = @transform_5, window_bounds = array<i64: 1, 1, 32>}]} {
    %c0 = arith.constant 0 : index
    %c0_0 = arith.constant 0 : index
    %c0_1 = arith.constant 0 : index
    %0 = vector.load %arg1[%c0, %c0_0, %c0_1] : memref<1x26x8xf32, #tpu.memory_space<vmem>>, vector<1x26x8xf32>
    %1 = vector.shape_cast %0 : vector<1x26x8xf32> to vector<26x8xf32>
    %2 = tpu.iota {dimensions = array<i32: 0>} : vector<16x1xi32>
    %c4_i32 = arith.constant 4 : i32
    %c0_i32 = arith.constant 0 : i32
    %3 = arith.cmpi eq, %c4_i32, %c0_i32 : i32
    %c1_i32 = arith.constant 1 : i32
    %4 = arith.select %3, %c1_i32, %c4_i32 : i32
    %5 = vector.broadcast %4 : i32 to vector<16x1xi32>
    %6 = arith.remsi %2, %5 : vector<16x1xi32>
    %c0_i32_2 = arith.constant 0 : i32
    %7 = vector.broadcast %c0_i32_2 : i32 to vector<16x1xi32>
    %8 = arith.cmpi ne, %6, %7 : vector<16x1xi32>
    %c0_i32_3 = arith.constant 0 : i32
    %9 = vector.broadcast %c0_i32_3 : i32 to vector<16x1xi32>
    %10 = arith.cmpi slt, %6, %9 : vector<16x1xi32>
    %c0_i32_4 = arith.constant 0 : i32
    %11 = arith.cmpi slt, %4, %c0_i32_4 : i32
    %12 = vector.broadcast %11 : i1 to vector<16x1xi1>
    %13 = vector.broadcast %12 : vector<16x1xi1> to vector<16x1xi1>
    %14 = arith.xori %10, %13 : vector<16x1xi1>
    %15 = arith.andi %14, %8 : vector<16x1xi1>
    %16 = vector.broadcast %4 : i32 to vector<16x1xi32>
    %17 = arith.addi %6, %16 : vector<16x1xi32>
    %18 = arith.select %15, %17, %6 : vector<16x1xi1>, vector<16x1xi32>
    %c0_i32_5 = arith.constant 0 : i32
    %19 = vector.broadcast %c0_i32_5 : i32 to vector<16x1xi32>
    %20 = arith.cmpi ne, %18, %19 : vector<16x1xi32>
    %c3_i32 = arith.constant 3 : i32
    %21 = vector.broadcast %c3_i32 : i32 to vector<16x1xi32>
    %22 = arith.cmpi ne, %18, %21 : vector<16x1xi32>
    %23 = vector.extract_strided_slice %1 {offsets = [0, 0], sizes = [16, 8], strides = [1, 1]} : vector<26x8xf32> to vector<16x8xf32>
    %cst = arith.constant 0.000000e+00 : f32
    %24 = vector.broadcast %cst : f32 to vector<16x8xf32>
    %25 = vector.shape_cast %20 : vector<16x1xi1> to vector<16x1xi1>
    %26 = vector.broadcast %25 : vector<16x1xi1> to vector<16x8xi1>
    %27 = arith.select %26, %23, %24 : vector<16x8xi1>, vector<16x8xf32>
    %c0_6 = arith.constant 0 : index
    %c0_7 = arith.constant 0 : index
    %c0_8 = arith.constant 0 : index
    %28 = vector.load %arg2[%c0_6, %c0_7, %c0_8] : memref<9x8x32xf32, #tpu.memory_space<vmem>>, vector<1x8x32xf32>
    %29 = vector.shape_cast %28 : vector<1x8x32xf32> to vector<8x32xf32>
    %cst_9 = arith.constant dense<0.000000e+00> : vector<16x32xf32>
    %30 = tpu.matmul %27, %29, %cst_9 {dimension_numbers = #tpu.dot_dimension_numbers<[1], [0], [0], [1], [0, 0, 1, 1], [], []>} : vector<16x8xf32>, vector<8x32xf32>, vector<16x32xf32> -> vector<16x32xf32>
    %31 = vector.extract_strided_slice %1 {offsets = [1, 0], sizes = [16, 8], strides = [1, 1]} : vector<26x8xf32> to vector<16x8xf32>
    %c1 = arith.constant 1 : index
    %c0_10 = arith.constant 0 : index
    %c0_11 = arith.constant 0 : index
    %32 = vector.load %arg2[%c1, %c0_10, %c0_11] : memref<9x8x32xf32, #tpu.memory_space<vmem>>, vector<1x8x32xf32>
    %33 = vector.shape_cast %32 : vector<1x8x32xf32> to vector<8x32xf32>
    %cst_12 = arith.constant dense<0.000000e+00> : vector<16x32xf32>
    %34 = tpu.matmul %31, %33, %cst_12 {dimension_numbers = #tpu.dot_dimension_numbers<[1], [0], [0], [1], [0, 0, 1, 1], [], []>} : vector<16x8xf32>, vector<8x32xf32>, vector<16x32xf32> -> vector<16x32xf32>
    %35 = arith.addf %30, %34 : vector<16x32xf32>
    %36 = vector.extract_strided_slice %1 {offsets = [2, 0], sizes = [16, 8], strides = [1, 1]} : vector<26x8xf32> to vector<16x8xf32>
    %cst_13 = arith.constant 0.000000e+00 : f32
    %37 = vector.broadcast %cst_13 : f32 to vector<16x8xf32>
    %38 = vector.shape_cast %22 : vector<16x1xi1> to vector<16x1xi1>
    %39 = vector.broadcast %38 : vector<16x1xi1> to vector<16x8xi1>
    %40 = arith.select %39, %36, %37 : vector<16x8xi1>, vector<16x8xf32>
    %c2 = arith.constant 2 : index
    %c0_14 = arith.constant 0 : index
    %c0_15 = arith.constant 0 : index
    %41 = vector.load %arg2[%c2, %c0_14, %c0_15] : memref<9x8x32xf32, #tpu.memory_space<vmem>>, vector<1x8x32xf32>
    %42 = vector.shape_cast %41 : vector<1x8x32xf32> to vector<8x32xf32>
    %cst_16 = arith.constant dense<0.000000e+00> : vector<16x32xf32>
    %43 = tpu.matmul %40, %42, %cst_16 {dimension_numbers = #tpu.dot_dimension_numbers<[1], [0], [0], [1], [0, 0, 1, 1], [], []>} : vector<16x8xf32>, vector<8x32xf32>, vector<16x32xf32> -> vector<16x32xf32>
    %44 = arith.addf %35, %43 : vector<16x32xf32>
    %45 = vector.extract_strided_slice %1 {offsets = [4, 0], sizes = [16, 8], strides = [1, 1]} : vector<26x8xf32> to vector<16x8xf32>
    %cst_17 = arith.constant 0.000000e+00 : f32
    %46 = vector.broadcast %cst_17 : f32 to vector<16x8xf32>
    %47 = vector.shape_cast %20 : vector<16x1xi1> to vector<16x1xi1>
    %48 = vector.broadcast %47 : vector<16x1xi1> to vector<16x8xi1>
    %49 = arith.select %48, %45, %46 : vector<16x8xi1>, vector<16x8xf32>
    %c3 = arith.constant 3 : index
    %c0_18 = arith.constant 0 : index
    %c0_19 = arith.constant 0 : index
    %50 = vector.load %arg2[%c3, %c0_18, %c0_19] : memref<9x8x32xf32, #tpu.memory_space<vmem>>, vector<1x8x32xf32>
    %51 = vector.shape_cast %50 : vector<1x8x32xf32> to vector<8x32xf32>
    %cst_20 = arith.constant dense<0.000000e+00> : vector<16x32xf32>
    %52 = tpu.matmul %49, %51, %cst_20 {dimension_numbers = #tpu.dot_dimension_numbers<[1], [0], [0], [1], [0, 0, 1, 1], [], []>} : vector<16x8xf32>, vector<8x32xf32>, vector<16x32xf32> -> vector<16x32xf32>
    %53 = arith.addf %44, %52 : vector<16x32xf32>
    %54 = vector.extract_strided_slice %1 {offsets = [5, 0], sizes = [16, 8], strides = [1, 1]} : vector<26x8xf32> to vector<16x8xf32>
    %c4 = arith.constant 4 : index
    %c0_21 = arith.constant 0 : index
    %c0_22 = arith.constant 0 : index
    %55 = vector.load %arg2[%c4, %c0_21, %c0_22] : memref<9x8x32xf32, #tpu.memory_space<vmem>>, vector<1x8x32xf32>
    %56 = vector.shape_cast %55 : vector<1x8x32xf32> to vector<8x32xf32>
    %cst_23 = arith.constant dense<0.000000e+00> : vector<16x32xf32>
    %57 = tpu.matmul %54, %56, %cst_23 {dimension_numbers = #tpu.dot_dimension_numbers<[1], [0], [0], [1], [0, 0, 1, 1], [], []>} : vector<16x8xf32>, vector<8x32xf32>, vector<16x32xf32> -> vector<16x32xf32>
    %58 = arith.addf %53, %57 : vector<16x32xf32>
    %59 = vector.extract_strided_slice %1 {offsets = [6, 0], sizes = [16, 8], strides = [1, 1]} : vector<26x8xf32> to vector<16x8xf32>
    %cst_24 = arith.constant 0.000000e+00 : f32
    %60 = vector.broadcast %cst_24 : f32 to vector<16x8xf32>
    %61 = vector.shape_cast %22 : vector<16x1xi1> to vector<16x1xi1>
    %62 = vector.broadcast %61 : vector<16x1xi1> to vector<16x8xi1>
    %63 = arith.select %62, %59, %60 : vector<16x8xi1>, vector<16x8xf32>
    %c5 = arith.constant 5 : index
    %c0_25 = arith.constant 0 : index
    %c0_26 = arith.constant 0 : index
    %64 = vector.load %arg2[%c5, %c0_25, %c0_26] : memref<9x8x32xf32, #tpu.memory_space<vmem>>, vector<1x8x32xf32>
    %65 = vector.shape_cast %64 : vector<1x8x32xf32> to vector<8x32xf32>
    %cst_27 = arith.constant dense<0.000000e+00> : vector<16x32xf32>
    %66 = tpu.matmul %63, %65, %cst_27 {dimension_numbers = #tpu.dot_dimension_numbers<[1], [0], [0], [1], [0, 0, 1, 1], [], []>} : vector<16x8xf32>, vector<8x32xf32>, vector<16x32xf32> -> vector<16x32xf32>
    %67 = arith.addf %58, %66 : vector<16x32xf32>
    %68 = vector.extract_strided_slice %1 {offsets = [8, 0], sizes = [16, 8], strides = [1, 1]} : vector<26x8xf32> to vector<16x8xf32>
    %cst_28 = arith.constant 0.000000e+00 : f32
    %69 = vector.broadcast %cst_28 : f32 to vector<16x8xf32>
    %70 = vector.shape_cast %20 : vector<16x1xi1> to vector<16x1xi1>
    %71 = vector.broadcast %70 : vector<16x1xi1> to vector<16x8xi1>
    %72 = arith.select %71, %68, %69 : vector<16x8xi1>, vector<16x8xf32>
    %c6 = arith.constant 6 : index
    %c0_29 = arith.constant 0 : index
    %c0_30 = arith.constant 0 : index
    %73 = vector.load %arg2[%c6, %c0_29, %c0_30] : memref<9x8x32xf32, #tpu.memory_space<vmem>>, vector<1x8x32xf32>
    %74 = vector.shape_cast %73 : vector<1x8x32xf32> to vector<8x32xf32>
    %cst_31 = arith.constant dense<0.000000e+00> : vector<16x32xf32>
    %75 = tpu.matmul %72, %74, %cst_31 {dimension_numbers = #tpu.dot_dimension_numbers<[1], [0], [0], [1], [0, 0, 1, 1], [], []>} : vector<16x8xf32>, vector<8x32xf32>, vector<16x32xf32> -> vector<16x32xf32>
    %76 = arith.addf %67, %75 : vector<16x32xf32>
    %77 = vector.extract_strided_slice %1 {offsets = [9, 0], sizes = [16, 8], strides = [1, 1]} : vector<26x8xf32> to vector<16x8xf32>
    %c7 = arith.constant 7 : index
    %c0_32 = arith.constant 0 : index
    %c0_33 = arith.constant 0 : index
    %78 = vector.load %arg2[%c7, %c0_32, %c0_33] : memref<9x8x32xf32, #tpu.memory_space<vmem>>, vector<1x8x32xf32>
    %79 = vector.shape_cast %78 : vector<1x8x32xf32> to vector<8x32xf32>
    %cst_34 = arith.constant dense<0.000000e+00> : vector<16x32xf32>
    %80 = tpu.matmul %77, %79, %cst_34 {dimension_numbers = #tpu.dot_dimension_numbers<[1], [0], [0], [1], [0, 0, 1, 1], [], []>} : vector<16x8xf32>, vector<8x32xf32>, vector<16x32xf32> -> vector<16x32xf32>
    %81 = arith.addf %76, %80 : vector<16x32xf32>
    %82 = vector.extract_strided_slice %1 {offsets = [10, 0], sizes = [16, 8], strides = [1, 1]} : vector<26x8xf32> to vector<16x8xf32>
    %cst_35 = arith.constant 0.000000e+00 : f32
    %83 = vector.broadcast %cst_35 : f32 to vector<16x8xf32>
    %84 = vector.shape_cast %22 : vector<16x1xi1> to vector<16x1xi1>
    %85 = vector.broadcast %84 : vector<16x1xi1> to vector<16x8xi1>
    %86 = arith.select %85, %82, %83 : vector<16x8xi1>, vector<16x8xf32>
    %c8 = arith.constant 8 : index
    %c0_36 = arith.constant 0 : index
    %c0_37 = arith.constant 0 : index
    %87 = vector.load %arg2[%c8, %c0_36, %c0_37] : memref<9x8x32xf32, #tpu.memory_space<vmem>>, vector<1x8x32xf32>
    %88 = vector.shape_cast %87 : vector<1x8x32xf32> to vector<8x32xf32>
    %cst_38 = arith.constant dense<0.000000e+00> : vector<16x32xf32>
    %89 = tpu.matmul %86, %88, %cst_38 {dimension_numbers = #tpu.dot_dimension_numbers<[1], [0], [0], [1], [0, 0, 1, 1], [], []>} : vector<16x8xf32>, vector<8x32xf32>, vector<16x32xf32> -> vector<16x32xf32>
    %90 = arith.addf %81, %89 : vector<16x32xf32>
    %c0_39 = arith.constant 0 : index
    %c0_40 = arith.constant 0 : index
    %c0_41 = arith.constant 0 : index
    %91 = vector.load %arg4[%c0_39, %c0_40, %c0_41] : memref<1x16x32xf32, #tpu.memory_space<vmem>>, vector<1x16x32xf32>
    %92 = vector.shape_cast %91 : vector<1x16x32xf32> to vector<16x32xf32>
    %93 = vector.shape_cast %90 : vector<16x32xf32> to vector<1x16x32xf32>
    tpu.vector_store %arg4[%c0_39, %c0_40, %c0_41], %93 {strides = array<i32>} : memref<1x16x32xf32, #tpu.memory_space<vmem>>, vector<1x16x32xf32>,
    %cst_42 = arith.constant dense<0.000000e+00> : vector<32xf32>
    %94 = vector.multi_reduction <add>, %90, %cst_42 [0] : vector<16x32xf32> to vector<32xf32>
    %95 = vector.shape_cast %94 : vector<32xf32> to vector<1x32xf32>
    %c0_43 = arith.constant 0 : index
    %c0_44 = arith.constant 0 : index
    %c0_45 = arith.constant 0 : index
    %96 = vector.load %arg5[%c0_43, %c0_44, %c0_45] : memref<1x1x32xf32, #tpu.memory_space<vmem>>, vector<1x1x32xf32>
    %97 = vector.shape_cast %96 : vector<1x1x32xf32> to vector<1x32xf32>
    %98 = vector.shape_cast %95 : vector<1x32xf32> to vector<1x1x32xf32>
    tpu.vector_store %arg5[%c0_43, %c0_44, %c0_45], %98 {strides = array<i32>} : memref<1x1x32xf32, #tpu.memory_space<vmem>>, vector<1x1x32xf32>,
    %99 = arith.mulf %90, %90 : vector<16x32xf32>
    %cst_46 = arith.constant dense<0.000000e+00> : vector<32xf32>
    %100 = vector.multi_reduction <add>, %99, %cst_46 [0] : vector<16x32xf32> to vector<32xf32>
    %101 = vector.shape_cast %100 : vector<32xf32> to vector<1x32xf32>
    %c0_47 = arith.constant 0 : index
    %c0_48 = arith.constant 0 : index
    %c0_49 = arith.constant 0 : index
    %102 = vector.load %arg6[%c0_47, %c0_48, %c0_49] : memref<1x1x32xf32, #tpu.memory_space<vmem>>, vector<1x1x32xf32>
    %103 = vector.shape_cast %102 : vector<1x1x32xf32> to vector<1x32xf32>
    %104 = vector.shape_cast %101 : vector<1x32xf32> to vector<1x1x32xf32>
    tpu.vector_store %arg6[%c0_47, %c0_48, %c0_49], %104 {strides = array<i32>} : memref<1x1x32xf32, #tpu.memory_space<vmem>>, vector<1x1x32xf32>,
    return
  }
  func.func @transform_0(%arg0: i32) -> (i32, i32, i32) {
    %c0_i32 = arith.constant 0 : i32
    %c0_i32_0 = arith.constant 0 : i32
    %c0_i32_1 = arith.constant 0 : i32
    return %arg0, %c0_i32, %c0_i32_0 : i32, i32, i32
  }
  func.func @transform_1(%arg0: i32) -> (i32, i32, i32) {
    %c0_i32 = arith.constant 0 : i32
    %c0_i32_0 = arith.constant 0 : i32
    %c0_i32_1 = arith.constant 0 : i32
    %c0_i32_2 = arith.constant 0 : i32
    return %c0_i32, %c0_i32_0, %c0_i32_1 : i32, i32, i32
  }
  func.func @transform_2(%arg0: i32) -> (i32, i32, i32) {
    %c0_i32 = arith.constant 0 : i32
    %c0_i32_0 = arith.constant 0 : i32
    %c0_i32_1 = arith.constant 0 : i32
    %c0_i32_2 = arith.constant 0 : i32
    return %c0_i32, %c0_i32_0, %c0_i32_1 : i32, i32, i32
  }
  func.func @transform_3(%arg0: i32) -> (i32, i32, i32) {
    %c0_i32 = arith.constant 0 : i32
    %c0_i32_0 = arith.constant 0 : i32
    %c0_i32_1 = arith.constant 0 : i32
    return %arg0, %c0_i32, %c0_i32_0 : i32, i32, i32
  }
  func.func @transform_4(%arg0: i32) -> (i32, i32, i32) {
    %c0_i32 = arith.constant 0 : i32
    %c0_i32_0 = arith.constant 0 : i32
    %c0_i32_1 = arith.constant 0 : i32
    return %arg0, %c0_i32, %c0_i32_0 : i32, i32, i32
  }
  func.func @transform_5(%arg0: i32) -> (i32, i32, i32) {
    %c0_i32 = arith.constant 0 : i32
    %c0_i32_0 = arith.constant 0 : i32
    %c0_i32_1 = arith.constant 0 : i32
    return %arg0, %c0_i32, %c0_i32_0 : i32, i32, i32
  }
}

module attributes {stable_mosaic.version = 11 : i64} {
  func.func @_bn_act_kernel(%arg0: i32, %arg1: memref<8x128xf32, #tpu.memory_space<vmem>>, %arg2: memref<1x128xf32, #tpu.memory_space<vmem>>, %arg3: memref<1x128xf32, #tpu.memory_space<vmem>>, %arg4: memref<8x128xf32, #tpu.memory_space<vmem>>) attributes {dimension_semantics = [#tpu.dimension_semantics<parallel>], iteration_bounds = array<i64: 1>, scalar_prefetch = 0 : i64, scratch_operands = 0 : i64, tpu.core_type = #tpu.core_type<tc>, window_params = [{transform_indices = @transform_0, window_bounds = array<i64: 8, 128>}, {pipeline_mode = #tpu.pipeline_mode<synchronous>, transform_indices = @transform_1, window_bounds = array<i64: 1, 128>}, {pipeline_mode = #tpu.pipeline_mode<synchronous>, transform_indices = @transform_2, window_bounds = array<i64: 1, 128>}, {transform_indices = @transform_3, window_bounds = array<i64: 8, 128>}]} {
    %c0 = arith.constant 0 : index
    %c0_0 = arith.constant 0 : index
    %0 = vector.load %arg1[%c0, %c0_0] : memref<8x128xf32, #tpu.memory_space<vmem>>, vector<8x128xf32>
    %c0_1 = arith.constant 0 : index
    %c0_2 = arith.constant 0 : index
    %1 = vector.load %arg2[%c0_1, %c0_2] : memref<1x128xf32, #tpu.memory_space<vmem>>, vector<1x128xf32>
    %2 = vector.broadcast %1 : vector<1x128xf32> to vector<8x128xf32>
    %3 = arith.mulf %0, %2 : vector<8x128xf32>
    %c0_3 = arith.constant 0 : index
    %c0_4 = arith.constant 0 : index
    %4 = vector.load %arg3[%c0_3, %c0_4] : memref<1x128xf32, #tpu.memory_space<vmem>>, vector<1x128xf32>
    %5 = vector.broadcast %4 : vector<1x128xf32> to vector<8x128xf32>
    %6 = arith.addf %3, %5 : vector<8x128xf32>
    %cst = arith.constant 0.000000e+00 : f32
    %7 = vector.broadcast %cst : f32 to vector<8x128xf32>
    %8 = arith.cmpf oge, %6, %7 : vector<8x128xf32>
    %cst_5 = arith.constant 2.000000e-01 : f32
    %9 = vector.broadcast %cst_5 : f32 to vector<8x128xf32>
    %10 = arith.mulf %9, %6 : vector<8x128xf32>
    %11 = arith.select %8, %6, %10 : vector<8x128xi1>, vector<8x128xf32>
    %c0_6 = arith.constant 0 : index
    %c0_7 = arith.constant 0 : index
    %12 = vector.load %arg4[%c0_6, %c0_7] : memref<8x128xf32, #tpu.memory_space<vmem>>, vector<8x128xf32>
    tpu.vector_store %arg4[%c0_6, %c0_7], %11 {strides = array<i32>} : memref<8x128xf32, #tpu.memory_space<vmem>>, vector<8x128xf32>,
    return
  }
  func.func @transform_0(%arg0: i32) -> (i32, i32) {
    %c0_i32 = arith.constant 0 : i32
    %c0_i32_0 = arith.constant 0 : i32
    return %arg0, %c0_i32 : i32, i32
  }
  func.func @transform_1(%arg0: i32) -> (i32, i32) {
    %c0_i32 = arith.constant 0 : i32
    %c0_i32_0 = arith.constant 0 : i32
    %c0_i32_1 = arith.constant 0 : i32
    return %c0_i32, %c0_i32_0 : i32, i32
  }
  func.func @transform_2(%arg0: i32) -> (i32, i32) {
    %c0_i32 = arith.constant 0 : i32
    %c0_i32_0 = arith.constant 0 : i32
    %c0_i32_1 = arith.constant 0 : i32
    return %c0_i32, %c0_i32_0 : i32, i32
  }
  func.func @transform_3(%arg0: i32) -> (i32, i32) {
    %c0_i32 = arith.constant 0 : i32
    %c0_i32_0 = arith.constant 0 : i32
    return %arg0, %c0_i32 : i32, i32
  }
}

module attributes {stable_mosaic.version = 11 : i64} {
  func.func @_conv_taps_kernel(%arg0: i32, %arg1: memref<1x16x32xf32, #tpu.memory_space<vmem>>, %arg2: memref<1x32x64xf32, #tpu.memory_space<vmem>>, %arg3: memref<1x1x64xf32, #tpu.memory_space<vmem>>, %arg4: memref<1x16x64xf32, #tpu.memory_space<vmem>>, %arg5: memref<1x1x64xf32, #tpu.memory_space<vmem>>, %arg6: memref<1x1x64xf32, #tpu.memory_space<vmem>>) attributes {dimension_semantics = [#tpu.dimension_semantics<parallel>], iteration_bounds = array<i64: 2>, scalar_prefetch = 0 : i64, scratch_operands = 0 : i64, tpu.core_type = #tpu.core_type<tc>, window_params = [{transform_indices = @transform_0, window_bounds = array<i64: 1, 16, 32>}, {pipeline_mode = #tpu.pipeline_mode<synchronous>, transform_indices = @transform_1, window_bounds = array<i64: 1, 32, 64>}, {pipeline_mode = #tpu.pipeline_mode<synchronous>, transform_indices = @transform_2, window_bounds = array<i64: 1, 1, 64>}, {transform_indices = @transform_3, window_bounds = array<i64: 1, 16, 64>}, {transform_indices = @transform_4, window_bounds = array<i64: 1, 1, 64>}, {transform_indices = @transform_5, window_bounds = array<i64: 1, 1, 64>}]} {
    %c0 = arith.constant 0 : index
    %c0_0 = arith.constant 0 : index
    %c0_1 = arith.constant 0 : index
    %0 = vector.load %arg1[%c0, %c0_0, %c0_1] : memref<1x16x32xf32, #tpu.memory_space<vmem>>, vector<1x16x32xf32>
    %1 = vector.shape_cast %0 : vector<1x16x32xf32> to vector<16x32xf32>
    %c0_2 = arith.constant 0 : index
    %c0_3 = arith.constant 0 : index
    %c0_4 = arith.constant 0 : index
    %2 = vector.load %arg2[%c0_2, %c0_3, %c0_4] : memref<1x32x64xf32, #tpu.memory_space<vmem>>, vector<1x32x64xf32>
    %3 = vector.shape_cast %2 : vector<1x32x64xf32> to vector<32x64xf32>
    %cst = arith.constant dense<0.000000e+00> : vector<16x64xf32>
    %4 = tpu.matmul %1, %3, %cst {dimension_numbers = #tpu.dot_dimension_numbers<[1], [0], [0], [1], [0, 0, 1, 1], [], []>} : vector<16x32xf32>, vector<32x64xf32>, vector<16x64xf32> -> vector<16x64xf32>
    %c0_5 = arith.constant 0 : index
    %c0_6 = arith.constant 0 : index
    %c0_7 = arith.constant 0 : index
    %5 = vector.load %arg4[%c0_5, %c0_6, %c0_7] : memref<1x16x64xf32, #tpu.memory_space<vmem>>, vector<1x16x64xf32>
    %6 = vector.shape_cast %5 : vector<1x16x64xf32> to vector<16x64xf32>
    %7 = vector.shape_cast %4 : vector<16x64xf32> to vector<1x16x64xf32>
    tpu.vector_store %arg4[%c0_5, %c0_6, %c0_7], %7 {strides = array<i32>} : memref<1x16x64xf32, #tpu.memory_space<vmem>>, vector<1x16x64xf32>,
    %cst_8 = arith.constant dense<0.000000e+00> : vector<64xf32>
    %8 = vector.multi_reduction <add>, %4, %cst_8 [0] : vector<16x64xf32> to vector<64xf32>
    %9 = vector.shape_cast %8 : vector<64xf32> to vector<1x64xf32>
    %c0_9 = arith.constant 0 : index
    %c0_10 = arith.constant 0 : index
    %c0_11 = arith.constant 0 : index
    %10 = vector.load %arg5[%c0_9, %c0_10, %c0_11] : memref<1x1x64xf32, #tpu.memory_space<vmem>>, vector<1x1x64xf32>
    %11 = vector.shape_cast %10 : vector<1x1x64xf32> to vector<1x64xf32>
    %12 = vector.shape_cast %9 : vector<1x64xf32> to vector<1x1x64xf32>
    tpu.vector_store %arg5[%c0_9, %c0_10, %c0_11], %12 {strides = array<i32>} : memref<1x1x64xf32, #tpu.memory_space<vmem>>, vector<1x1x64xf32>,
    %13 = arith.mulf %4, %4 : vector<16x64xf32>
    %cst_12 = arith.constant dense<0.000000e+00> : vector<64xf32>
    %14 = vector.multi_reduction <add>, %13, %cst_12 [0] : vector<16x64xf32> to vector<64xf32>
    %15 = vector.shape_cast %14 : vector<64xf32> to vector<1x64xf32>
    %c0_13 = arith.constant 0 : index
    %c0_14 = arith.constant 0 : index
    %c0_15 = arith.constant 0 : index
    %16 = vector.load %arg6[%c0_13, %c0_14, %c0_15] : memref<1x1x64xf32, #tpu.memory_space<vmem>>, vector<1x1x64xf32>
    %17 = vector.shape_cast %16 : vector<1x1x64xf32> to vector<1x64xf32>
    %18 = vector.shape_cast %15 : vector<1x64xf32> to vector<1x1x64xf32>
    tpu.vector_store %arg6[%c0_13, %c0_14, %c0_15], %18 {strides = array<i32>} : memref<1x1x64xf32, #tpu.memory_space<vmem>>, vector<1x1x64xf32>,
    return
  }
  func.func @transform_0(%arg0: i32) -> (i32, i32, i32) {
    %c0_i32 = arith.constant 0 : i32
    %c0_i32_0 = arith.constant 0 : i32
    %c0_i32_1 = arith.constant 0 : i32
    return %arg0, %c0_i32, %c0_i32_0 : i32, i32, i32
  }
  func.func @transform_1(%arg0: i32) -> (i32, i32, i32) {
    %c0_i32 = arith.constant 0 : i32
    %c0_i32_0 = arith.constant 0 : i32
    %c0_i32_1 = arith.constant 0 : i32
    %c0_i32_2 = arith.constant 0 : i32
    return %c0_i32, %c0_i32_0, %c0_i32_1 : i32, i32, i32
  }
  func.func @transform_2(%arg0: i32) -> (i32, i32, i32) {
    %c0_i32 = arith.constant 0 : i32
    %c0_i32_0 = arith.constant 0 : i32
    %c0_i32_1 = arith.constant 0 : i32
    %c0_i32_2 = arith.constant 0 : i32
    return %c0_i32, %c0_i32_0, %c0_i32_1 : i32, i32, i32
  }
  func.func @transform_3(%arg0: i32) -> (i32, i32, i32) {
    %c0_i32 = arith.constant 0 : i32
    %c0_i32_0 = arith.constant 0 : i32
    %c0_i32_1 = arith.constant 0 : i32
    return %arg0, %c0_i32, %c0_i32_0 : i32, i32, i32
  }
  func.func @transform_4(%arg0: i32) -> (i32, i32, i32) {
    %c0_i32 = arith.constant 0 : i32
    %c0_i32_0 = arith.constant 0 : i32
    %c0_i32_1 = arith.constant 0 : i32
    return %arg0, %c0_i32, %c0_i32_0 : i32, i32, i32
  }
  func.func @transform_5(%arg0: i32) -> (i32, i32, i32) {
    %c0_i32 = arith.constant 0 : i32
    %c0_i32_0 = arith.constant 0 : i32
    %c0_i32_1 = arith.constant 0 : i32
    return %arg0, %c0_i32, %c0_i32_0 : i32, i32, i32
  }
}

module attributes {stable_mosaic.version = 11 : i64} {
  func.func @_bn_act_kernel(%arg0: i32, %arg1: memref<16x128xf32, #tpu.memory_space<vmem>>, %arg2: memref<1x128xf32, #tpu.memory_space<vmem>>, %arg3: memref<1x128xf32, #tpu.memory_space<vmem>>, %arg4: memref<16x128xf32, #tpu.memory_space<vmem>>) attributes {dimension_semantics = [#tpu.dimension_semantics<parallel>], iteration_bounds = array<i64: 1>, scalar_prefetch = 0 : i64, scratch_operands = 0 : i64, tpu.core_type = #tpu.core_type<tc>, window_params = [{transform_indices = @transform_0, window_bounds = array<i64: 16, 128>}, {pipeline_mode = #tpu.pipeline_mode<synchronous>, transform_indices = @transform_1, window_bounds = array<i64: 1, 128>}, {pipeline_mode = #tpu.pipeline_mode<synchronous>, transform_indices = @transform_2, window_bounds = array<i64: 1, 128>}, {transform_indices = @transform_3, window_bounds = array<i64: 16, 128>}]} {
    %c0 = arith.constant 0 : index
    %c0_0 = arith.constant 0 : index
    %0 = vector.load %arg1[%c0, %c0_0] : memref<16x128xf32, #tpu.memory_space<vmem>>, vector<16x128xf32>
    %c0_1 = arith.constant 0 : index
    %c0_2 = arith.constant 0 : index
    %1 = vector.load %arg2[%c0_1, %c0_2] : memref<1x128xf32, #tpu.memory_space<vmem>>, vector<1x128xf32>
    %2 = vector.broadcast %1 : vector<1x128xf32> to vector<16x128xf32>
    %3 = arith.mulf %0, %2 : vector<16x128xf32>
    %c0_3 = arith.constant 0 : index
    %c0_4 = arith.constant 0 : index
    %4 = vector.load %arg3[%c0_3, %c0_4] : memref<1x128xf32, #tpu.memory_space<vmem>>, vector<1x128xf32>
    %5 = vector.broadcast %4 : vector<1x128xf32> to vector<16x128xf32>
    %6 = arith.addf %3, %5 : vector<16x128xf32>
    %cst = arith.constant 0.000000e+00 : f32
    %7 = vector.broadcast %cst : f32 to vector<16x128xf32>
    %8 = arith.cmpf oge, %6, %7 : vector<16x128xf32>
    %cst_5 = arith.constant 2.000000e-01 : f32
    %9 = vector.broadcast %cst_5 : f32 to vector<16x128xf32>
    %10 = arith.mulf %9, %6 : vector<16x128xf32>
    %11 = arith.select %8, %6, %10 : vector<16x128xi1>, vector<16x128xf32>
    %c0_6 = arith.constant 0 : index
    %c0_7 = arith.constant 0 : index
    %12 = vector.load %arg4[%c0_6, %c0_7] : memref<16x128xf32, #tpu.memory_space<vmem>>, vector<16x128xf32>
    tpu.vector_store %arg4[%c0_6, %c0_7], %11 {strides = array<i32>} : memref<16x128xf32, #tpu.memory_space<vmem>>, vector<16x128xf32>,
    return
  }
  func.func @transform_0(%arg0: i32) -> (i32, i32) {
    %c0_i32 = arith.constant 0 : i32
    %c0_i32_0 = arith.constant 0 : i32
    return %arg0, %c0_i32 : i32, i32
  }
  func.func @transform_1(%arg0: i32) -> (i32, i32) {
    %c0_i32 = arith.constant 0 : i32
    %c0_i32_0 = arith.constant 0 : i32
    %c0_i32_1 = arith.constant 0 : i32
    return %c0_i32, %c0_i32_0 : i32, i32
  }
  func.func @transform_2(%arg0: i32) -> (i32, i32) {
    %c0_i32 = arith.constant 0 : i32
    %c0_i32_0 = arith.constant 0 : i32
    %c0_i32_1 = arith.constant 0 : i32
    return %c0_i32, %c0_i32_0 : i32, i32
  }
  func.func @transform_3(%arg0: i32) -> (i32, i32) {
    %c0_i32 = arith.constant 0 : i32
    %c0_i32_0 = arith.constant 0 : i32
    return %arg0, %c0_i32 : i32, i32
  }
}

module attributes {stable_mosaic.version = 11 : i64} {
  func.func @_conv_taps_kernel(%arg0: i32, %arg1: memref<1x82x16xf32, #tpu.memory_space<vmem>>, %arg2: memref<9x16x16xf32, #tpu.memory_space<vmem>>, %arg3: memref<1x1x16xf32, #tpu.memory_space<vmem>>, %arg4: memref<1x64x16xf32, #tpu.memory_space<vmem>>, %arg5: memref<1x1x16xf32, #tpu.memory_space<vmem>>, %arg6: memref<1x1x16xf32, #tpu.memory_space<vmem>>) attributes {dimension_semantics = [#tpu.dimension_semantics<parallel>], iteration_bounds = array<i64: 2>, scalar_prefetch = 0 : i64, scratch_operands = 0 : i64, tpu.core_type = #tpu.core_type<tc>, window_params = [{transform_indices = @transform_0, window_bounds = array<i64: 1, 82, 16>}, {pipeline_mode = #tpu.pipeline_mode<synchronous>, transform_indices = @transform_1, window_bounds = array<i64: 9, 16, 16>}, {pipeline_mode = #tpu.pipeline_mode<synchronous>, transform_indices = @transform_2, window_bounds = array<i64: 1, 1, 16>}, {transform_indices = @transform_3, window_bounds = array<i64: 1, 64, 16>}, {transform_indices = @transform_4, window_bounds = array<i64: 1, 1, 16>}, {transform_indices = @transform_5, window_bounds = array<i64: 1, 1, 16>}]} {
    %c0 = arith.constant 0 : index
    %c0_0 = arith.constant 0 : index
    %c0_1 = arith.constant 0 : index
    %0 = vector.load %arg1[%c0, %c0_0, %c0_1] : memref<1x82x16xf32, #tpu.memory_space<vmem>>, vector<1x82x16xf32>
    %1 = vector.shape_cast %0 : vector<1x82x16xf32> to vector<82x16xf32>
    %2 = tpu.iota {dimensions = array<i32: 0>} : vector<64x1xi32>
    %c8_i32 = arith.constant 8 : i32
    %c0_i32 = arith.constant 0 : i32
    %3 = arith.cmpi eq, %c8_i32, %c0_i32 : i32
    %c1_i32 = arith.constant 1 : i32
    %4 = arith.select %3, %c1_i32, %c8_i32 : i32
    %5 = vector.broadcast %4 : i32 to vector<64x1xi32>
    %6 = arith.remsi %2, %5 : vector<64x1xi32>
    %c0_i32_2 = arith.constant 0 : i32
    %7 = vector.broadcast %c0_i32_2 : i32 to vector<64x1xi32>
    %8 = arith.cmpi ne, %6, %7 : vector<64x1xi32>
    %c0_i32_3 = arith.constant 0 : i32
    %9 = vector.broadcast %c0_i32_3 : i32 to vector<64x1xi32>
    %10 = arith.cmpi slt, %6, %9 : vector<64x1xi32>
    %c0_i32_4 = arith.constant 0 : i32
    %11 = arith.cmpi slt, %4, %c0_i32_4 : i32
    %12 = vector.broadcast %11 : i1 to vector<64x1xi1>
    %13 = vector.broadcast %12 : vector<64x1xi1> to vector<64x1xi1>
    %14 = arith.xori %10, %13 : vector<64x1xi1>
    %15 = arith.andi %14, %8 : vector<64x1xi1>
    %16 = vector.broadcast %4 : i32 to vector<64x1xi32>
    %17 = arith.addi %6, %16 : vector<64x1xi32>
    %18 = arith.select %15, %17, %6 : vector<64x1xi1>, vector<64x1xi32>
    %c0_i32_5 = arith.constant 0 : i32
    %19 = vector.broadcast %c0_i32_5 : i32 to vector<64x1xi32>
    %20 = arith.cmpi ne, %18, %19 : vector<64x1xi32>
    %c7_i32 = arith.constant 7 : i32
    %21 = vector.broadcast %c7_i32 : i32 to vector<64x1xi32>
    %22 = arith.cmpi ne, %18, %21 : vector<64x1xi32>
    %23 = vector.extract_strided_slice %1 {offsets = [0, 0], sizes = [64, 16], strides = [1, 1]} : vector<82x16xf32> to vector<64x16xf32>
    %cst = arith.constant 0.000000e+00 : f32
    %24 = vector.broadcast %cst : f32 to vector<64x16xf32>
    %25 = vector.shape_cast %20 : vector<64x1xi1> to vector<64x1xi1>
    %26 = vector.broadcast %25 : vector<64x1xi1> to vector<64x16xi1>
    %27 = arith.select %26, %23, %24 : vector<64x16xi1>, vector<64x16xf32>
    %c0_6 = arith.constant 0 : index
    %c0_7 = arith.constant 0 : index
    %c0_8 = arith.constant 0 : index
    %28 = vector.load %arg2[%c0_6, %c0_7, %c0_8] : memref<9x16x16xf32, #tpu.memory_space<vmem>>, vector<1x16x16xf32>
    %29 = vector.shape_cast %28 : vector<1x16x16xf32> to vector<16x16xf32>
    %cst_9 = arith.constant dense<0.000000e+00> : vector<64x16xf32>
    %30 = tpu.matmul %27, %29, %cst_9 {dimension_numbers = #tpu.dot_dimension_numbers<[1], [0], [0], [1], [0, 0, 1, 1], [], []>} : vector<64x16xf32>, vector<16x16xf32>, vector<64x16xf32> -> vector<64x16xf32>
    %31 = vector.extract_strided_slice %1 {offsets = [1, 0], sizes = [64, 16], strides = [1, 1]} : vector<82x16xf32> to vector<64x16xf32>
    %c1 = arith.constant 1 : index
    %c0_10 = arith.constant 0 : index
    %c0_11 = arith.constant 0 : index
    %32 = vector.load %arg2[%c1, %c0_10, %c0_11] : memref<9x16x16xf32, #tpu.memory_space<vmem>>, vector<1x16x16xf32>
    %33 = vector.shape_cast %32 : vector<1x16x16xf32> to vector<16x16xf32>
    %cst_12 = arith.constant dense<0.000000e+00> : vector<64x16xf32>
    %34 = tpu.matmul %31, %33, %cst_12 {dimension_numbers = #tpu.dot_dimension_numbers<[1], [0], [0], [1], [0, 0, 1, 1], [], []>} : vector<64x16xf32>, vector<16x16xf32>, vector<64x16xf32> -> vector<64x16xf32>
    %35 = arith.addf %30, %34 : vector<64x16xf32>
    %36 = vector.extract_strided_slice %1 {offsets = [2, 0], sizes = [64, 16], strides = [1, 1]} : vector<82x16xf32> to vector<64x16xf32>
    %cst_13 = arith.constant 0.000000e+00 : f32
    %37 = vector.broadcast %cst_13 : f32 to vector<64x16xf32>
    %38 = vector.shape_cast %22 : vector<64x1xi1> to vector<64x1xi1>
    %39 = vector.broadcast %38 : vector<64x1xi1> to vector<64x16xi1>
    %40 = arith.select %39, %36, %37 : vector<64x16xi1>, vector<64x16xf32>
    %c2 = arith.constant 2 : index
    %c0_14 = arith.constant 0 : index
    %c0_15 = arith.constant 0 : index
    %41 = vector.load %arg2[%c2, %c0_14, %c0_15] : memref<9x16x16xf32, #tpu.memory_space<vmem>>, vector<1x16x16xf32>
    %42 = vector.shape_cast %41 : vector<1x16x16xf32> to vector<16x16xf32>
    %cst_16 = arith.constant dense<0.000000e+00> : vector<64x16xf32>
    %43 = tpu.matmul %40, %42, %cst_16 {dimension_numbers = #tpu.dot_dimension_numbers<[1], [0], [0], [1], [0, 0, 1, 1], [], []>} : vector<64x16xf32>, vector<16x16xf32>, vector<64x16xf32> -> vector<64x16xf32>
    %44 = arith.addf %35, %43 : vector<64x16xf32>
    %45 = vector.extract_strided_slice %1 {offsets = [8, 0], sizes = [64, 16], strides = [1, 1]} : vector<82x16xf32> to vector<64x16xf32>
    %cst_17 = arith.constant 0.000000e+00 : f32
    %46 = vector.broadcast %cst_17 : f32 to vector<64x16xf32>
    %47 = vector.shape_cast %20 : vector<64x1xi1> to vector<64x1xi1>
    %48 = vector.broadcast %47 : vector<64x1xi1> to vector<64x16xi1>
    %49 = arith.select %48, %45, %46 : vector<64x16xi1>, vector<64x16xf32>
    %c3 = arith.constant 3 : index
    %c0_18 = arith.constant 0 : index
    %c0_19 = arith.constant 0 : index
    %50 = vector.load %arg2[%c3, %c0_18, %c0_19] : memref<9x16x16xf32, #tpu.memory_space<vmem>>, vector<1x16x16xf32>
    %51 = vector.shape_cast %50 : vector<1x16x16xf32> to vector<16x16xf32>
    %cst_20 = arith.constant dense<0.000000e+00> : vector<64x16xf32>
    %52 = tpu.matmul %49, %51, %cst_20 {dimension_numbers = #tpu.dot_dimension_numbers<[1], [0], [0], [1], [0, 0, 1, 1], [], []>} : vector<64x16xf32>, vector<16x16xf32>, vector<64x16xf32> -> vector<64x16xf32>
    %53 = arith.addf %44, %52 : vector<64x16xf32>
    %54 = vector.extract_strided_slice %1 {offsets = [9, 0], sizes = [64, 16], strides = [1, 1]} : vector<82x16xf32> to vector<64x16xf32>
    %c4 = arith.constant 4 : index
    %c0_21 = arith.constant 0 : index
    %c0_22 = arith.constant 0 : index
    %55 = vector.load %arg2[%c4, %c0_21, %c0_22] : memref<9x16x16xf32, #tpu.memory_space<vmem>>, vector<1x16x16xf32>
    %56 = vector.shape_cast %55 : vector<1x16x16xf32> to vector<16x16xf32>
    %cst_23 = arith.constant dense<0.000000e+00> : vector<64x16xf32>
    %57 = tpu.matmul %54, %56, %cst_23 {dimension_numbers = #tpu.dot_dimension_numbers<[1], [0], [0], [1], [0, 0, 1, 1], [], []>} : vector<64x16xf32>, vector<16x16xf32>, vector<64x16xf32> -> vector<64x16xf32>
    %58 = arith.addf %53, %57 : vector<64x16xf32>
    %59 = vector.extract_strided_slice %1 {offsets = [10, 0], sizes = [64, 16], strides = [1, 1]} : vector<82x16xf32> to vector<64x16xf32>
    %cst_24 = arith.constant 0.000000e+00 : f32
    %60 = vector.broadcast %cst_24 : f32 to vector<64x16xf32>
    %61 = vector.shape_cast %22 : vector<64x1xi1> to vector<64x1xi1>
    %62 = vector.broadcast %61 : vector<64x1xi1> to vector<64x16xi1>
    %63 = arith.select %62, %59, %60 : vector<64x16xi1>, vector<64x16xf32>
    %c5 = arith.constant 5 : index
    %c0_25 = arith.constant 0 : index
    %c0_26 = arith.constant 0 : index
    %64 = vector.load %arg2[%c5, %c0_25, %c0_26] : memref<9x16x16xf32, #tpu.memory_space<vmem>>, vector<1x16x16xf32>
    %65 = vector.shape_cast %64 : vector<1x16x16xf32> to vector<16x16xf32>
    %cst_27 = arith.constant dense<0.000000e+00> : vector<64x16xf32>
    %66 = tpu.matmul %63, %65, %cst_27 {dimension_numbers = #tpu.dot_dimension_numbers<[1], [0], [0], [1], [0, 0, 1, 1], [], []>} : vector<64x16xf32>, vector<16x16xf32>, vector<64x16xf32> -> vector<64x16xf32>
    %67 = arith.addf %58, %66 : vector<64x16xf32>
    %68 = vector.extract_strided_slice %1 {offsets = [16, 0], sizes = [64, 16], strides = [1, 1]} : vector<82x16xf32> to vector<64x16xf32>
    %cst_28 = arith.constant 0.000000e+00 : f32
    %69 = vector.broadcast %cst_28 : f32 to vector<64x16xf32>
    %70 = vector.shape_cast %20 : vector<64x1xi1> to vector<64x1xi1>
    %71 = vector.broadcast %70 : vector<64x1xi1> to vector<64x16xi1>
    %72 = arith.select %71, %68, %69 : vector<64x16xi1>, vector<64x16xf32>
    %c6 = arith.constant 6 : index
    %c0_29 = arith.constant 0 : index
    %c0_30 = arith.constant 0 : index
    %73 = vector.load %arg2[%c6, %c0_29, %c0_30] : memref<9x16x16xf32, #tpu.memory_space<vmem>>, vector<1x16x16xf32>
    %74 = vector.shape_cast %73 : vector<1x16x16xf32> to vector<16x16xf32>
    %cst_31 = arith.constant dense<0.000000e+00> : vector<64x16xf32>
    %75 = tpu.matmul %72, %74, %cst_31 {dimension_numbers = #tpu.dot_dimension_numbers<[1], [0], [0], [1], [0, 0, 1, 1], [], []>} : vector<64x16xf32>, vector<16x16xf32>, vector<64x16xf32> -> vector<64x16xf32>
    %76 = arith.addf %67, %75 : vector<64x16xf32>
    %77 = vector.extract_strided_slice %1 {offsets = [17, 0], sizes = [64, 16], strides = [1, 1]} : vector<82x16xf32> to vector<64x16xf32>
    %c7 = arith.constant 7 : index
    %c0_32 = arith.constant 0 : index
    %c0_33 = arith.constant 0 : index
    %78 = vector.load %arg2[%c7, %c0_32, %c0_33] : memref<9x16x16xf32, #tpu.memory_space<vmem>>, vector<1x16x16xf32>
    %79 = vector.shape_cast %78 : vector<1x16x16xf32> to vector<16x16xf32>
    %cst_34 = arith.constant dense<0.000000e+00> : vector<64x16xf32>
    %80 = tpu.matmul %77, %79, %cst_34 {dimension_numbers = #tpu.dot_dimension_numbers<[1], [0], [0], [1], [0, 0, 1, 1], [], []>} : vector<64x16xf32>, vector<16x16xf32>, vector<64x16xf32> -> vector<64x16xf32>
    %81 = arith.addf %76, %80 : vector<64x16xf32>
    %82 = vector.extract_strided_slice %1 {offsets = [18, 0], sizes = [64, 16], strides = [1, 1]} : vector<82x16xf32> to vector<64x16xf32>
    %cst_35 = arith.constant 0.000000e+00 : f32
    %83 = vector.broadcast %cst_35 : f32 to vector<64x16xf32>
    %84 = vector.shape_cast %22 : vector<64x1xi1> to vector<64x1xi1>
    %85 = vector.broadcast %84 : vector<64x1xi1> to vector<64x16xi1>
    %86 = arith.select %85, %82, %83 : vector<64x16xi1>, vector<64x16xf32>
    %c8 = arith.constant 8 : index
    %c0_36 = arith.constant 0 : index
    %c0_37 = arith.constant 0 : index
    %87 = vector.load %arg2[%c8, %c0_36, %c0_37] : memref<9x16x16xf32, #tpu.memory_space<vmem>>, vector<1x16x16xf32>
    %88 = vector.shape_cast %87 : vector<1x16x16xf32> to vector<16x16xf32>
    %cst_38 = arith.constant dense<0.000000e+00> : vector<64x16xf32>
    %89 = tpu.matmul %86, %88, %cst_38 {dimension_numbers = #tpu.dot_dimension_numbers<[1], [0], [0], [1], [0, 0, 1, 1], [], []>} : vector<64x16xf32>, vector<16x16xf32>, vector<64x16xf32> -> vector<64x16xf32>
    %90 = arith.addf %81, %89 : vector<64x16xf32>
    %c0_39 = arith.constant 0 : index
    %c0_40 = arith.constant 0 : index
    %c0_41 = arith.constant 0 : index
    %91 = vector.load %arg4[%c0_39, %c0_40, %c0_41] : memref<1x64x16xf32, #tpu.memory_space<vmem>>, vector<1x64x16xf32>
    %92 = vector.shape_cast %91 : vector<1x64x16xf32> to vector<64x16xf32>
    %93 = vector.shape_cast %90 : vector<64x16xf32> to vector<1x64x16xf32>
    tpu.vector_store %arg4[%c0_39, %c0_40, %c0_41], %93 {strides = array<i32>} : memref<1x64x16xf32, #tpu.memory_space<vmem>>, vector<1x64x16xf32>,
    %cst_42 = arith.constant dense<0.000000e+00> : vector<16xf32>
    %94 = vector.multi_reduction <add>, %90, %cst_42 [0] : vector<64x16xf32> to vector<16xf32>
    %95 = vector.shape_cast %94 : vector<16xf32> to vector<1x16xf32>
    %c0_43 = arith.constant 0 : index
    %c0_44 = arith.constant 0 : index
    %c0_45 = arith.constant 0 : index
    %96 = vector.load %arg5[%c0_43, %c0_44, %c0_45] : memref<1x1x16xf32, #tpu.memory_space<vmem>>, vector<1x1x16xf32>
    %97 = vector.shape_cast %96 : vector<1x1x16xf32> to vector<1x16xf32>
    %98 = vector.shape_cast %95 : vector<1x16xf32> to vector<1x1x16xf32>
    tpu.vector_store %arg5[%c0_43, %c0_44, %c0_45], %98 {strides = array<i32>} : memref<1x1x16xf32, #tpu.memory_space<vmem>>, vector<1x1x16xf32>,
    %99 = arith.mulf %90, %90 : vector<64x16xf32>
    %cst_46 = arith.constant dense<0.000000e+00> : vector<16xf32>
    %100 = vector.multi_reduction <add>, %99, %cst_46 [0] : vector<64x16xf32> to vector<16xf32>
    %101 = vector.shape_cast %100 : vector<16xf32> to vector<1x16xf32>
    %c0_47 = arith.constant 0 : index
    %c0_48 = arith.constant 0 : index
    %c0_49 = arith.constant 0 : index
    %102 = vector.load %arg6[%c0_47, %c0_48, %c0_49] : memref<1x1x16xf32, #tpu.memory_space<vmem>>, vector<1x1x16xf32>
    %103 = vector.shape_cast %102 : vector<1x1x16xf32> to vector<1x16xf32>
    %104 = vector.shape_cast %101 : vector<1x16xf32> to vector<1x1x16xf32>
    tpu.vector_store %arg6[%c0_47, %c0_48, %c0_49], %104 {strides = array<i32>} : memref<1x1x16xf32, #tpu.memory_space<vmem>>, vector<1x1x16xf32>,
    return
  }
  func.func @transform_0(%arg0: i32) -> (i32, i32, i32) {
    %c0_i32 = arith.constant 0 : i32
    %c0_i32_0 = arith.constant 0 : i32
    %c0_i32_1 = arith.constant 0 : i32
    return %arg0, %c0_i32, %c0_i32_0 : i32, i32, i32
  }
  func.func @transform_1(%arg0: i32) -> (i32, i32, i32) {
    %c0_i32 = arith.constant 0 : i32
    %c0_i32_0 = arith.constant 0 : i32
    %c0_i32_1 = arith.constant 0 : i32
    %c0_i32_2 = arith.constant 0 : i32
    return %c0_i32, %c0_i32_0, %c0_i32_1 : i32, i32, i32
  }
  func.func @transform_2(%arg0: i32) -> (i32, i32, i32) {
    %c0_i32 = arith.constant 0 : i32
    %c0_i32_0 = arith.constant 0 : i32
    %c0_i32_1 = arith.constant 0 : i32
    %c0_i32_2 = arith.constant 0 : i32
    return %c0_i32, %c0_i32_0, %c0_i32_1 : i32, i32, i32
  }
  func.func @transform_3(%arg0: i32) -> (i32, i32, i32) {
    %c0_i32 = arith.constant 0 : i32
    %c0_i32_0 = arith.constant 0 : i32
    %c0_i32_1 = arith.constant 0 : i32
    return %arg0, %c0_i32, %c0_i32_0 : i32, i32, i32
  }
  func.func @transform_4(%arg0: i32) -> (i32, i32, i32) {
    %c0_i32 = arith.constant 0 : i32
    %c0_i32_0 = arith.constant 0 : i32
    %c0_i32_1 = arith.constant 0 : i32
    return %arg0, %c0_i32, %c0_i32_0 : i32, i32, i32
  }
  func.func @transform_5(%arg0: i32) -> (i32, i32, i32) {
    %c0_i32 = arith.constant 0 : i32
    %c0_i32_0 = arith.constant 0 : i32
    %c0_i32_1 = arith.constant 0 : i32
    return %arg0, %c0_i32, %c0_i32_0 : i32, i32, i32
  }
}

module attributes {stable_mosaic.version = 11 : i64} {
  func.func @_bn_act_add_kernel(%arg0: i32, %arg1: memref<16x128xf32, #tpu.memory_space<vmem>>, %arg2: memref<1x128xf32, #tpu.memory_space<vmem>>, %arg3: memref<1x128xf32, #tpu.memory_space<vmem>>, %arg4: memref<16x128xf32, #tpu.memory_space<vmem>>, %arg5: memref<16x128xf32, #tpu.memory_space<vmem>>) attributes {dimension_semantics = [#tpu.dimension_semantics<parallel>], iteration_bounds = array<i64: 1>, scalar_prefetch = 0 : i64, scratch_operands = 0 : i64, tpu.core_type = #tpu.core_type<tc>, window_params = [{transform_indices = @transform_0, window_bounds = array<i64: 16, 128>}, {pipeline_mode = #tpu.pipeline_mode<synchronous>, transform_indices = @transform_1, window_bounds = array<i64: 1, 128>}, {pipeline_mode = #tpu.pipeline_mode<synchronous>, transform_indices = @transform_2, window_bounds = array<i64: 1, 128>}, {transform_indices = @transform_3, window_bounds = array<i64: 16, 128>}, {transform_indices = @transform_4, window_bounds = array<i64: 16, 128>}]} {
    %c0 = arith.constant 0 : index
    %c0_0 = arith.constant 0 : index
    %0 = vector.load %arg1[%c0, %c0_0] : memref<16x128xf32, #tpu.memory_space<vmem>>, vector<16x128xf32>
    %c0_1 = arith.constant 0 : index
    %c0_2 = arith.constant 0 : index
    %1 = vector.load %arg2[%c0_1, %c0_2] : memref<1x128xf32, #tpu.memory_space<vmem>>, vector<1x128xf32>
    %2 = vector.broadcast %1 : vector<1x128xf32> to vector<16x128xf32>
    %3 = arith.mulf %0, %2 : vector<16x128xf32>
    %c0_3 = arith.constant 0 : index
    %c0_4 = arith.constant 0 : index
    %4 = vector.load %arg3[%c0_3, %c0_4] : memref<1x128xf32, #tpu.memory_space<vmem>>, vector<1x128xf32>
    %5 = vector.broadcast %4 : vector<1x128xf32> to vector<16x128xf32>
    %6 = arith.addf %3, %5 : vector<16x128xf32>
    %cst = arith.constant 0.000000e+00 : f32
    %7 = vector.broadcast %cst : f32 to vector<16x128xf32>
    %8 = arith.cmpf oge, %6, %7 : vector<16x128xf32>
    %cst_5 = arith.constant 2.000000e-01 : f32
    %9 = vector.broadcast %cst_5 : f32 to vector<16x128xf32>
    %10 = arith.mulf %9, %6 : vector<16x128xf32>
    %11 = arith.select %8, %6, %10 : vector<16x128xi1>, vector<16x128xf32>
    %c0_6 = arith.constant 0 : index
    %c0_7 = arith.constant 0 : index
    %12 = vector.load %arg4[%c0_6, %c0_7] : memref<16x128xf32, #tpu.memory_space<vmem>>, vector<16x128xf32>
    %13 = arith.addf %11, %12 : vector<16x128xf32>
    %c0_8 = arith.constant 0 : index
    %c0_9 = arith.constant 0 : index
    %14 = vector.load %arg5[%c0_8, %c0_9] : memref<16x128xf32, #tpu.memory_space<vmem>>, vector<16x128xf32>
    tpu.vector_store %arg5[%c0_8, %c0_9], %13 {strides = array<i32>} : memref<16x128xf32, #tpu.memory_space<vmem>>, vector<16x128xf32>,
    return
  }
  func.func @transform_0(%arg0: i32) -> (i32, i32) {
    %c0_i32 = arith.constant 0 : i32
    %c0_i32_0 = arith.constant 0 : i32
    return %arg0, %c0_i32 : i32, i32
  }
  func.func @transform_1(%arg0: i32) -> (i32, i32) {
    %c0_i32 = arith.constant 0 : i32
    %c0_i32_0 = arith.constant 0 : i32
    %c0_i32_1 = arith.constant 0 : i32
    return %c0_i32, %c0_i32_0 : i32, i32
  }
  func.func @transform_2(%arg0: i32) -> (i32, i32) {
    %c0_i32 = arith.constant 0 : i32
    %c0_i32_0 = arith.constant 0 : i32
    %c0_i32_1 = arith.constant 0 : i32
    return %c0_i32, %c0_i32_0 : i32, i32
  }
  func.func @transform_3(%arg0: i32) -> (i32, i32) {
    %c0_i32 = arith.constant 0 : i32
    %c0_i32_0 = arith.constant 0 : i32
    return %arg0, %c0_i32 : i32, i32
  }
  func.func @transform_4(%arg0: i32) -> (i32, i32) {
    %c0_i32 = arith.constant 0 : i32
    %c0_i32_0 = arith.constant 0 : i32
    return %arg0, %c0_i32 : i32, i32
  }
}

module attributes {stable_mosaic.version = 11 : i64} {
  func.func @_conv_taps_kernel(%arg0: i32, %arg1: memref<1x64x16xf32, #tpu.memory_space<vmem>>, %arg2: memref<1x16x32xf32, #tpu.memory_space<vmem>>, %arg3: memref<1x1x32xf32, #tpu.memory_space<vmem>>, %arg4: memref<1x64x32xf32, #tpu.memory_space<vmem>>, %arg5: memref<1x1x32xf32, #tpu.memory_space<vmem>>, %arg6: memref<1x1x32xf32, #tpu.memory_space<vmem>>) attributes {dimension_semantics = [#tpu.dimension_semantics<parallel>], iteration_bounds = array<i64: 2>, scalar_prefetch = 0 : i64, scratch_operands = 0 : i64, tpu.core_type = #tpu.core_type<tc>, window_params = [{transform_indices = @transform_0, window_bounds = array<i64: 1, 64, 16>}, {pipeline_mode = #tpu.pipeline_mode<synchronous>, transform_indices = @transform_1, window_bounds = array<i64: 1, 16, 32>}, {pipeline_mode = #tpu.pipeline_mode<synchronous>, transform_indices = @transform_2, window_bounds = array<i64: 1, 1, 32>}, {transform_indices = @transform_3, window_bounds = array<i64: 1, 64, 32>}, {transform_indices = @transform_4, window_bounds = array<i64: 1, 1, 32>}, {transform_indices = @transform_5, window_bounds = array<i64: 1, 1, 32>}]} {
    %c0 = arith.constant 0 : index
    %c0_0 = arith.constant 0 : index
    %c0_1 = arith.constant 0 : index
    %0 = vector.load %arg1[%c0, %c0_0, %c0_1] : memref<1x64x16xf32, #tpu.memory_space<vmem>>, vector<1x64x16xf32>
    %1 = vector.shape_cast %0 : vector<1x64x16xf32> to vector<64x16xf32>
    %c0_2 = arith.constant 0 : index
    %c0_3 = arith.constant 0 : index
    %c0_4 = arith.constant 0 : index
    %2 = vector.load %arg2[%c0_2, %c0_3, %c0_4] : memref<1x16x32xf32, #tpu.memory_space<vmem>>, vector<1x16x32xf32>
    %3 = vector.shape_cast %2 : vector<1x16x32xf32> to vector<16x32xf32>
    %cst = arith.constant dense<0.000000e+00> : vector<64x32xf32>
    %4 = tpu.matmul %1, %3, %cst {dimension_numbers = #tpu.dot_dimension_numbers<[1], [0], [0], [1], [0, 0, 1, 1], [], []>} : vector<64x16xf32>, vector<16x32xf32>, vector<64x32xf32> -> vector<64x32xf32>
    %c0_5 = arith.constant 0 : index
    %c0_6 = arith.constant 0 : index
    %c0_7 = arith.constant 0 : index
    %5 = vector.load %arg4[%c0_5, %c0_6, %c0_7] : memref<1x64x32xf32, #tpu.memory_space<vmem>>, vector<1x64x32xf32>
    %6 = vector.shape_cast %5 : vector<1x64x32xf32> to vector<64x32xf32>
    %7 = vector.shape_cast %4 : vector<64x32xf32> to vector<1x64x32xf32>
    tpu.vector_store %arg4[%c0_5, %c0_6, %c0_7], %7 {strides = array<i32>} : memref<1x64x32xf32, #tpu.memory_space<vmem>>, vector<1x64x32xf32>,
    %cst_8 = arith.constant dense<0.000000e+00> : vector<32xf32>
    %8 = vector.multi_reduction <add>, %4, %cst_8 [0] : vector<64x32xf32> to vector<32xf32>
    %9 = vector.shape_cast %8 : vector<32xf32> to vector<1x32xf32>
    %c0_9 = arith.constant 0 : index
    %c0_10 = arith.constant 0 : index
    %c0_11 = arith.constant 0 : index
    %10 = vector.load %arg5[%c0_9, %c0_10, %c0_11] : memref<1x1x32xf32, #tpu.memory_space<vmem>>, vector<1x1x32xf32>
    %11 = vector.shape_cast %10 : vector<1x1x32xf32> to vector<1x32xf32>
    %12 = vector.shape_cast %9 : vector<1x32xf32> to vector<1x1x32xf32>
    tpu.vector_store %arg5[%c0_9, %c0_10, %c0_11], %12 {strides = array<i32>} : memref<1x1x32xf32, #tpu.memory_space<vmem>>, vector<1x1x32xf32>,
    %13 = arith.mulf %4, %4 : vector<64x32xf32>
    %cst_12 = arith.constant dense<0.000000e+00> : vector<32xf32>
    %14 = vector.multi_reduction <add>, %13, %cst_12 [0] : vector<64x32xf32> to vector<32xf32>
    %15 = vector.shape_cast %14 : vector<32xf32> to vector<1x32xf32>
    %c0_13 = arith.constant 0 : index
    %c0_14 = arith.constant 0 : index
    %c0_15 = arith.constant 0 : index
    %16 = vector.load %arg6[%c0_13, %c0_14, %c0_15] : memref<1x1x32xf32, #tpu.memory_space<vmem>>, vector<1x1x32xf32>
    %17 = vector.shape_cast %16 : vector<1x1x32xf32> to vector<1x32xf32>
    %18 = vector.shape_cast %15 : vector<1x32xf32> to vector<1x1x32xf32>
    tpu.vector_store %arg6[%c0_13, %c0_14, %c0_15], %18 {strides = array<i32>} : memref<1x1x32xf32, #tpu.memory_space<vmem>>, vector<1x1x32xf32>,
    return
  }
  func.func @transform_0(%arg0: i32) -> (i32, i32, i32) {
    %c0_i32 = arith.constant 0 : i32
    %c0_i32_0 = arith.constant 0 : i32
    %c0_i32_1 = arith.constant 0 : i32
    return %arg0, %c0_i32, %c0_i32_0 : i32, i32, i32
  }
  func.func @transform_1(%arg0: i32) -> (i32, i32, i32) {
    %c0_i32 = arith.constant 0 : i32
    %c0_i32_0 = arith.constant 0 : i32
    %c0_i32_1 = arith.constant 0 : i32
    %c0_i32_2 = arith.constant 0 : i32
    return %c0_i32, %c0_i32_0, %c0_i32_1 : i32, i32, i32
  }
  func.func @transform_2(%arg0: i32) -> (i32, i32, i32) {
    %c0_i32 = arith.constant 0 : i32
    %c0_i32_0 = arith.constant 0 : i32
    %c0_i32_1 = arith.constant 0 : i32
    %c0_i32_2 = arith.constant 0 : i32
    return %c0_i32, %c0_i32_0, %c0_i32_1 : i32, i32, i32
  }
  func.func @transform_3(%arg0: i32) -> (i32, i32, i32) {
    %c0_i32 = arith.constant 0 : i32
    %c0_i32_0 = arith.constant 0 : i32
    %c0_i32_1 = arith.constant 0 : i32
    return %arg0, %c0_i32, %c0_i32_0 : i32, i32, i32
  }
  func.func @transform_4(%arg0: i32) -> (i32, i32, i32) {
    %c0_i32 = arith.constant 0 : i32
    %c0_i32_0 = arith.constant 0 : i32
    %c0_i32_1 = arith.constant 0 : i32
    return %arg0, %c0_i32, %c0_i32_0 : i32, i32, i32
  }
  func.func @transform_5(%arg0: i32) -> (i32, i32, i32) {
    %c0_i32 = arith.constant 0 : i32
    %c0_i32_0 = arith.constant 0 : i32
    %c0_i32_1 = arith.constant 0 : i32
    return %arg0, %c0_i32, %c0_i32_0 : i32, i32, i32
  }
}

module attributes {stable_mosaic.version = 11 : i64} {
  func.func @_bn_act_kernel(%arg0: i32, %arg1: memref<32x128xf32, #tpu.memory_space<vmem>>, %arg2: memref<1x128xf32, #tpu.memory_space<vmem>>, %arg3: memref<1x128xf32, #tpu.memory_space<vmem>>, %arg4: memref<32x128xf32, #tpu.memory_space<vmem>>) attributes {dimension_semantics = [#tpu.dimension_semantics<parallel>], iteration_bounds = array<i64: 1>, scalar_prefetch = 0 : i64, scratch_operands = 0 : i64, tpu.core_type = #tpu.core_type<tc>, window_params = [{transform_indices = @transform_0, window_bounds = array<i64: 32, 128>}, {pipeline_mode = #tpu.pipeline_mode<synchronous>, transform_indices = @transform_1, window_bounds = array<i64: 1, 128>}, {pipeline_mode = #tpu.pipeline_mode<synchronous>, transform_indices = @transform_2, window_bounds = array<i64: 1, 128>}, {transform_indices = @transform_3, window_bounds = array<i64: 32, 128>}]} {
    %c0 = arith.constant 0 : index
    %c0_0 = arith.constant 0 : index
    %0 = vector.load %arg1[%c0, %c0_0] : memref<32x128xf32, #tpu.memory_space<vmem>>, vector<32x128xf32>
    %c0_1 = arith.constant 0 : index
    %c0_2 = arith.constant 0 : index
    %1 = vector.load %arg2[%c0_1, %c0_2] : memref<1x128xf32, #tpu.memory_space<vmem>>, vector<1x128xf32>
    %2 = vector.broadcast %1 : vector<1x128xf32> to vector<32x128xf32>
    %3 = arith.mulf %0, %2 : vector<32x128xf32>
    %c0_3 = arith.constant 0 : index
    %c0_4 = arith.constant 0 : index
    %4 = vector.load %arg3[%c0_3, %c0_4] : memref<1x128xf32, #tpu.memory_space<vmem>>, vector<1x128xf32>
    %5 = vector.broadcast %4 : vector<1x128xf32> to vector<32x128xf32>
    %6 = arith.addf %3, %5 : vector<32x128xf32>
    %cst = arith.constant 0.000000e+00 : f32
    %7 = vector.broadcast %cst : f32 to vector<32x128xf32>
    %8 = arith.cmpf oge, %6, %7 : vector<32x128xf32>
    %cst_5 = arith.constant 2.000000e-01 : f32
    %9 = vector.broadcast %cst_5 : f32 to vector<32x128xf32>
    %10 = arith.mulf %9, %6 : vector<32x128xf32>
    %11 = arith.select %8, %6, %10 : vector<32x128xi1>, vector<32x128xf32>
    %c0_6 = arith.constant 0 : index
    %c0_7 = arith.constant 0 : index
    %12 = vector.load %arg4[%c0_6, %c0_7] : memref<32x128xf32, #tpu.memory_space<vmem>>, vector<32x128xf32>
    tpu.vector_store %arg4[%c0_6, %c0_7], %11 {strides = array<i32>} : memref<32x128xf32, #tpu.memory_space<vmem>>, vector<32x128xf32>,
    return
  }
  func.func @transform_0(%arg0: i32) -> (i32, i32) {
    %c0_i32 = arith.constant 0 : i32
    %c0_i32_0 = arith.constant 0 : i32
    return %arg0, %c0_i32 : i32, i32
  }
  func.func @transform_1(%arg0: i32) -> (i32, i32) {
    %c0_i32 = arith.constant 0 : i32
    %c0_i32_0 = arith.constant 0 : i32
    %c0_i32_1 = arith.constant 0 : i32
    return %c0_i32, %c0_i32_0 : i32, i32
  }
  func.func @transform_2(%arg0: i32) -> (i32, i32) {
    %c0_i32 = arith.constant 0 : i32
    %c0_i32_0 = arith.constant 0 : i32
    %c0_i32_1 = arith.constant 0 : i32
    return %c0_i32, %c0_i32_0 : i32, i32
  }
  func.func @transform_3(%arg0: i32) -> (i32, i32) {
    %c0_i32 = arith.constant 0 : i32
    %c0_i32_0 = arith.constant 0 : i32
    return %arg0, %c0_i32 : i32, i32
  }
}

module attributes {stable_mosaic.version = 11 : i64} {
  func.func @_conv_taps_kernel(%arg0: i32, %arg1: memref<1x290x8xf32, #tpu.memory_space<vmem>>, %arg2: memref<9x8x8xf32, #tpu.memory_space<vmem>>, %arg3: memref<1x1x8xf32, #tpu.memory_space<vmem>>, %arg4: memref<1x256x8xf32, #tpu.memory_space<vmem>>, %arg5: memref<1x1x8xf32, #tpu.memory_space<vmem>>, %arg6: memref<1x1x8xf32, #tpu.memory_space<vmem>>) attributes {dimension_semantics = [#tpu.dimension_semantics<parallel>], iteration_bounds = array<i64: 2>, scalar_prefetch = 0 : i64, scratch_operands = 0 : i64, tpu.core_type = #tpu.core_type<tc>, window_params = [{transform_indices = @transform_0, window_bounds = array<i64: 1, 290, 8>}, {pipeline_mode = #tpu.pipeline_mode<synchronous>, transform_indices = @transform_1, window_bounds = array<i64: 9, 8, 8>}, {pipeline_mode = #tpu.pipeline_mode<synchronous>, transform_indices = @transform_2, window_bounds = array<i64: 1, 1, 8>}, {transform_indices = @transform_3, window_bounds = array<i64: 1, 256, 8>}, {transform_indices = @transform_4, window_bounds = array<i64: 1, 1, 8>}, {transform_indices = @transform_5, window_bounds = array<i64: 1, 1, 8>}]} {
    %c0 = arith.constant 0 : index
    %c0_0 = arith.constant 0 : index
    %c0_1 = arith.constant 0 : index
    %0 = vector.load %arg1[%c0, %c0_0, %c0_1] : memref<1x290x8xf32, #tpu.memory_space<vmem>>, vector<1x290x8xf32>
    %1 = vector.shape_cast %0 : vector<1x290x8xf32> to vector<290x8xf32>
    %2 = tpu.iota {dimensions = array<i32: 0>} : vector<256x1xi32>
    %c16_i32 = arith.constant 16 : i32
    %c0_i32 = arith.constant 0 : i32
    %3 = arith.cmpi eq, %c16_i32, %c0_i32 : i32
    %c1_i32 = arith.constant 1 : i32
    %4 = arith.select %3, %c1_i32, %c16_i32 : i32
    %5 = vector.broadcast %4 : i32 to vector<256x1xi32>
    %6 = arith.remsi %2, %5 : vector<256x1xi32>
    %c0_i32_2 = arith.constant 0 : i32
    %7 = vector.broadcast %c0_i32_2 : i32 to vector<256x1xi32>
    %8 = arith.cmpi ne, %6, %7 : vector<256x1xi32>
    %c0_i32_3 = arith.constant 0 : i32
    %9 = vector.broadcast %c0_i32_3 : i32 to vector<256x1xi32>
    %10 = arith.cmpi slt, %6, %9 : vector<256x1xi32>
    %c0_i32_4 = arith.constant 0 : i32
    %11 = arith.cmpi slt, %4, %c0_i32_4 : i32
    %12 = vector.broadcast %11 : i1 to vector<256x1xi1>
    %13 = vector.broadcast %12 : vector<256x1xi1> to vector<256x1xi1>
    %14 = arith.xori %10, %13 : vector<256x1xi1>
    %15 = arith.andi %14, %8 : vector<256x1xi1>
    %16 = vector.broadcast %4 : i32 to vector<256x1xi32>
    %17 = arith.addi %6, %16 : vector<256x1xi32>
    %18 = arith.select %15, %17, %6 : vector<256x1xi1>, vector<256x1xi32>
    %c0_i32_5 = arith.constant 0 : i32
    %19 = vector.broadcast %c0_i32_5 : i32 to vector<256x1xi32>
    %20 = arith.cmpi ne, %18, %19 : vector<256x1xi32>
    %c15_i32 = arith.constant 15 : i32
    %21 = vector.broadcast %c15_i32 : i32 to vector<256x1xi32>
    %22 = arith.cmpi ne, %18, %21 : vector<256x1xi32>
    %23 = vector.extract_strided_slice %1 {offsets = [0, 0], sizes = [256, 8], strides = [1, 1]} : vector<290x8xf32> to vector<256x8xf32>
    %cst = arith.constant 0.000000e+00 : f32
    %24 = vector.broadcast %cst : f32 to vector<256x8xf32>
    %25 = vector.shape_cast %20 : vector<256x1xi1> to vector<256x1xi1>
    %26 = vector.broadcast %25 : vector<256x1xi1> to vector<256x8xi1>
    %27 = arith.select %26, %23, %24 : vector<256x8xi1>, vector<256x8xf32>
    %c0_6 = arith.constant 0 : index
    %c0_7 = arith.constant 0 : index
    %c0_8 = arith.constant 0 : index
    %28 = vector.load %arg2[%c0_6, %c0_7, %c0_8] : memref<9x8x8xf32, #tpu.memory_space<vmem>>, vector<1x8x8xf32>
    %29 = vector.shape_cast %28 : vector<1x8x8xf32> to vector<8x8xf32>
    %cst_9 = arith.constant dense<0.000000e+00> : vector<256x8xf32>
    %30 = tpu.matmul %27, %29, %cst_9 {dimension_numbers = #tpu.dot_dimension_numbers<[1], [0], [0], [1], [0, 0, 1, 1], [], []>} : vector<256x8xf32>, vector<8x8xf32>, vector<256x8xf32> -> vector<256x8xf32>
    %31 = vector.extract_strided_slice %1 {offsets = [1, 0], sizes = [256, 8], strides = [1, 1]} : vector<290x8xf32> to vector<256x8xf32>
    %c1 = arith.constant 1 : index
    %c0_10 = arith.constant 0 : index
    %c0_11 = arith.constant 0 : index
    %32 = vector.load %arg2[%c1, %c0_10, %c0_11] : memref<9x8x8xf32, #tpu.memory_space<vmem>>, vector<1x8x8xf32>
    %33 = vector.shape_cast %32 : vector<1x8x8xf32> to vector<8x8xf32>
    %cst_12 = arith.constant dense<0.000000e+00> : vector<256x8xf32>
    %34 = tpu.matmul %31, %33, %cst_12 {dimension_numbers = #tpu.dot_dimension_numbers<[1], [0], [0], [1], [0, 0, 1, 1], [], []>} : vector<256x8xf32>, vector<8x8xf32>, vector<256x8xf32> -> vector<256x8xf32>
    %35 = arith.addf %30, %34 : vector<256x8xf32>
    %36 = vector.extract_strided_slice %1 {offsets = [2, 0], sizes = [256, 8], strides = [1, 1]} : vector<290x8xf32> to vector<256x8xf32>
    %cst_13 = arith.constant 0.000000e+00 : f32
    %37 = vector.broadcast %cst_13 : f32 to vector<256x8xf32>
    %38 = vector.shape_cast %22 : vector<256x1xi1> to vector<256x1xi1>
    %39 = vector.broadcast %38 : vector<256x1xi1> to vector<256x8xi1>
    %40 = arith.select %39, %36, %37 : vector<256x8xi1>, vector<256x8xf32>
    %c2 = arith.constant 2 : index
    %c0_14 = arith.constant 0 : index
    %c0_15 = arith.constant 0 : index
    %41 = vector.load %arg2[%c2, %c0_14, %c0_15] : memref<9x8x8xf32, #tpu.memory_space<vmem>>, vector<1x8x8xf32>
    %42 = vector.shape_cast %41 : vector<1x8x8xf32> to vector<8x8xf32>
    %cst_16 = arith.constant dense<0.000000e+00> : vector<256x8xf32>
    %43 = tpu.matmul %40, %42, %cst_16 {dimension_numbers = #tpu.dot_dimension_numbers<[1], [0], [0], [1], [0, 0, 1, 1], [], []>} : vector<256x8xf32>, vector<8x8xf32>, vector<256x8xf32> -> vector<256x8xf32>
    %44 = arith.addf %35, %43 : vector<256x8xf32>
    %45 = vector.extract_strided_slice %1 {offsets = [16, 0], sizes = [256, 8], strides = [1, 1]} : vector<290x8xf32> to vector<256x8xf32>
    %cst_17 = arith.constant 0.000000e+00 : f32
    %46 = vector.broadcast %cst_17 : f32 to vector<256x8xf32>
    %47 = vector.shape_cast %20 : vector<256x1xi1> to vector<256x1xi1>
    %48 = vector.broadcast %47 : vector<256x1xi1> to vector<256x8xi1>
    %49 = arith.select %48, %45, %46 : vector<256x8xi1>, vector<256x8xf32>
    %c3 = arith.constant 3 : index
    %c0_18 = arith.constant 0 : index
    %c0_19 = arith.constant 0 : index
    %50 = vector.load %arg2[%c3, %c0_18, %c0_19] : memref<9x8x8xf32, #tpu.memory_space<vmem>>, vector<1x8x8xf32>
    %51 = vector.shape_cast %50 : vector<1x8x8xf32> to vector<8x8xf32>
    %cst_20 = arith.constant dense<0.000000e+00> : vector<256x8xf32>
    %52 = tpu.matmul %49, %51, %cst_20 {dimension_numbers = #tpu.dot_dimension_numbers<[1], [0], [0], [1], [0, 0, 1, 1], [], []>} : vector<256x8xf32>, vector<8x8xf32>, vector<256x8xf32> -> vector<256x8xf32>
    %53 = arith.addf %44, %52 : vector<256x8xf32>
    %54 = vector.extract_strided_slice %1 {offsets = [17, 0], sizes = [256, 8], strides = [1, 1]} : vector<290x8xf32> to vector<256x8xf32>
    %c4 = arith.constant 4 : index
    %c0_21 = arith.constant 0 : index
    %c0_22 = arith.constant 0 : index
    %55 = vector.load %arg2[%c4, %c0_21, %c0_22] : memref<9x8x8xf32, #tpu.memory_space<vmem>>, vector<1x8x8xf32>
    %56 = vector.shape_cast %55 : vector<1x8x8xf32> to vector<8x8xf32>
    %cst_23 = arith.constant dense<0.000000e+00> : vector<256x8xf32>
    %57 = tpu.matmul %54, %56, %cst_23 {dimension_numbers = #tpu.dot_dimension_numbers<[1], [0], [0], [1], [0, 0, 1, 1], [], []>} : vector<256x8xf32>, vector<8x8xf32>, vector<256x8xf32> -> vector<256x8xf32>
    %58 = arith.addf %53, %57 : vector<256x8xf32>
    %59 = vector.extract_strided_slice %1 {offsets = [18, 0], sizes = [256, 8], strides = [1, 1]} : vector<290x8xf32> to vector<256x8xf32>
    %cst_24 = arith.constant 0.000000e+00 : f32
    %60 = vector.broadcast %cst_24 : f32 to vector<256x8xf32>
    %61 = vector.shape_cast %22 : vector<256x1xi1> to vector<256x1xi1>
    %62 = vector.broadcast %61 : vector<256x1xi1> to vector<256x8xi1>
    %63 = arith.select %62, %59, %60 : vector<256x8xi1>, vector<256x8xf32>
    %c5 = arith.constant 5 : index
    %c0_25 = arith.constant 0 : index
    %c0_26 = arith.constant 0 : index
    %64 = vector.load %arg2[%c5, %c0_25, %c0_26] : memref<9x8x8xf32, #tpu.memory_space<vmem>>, vector<1x8x8xf32>
    %65 = vector.shape_cast %64 : vector<1x8x8xf32> to vector<8x8xf32>
    %cst_27 = arith.constant dense<0.000000e+00> : vector<256x8xf32>
    %66 = tpu.matmul %63, %65, %cst_27 {dimension_numbers = #tpu.dot_dimension_numbers<[1], [0], [0], [1], [0, 0, 1, 1], [], []>} : vector<256x8xf32>, vector<8x8xf32>, vector<256x8xf32> -> vector<256x8xf32>
    %67 = arith.addf %58, %66 : vector<256x8xf32>
    %68 = vector.extract_strided_slice %1 {offsets = [32, 0], sizes = [256, 8], strides = [1, 1]} : vector<290x8xf32> to vector<256x8xf32>
    %cst_28 = arith.constant 0.000000e+00 : f32
    %69 = vector.broadcast %cst_28 : f32 to vector<256x8xf32>
    %70 = vector.shape_cast %20 : vector<256x1xi1> to vector<256x1xi1>
    %71 = vector.broadcast %70 : vector<256x1xi1> to vector<256x8xi1>
    %72 = arith.select %71, %68, %69 : vector<256x8xi1>, vector<256x8xf32>
    %c6 = arith.constant 6 : index
    %c0_29 = arith.constant 0 : index
    %c0_30 = arith.constant 0 : index
    %73 = vector.load %arg2[%c6, %c0_29, %c0_30] : memref<9x8x8xf32, #tpu.memory_space<vmem>>, vector<1x8x8xf32>
    %74 = vector.shape_cast %73 : vector<1x8x8xf32> to vector<8x8xf32>
    %cst_31 = arith.constant dense<0.000000e+00> : vector<256x8xf32>
    %75 = tpu.matmul %72, %74, %cst_31 {dimension_numbers = #tpu.dot_dimension_numbers<[1], [0], [0], [1], [0, 0, 1, 1], [], []>} : vector<256x8xf32>, vector<8x8xf32>, vector<256x8xf32> -> vector<256x8xf32>
    %76 = arith.addf %67, %75 : vector<256x8xf32>
    %77 = vector.extract_strided_slice %1 {offsets = [33, 0], sizes = [256, 8], strides = [1, 1]} : vector<290x8xf32> to vector<256x8xf32>
    %c7 = arith.constant 7 : index
    %c0_32 = arith.constant 0 : index
    %c0_33 = arith.constant 0 : index
    %78 = vector.load %arg2[%c7, %c0_32, %c0_33] : memref<9x8x8xf32, #tpu.memory_space<vmem>>, vector<1x8x8xf32>
    %79 = vector.shape_cast %78 : vector<1x8x8xf32> to vector<8x8xf32>
    %cst_34 = arith.constant dense<0.000000e+00> : vector<256x8xf32>
    %80 = tpu.matmul %77, %79, %cst_34 {dimension_numbers = #tpu.dot_dimension_numbers<[1], [0], [0], [1], [0, 0, 1, 1], [], []>} : vector<256x8xf32>, vector<8x8xf32>, vector<256x8xf32> -> vector<256x8xf32>
    %81 = arith.addf %76, %80 : vector<256x8xf32>
    %82 = vector.extract_strided_slice %1 {offsets = [34, 0], sizes = [256, 8], strides = [1, 1]} : vector<290x8xf32> to vector<256x8xf32>
    %cst_35 = arith.constant 0.000000e+00 : f32
    %83 = vector.broadcast %cst_35 : f32 to vector<256x8xf32>
    %84 = vector.shape_cast %22 : vector<256x1xi1> to vector<256x1xi1>
    %85 = vector.broadcast %84 : vector<256x1xi1> to vector<256x8xi1>
    %86 = arith.select %85, %82, %83 : vector<256x8xi1>, vector<256x8xf32>
    %c8 = arith.constant 8 : index
    %c0_36 = arith.constant 0 : index
    %c0_37 = arith.constant 0 : index
    %87 = vector.load %arg2[%c8, %c0_36, %c0_37] : memref<9x8x8xf32, #tpu.memory_space<vmem>>, vector<1x8x8xf32>
    %88 = vector.shape_cast %87 : vector<1x8x8xf32> to vector<8x8xf32>
    %cst_38 = arith.constant dense<0.000000e+00> : vector<256x8xf32>
    %89 = tpu.matmul %86, %88, %cst_38 {dimension_numbers = #tpu.dot_dimension_numbers<[1], [0], [0], [1], [0, 0, 1, 1], [], []>} : vector<256x8xf32>, vector<8x8xf32>, vector<256x8xf32> -> vector<256x8xf32>
    %90 = arith.addf %81, %89 : vector<256x8xf32>
    %c0_39 = arith.constant 0 : index
    %c0_40 = arith.constant 0 : index
    %c0_41 = arith.constant 0 : index
    %91 = vector.load %arg4[%c0_39, %c0_40, %c0_41] : memref<1x256x8xf32, #tpu.memory_space<vmem>>, vector<1x256x8xf32>
    %92 = vector.shape_cast %91 : vector<1x256x8xf32> to vector<256x8xf32>
    %93 = vector.shape_cast %90 : vector<256x8xf32> to vector<1x256x8xf32>
    tpu.vector_store %arg4[%c0_39, %c0_40, %c0_41], %93 {strides = array<i32>} : memref<1x256x8xf32, #tpu.memory_space<vmem>>, vector<1x256x8xf32>,
    %cst_42 = arith.constant dense<0.000000e+00> : vector<8xf32>
    %94 = vector.multi_reduction <add>, %90, %cst_42 [0] : vector<256x8xf32> to vector<8xf32>
    %95 = vector.shape_cast %94 : vector<8xf32> to vector<1x8xf32>
    %c0_43 = arith.constant 0 : index
    %c0_44 = arith.constant 0 : index
    %c0_45 = arith.constant 0 : index
    %96 = vector.load %arg5[%c0_43, %c0_44, %c0_45] : memref<1x1x8xf32, #tpu.memory_space<vmem>>, vector<1x1x8xf32>
    %97 = vector.shape_cast %96 : vector<1x1x8xf32> to vector<1x8xf32>
    %98 = vector.shape_cast %95 : vector<1x8xf32> to vector<1x1x8xf32>
    tpu.vector_store %arg5[%c0_43, %c0_44, %c0_45], %98 {strides = array<i32>} : memref<1x1x8xf32, #tpu.memory_space<vmem>>, vector<1x1x8xf32>,
    %99 = arith.mulf %90, %90 : vector<256x8xf32>
    %cst_46 = arith.constant dense<0.000000e+00> : vector<8xf32>
    %100 = vector.multi_reduction <add>, %99, %cst_46 [0] : vector<256x8xf32> to vector<8xf32>
    %101 = vector.shape_cast %100 : vector<8xf32> to vector<1x8xf32>
    %c0_47 = arith.constant 0 : index
    %c0_48 = arith.constant 0 : index
    %c0_49 = arith.constant 0 : index
    %102 = vector.load %arg6[%c0_47, %c0_48, %c0_49] : memref<1x1x8xf32, #tpu.memory_space<vmem>>, vector<1x1x8xf32>
    %103 = vector.shape_cast %102 : vector<1x1x8xf32> to vector<1x8xf32>
    %104 = vector.shape_cast %101 : vector<1x8xf32> to vector<1x1x8xf32>
    tpu.vector_store %arg6[%c0_47, %c0_48, %c0_49], %104 {strides = array<i32>} : memref<1x1x8xf32, #tpu.memory_space<vmem>>, vector<1x1x8xf32>,
    return
  }
  func.func @transform_0(%arg0: i32) -> (i32, i32, i32) {
    %c0_i32 = arith.constant 0 : i32
    %c0_i32_0 = arith.constant 0 : i32
    %c0_i32_1 = arith.constant 0 : i32
    return %arg0, %c0_i32, %c0_i32_0 : i32, i32, i32
  }
  func.func @transform_1(%arg0: i32) -> (i32, i32, i32) {
    %c0_i32 = arith.constant 0 : i32
    %c0_i32_0 = arith.constant 0 : i32
    %c0_i32_1 = arith.constant 0 : i32
    %c0_i32_2 = arith.constant 0 : i32
    return %c0_i32, %c0_i32_0, %c0_i32_1 : i32, i32, i32
  }
  func.func @transform_2(%arg0: i32) -> (i32, i32, i32) {
    %c0_i32 = arith.constant 0 : i32
    %c0_i32_0 = arith.constant 0 : i32
    %c0_i32_1 = arith.constant 0 : i32
    %c0_i32_2 = arith.constant 0 : i32
    return %c0_i32, %c0_i32_0, %c0_i32_1 : i32, i32, i32
  }
  func.func @transform_3(%arg0: i32) -> (i32, i32, i32) {
    %c0_i32 = arith.constant 0 : i32
    %c0_i32_0 = arith.constant 0 : i32
    %c0_i32_1 = arith.constant 0 : i32
    return %arg0, %c0_i32, %c0_i32_0 : i32, i32, i32
  }
  func.func @transform_4(%arg0: i32) -> (i32, i32, i32) {
    %c0_i32 = arith.constant 0 : i32
    %c0_i32_0 = arith.constant 0 : i32
    %c0_i32_1 = arith.constant 0 : i32
    return %arg0, %c0_i32, %c0_i32_0 : i32, i32, i32
  }
  func.func @transform_5(%arg0: i32) -> (i32, i32, i32) {
    %c0_i32 = arith.constant 0 : i32
    %c0_i32_0 = arith.constant 0 : i32
    %c0_i32_1 = arith.constant 0 : i32
    return %arg0, %c0_i32, %c0_i32_0 : i32, i32, i32
  }
}

module attributes {stable_mosaic.version = 11 : i64} {
  func.func @_bn_act_add_kernel(%arg0: i32, %arg1: memref<32x128xf32, #tpu.memory_space<vmem>>, %arg2: memref<1x128xf32, #tpu.memory_space<vmem>>, %arg3: memref<1x128xf32, #tpu.memory_space<vmem>>, %arg4: memref<32x128xf32, #tpu.memory_space<vmem>>, %arg5: memref<32x128xf32, #tpu.memory_space<vmem>>) attributes {dimension_semantics = [#tpu.dimension_semantics<parallel>], iteration_bounds = array<i64: 1>, scalar_prefetch = 0 : i64, scratch_operands = 0 : i64, tpu.core_type = #tpu.core_type<tc>, window_params = [{transform_indices = @transform_0, window_bounds = array<i64: 32, 128>}, {pipeline_mode = #tpu.pipeline_mode<synchronous>, transform_indices = @transform_1, window_bounds = array<i64: 1, 128>}, {pipeline_mode = #tpu.pipeline_mode<synchronous>, transform_indices = @transform_2, window_bounds = array<i64: 1, 128>}, {transform_indices = @transform_3, window_bounds = array<i64: 32, 128>}, {transform_indices = @transform_4, window_bounds = array<i64: 32, 128>}]} {
    %c0 = arith.constant 0 : index
    %c0_0 = arith.constant 0 : index
    %0 = vector.load %arg1[%c0, %c0_0] : memref<32x128xf32, #tpu.memory_space<vmem>>, vector<32x128xf32>
    %c0_1 = arith.constant 0 : index
    %c0_2 = arith.constant 0 : index
    %1 = vector.load %arg2[%c0_1, %c0_2] : memref<1x128xf32, #tpu.memory_space<vmem>>, vector<1x128xf32>
    %2 = vector.broadcast %1 : vector<1x128xf32> to vector<32x128xf32>
    %3 = arith.mulf %0, %2 : vector<32x128xf32>
    %c0_3 = arith.constant 0 : index
    %c0_4 = arith.constant 0 : index
    %4 = vector.load %arg3[%c0_3, %c0_4] : memref<1x128xf32, #tpu.memory_space<vmem>>, vector<1x128xf32>
    %5 = vector.broadcast %4 : vector<1x128xf32> to vector<32x128xf32>
    %6 = arith.addf %3, %5 : vector<32x128xf32>
    %cst = arith.constant 0.000000e+00 : f32
    %7 = vector.broadcast %cst : f32 to vector<32x128xf32>
    %8 = arith.cmpf oge, %6, %7 : vector<32x128xf32>
    %cst_5 = arith.constant 2.000000e-01 : f32
    %9 = vector.broadcast %cst_5 : f32 to vector<32x128xf32>
    %10 = arith.mulf %9, %6 : vector<32x128xf32>
    %11 = arith.select %8, %6, %10 : vector<32x128xi1>, vector<32x128xf32>
    %c0_6 = arith.constant 0 : index
    %c0_7 = arith.constant 0 : index
    %12 = vector.load %arg4[%c0_6, %c0_7] : memref<32x128xf32, #tpu.memory_space<vmem>>, vector<32x128xf32>
    %13 = arith.addf %11, %12 : vector<32x128xf32>
    %c0_8 = arith.constant 0 : index
    %c0_9 = arith.constant 0 : index
    %14 = vector.load %arg5[%c0_8, %c0_9] : memref<32x128xf32, #tpu.memory_space<vmem>>, vector<32x128xf32>
    tpu.vector_store %arg5[%c0_8, %c0_9], %13 {strides = array<i32>} : memref<32x128xf32, #tpu.memory_space<vmem>>, vector<32x128xf32>,
    return
  }
  func.func @transform_0(%arg0: i32) -> (i32, i32) {
    %c0_i32 = arith.constant 0 : i32
    %c0_i32_0 = arith.constant 0 : i32
    return %arg0, %c0_i32 : i32, i32
  }
  func.func @transform_1(%arg0: i32) -> (i32, i32) {
    %c0_i32 = arith.constant 0 : i32
    %c0_i32_0 = arith.constant 0 : i32
    %c0_i32_1 = arith.constant 0 : i32
    return %c0_i32, %c0_i32_0 : i32, i32
  }
  func.func @transform_2(%arg0: i32) -> (i32, i32) {
    %c0_i32 = arith.constant 0 : i32
    %c0_i32_0 = arith.constant 0 : i32
    %c0_i32_1 = arith.constant 0 : i32
    return %c0_i32, %c0_i32_0 : i32, i32
  }
  func.func @transform_3(%arg0: i32) -> (i32, i32) {
    %c0_i32 = arith.constant 0 : i32
    %c0_i32_0 = arith.constant 0 : i32
    return %arg0, %c0_i32 : i32, i32
  }
  func.func @transform_4(%arg0: i32) -> (i32, i32) {
    %c0_i32 = arith.constant 0 : i32
    %c0_i32_0 = arith.constant 0 : i32
    return %arg0, %c0_i32 : i32, i32
  }
}

module attributes {stable_mosaic.version = 11 : i64} {
  func.func @_conv_taps_kernel(%arg0: i32, %arg1: memref<1x16x32xf32, #tpu.memory_space<vmem>>, %arg2: memref<1x32x128xf32, #tpu.memory_space<vmem>>, %arg3: memref<1x1x128xf32, #tpu.memory_space<vmem>>, %arg4: memref<1x16x128xf32, #tpu.memory_space<vmem>>, %arg5: memref<1x1x128xf32, #tpu.memory_space<vmem>>, %arg6: memref<1x1x128xf32, #tpu.memory_space<vmem>>) attributes {dimension_semantics = [#tpu.dimension_semantics<parallel>], iteration_bounds = array<i64: 2>, scalar_prefetch = 0 : i64, scratch_operands = 0 : i64, tpu.core_type = #tpu.core_type<tc>, window_params = [{transform_indices = @transform_0, window_bounds = array<i64: 1, 16, 32>}, {pipeline_mode = #tpu.pipeline_mode<synchronous>, transform_indices = @transform_1, window_bounds = array<i64: 1, 32, 128>}, {pipeline_mode = #tpu.pipeline_mode<synchronous>, transform_indices = @transform_2, window_bounds = array<i64: 1, 1, 128>}, {transform_indices = @transform_3, window_bounds = array<i64: 1, 16, 128>}, {transform_indices = @transform_4, window_bounds = array<i64: 1, 1, 128>}, {transform_indices = @transform_5, window_bounds = array<i64: 1, 1, 128>}]} {
    %c0 = arith.constant 0 : index
    %c0_0 = arith.constant 0 : index
    %c0_1 = arith.constant 0 : index
    %0 = vector.load %arg1[%c0, %c0_0, %c0_1] : memref<1x16x32xf32, #tpu.memory_space<vmem>>, vector<1x16x32xf32>
    %1 = vector.shape_cast %0 : vector<1x16x32xf32> to vector<16x32xf32>
    %c0_2 = arith.constant 0 : index
    %c0_3 = arith.constant 0 : index
    %c0_4 = arith.constant 0 : index
    %2 = vector.load %arg2[%c0_2, %c0_3, %c0_4] : memref<1x32x128xf32, #tpu.memory_space<vmem>>, vector<1x32x128xf32>
    %3 = vector.shape_cast %2 : vector<1x32x128xf32> to vector<32x128xf32>
    %cst = arith.constant dense<0.000000e+00> : vector<16x128xf32>
    %4 = tpu.matmul %1, %3, %cst {dimension_numbers = #tpu.dot_dimension_numbers<[1], [0], [0], [1], [0, 0, 1, 1], [], []>} : vector<16x32xf32>, vector<32x128xf32>, vector<16x128xf32> -> vector<16x128xf32>
    %c0_5 = arith.constant 0 : index
    %c0_6 = arith.constant 0 : index
    %c0_7 = arith.constant 0 : index
    %5 = vector.load %arg4[%c0_5, %c0_6, %c0_7] : memref<1x16x128xf32, #tpu.memory_space<vmem>>, vector<1x16x128xf32>
    %6 = vector.shape_cast %5 : vector<1x16x128xf32> to vector<16x128xf32>
    %7 = vector.shape_cast %4 : vector<16x128xf32> to vector<1x16x128xf32>
    tpu.vector_store %arg4[%c0_5, %c0_6, %c0_7], %7 {strides = array<i32>} : memref<1x16x128xf32, #tpu.memory_space<vmem>>, vector<1x16x128xf32>,
    %cst_8 = arith.constant dense<0.000000e+00> : vector<128xf32>
    %8 = vector.multi_reduction <add>, %4, %cst_8 [0] : vector<16x128xf32> to vector<128xf32>
    %9 = vector.shape_cast %8 : vector<128xf32> to vector<1x128xf32>
    %c0_9 = arith.constant 0 : index
    %c0_10 = arith.constant 0 : index
    %c0_11 = arith.constant 0 : index
    %10 = vector.load %arg5[%c0_9, %c0_10, %c0_11] : memref<1x1x128xf32, #tpu.memory_space<vmem>>, vector<1x1x128xf32>
    %11 = vector.shape_cast %10 : vector<1x1x128xf32> to vector<1x128xf32>
    %12 = vector.shape_cast %9 : vector<1x128xf32> to vector<1x1x128xf32>
    tpu.vector_store %arg5[%c0_9, %c0_10, %c0_11], %12 {strides = array<i32>} : memref<1x1x128xf32, #tpu.memory_space<vmem>>, vector<1x1x128xf32>,
    %13 = arith.mulf %4, %4 : vector<16x128xf32>
    %cst_12 = arith.constant dense<0.000000e+00> : vector<128xf32>
    %14 = vector.multi_reduction <add>, %13, %cst_12 [0] : vector<16x128xf32> to vector<128xf32>
    %15 = vector.shape_cast %14 : vector<128xf32> to vector<1x128xf32>
    %c0_13 = arith.constant 0 : index
    %c0_14 = arith.constant 0 : index
    %c0_15 = arith.constant 0 : index
    %16 = vector.load %arg6[%c0_13, %c0_14, %c0_15] : memref<1x1x128xf32, #tpu.memory_space<vmem>>, vector<1x1x128xf32>
    %17 = vector.shape_cast %16 : vector<1x1x128xf32> to vector<1x128xf32>
    %18 = vector.shape_cast %15 : vector<1x128xf32> to vector<1x1x128xf32>
    tpu.vector_store %arg6[%c0_13, %c0_14, %c0_15], %18 {strides = array<i32>} : memref<1x1x128xf32, #tpu.memory_space<vmem>>, vector<1x1x128xf32>,
    return
  }
  func.func @transform_0(%arg0: i32) -> (i32, i32, i32) {
    %c0_i32 = arith.constant 0 : i32
    %c0_i32_0 = arith.constant 0 : i32
    %c0_i32_1 = arith.constant 0 : i32
    return %arg0, %c0_i32, %c0_i32_0 : i32, i32, i32
  }
  func.func @transform_1(%arg0: i32) -> (i32, i32, i32) {
    %c0_i32 = arith.constant 0 : i32
    %c0_i32_0 = arith.constant 0 : i32
    %c0_i32_1 = arith.constant 0 : i32
    %c0_i32_2 = arith.constant 0 : i32
    return %c0_i32, %c0_i32_0, %c0_i32_1 : i32, i32, i32
  }
  func.func @transform_2(%arg0: i32) -> (i32, i32, i32) {
    %c0_i32 = arith.constant 0 : i32
    %c0_i32_0 = arith.constant 0 : i32
    %c0_i32_1 = arith.constant 0 : i32
    %c0_i32_2 = arith.constant 0 : i32
    return %c0_i32, %c0_i32_0, %c0_i32_1 : i32, i32, i32
  }
  func.func @transform_3(%arg0: i32) -> (i32, i32, i32) {
    %c0_i32 = arith.constant 0 : i32
    %c0_i32_0 = arith.constant 0 : i32
    %c0_i32_1 = arith.constant 0 : i32
    return %arg0, %c0_i32, %c0_i32_0 : i32, i32, i32
  }
  func.func @transform_4(%arg0: i32) -> (i32, i32, i32) {
    %c0_i32 = arith.constant 0 : i32
    %c0_i32_0 = arith.constant 0 : i32
    %c0_i32_1 = arith.constant 0 : i32
    return %arg0, %c0_i32, %c0_i32_0 : i32, i32, i32
  }
  func.func @transform_5(%arg0: i32) -> (i32, i32, i32) {
    %c0_i32 = arith.constant 0 : i32
    %c0_i32_0 = arith.constant 0 : i32
    %c0_i32_1 = arith.constant 0 : i32
    return %arg0, %c0_i32, %c0_i32_0 : i32, i32, i32
  }
}

module attributes {stable_mosaic.version = 11 : i64} {
  func.func @_conv_taps_kernel(%arg0: i32, %arg1: memref<1x290x8xf32, #tpu.memory_space<vmem>>, %arg2: memref<9x8x3xf32, #tpu.memory_space<vmem>>, %arg3: memref<1x1x3xf32, #tpu.memory_space<vmem>>, %arg4: memref<1x256x3xf32, #tpu.memory_space<vmem>>, %arg5: memref<1x1x3xf32, #tpu.memory_space<vmem>>, %arg6: memref<1x1x3xf32, #tpu.memory_space<vmem>>) attributes {dimension_semantics = [#tpu.dimension_semantics<parallel>], iteration_bounds = array<i64: 2>, scalar_prefetch = 0 : i64, scratch_operands = 0 : i64, tpu.core_type = #tpu.core_type<tc>, window_params = [{transform_indices = @transform_0, window_bounds = array<i64: 1, 290, 8>}, {pipeline_mode = #tpu.pipeline_mode<synchronous>, transform_indices = @transform_1, window_bounds = array<i64: 9, 8, 3>}, {pipeline_mode = #tpu.pipeline_mode<synchronous>, transform_indices = @transform_2, window_bounds = array<i64: 1, 1, 3>}, {transform_indices = @transform_3, window_bounds = array<i64: 1, 256, 3>}, {transform_indices = @transform_4, window_bounds = array<i64: 1, 1, 3>}, {transform_indices = @transform_5, window_bounds = array<i64: 1, 1, 3>}]} {
    %c0 = arith.constant 0 : index
    %c0_0 = arith.constant 0 : index
    %c0_1 = arith.constant 0 : index
    %0 = vector.load %arg1[%c0, %c0_0, %c0_1] : memref<1x290x8xf32, #tpu.memory_space<vmem>>, vector<1x290x8xf32>
    %1 = vector.shape_cast %0 : vector<1x290x8xf32> to vector<290x8xf32>
    %2 = tpu.iota {dimensions = array<i32: 0>} : vector<256x1xi32>
    %c16_i32 = arith.constant 16 : i32
    %c0_i32 = arith.constant 0 : i32
    %3 = arith.cmpi eq, %c16_i32, %c0_i32 : i32
    %c1_i32 = arith.constant 1 : i32
    %4 = arith.select %3, %c1_i32, %c16_i32 : i32
    %5 = vector.broadcast %4 : i32 to vector<256x1xi32>
    %6 = arith.remsi %2, %5 : vector<256x1xi32>
    %c0_i32_2 = arith.constant 0 : i32
    %7 = vector.broadcast %c0_i32_2 : i32 to vector<256x1xi32>
    %8 = arith.cmpi ne, %6, %7 : vector<256x1xi32>
    %c0_i32_3 = arith.constant 0 : i32
    %9 = vector.broadcast %c0_i32_3 : i32 to vector<256x1xi32>
    %10 = arith.cmpi slt, %6, %9 : vector<256x1xi32>
    %c0_i32_4 = arith.constant 0 : i32
    %11 = arith.cmpi slt, %4, %c0_i32_4 : i32
    %12 = vector.broadcast %11 : i1 to vector<256x1xi1>
    %13 = vector.broadcast %12 : vector<256x1xi1> to vector<256x1xi1>
    %14 = arith.xori %10, %13 : vector<256x1xi1>
    %15 = arith.andi %14, %8 : vector<256x1xi1>
    %16 = vector.broadcast %4 : i32 to vector<256x1xi32>
    %17 = arith.addi %6, %16 : vector<256x1xi32>
    %18 = arith.select %15, %17, %6 : vector<256x1xi1>, vector<256x1xi32>
    %c0_i32_5 = arith.constant 0 : i32
    %19 = vector.broadcast %c0_i32_5 : i32 to vector<256x1xi32>
    %20 = arith.cmpi ne, %18, %19 : vector<256x1xi32>
    %c15_i32 = arith.constant 15 : i32
    %21 = vector.broadcast %c15_i32 : i32 to vector<256x1xi32>
    %22 = arith.cmpi ne, %18, %21 : vector<256x1xi32>
    %23 = vector.extract_strided_slice %1 {offsets = [0, 0], sizes = [256, 8], strides = [1, 1]} : vector<290x8xf32> to vector<256x8xf32>
    %cst = arith.constant 0.000000e+00 : f32
    %24 = vector.broadcast %cst : f32 to vector<256x8xf32>
    %25 = vector.shape_cast %20 : vector<256x1xi1> to vector<256x1xi1>
    %26 = vector.broadcast %25 : vector<256x1xi1> to vector<256x8xi1>
    %27 = arith.select %26, %23, %24 : vector<256x8xi1>, vector<256x8xf32>
    %c0_6 = arith.constant 0 : index
    %c0_7 = arith.constant 0 : index
    %c0_8 = arith.constant 0 : index
    %28 = vector.load %arg2[%c0_6, %c0_7, %c0_8] : memref<9x8x3xf32, #tpu.memory_space<vmem>>, vector<1x8x3xf32>
    %29 = vector.shape_cast %28 : vector<1x8x3xf32> to vector<8x3xf32>
    %cst_9 = arith.constant dense<0.000000e+00> : vector<256x3xf32>
    %30 = tpu.matmul %27, %29, %cst_9 {dimension_numbers = #tpu.dot_dimension_numbers<[1], [0], [0], [1], [0, 0, 1, 1], [], []>} : vector<256x8xf32>, vector<8x3xf32>, vector<256x3xf32> -> vector<256x3xf32>
    %31 = vector.extract_strided_slice %1 {offsets = [1, 0], sizes = [256, 8], strides = [1, 1]} : vector<290x8xf32> to vector<256x8xf32>
    %c1 = arith.constant 1 : index
    %c0_10 = arith.constant 0 : index
    %c0_11 = arith.constant 0 : index
    %32 = vector.load %arg2[%c1, %c0_10, %c0_11] : memref<9x8x3xf32, #tpu.memory_space<vmem>>, vector<1x8x3xf32>
    %33 = vector.shape_cast %32 : vector<1x8x3xf32> to vector<8x3xf32>
    %cst_12 = arith.constant dense<0.000000e+00> : vector<256x3xf32>
    %34 = tpu.matmul %31, %33, %cst_12 {dimension_numbers = #tpu.dot_dimension_numbers<[1], [0], [0], [1], [0, 0, 1, 1], [], []>} : vector<256x8xf32>, vector<8x3xf32>, vector<256x3xf32> -> vector<256x3xf32>
    %35 = arith.addf %30, %34 : vector<256x3xf32>
    %36 = vector.extract_strided_slice %1 {offsets = [2, 0], sizes = [256, 8], strides = [1, 1]} : vector<290x8xf32> to vector<256x8xf32>
    %cst_13 = arith.constant 0.000000e+00 : f32
    %37 = vector.broadcast %cst_13 : f32 to vector<256x8xf32>
    %38 = vector.shape_cast %22 : vector<256x1xi1> to vector<256x1xi1>
    %39 = vector.broadcast %38 : vector<256x1xi1> to vector<256x8xi1>
    %40 = arith.select %39, %36, %37 : vector<256x8xi1>, vector<256x8xf32>
    %c2 = arith.constant 2 : index
    %c0_14 = arith.constant 0 : index
    %c0_15 = arith.constant 0 : index
    %41 = vector.load %arg2[%c2, %c0_14, %c0_15] : memref<9x8x3xf32, #tpu.memory_space<vmem>>, vector<1x8x3xf32>
    %42 = vector.shape_cast %41 : vector<1x8x3xf32> to vector<8x3xf32>
    %cst_16 = arith.constant dense<0.000000e+00> : vector<256x3xf32>
    %43 = tpu.matmul %40, %42, %cst_16 {dimension_numbers = #tpu.dot_dimension_numbers<[1], [0], [0], [1], [0, 0, 1, 1], [], []>} : vector<256x8xf32>, vector<8x3xf32>, vector<256x3xf32> -> vector<256x3xf32>
    %44 = arith.addf %35, %43 : vector<256x3xf32>
    %45 = vector.extract_strided_slice %1 {offsets = [16, 0], sizes = [256, 8], strides = [1, 1]} : vector<290x8xf32> to vector<256x8xf32>
    %cst_17 = arith.constant 0.000000e+00 : f32
    %46 = vector.broadcast %cst_17 : f32 to vector<256x8xf32>
    %47 = vector.shape_cast %20 : vector<256x1xi1> to vector<256x1xi1>
    %48 = vector.broadcast %47 : vector<256x1xi1> to vector<256x8xi1>
    %49 = arith.select %48, %45, %46 : vector<256x8xi1>, vector<256x8xf32>
    %c3 = arith.constant 3 : index
    %c0_18 = arith.constant 0 : index
    %c0_19 = arith.constant 0 : index
    %50 = vector.load %arg2[%c3, %c0_18, %c0_19] : memref<9x8x3xf32, #tpu.memory_space<vmem>>, vector<1x8x3xf32>
    %51 = vector.shape_cast %50 : vector<1x8x3xf32> to vector<8x3xf32>
    %cst_20 = arith.constant dense<0.000000e+00> : vector<256x3xf32>
    %52 = tpu.matmul %49, %51, %cst_20 {dimension_numbers = #tpu.dot_dimension_numbers<[1], [0], [0], [1], [0, 0, 1, 1], [], []>} : vector<256x8xf32>, vector<8x3xf32>, vector<256x3xf32> -> vector<256x3xf32>
    %53 = arith.addf %44, %52 : vector<256x3xf32>
    %54 = vector.extract_strided_slice %1 {offsets = [17, 0], sizes = [256, 8], strides = [1, 1]} : vector<290x8xf32> to vector<256x8xf32>
    %c4 = arith.constant 4 : index
    %c0_21 = arith.constant 0 : index
    %c0_22 = arith.constant 0 : index
    %55 = vector.load %arg2[%c4, %c0_21, %c0_22] : memref<9x8x3xf32, #tpu.memory_space<vmem>>, vector<1x8x3xf32>
    %56 = vector.shape_cast %55 : vector<1x8x3xf32> to vector<8x3xf32>
    %cst_23 = arith.constant dense<0.000000e+00> : vector<256x3xf32>
    %57 = tpu.matmul %54, %56, %cst_23 {dimension_numbers = #tpu.dot_dimension_numbers<[1], [0], [0], [1], [0, 0, 1, 1], [], []>} : vector<256x8xf32>, vector<8x3xf32>, vector<256x3xf32> -> vector<256x3xf32>
    %58 = arith.addf %53, %57 : vector<256x3xf32>
    %59 = vector.extract_strided_slice %1 {offsets = [18, 0], sizes = [256, 8], strides = [1, 1]} : vector<290x8xf32> to vector<256x8xf32>
    %cst_24 = arith.constant 0.000000e+00 : f32
    %60 = vector.broadcast %cst_24 : f32 to vector<256x8xf32>
    %61 = vector.shape_cast %22 : vector<256x1xi1> to vector<256x1xi1>
    %62 = vector.broadcast %61 : vector<256x1xi1> to vector<256x8xi1>
    %63 = arith.select %62, %59, %60 : vector<256x8xi1>, vector<256x8xf32>
    %c5 = arith.constant 5 : index
    %c0_25 = arith.constant 0 : index
    %c0_26 = arith.constant 0 : index
    %64 = vector.load %arg2[%c5, %c0_25, %c0_26] : memref<9x8x3xf32, #tpu.memory_space<vmem>>, vector<1x8x3xf32>
    %65 = vector.shape_cast %64 : vector<1x8x3xf32> to vector<8x3xf32>
    %cst_27 = arith.constant dense<0.000000e+00> : vector<256x3xf32>
    %66 = tpu.matmul %63, %65, %cst_27 {dimension_numbers = #tpu.dot_dimension_numbers<[1], [0], [0], [1], [0, 0, 1, 1], [], []>} : vector<256x8xf32>, vector<8x3xf32>, vector<256x3xf32> -> vector<256x3xf32>
    %67 = arith.addf %58, %66 : vector<256x3xf32>
    %68 = vector.extract_strided_slice %1 {offsets = [32, 0], sizes = [256, 8], strides = [1, 1]} : vector<290x8xf32> to vector<256x8xf32>
    %cst_28 = arith.constant 0.000000e+00 : f32
    %69 = vector.broadcast %cst_28 : f32 to vector<256x8xf32>
    %70 = vector.shape_cast %20 : vector<256x1xi1> to vector<256x1xi1>
    %71 = vector.broadcast %70 : vector<256x1xi1> to vector<256x8xi1>
    %72 = arith.select %71, %68, %69 : vector<256x8xi1>, vector<256x8xf32>
    %c6 = arith.constant 6 : index
    %c0_29 = arith.constant 0 : index
    %c0_30 = arith.constant 0 : index
    %73 = vector.load %arg2[%c6, %c0_29, %c0_30] : memref<9x8x3xf32, #tpu.memory_space<vmem>>, vector<1x8x3xf32>
    %74 = vector.shape_cast %73 : vector<1x8x3xf32> to vector<8x3xf32>
    %cst_31 = arith.constant dense<0.000000e+00> : vector<256x3xf32>
    %75 = tpu.matmul %72, %74, %cst_31 {dimension_numbers = #tpu.dot_dimension_numbers<[1], [0], [0], [1], [0, 0, 1, 1], [], []>} : vector<256x8xf32>, vector<8x3xf32>, vector<256x3xf32> -> vector<256x3xf32>
    %76 = arith.addf %67, %75 : vector<256x3xf32>
    %77 = vector.extract_strided_slice %1 {offsets = [33, 0], sizes = [256, 8], strides = [1, 1]} : vector<290x8xf32> to vector<256x8xf32>
    %c7 = arith.constant 7 : index
    %c0_32 = arith.constant 0 : index
    %c0_33 = arith.constant 0 : index
    %78 = vector.load %arg2[%c7, %c0_32, %c0_33] : memref<9x8x3xf32, #tpu.memory_space<vmem>>, vector<1x8x3xf32>
    %79 = vector.shape_cast %78 : vector<1x8x3xf32> to vector<8x3xf32>
    %cst_34 = arith.constant dense<0.000000e+00> : vector<256x3xf32>
    %80 = tpu.matmul %77, %79, %cst_34 {dimension_numbers = #tpu.dot_dimension_numbers<[1], [0], [0], [1], [0, 0, 1, 1], [], []>} : vector<256x8xf32>, vector<8x3xf32>, vector<256x3xf32> -> vector<256x3xf32>
    %81 = arith.addf %76, %80 : vector<256x3xf32>
    %82 = vector.extract_strided_slice %1 {offsets = [34, 0], sizes = [256, 8], strides = [1, 1]} : vector<290x8xf32> to vector<256x8xf32>
    %cst_35 = arith.constant 0.000000e+00 : f32
    %83 = vector.broadcast %cst_35 : f32 to vector<256x8xf32>
    %84 = vector.shape_cast %22 : vector<256x1xi1> to vector<256x1xi1>
    %85 = vector.broadcast %84 : vector<256x1xi1> to vector<256x8xi1>
    %86 = arith.select %85, %82, %83 : vector<256x8xi1>, vector<256x8xf32>
    %c8 = arith.constant 8 : index
    %c0_36 = arith.constant 0 : index
    %c0_37 = arith.constant 0 : index
    %87 = vector.load %arg2[%c8, %c0_36, %c0_37] : memref<9x8x3xf32, #tpu.memory_space<vmem>>, vector<1x8x3xf32>
    %88 = vector.shape_cast %87 : vector<1x8x3xf32> to vector<8x3xf32>
    %cst_38 = arith.constant dense<0.000000e+00> : vector<256x3xf32>
    %89 = tpu.matmul %86, %88, %cst_38 {dimension_numbers = #tpu.dot_dimension_numbers<[1], [0], [0], [1], [0, 0, 1, 1], [], []>} : vector<256x8xf32>, vector<8x3xf32>, vector<256x3xf32> -> vector<256x3xf32>
    %90 = arith.addf %81, %89 : vector<256x3xf32>
    %c0_39 = arith.constant 0 : index
    %c0_40 = arith.constant 0 : index
    %c0_41 = arith.constant 0 : index
    %91 = vector.load %arg3[%c0_39, %c0_40, %c0_41] : memref<1x1x3xf32, #tpu.memory_space<vmem>>, vector<1x1x3xf32>
    %92 = vector.shape_cast %91 : vector<1x1x3xf32> to vector<1x3xf32>
    %93 = vector.broadcast %92 : vector<1x3xf32> to vector<256x3xf32>
    %94 = arith.addf %90, %93 : vector<256x3xf32>
    %c0_42 = arith.constant 0 : index
    %c0_43 = arith.constant 0 : index
    %c0_44 = arith.constant 0 : index
    %95 = vector.load %arg4[%c0_42, %c0_43, %c0_44] : memref<1x256x3xf32, #tpu.memory_space<vmem>>, vector<1x256x3xf32>
    %96 = vector.shape_cast %95 : vector<1x256x3xf32> to vector<256x3xf32>
    %97 = vector.shape_cast %94 : vector<256x3xf32> to vector<1x256x3xf32>
    tpu.vector_store %arg4[%c0_42, %c0_43, %c0_44], %97 {strides = array<i32>} : memref<1x256x3xf32, #tpu.memory_space<vmem>>, vector<1x256x3xf32>,
    %cst_45 = arith.constant dense<0.000000e+00> : vector<3xf32>
    %98 = vector.multi_reduction <add>, %94, %cst_45 [0] : vector<256x3xf32> to vector<3xf32>
    %99 = vector.shape_cast %98 : vector<3xf32> to vector<1x3xf32>
    %c0_46 = arith.constant 0 : index
    %c0_47 = arith.constant 0 : index
    %c0_48 = arith.constant 0 : index
    %100 = vector.load %arg5[%c0_46, %c0_47, %c0_48] : memref<1x1x3xf32, #tpu.memory_space<vmem>>, vector<1x1x3xf32>
    %101 = vector.shape_cast %100 : vector<1x1x3xf32> to vector<1x3xf32>
    %102 = vector.shape_cast %99 : vector<1x3xf32> to vector<1x1x3xf32>
    tpu.vector_store %arg5[%c0_46, %c0_47, %c0_48], %102 {strides = array<i32>} : memref<1x1x3xf32, #tpu.memory_space<vmem>>, vector<1x1x3xf32>,
    %103 = arith.mulf %94, %94 : vector<256x3xf32>
    %cst_49 = arith.constant dense<0.000000e+00> : vector<3xf32>
    %104 = vector.multi_reduction <add>, %103, %cst_49 [0] : vector<256x3xf32> to vector<3xf32>
    %105 = vector.shape_cast %104 : vector<3xf32> to vector<1x3xf32>
    %c0_50 = arith.constant 0 : index
    %c0_51 = arith.constant 0 : index
    %c0_52 = arith.constant 0 : index
    %106 = vector.load %arg6[%c0_50, %c0_51, %c0_52] : memref<1x1x3xf32, #tpu.memory_space<vmem>>, vector<1x1x3xf32>
    %107 = vector.shape_cast %106 : vector<1x1x3xf32> to vector<1x3xf32>
    %108 = vector.shape_cast %105 : vector<1x3xf32> to vector<1x1x3xf32>
    tpu.vector_store %arg6[%c0_50, %c0_51, %c0_52], %108 {strides = array<i32>} : memref<1x1x3xf32, #tpu.memory_space<vmem>>, vector<1x1x3xf32>,
    return
  }
  func.func @transform_0(%arg0: i32) -> (i32, i32, i32) {
    %c0_i32 = arith.constant 0 : i32
    %c0_i32_0 = arith.constant 0 : i32
    %c0_i32_1 = arith.constant 0 : i32
    return %arg0, %c0_i32, %c0_i32_0 : i32, i32, i32
  }
  func.func @transform_1(%arg0: i32) -> (i32, i32, i32) {
    %c0_i32 = arith.constant 0 : i32
    %c0_i32_0 = arith.constant 0 : i32
    %c0_i32_1 = arith.constant 0 : i32
    %c0_i32_2 = arith.constant 0 : i32
    return %c0_i32, %c0_i32_0, %c0_i32_1 : i32, i32, i32
  }
  func.func @transform_2(%arg0: i32) -> (i32, i32, i32) {
    %c0_i32 = arith.constant 0 : i32
    %c0_i32_0 = arith.constant 0 : i32
    %c0_i32_1 = arith.constant 0 : i32
    %c0_i32_2 = arith.constant 0 : i32
    return %c0_i32, %c0_i32_0, %c0_i32_1 : i32, i32, i32
  }
  func.func @transform_3(%arg0: i32) -> (i32, i32, i32) {
    %c0_i32 = arith.constant 0 : i32
    %c0_i32_0 = arith.constant 0 : i32
    %c0_i32_1 = arith.constant 0 : i32
    return %arg0, %c0_i32, %c0_i32_0 : i32, i32, i32
  }
  func.func @transform_4(%arg0: i32) -> (i32, i32, i32) {
    %c0_i32 = arith.constant 0 : i32
    %c0_i32_0 = arith.constant 0 : i32
    %c0_i32_1 = arith.constant 0 : i32
    return %arg0, %c0_i32, %c0_i32_0 : i32, i32, i32
  }
  func.func @transform_5(%arg0: i32) -> (i32, i32, i32) {
    %c0_i32 = arith.constant 0 : i32
    %c0_i32_0 = arith.constant 0 : i32
    %c0_i32_1 = arith.constant 0 : i32
    return %arg0, %c0_i32, %c0_i32_0 : i32, i32, i32
  }
}

</mosaic_0001>

<bundles_post_ra>
// kernel: tile.93
= control target key start
LH: loop header
LB: loop body
LE: loop exit
PB: predicated region body
PF: predicated region fallthrough
CT: control target
= control target key end

     0   :  { %s22_s0 = inlined_call_operand.vmem [shape: f32[32], index: 0, kind: input, shape index: {}]   ;;  %s23_s1 = inlined_call_operand.vmem [shape: f32[4,32], index: 1, kind: output, shape index: {}]  }
   0x1   :  { %v4_v0 = vld [vmem:[%s22_s0] ss:$0 sm:$0xff] }
   0x2   :  { %5 = vst [vmem:[%s23_s1] sm:$0xf] %v4_v0 }

// kernel: tile.94
= control target key start
LH: loop header
LB: loop body
LE: loop exit
PB: predicated region body
PF: predicated region fallthrough
CT: control target
= control target key end

     0   :  { %s37_s8 = smov 32   ;;  %s38_s9 = smov 64   ;;  %vm7_vm0 = vcmask 261120   ;;  %vm13_vm1 = vcmask 1048320   ;;  %vm19_vm2 = vcmask 785920   ;;  %vm25_vm3 = vcmask 523520   ;;  %s55_s0 = inlined_call_operand.vmem [shape: f32[4,32], index: 0, kind: input, shape index: {}]   ;;  %s56_s1 = inlined_call_operand.vmem [shape: f32[1,128], index: 1, kind: output, shape index: {}]  }
   0x1   :  { %v4_v0 = vld [vmem:[%s55_s0] sm:$0xf]  ;;  %s36_s0 = smov 96  }
   0x2   :  { %5 = vst [vmem:[#allocation1] sm:$0xf] %v4_v0 }
   0x9   :  { %v10_v1 = vld [vmem:[#allocation1 + $0x3] sm:$0x1]   ;;  %v22_v2 = vld [vmem:[#allocation1 + $0x1] sm:$0x1]   ;;  %v16_v3 = vld [vmem:[#allocation1 + $0x2] sm:$0x1]  }
   0xa   :  { %11 = vrot.lane.b32.xlu0 %v10_v1, %s36_s0  ;;  %23 = vrot.lane.b32.xlu1 %v22_v2, %s37_s8  ;;  %v6_v4 = vld [vmem:[#allocation1] sm:$0x1]  }
   0xb   :  { %8 = vst.msk [vmem:[#allocation0] sm:$0x1] %vm7_vm0, %v6_v4  }
  0x12   :  { %17 = vrot.lane.b32.xlu0 %v16_v3, %s38_s9 }
  0x7c   :  { %v12_v5 = vpop.permute.xlu0 %11   ;;  %v24_v6 = vpop.permute.xlu1 %23  }
  0x7d   :  { %14 = vst.msk [vmem:[#allocation0] sm:$0x1] %vm13_vm1, %v12_v5  }
  0x84   :  { %v18_v7 = vpop.permute.xlu0 %17  }
  0x85   :  { %20 = vst.msk [vmem:[#allocation0] sm:$0x1] %vm19_vm2, %v18_v7  }
  0x86   :  { %26 = vst.msk [vmem:[#allocation0] sm:$0x1] %vm25_vm3, %v24_v6  }
  0x8d   :  { %v29_v8 = vld [vmem:[#allocation0] sm:$0x1] }
  0x8e   :  { %32 = vst [vmem:[%s56_s1] sm:$0x1] %v29_v8 }

// kernel: tile.103
= control target key start
LH: loop header
LB: loop body
LE: loop exit
PB: predicated region body
PF: predicated region fallthrough
CT: control target
= control target key end

     0   :  { %s22_s0 = inlined_call_operand.vmem [shape: f32[16], index: 0, kind: input, shape index: {}]   ;;  %s23_s1 = inlined_call_operand.vmem [shape: f32[8,16], index: 1, kind: output, shape index: {}]  }
   0x1   :  { %v4_v0 = vld [vmem:[%s22_s0] ss:$0 sm:$0xff] }
   0x2   :  { %5 = vst [vmem:[%s23_s1] sm:$0xff] %v4_v0 }

// kernel: tile.104
= control target key start
LH: loop header
LB: loop body
LE: loop exit
PB: predicated region body
PF: predicated region fallthrough
CT: control target
= control target key end

     0   :  { %s67_s10 = smov 112   ;;  %s68_s11 = smov 80   ;;  %vm3_vm0 = vcmask 130048   ;;  %vm9_vm1 = vcmask 1048448   ;;  %vm15_vm2 = vcmask 917248   ;;  %vm21_vm3 = vcmask 786048   ;;  %s111_s0 = inlined_call_operand.vmem [shape: f32[8,16], index: 0, kind: input, shape index: {}]   ;;  %s112_s1 = inlined_call_operand.vmem [shape: f32[1,128], index: 1, kind: output, shape index: {}]  }
   0x1   :  { %v53_v0 = vld [vmem:[%s111_s0 + $0x7] sm:$0x1]   ;;  %v55_v1 = vld [vmem:[%s111_s0 + $0x5] sm:$0x1]   ;;  %v57_v2 = vld [vmem:[%s111_s0 + $0x3] sm:$0x1]  }
   0x2   :  { %7 = vrot.lane.b32.xlu0 %v53_v0, %s67_s10  ;;  %19 = vrot.lane.b32.xlu1 %v55_v1, %s68_s11  ;;  %s69_s14 = smov 48   ;;  %v54_v3 = vld [vmem:[%s111_s0 + $0x6] sm:$0x1]   ;;  %v56_v4 = vld [vmem:[%s111_s0 + $0x4] sm:$0x1]   ;;  %s70_s21 = smov 96  }
   0x3   :  { %31 = vrot.lane.b32.xlu2 %v57_v2, %s69_s14  ;;  %v58_v5 = vld [vmem:[%s111_s0 + $0x2] sm:$0x1]   ;;  %s71_s22 = smov 64   ;;  %s72_s23 = smov 32   ;;  %v59_v6 = vld [vmem:[%s111_s0 + $0x1] sm:$0x1]  }
   0x4   :  { %s73_s26 = smov 16   ;;  %v2_v7 = vld [vmem:[%s111_s0] sm:$0x1]   ;;  %vm27_vm4 = vcmask 654848   ;;  %vm33_vm5 = vcmask 523648   ;;  %vm39_vm6 = vcmask 392448  }
   0x5   :  { %4 = vst.msk [vmem:[#allocation0] sm:$0x1] %vm3_vm0, %v2_v7   ;;  %vm45_vm7 = vcmask 261248  }
   0xa   :  { %13 = vrot.lane.b32.xlu0 %v54_v3, %s70_s21  ;;  %25 = vrot.lane.b32.xlu1 %v56_v4, %s71_s22 }
   0xb   :  { %37 = vrot.lane.b32.xlu2 %v58_v5, %s72_s23 }
  0x12   :  { %43 = vrot.lane.b32.xlu0 %v59_v6, %s73_s26 }
  0x5d   :  { %v32_v8 = vpop.permute.xlu2 %31  }
  0x65   :  { %v38_v9 = vpop.permute.xlu2 %37  }
  0x74   :  { %v8_v10 = vpop.permute.xlu0 %7   ;;  %v20_v11 = vpop.permute.xlu1 %19  }
  0x75   :  { %10 = vst.msk [vmem:[#allocation0] sm:$0x1] %vm9_vm1, %v8_v10  }
  0x7c   :  { %v14_v12 = vpop.permute.xlu0 %13   ;;  %v26_v13 = vpop.permute.xlu1 %25  }
  0x7d   :  { %16 = vst.msk [vmem:[#allocation0] sm:$0x1] %vm15_vm2, %v14_v12  }
  0x7e   :  { %22 = vst.msk [vmem:[#allocation0] sm:$0x1] %vm21_vm3, %v20_v11  }
  0x7f   :  { %28 = vst.msk [vmem:[#allocation0] sm:$0x1] %vm27_vm4, %v26_v13  }
  0x80   :  { %34 = vst.msk [vmem:[#allocation0] sm:$0x1] %vm33_vm5, %v32_v8  }
  0x81   :  { %40 = vst.msk [vmem:[#allocation0] sm:$0x1] %vm39_vm6, %v38_v9  }
  0x84   :  { %v44_v14 = vpop.permute.xlu0 %43  }
  0x85   :  { %46 = vst.msk [vmem:[#allocation0] sm:$0x1] %vm45_vm7, %v44_v14  }
  0x8c   :  { %v49_v15 = vld [vmem:[#allocation0] sm:$0x1] }
  0x8d   :  { %52 = vst [vmem:[%s112_s1] sm:$0x1] %v49_v15 }

// kernel: _lambda_.20
= control target key start
LH: loop header
LB: loop body
LE: loop exit
PB: predicated region body
PF: predicated region fallthrough
CT: control target
= control target key end

     0   :  { %s67_s0 = inlined_call_operand.vmem [shape: f32[8,128], index: 0, kind: input, shape index: {}]   ;;  %s68_s1 = inlined_call_operand.vmem [shape: f32[1,128], index: 1, kind: input, shape index: {}]   ;;  %s69_s2 = inlined_call_operand.vmem [shape: f32[1,128], index: 2, kind: input, shape index: {}]   ;;  %s70_s3 = inlined_call_operand.vmem [shape: f32[8,128], index: 3, kind: output, shape index: {}]  }
   0x1   :  { %v14_v0 = vld [vmem:[%s67_s0] sm:$0xff] }
   0x2   :  { %v33_v1 = vld [vmem:[%s68_s1] ss:$0 sm:$0xff] }
   0x3   :  { %v34_v2 = vld [vmem:[%s69_s2] ss:$0 sm:$0xff]  ;;  %v19_v3 = vmul.f32 %v33_v1, %v14_v0 }
   0x5   :  { %v24_v4 = vadd.f32 %v34_v2, %v19_v3 }
   0x7   :  { %vm25_vm0 = vcmp.ge.f32.partialorder %v24_v4, 0.0  ;;  %v26_v5 = vmul.f32 0.2, %v24_v4 }
   0x9   :  { %v27_v6 = vsel %vm25_vm0, %v24_v4, %v26_v5 }
   0xa   :  { %28 = vst [vmem:[%s70_s3] sm:$0xff] %v27_v6 }

// kernel: _lambda_.19
= control target key start
LH: loop header
LB: loop body
LE: loop exit
PB: predicated region body
PF: predicated region fallthrough
CT: control target
= control target key end

     0   :  { %s844_s18 = smov 0   ;;  %s997_s0 = inlined_call_operand.vmem [shape: f32[2,26,8], index: 0, kind: input, shape index: {}]   ;;  %s998_s1 = inlined_call_operand.vmem [shape: f32[9,8,32], index: 1, kind: input, shape index: {}]   ;;  %s999_s2 = inlined_call_operand.vmem [shape: f32[1,1,32], index: 2, kind: input, shape index: {}]   ;;  %s1000_s3 = inlined_call_operand.vmem [shape: f32[2,16,32], index: 3, kind: output, shape index: {0}]   ;;  %s1001_s4 = inlined_call_operand.vmem [shape: f32[2,1,32], index: 4, kind: output, shape index: {1}]   ;;  %s1002_s5 = inlined_call_operand.vmem [shape: f32[2,1,32], index: 5, kind: output, shape index: {2}]  }
   0x1 LB: > { %s758_s2 = sadd.s32 4294967295, %s812_s18   ;;  %p762_p0 = scmp.ge.s32.totalorder %s812_s18, 1  ;;  %s812_s18 = sphi %s844_s18, %s16_s18  }
   0x2   : > { %p192_p1 = scmp.lt.s32.totalorder %s812_s18, 3 }
   0x4   : > { %p193_p2 = pnand %p762_p0, %p192_p1 }
   0x5   : > { %p226_p3 = scmp.lt.s32.totalorder (!%p193_p2), %s758_s2, 1 }
   0x6   : > { %196 = sbr.rel (%p193_p2) target bundleno = 202 (0xca), region = 32 }
   0xb   : > { %v767_v0 = vld [vmem:[%s998_s1 + $0x8] sm:$0xff]  ;;  %v283_v1 = vld [vmem:[%s998_s1] sm:$0xff]  ;;  %v772_v2 = vld [vmem:[%s998_s1 + $0x10] sm:$0xff]  ;;  %v246_v3 = vlaneseq  ;;  %s1012_s2 = smov (!%p226_p3, %s758_s2), 1  ;;  %vm289_vm0 = vcmask 1046528   ;;  %vm295_vm1 = vcmask 64512  }
   0xc   : > { %797 = vmatpush.msra.mxu1 %v767_v0  ;;  %389 = vmatpush.msra.mxu2 %v772_v2  ;;  %v784_v4 = vld [vmem:[%s998_s1 + $0x30] sm:$0xff]  ;;  %v775_v5 = vld [vmem:[%s998_s1 + $0x18] sm:$0xff]  ;;  %v778_v6 = vld [vmem:[%s998_s1 + $0x20] sm:$0xff]  ;;  %s795_s8 = sshll.u32 %s1012_s2, 5  ;;  %vm356_vm3 = vcmask 1045504   ;;  %vm399_vm4 = vcmask 1043456   ;;  %s238_s23 = scalar_lea.vmem %s1001_s4, %s1012_s2 }
   0xd   : > { %v247_v7 = vshrl.u32 %v246_v3, 7  ;;  %v787_v8 = vld [vmem:[%s998_s1 + $0x38] sm:$0xff]  ;;  %315 = vmatpush.msra.mxu0 %v767_v0  ;;  %432 = vmatpush.msra.mxu3 %v775_v5  ;;  %s879_s11 = scalar_lea.vmem %s997_s0, %s795_s8  ;;  %v781_v25 = vld [vmem:[%s998_s1 + $0x28] sm:$0xff]  ;;  %v790_v31 = vld [vmem:[%s998_s1 + $0x40] sm:$0xff]  ;;  %vm444_vm7 = vcmask 1042432   ;;  %vm479_vm9 = vcmask 1041408   ;;  %s241_s26 = scalar_lea.vmem %s1002_s5, %s1012_s2 }
   0xe   : > { %344 = vmatpush.msrb.mxu1 %v283_v1  ;;  %547 = vmatpush.msrb.mxu2 %v784_v4  ;;  %v882_v11 = vld [vmem:[%s879_s11 + $0x8] sm:$0xff]  ;;  %v885_v12 = vld [vmem:[%s879_s11 + $0x10] sm:$0xff]  ;;  %v242_v13 = vld [vmem:[%s879_s11] sm:$0xff]  ;;  %s796_s16 = sshll.u32 %s1012_s2, 4  ;;  %vm627_vm10 = vcmask 261120   ;;  %vm639_vm11 = vcmask 253952  }
   0xf   : > { %v253_v9 = vand.u32 3, %v247_v7  ;;  %469 = vmatpush.msrb.mxu0 %v778_v6  ;;  %579 = vmatpush.msrb.mxu3 %v787_v8  ;;  %v248_v10 = vadd.s32 8, %v247_v7  ;;  %v291_v15 = vrot.slane %v882_v11, 1  ;;  %v293_v16 = vrot.slane %v885_v12, 1  ;;  %v245_v50 = vld [vmem:[%s879_s11 + $0x18] sm:$0x3]  ;;  %s235_s20 = scalar_lea.vmem %s1000_s3, %s796_s16 }
  0x10   : > { %v357_v17 = vrot.slane %v242_v13, 2  ;;  %v358_v18 = vrot.slane %v882_v11, 2  ;;  %v290_v19 = vrot.slane %v242_v13, 1  ;;  %v400_v21 = vrot.slane %v242_v13, 4 }
  0x11   : > { %vm888_vm2 = vcmp.ne.s32.totalorder %v253_v9, 3  ;;  %vm895_vm5 = vcmp.ne.s32.totalorder %v253_v9, 0  ;;  %v401_v22 = vrot.slane %v882_v11, 4  ;;  %v294_v23 = vsel %vm289_vm0, %v291_v15, %v293_v16 }
  0x12   : > { %v359_v24 = vsel %vm356_vm3, %v357_v17, %v358_v18  ;;  %v260_v26 = vand.u32 3, %v248_v10  ;;  %v360_v27 = vrot.slane %v885_v12, 2  ;;  %769 = vmatmul.msk.f32.vlgmr.msra.gmra.mxu1 %vm295_vm1, %v294_v23  ;;  %v292_v29 = vsel %vm289_vm0, %v290_v19, %v291_v15 }
  0x13   : > { %v364_v28 = vsel %vm888_vm2, %v359_v24, 0.0  ;;  %v402_v30 = vsel %vm399_vm4, %v400_v21, %v401_v22  ;;  %768 = vmatmul.msk.f32.vlgmr.msra.gmra.mxu0 %vm295_vm1, %v292_v29  ;;  %v403_v33 = vrot.slane %v885_v12, 4  ;;  %512 = vmatpush.msra.mxu1 %v781_v25  ;;  %v445_v34 = vrot.slane %v242_v13, 5 }
  0x14   : > { %773 = vmatmul.msk.f32.vlgmr.msra.gmra.mxu2 %vm295_vm1, %v364_v28  ;;  %v407_v32 = vsel %vm895_vm5, %v402_v30, 0.0  ;;  %v446_v35 = vrot.slane %v882_v11, 5  ;;  %vm921_vm6 = vcmp.ne.s32.totalorder %v260_v26, 3  ;;  %v361_v37 = vsel %vm356_vm3, %v358_v18, %v360_v27  ;;  %617 = vmatpush.msra.mxu0 %v790_v31 }
  0x15   : > { %776 = vmatmul.msk.f32.vlgmr.msra.gmra.mxu3 %vm295_vm1, %v407_v32  ;;  %vm926_vm8 = vcmp.ne.s32.totalorder %v260_v26, 0  ;;  %v404_v39 = vsel %vm399_vm4, %v401_v22, %v403_v33  ;;  %v281_v40 = vsel %vm895_vm5, %v242_v13, 0.0  ;;  %v365_v41 = vsel %vm921_vm6, %v361_v37, 0.0 }
  0x16   : > { %v447_v42 = vsel %vm444_vm7, %v445_v34, %v446_v35  ;;  %v408_v43 = vsel %vm926_vm8, %v404_v39, 0.0  ;;  %v448_v44 = vrot.slane %v885_v12, 5  ;;  %v282_v45 = vsel %vm926_vm8, %v882_v11, 0.0 }
  0x17   : > { %v522_v46 = vsel %vm895_vm5, %v882_v11, 0.0  ;;  %v480_v48 = vrot.slane %v242_v13, 6  ;;  %v481_v49 = vrot.slane %v882_v11, 6  ;;  %v560_v52 = vrot.slane %v245_v50, 1 }
  0x18   : > { %v449_v47 = vsel %vm444_vm7, %v446_v35, %v448_v44  ;;  %v592_v54 = vsel %vm888_vm2, %v361_v37, 0.0  ;;  %v523_v55 = vsel %vm926_vm8, %v885_v12, 0.0  ;;  %v483_v56 = vrot.slane %v885_v12, 6 }
  0x19   : > { %v482_v51 = vsel %vm479_vm9, %v480_v48, %v481_v49  ;;  %v561_v57 = vsel %vm289_vm0, %v293_v16, %v560_v52  ;;  %v589_v58 = vrot.slane %v245_v50, 2 }
  0x1a   : > { %770 = vmatmul.msk.f32.vlgmr.msrb.gmra.mxu1 %vm295_vm1, %v281_v40  ;;  %v487_v53 = vsel %vm888_vm2, %v482_v51, 0.0  ;;  %v484_v59 = vsel %vm479_vm9, %v481_v49, %v483_v56 }
  0x1b   : > { %779 = vmatmul.msk.f32.vlgmr.msrb.gmra.mxu0 %vm295_vm1, %v447_v42  ;;  %v590_v60 = vsel %vm356_vm3, %v360_v27, %v589_v58  ;;  %v488_v61 = vsel %vm921_vm6, %v484_v59, 0.0 }
  0x1c   : > { %774 = vmatmul.msk.f32.gmra.mxu2 %vm295_vm1, %v365_v41  ;;  %v593_v62 = vsel %vm921_vm6, %v590_v60, 0.0 }
  0x1d   : > { %777 = vmatmul.msk.f32.gmra.mxu3 %vm295_vm1, %v408_v43 }
  0x22   : > { %771 = vmatmul.msk.f32.gmra.mxu1 %vm295_vm1, %v282_v45 }
  0x23   : > { %780 = vmatmul.msk.f32.gmra.mxu0 %vm295_vm1, %v449_v47 }
  0x24   : > { %785 = vmatmul.msk.f32.vlgmr.msrb.gmra.mxu2 %vm295_vm1, %v522_v46 }
  0x25   : > { %788 = vmatmul.msk.f32.vlgmr.msrb.gmra.mxu3 %vm295_vm1, %v294_v23 }
  0x2a   : > { %782 = vmatmul.msk.f32.vlgmr.msra.gmra.mxu1 %vm295_vm1, %v487_v53 }
  0x2b   : > { %791 = vmatmul.msk.f32.vlgmr.msra.gmra.mxu0 %vm295_vm1, %v592_v54 }
  0x2c   : > { %786 = vmatmul.msk.f32.gmra.mxu2 %vm295_vm1, %v523_v55 }
  0x2d   : > { %789 = vmatmul.msk.f32.gmra.mxu3 %vm295_vm1, %v561_v57 }
  0x32   : > { %783 = vmatmul.msk.f32.gmra.mxu1 %vm295_vm1, %v488_v61 }
  0x33   : > { %792 = vmatmul.msk.f32.gmra.mxu0 %vm295_vm1, %v593_v62 }
  0x8f   : > { %v320_v63 = vpop.f32.mrf.mxu1 }
  0x90   : > { %v317_v0 = vpop.f32.mrf.mxu0 }
  0x97   : > { %v391_v1 = vpop.f32.mrf.mxu2  ;;  %v346_v2 = vpop.f32.mrf.mxu1 }
  0x98   : > { %v434_v3 = vpop.f32.mrf.mxu3  ;;  %v471_v4 = vpop.f32.mrf.mxu0  ;;  %v347_v5 = vadd.f32 %v346_v2, %v317_v0 }
  0x9a   : > { %v397_v6 = vadd.f32 %v391_v1, %v347_v5 }
  0x9c   : > { %v440_v11 = vadd.f32 %v434_v3, %v397_v6 }
  0x9e   : > { %v477_v13 = vadd.f32 %v471_v4, %v440_v11 }
  0x9f   : > { %v394_v7 = vpop.f32.mrf.mxu2  ;;  %v349_v8 = vpop.f32.mrf.mxu1 }
  0xa0   : > { %v437_v9 = vpop.f32.mrf.mxu3  ;;  %v474_v10 = vpop.f32.mrf.mxu0  ;;  %v350_v12 = vadd.f32 %v349_v8, %v320_v63 }
  0xa2   : > { %v398_v14 = vadd.f32 %v394_v7, %v350_v12 }
  0xa4   : > { %v441_v20 = vadd.f32 %v437_v9, %v398_v14 }
  0xa6   : > { %v478_v23 = vadd.f32 %v474_v10, %v441_v20 }
  0xa7   : > { %v549_v15 = vpop.f32.mrf.mxu2  ;;  %v514_v16 = vpop.f32.mrf.mxu1 }
  0xa8   : > { %v581_v17 = vpop.f32.mrf.mxu3  ;;  %v520_v18 = vadd.f32 %v514_v16, %v477_v13  ;;  %v619_v19 = vpop.f32.mrf.mxu0 }
  0xaa   : > { %v555_v21 = vadd.f32 %v549_v15, %v520_v18 }
  0xac   : > { %v587_v22 = vadd.f32 %v581_v17, %v555_v21 }
  0xae   : > { %v625_v24 = vadd.f32 %v619_v19, %v587_v22 }
  0xaf   : > { %v517_v25 = vpop.f32.mrf.mxu1  ;;  %v552_v26 = vpop.f32.mrf.mxu2 }
  0xb0   : > { %628 = vst.msk [vmem:[%s235_s20] sm:$0xff] %vm627_vm10, %v625_v24  ;;  %v521_v27 = vadd.f32 %v517_v25, %v478_v23  ;;  %v584_v28 = vpop.f32.mrf.mxu3  ;;  %v622_v30 = vpop.f32.mrf.mxu0  ;;  %v641_v32 = vmul.f32 %v625_v24, %v625_v24  ;;  %v630_v34 = vsel %vm627_vm10, %v625_v24, 0.0 }
  0xb2   : > { %v556_v29 = vadd.f32 %v552_v26, %v521_v27  ;;  %v643_v38 = vsel %vm627_vm10, %v641_v32, 0.0 }
  0xb4   : > { %v588_v31 = vadd.f32 %v584_v28, %v556_v29 }
  0xb6   : > { %v626_v33 = vadd.f32 %v622_v30, %v588_v31 }
  0xb8   : > { %629 = vst.msk [vmem:[%s235_s20 + $0x8] sm:$0xff] %vm627_vm10, %v626_v33  ;;  %v631_v35 = vsel %vm627_vm10, %v626_v33, 0.0  ;;  %v642_v36 = vmul.f32 %v626_v33, %v626_v33 }
  0xb9   : > { %v632_v37 = vadd.f32 %v631_v35, %v630_v34 }
  0xba   : > { %v644_v39 = vsel %vm627_vm10, %v642_v36, 0.0 }
  0xbb   : > { %v633_v40 = vrot.slane %v632_v37, 4  ;;  %v645_v41 = vadd.f32 %v644_v39, %v643_v38 }
  0xbd   : > { %v634_v42 = vadd.f32 %v633_v40, %v632_v37  ;;  %v646_v43 = vrot.slane %v645_v41, 4 }
  0xbf   : > { %v635_v44 = vrot.slane %v634_v42, 2  ;;  %v647_v45 = vadd.f32 %v646_v43, %v645_v41 }
  0xc1   : > { %v636_v46 = vadd.f32 %v635_v44, %v634_v42  ;;  %v648_v47 = vrot.slane %v647_v45, 2 }
  0xc3   : > { %v637_v48 = vrot.slane %v636_v46, 1  ;;  %v649_v49 = vadd.f32 %v648_v47, %v647_v45 }
  0xc5   : > { %v638_v50 = vadd.f32 %v637_v48, %v636_v46  ;;  %v650_v51 = vrot.slane %v649_v49, 1 }
  0xc7   : > { %640 = vst.msk [vmem:[%s238_s23] sm:$0x1] %vm639_vm11, %v638_v50  ;;  %v651_v52 = vadd.f32 %v650_v51, %v649_v49 }
  0xc9   : > { %652 = vst.msk [vmem:[%s241_s26] sm:$0x1] %vm639_vm11, %v651_v52 }
  0xca PF: > { %s16_s18 = sadd.s32 1, %s812_s18  }
  0xcb   : > { %p13_p4 = scmp.ge.s32.totalorder %s16_s18, 4  }
  0xcd   :  { %15 = sbr.rel (!%p13_p4) target bundleno = 1 (0x1), region = 94 }

// kernel: _lambda_.21
= control target key start
LH: loop header
LB: loop body
LE: loop exit
PB: predicated region body
PF: predicated region fallthrough
CT: control target
= control target key end

     0   :  { %s474_s18 = smov 0   ;;  %s514_s0 = inlined_call_operand.vmem [shape: f32[2,16,32], index: 0, kind: input, shape index: {}]   ;;  %s515_s1 = inlined_call_operand.vmem [shape: f32[1,32,64], index: 1, kind: input, shape index: {}]   ;;  %s516_s2 = inlined_call_operand.vmem [shape: f32[1,1,64], index: 2, kind: input, shape index: {}]   ;;  %s517_s3 = inlined_call_operand.vmem [shape: f32[2,16,64], index: 3, kind: output, shape index: {0}]   ;;  %s518_s4 = inlined_call_operand.vmem [shape: f32[2,1,64], index: 4, kind: output, shape index: {1}]   ;;  %s519_s5 = inlined_call_operand.vmem [shape: f32[2,1,64], index: 5, kind: output, shape index: {2}]  }
   0x1 LB: > { %s409_s2 = sadd.s32 4294967295, %s442_s18   ;;  %p413_p0 = scmp.ge.s32.totalorder %s442_s18, 1  ;;  %s442_s18 = sphi %s474_s18, %s16_s18  }
   0x2   : > { %p192_p1 = scmp.lt.s32.totalorder %s442_s18, 3 }
   0x4   : > { %p193_p2 = pnand %p413_p0, %p192_p1 }
   0x5   : > { %p226_p3 = scmp.lt.s32.totalorder (!%p193_p2), %s409_s2, 1 }
   0x6   : > { %196 = sbr.rel (%p193_p2) target bundleno = 163 (0xa3), region = 32 }
   0xb   : > { %v247_v0 = vld [vmem:[%s515_s1 + $0x18] sm:$0xff]  ;;  %v246_v1 = vld [vmem:[%s515_s1 + $0x10] sm:$0xff]  ;;  %v245_v2 = vld [vmem:[%s515_s1 + $0x8] sm:$0xff]  ;;  %s521_s2 = smov (!%p226_p3, %s409_s2), 1  ;;  %vm248_vm0 = vcmask 261120   ;;  %vm278_vm1 = vcmask 523264  }
   0xc   : > { %267 = vmatpush.msra.mxu0 %v247_v0  ;;  %424 = vmatpush.msra.mxu1 %v247_v0  ;;  %v244_v3 = vld [vmem:[%s515_s1] sm:$0xff]  ;;  %s422_s27 = sshll.u32 %s521_s2, 4  ;;  %s238_s11 = scalar_lea.vmem %s518_s4, %s521_s2  ;;  %vm290_vm2 = vcmask 516096  }
   0xd   : > { %s230_s30 = scalar_lea.vmem %s514_s0, %s422_s27  ;;  %s235_s8 = scalar_lea.vmem %s517_s3, %s422_s27 }
   0xe   : > { %268 = vmatpush.msra.mxu0 %v246_v1  ;;  %425 = vmatpush.msra.mxu1 %v246_v1  ;;  %v242_v4 = vld [vmem:[%s230_s30] sm:$0xff]  ;;  %v243_v5 = vld [vmem:[%s230_s30 + $0x8] sm:$0xff]  ;;  %s241_s14 = scalar_lea.vmem %s519_s5, %s521_s2 }
  0x10   : > { %269 = vmatpush.msra.mxu0 %v245_v2  ;;  %426 = vmatpush.msra.mxu1 %v245_v2 }
  0x12   : > { %270 = vmatpush.msra.mxu0 %v244_v3  ;;  %427 = vmatpush.msra.mxu1 %v244_v3 }
  0x13   : > { %418 = vmatmul.msk.f32.vlgmr.msra.gmra.mxu0 %vm248_vm0, %v242_v4  ;;  %419 = vmatmul.msk.f32.vlgmr.msra.gmra.mxu1 %vm248_vm0, %v243_v5 }
  0x90   : > { %v272_v6 = vpop.f32.mrf.mxu0  ;;  %v275_v7 = vpop.f32.mrf.mxu1 }
  0x91   : > { %279 = vst.msk [vmem:[%s235_s8] sm:$0xff] %vm278_vm1, %v272_v6  ;;  %v281_v8 = vsel %vm278_vm1, %v272_v6, 0.0  ;;  %v292_v9 = vmul.f32 %v272_v6, %v272_v6  ;;  %v282_v10 = vsel %vm278_vm1, %v275_v7, 0.0  ;;  %v293_v11 = vmul.f32 %v275_v7, %v275_v7 }
  0x92   : > { %280 = vst.msk [vmem:[%s235_s8 + $0x8] sm:$0xff] %vm278_vm1, %v275_v7  ;;  %v283_v12 = vadd.f32 %v282_v10, %v281_v8 }
  0x93   : > { %v294_v13 = vsel %vm278_vm1, %v292_v9, 0.0  ;;  %v295_v14 = vsel %vm278_vm1, %v293_v11, 0.0 }
  0x94   : > { %v284_v15 = vrot.slane %v283_v12, 4  ;;  %v296_v16 = vadd.f32 %v295_v14, %v294_v13 }
  0x96   : > { %v285_v17 = vadd.f32 %v284_v15, %v283_v12  ;;  %v297_v18 = vrot.slane %v296_v16, 4 }
  0x98   : > { %v286_v19 = vrot.slane %v285_v17, 2  ;;  %v298_v20 = vadd.f32 %v297_v18, %v296_v16 }
  0x9a   : > { %v287_v21 = vadd.f32 %v286_v19, %v285_v17  ;;  %v299_v22 = vrot.slane %v298_v20, 2 }
  0x9c   : > { %v288_v23 = vrot.slane %v287_v21, 1  ;;  %v300_v24 = vadd.f32 %v299_v22, %v298_v20 }
  0x9e   : > { %v289_v25 = vadd.f32 %v288_v23, %v287_v21  ;;  %v301_v26 = vrot.slane %v300_v24, 1 }
  0xa0   : > { %291 = vst.msk [vmem:[%s238_s11] sm:$0x1] %vm290_vm2, %v289_v25  ;;  %v302_v27 = vadd.f32 %v301_v26, %v300_v24 }
  0xa2   : > { %303 = vst.msk [vmem:[%s241_s14] sm:$0x1] %vm290_vm2, %v302_v27 }
  0xa3 PF: > { %s16_s18 = sadd.s32 1, %s442_s18  }
  0xa4   : > { %p13_p4 = scmp.ge.s32.totalorder %s16_s18, 4  }
  0xa6   :  { %15 = sbr.rel (!%p13_p4) target bundleno = 1 (0x1), region = 86 }

// kernel: _lambda_.22
= control target key start
LH: loop header
LB: loop body
LE: loop exit
PB: predicated region body
PF: predicated region fallthrough
CT: control target
= control target key end

     0   :  { %s80_s0 = inlined_call_operand.vmem [shape: f32[16,128], index: 0, kind: input, shape index: {}]   ;;  %s81_s1 = inlined_call_operand.vmem [shape: f32[1,128], index: 1, kind: input, shape index: {}]   ;;  %s82_s2 = inlined_call_operand.vmem [shape: f32[1,128], index: 2, kind: input, shape index: {}]   ;;  %s83_s3 = inlined_call_operand.vmem [shape: f32[16,128], index: 3, kind: output, shape index: {}]  }
   0x1   :  { %v14_v0 = vld [vmem:[%s80_s0] sm:$0xff]  ;;  %v15_v3 = vld [vmem:[%s80_s0 + $0x8] sm:$0xff] }
   0x2   :  { %v40_v1 = vld [vmem:[%s81_s1] ss:$0 sm:$0xff] }
   0x3   :  { %v41_v2 = vld [vmem:[%s82_s2] ss:$0 sm:$0xff]  ;;  %v20_v4 = vmul.f32 %v40_v1, %v14_v0  ;;  %v21_v5 = vmul.f32 %v40_v1, %v15_v3 }
   0x5   :  { %v26_v6 = vadd.f32 %v41_v2, %v20_v4  ;;  %v27_v7 = vadd.f32 %v41_v2, %v21_v5 }
   0x7   :  { %vm28_vm0 = vcmp.ge.f32.partialorder %v26_v6, 0.0  ;;  %v30_v8 = vmul.f32 0.2, %v26_v6  ;;  %vm29_vm1 = vcmp.ge.f32.partialorder %v27_v7, 0.0  ;;  %v31_v9 = vmul.f32 0.2, %v27_v7 }
   0x9   :  { %v32_v10 = vsel %vm28_vm0, %v26_v6, %v30_v8  ;;  %v33_v11 = vsel %vm29_vm1, %v27_v7, %v31_v9 }
   0xa   :  { %34 = vst [vmem:[%s83_s3] sm:$0xff] %v32_v10 }
   0xb   :  { %35 = vst [vmem:[%s83_s3 + $0x8] sm:$0xff] %v33_v11 }

// kernel: tile.143
= control target key start
LH: loop header
LB: loop body
LE: loop exit
PB: predicated region body
PF: predicated region fallthrough
CT: control target
= control target key end

     0   :  { %s28_s0 = inlined_call_operand.vmem [shape: f32[8], index: 0, kind: input, shape index: {}]   ;;  %s29_s1 = inlined_call_operand.vmem [shape: f32[16,8], index: 1, kind: output, shape index: {}]  }
   0x1   :  { %v4_v0 = vld [vmem:[%s28_s0] ss:$0 sm:$0xff] }
   0x2   :  { %5 = vst [vmem:[%s29_s1] sm:$0xff] %v4_v0 }
   0x3   :  { %8 = vst [vmem:[%s29_s1 + $0x8] sm:$0xff] %v4_v0 }

// kernel: tile.144
= control target key start
LH: loop header
LB: loop body
LE: loop exit
PB: predicated region body
PF: predicated region fallthrough
CT: control target
= control target key end

     0   :  { %s131_s10 = smov 120   ;;  %s132_s11 = smov 104   ;;  %vm3_vm0 = vcmask 64512   ;;  %vm9_vm1 = vcmask 1048512   ;;  %vm15_vm2 = vcmask 982912   ;;  %vm21_vm3 = vcmask 917312   ;;  %s207_s0 = inlined_call_operand.vmem [shape: f32[16,8], index: 0, kind: input, shape index: {}]   ;;  %s208_s1 = inlined_call_operand.vmem [shape: f32[1,128], index: 1, kind: output, shape index: {}]  }
   0x1   :  { %v101_v0 = vld [vmem:[%s207_s0 + $0xf] sm:$0x1]   ;;  %v103_v1 = vld [vmem:[%s207_s0 + $0xd] sm:$0x1]   ;;  %v105_v2 = vld [vmem:[%s207_s0 + $0xb] sm:$0x1]  }
   0x2   :  { %7 = vrot.lane.b32.xlu0 %v101_v0, %s131_s10  ;;  %19 = vrot.lane.b32.xlu1 %v103_v1, %s132_s11  ;;  %s133_s14 = smov 88   ;;  %v102_v3 = vld [vmem:[%s207_s0 + $0xe] sm:$0x1]   ;;  %v104_v4 = vld [vmem:[%s207_s0 + $0xc] sm:$0x1]   ;;  %s134_s19 = smov 112  }
   0x3   :  { %31 = vrot.lane.b32.xlu2 %v105_v2, %s133_s14  ;;  %s135_s20 = smov 96   ;;  %v106_v5 = vld [vmem:[%s207_s0 + $0xa] sm:$0x1]   ;;  %s136_s23 = smov 80   ;;  %v107_v6 = vld [vmem:[%s207_s0 + $0x9] sm:$0x1]  }
   0x4   :  { %v108_v7 = vld [vmem:[%s207_s0 + $0x8] sm:$0x1]   ;;  %s137_s28 = smov 72   ;;  %s138_s29 = smov 64   ;;  %v109_v8 = vld [vmem:[%s207_s0 + $0x7] sm:$0x1]  }
   0x5   :  { %s139_s3 = smov 56   ;;  %v110_v9 = vld [vmem:[%s207_s0 + $0x6] sm:$0x1]   ;;  %v111_v10 = vld [vmem:[%s207_s0 + $0x5] sm:$0x1]   ;;  %s140_s8 = smov 48  }
   0x6   :  { %s141_s9 = smov 40   ;;  %v112_v11 = vld [vmem:[%s207_s0 + $0x4] sm:$0x1]   ;;  %s142_s12 = smov 32   ;;  %v113_v12 = vld [vmem:[%s207_s0 + $0x3] sm:$0x1]  }
   0x7   :  { %v114_v13 = vld [vmem:[%s207_s0 + $0x2] sm:$0x1]   ;;  %s143_s17 = smov 24   ;;  %s144_s18 = smov 16   ;;  %v115_v14 = vld [vmem:[%s207_s0 + $0x1] sm:$0x1]  }
   0x8   :  { %s145_s21 = smov 8   ;;  %v2_v15 = vld [vmem:[%s207_s0] sm:$0x1]   ;;  %vm27_vm4 = vcmask 851712   ;;  %vm33_vm5 = vcmask 786112   ;;  %vm39_vm6 = vcmask 720512  }
   0x9   :  { %4 = vst.msk [vmem:[#allocation0] sm:$0x1] %vm3_vm0, %v2_v15   ;;  %vm45_vm7 = vcmask 654912   ;;  %vm51_vm8 = vcmask 589312   ;;  %vm57_vm9 = vcmask 523712   ;;  %vm63_vm10 = vcmask 458112  }
   0xa   :  { %13 = vrot.lane.b32.xlu0 %v102_v3, %s134_s19  ;;  %25 = vrot.lane.b32.xlu1 %v104_v4, %s135_s20  ;;  %vm69_vm11 = vcmask 392512   ;;  %vm75_vm12 = vcmask 326912   ;;  %vm81_vm13 = vcmask 261312   ;;  %vm87_vm14 = vcmask 195712  }
   0xb   :  { %37 = vrot.lane.b32.xlu2 %v106_v5, %s136_s23  ;;  %vm93_vm15 = vcmask 130112  }
  0x12   :  { %43 = vrot.lane.b32.xlu0 %v107_v6, %s137_s28  ;;  %49 = vrot.lane.b32.xlu1 %v108_v7, %s138_s29 }
  0x13   :  { %55 = vrot.lane.b32.xlu2 %v109_v8, %s139_s3 }
  0x1a   :  { %61 = vrot.lane.b32.xlu0 %v110_v9, %s140_s8  ;;  %67 = vrot.lane.b32.xlu1 %v111_v10, %s141_s9 }
  0x1b   :  { %73 = vrot.lane.b32.xlu2 %v112_v11, %s142_s12 }
  0x22   :  { %79 = vrot.lane.b32.xlu0 %v113_v12, %s143_s17  ;;  %85 = vrot.lane.b32.xlu1 %v114_v13, %s144_s18 }
  0x23   :  { %91 = vrot.lane.b32.xlu2 %v115_v14, %s145_s21 }
  0x5d   :  { %v32_v16 = vpop.permute.xlu2 %31  }
  0x65   :  { %v38_v17 = vpop.permute.xlu2 %37  }
  0x6d   :  { %v56_v18 = vpop.permute.xlu2 %55  }
  0x74   :  { %v8_v19 = vpop.permute.xlu0 %7   ;;  %v20_v20 = vpop.permute.xlu1 %19  }
  0x75   :  { %10 = vst.msk [vmem:[#allocation0] sm:$0x1] %vm9_vm1, %v8_v19   ;;  %v74_v21 = vpop.permute.xlu2 %73  }
  0x7c   :  { %v14_v22 = vpop.permute.xlu0 %13   ;;  %v26_v23 = vpop.permute.xlu1 %25  }
  0x7d   :  { %16 = vst.msk [vmem:[#allocation0] sm:$0x1] %vm15_vm2, %v14_v22   ;;  %v92_v24 = vpop.permute.xlu2 %91  }
  0x7e   :  { %22 = vst.msk [vmem:[#allocation0] sm:$0x1] %vm21_vm3, %v20_v20  }
  0x7f   :  { %28 = vst.msk [vmem:[#allocation0] sm:$0x1] %vm27_vm4, %v26_v23  }
  0x80   :  { %34 = vst.msk [vmem:[#allocation0] sm:$0x1] %vm33_vm5, %v32_v16  }
  0x81   :  { %40 = vst.msk [vmem:[#allocation0] sm:$0x1] %vm39_vm6, %v38_v17  }
  0x84   :  { %v44_v25 = vpop.permute.xlu0 %43   ;;  %v50_v26 = vpop.permute.xlu1 %49  }
  0x85   :  { %46 = vst.msk [vmem:[#allocation0] sm:$0x1] %vm45_vm7, %v44_v25  }
  0x86   :  { %52 = vst.msk [vmem:[#allocation0] sm:$0x1] %vm51_vm8, %v50_v26  }
  0x87   :  { %58 = vst.msk [vmem:[#allocation0] sm:$0x1] %vm57_vm9, %v56_v18  }
  0x8c   :  { %v62_v27 = vpop.permute.xlu0 %61   ;;  %v68_v28 = vpop.permute.xlu1 %67  }
  0x8d   :  { %64 = vst.msk [vmem:[#allocation0] sm:$0x1] %vm63_vm10, %v62_v27  }
  0x8e   :  { %70 = vst.msk [vmem:[#allocation0] sm:$0x1] %vm69_vm11, %v68_v28  }
  0x8f   :  { %76 = vst.msk [vmem:[#allocation0] sm:$0x1] %vm75_vm12, %v74_v21  }
  0x94   :  { %v80_v29 = vpop.permute.xlu0 %79   ;;  %v86_v30 = vpop.permute.xlu1 %85  }
  0x95   :  { %82 = vst.msk [vmem:[#allocation0] sm:$0x1] %vm81_vm13, %v80_v29  }
  0x96   :  { %88 = vst.msk [vmem:[#allocation0] sm:$0x1] %vm87_vm14, %v86_v30  }
  0x97   :  { %94 = vst.msk [vmem:[#allocation0] sm:$0x1] %vm93_vm15, %v92_v24  }
  0x9e   :  { %v97_v31 = vld [vmem:[#allocation0] sm:$0x1] }
  0x9f   :  { %100 = vst [vmem:[%s208_s1] sm:$0x1] %v97_v31 }

// kernel: _lambda_.26
= control target key start
LH: loop header
LB: loop body
LE: loop exit
PB: predicated region body
PF: predicated region fallthrough
CT: control target
= control target key end

     0   :  { %s98_s0 = inlined_call_operand.vmem [shape: f32[16,128], index: 0, kind: input, shape index: {}]   ;;  %s99_s1 = inlined_call_operand.vmem [shape: f32[1,128], index: 1, kind: input, shape index: {}]   ;;  %s100_s2 = inlined_call_operand.vmem [shape: f32[1,128], index: 2, kind: input, shape index: {}]   ;;  %s101_s3 = inlined_call_operand.vmem [shape: f32[16,128], index: 3, kind: input, shape index: {}]   ;;  %s102_s4 = inlined_call_operand.vmem [shape: f32[16,128], index: 4, kind: output, shape index: {}]  }
   0x1   :  { %v17_v0 = vld [vmem:[%s98_s0] sm:$0xff]  ;;  %v18_v4 = vld [vmem:[%s98_s0 + $0x8] sm:$0xff] }
   0x2   :  { %v47_v1 = vld [vmem:[%s99_s1] ss:$0 sm:$0xff]  ;;  %v38_v11 = vld [vmem:[%s101_s3 + $0x8] sm:$0xff] }
   0x3   :  { %v48_v2 = vld [vmem:[%s100_s2] ss:$0 sm:$0xff]  ;;  %v23_v3 = vmul.f32 %v47_v1, %v17_v0  ;;  %v24_v5 = vmul.f32 %v47_v1, %v18_v4 }
   0x4   :  { %v37_v9 = vld [vmem:[%s101_s3] sm:$0xff] }
   0x5   :  { %v29_v6 = vadd.f32 %v48_v2, %v23_v3  ;;  %v30_v7 = vadd.f32 %v48_v2, %v24_v5 }
   0x7   :  { %vm31_vm0 = vcmp.ge.f32.partialorder %v29_v6, 0.0  ;;  %v33_v8 = vmul.f32 0.2, %v29_v6  ;;  %vm32_vm1 = vcmp.ge.f32.partialorder %v30_v7, 0.0  ;;  %v34_v10 = vmul.f32 0.2, %v30_v7 }
   0x9   :  { %v35_v12 = vsel %vm31_vm0, %v29_v6, %v33_v8  ;;  %v36_v14 = vsel %vm32_vm1, %v30_v7, %v34_v10 }
   0xa   :  { %v39_v13 = vadd.f32 %v37_v9, %v35_v12  ;;  %v40_v15 = vadd.f32 %v38_v11, %v36_v14 }
   0xc   :  { %41 = vst [vmem:[%s102_s4] sm:$0xff] %v39_v13 }
   0xd   :  { %42 = vst [vmem:[%s102_s4 + $0x8] sm:$0xff] %v40_v15 }

// kernel: _lambda_.29
= control target key start
LH: loop header
LB: loop body
LE: loop exit
PB: predicated region body
PF: predicated region fallthrough
CT: control target
= control target key end

     0   :  { %s558_s18 = smov 0   ;;  %s634_s0 = inlined_call_operand.vmem [shape: f32[2,64,16], index: 0, kind: input, shape index: {}]   ;;  %s635_s1 = inlined_call_operand.vmem [shape: f32[1,16,32], index: 1, kind: input, shape index: {}]   ;;  %s636_s2 = inlined_call_operand.vmem [shape: f32[1,1,32], index: 2, kind: input, shape index: {}]   ;;  %s637_s3 = inlined_call_operand.vmem [shape: f32[2,64,32], index: 3, kind: output, shape index: {0}]   ;;  %s638_s4 = inlined_call_operand.vmem [shape: f32[2,1,32], index: 4, kind: output, shape index: {1}]   ;;  %s639_s5 = inlined_call_operand.vmem [shape: f32[2,1,32], index: 5, kind: output, shape index: {2}]  }
   0x1 LB: > { %s485_s2 = sadd.s32 4294967295, %s526_s18   ;;  %p489_p0 = scmp.ge.s32.totalorder %s526_s18, 1  ;;  %s526_s18 = sphi %s558_s18, %s16_s18  }
   0x2   : > { %p192_p1 = scmp.lt.s32.totalorder %s526_s18, 3 }
   0x4   : > { %p193_p2 = pnand %p489_p0, %p192_p1 }
   0x5   : > { %p226_p3 = scmp.lt.s32.totalorder (!%p193_p2), %s485_s2, 1 }
   0x6   : > { %196 = sbr.rel (%p193_p2) target bundleno = 180 (0xb4), region = 32 }
   0xb   : > { %v251_v0 = vld [vmem:[%s635_s1 + $0x8] sm:$0xff]  ;;  %v250_v1 = vld [vmem:[%s635_s1] sm:$0xff]  ;;  %s641_s2 = smov (!%p226_p3, %s485_s2), 1  ;;  %vm252_vm0 = vcmask 130048   ;;  %vm318_vm1 = vcmask 261120   ;;  %vm348_vm2 = vcmask 253952  }
   0xc   : > { %291 = vmatpush.msra.mxu0 %v251_v0  ;;  %507 = vmatpush.msra.mxu2 %v251_v0  ;;  %s504_s23 = sshll.u32 %s641_s2, 6  ;;  %s238_s7 = scalar_lea.vmem %s638_s4, %s641_s2 }
   0xd   : > { %506 = vmatpush.msra.mxu1 %v251_v0  ;;  %508 = vmatpush.msra.mxu3 %v251_v0  ;;  %s230_s26 = scalar_lea.vmem %s634_s0, %s504_s23  ;;  %s589_s29 = scalar_lea.vmem %s637_s3, %s504_s23 }
   0xe   : > { %292 = vmatpush.msra.mxu0 %v250_v1  ;;  %510 = vmatpush.msra.mxu2 %v250_v1  ;;  %v242_v2 = vld [vmem:[%s230_s26] sm:$0xff]  ;;  %v244_v4 = vld [vmem:[%s230_s26 + $0x10] sm:$0xff]  ;;  %v243_v6 = vld [vmem:[%s230_s26 + $0x8] sm:$0xff]  ;;  %s241_s10 = scalar_lea.vmem %s639_s5, %s641_s2 }
   0xf   : > { %509 = vmatpush.msra.mxu1 %v250_v1  ;;  %511 = vmatpush.msra.mxu3 %v250_v1  ;;  %v246_v3 = vld [vmem:[%s230_s26 + $0x20] sm:$0xff]  ;;  %v248_v5 = vld [vmem:[%s230_s26 + $0x30] sm:$0xff]  ;;  %v247_v7 = vld [vmem:[%s230_s26 + $0x28] sm:$0xff] }
  0x10   : > { %494 = vmatmul.msk.f32.vlgmr.msra.gmra.mxu0 %vm252_vm0, %v242_v2  ;;  %498 = vmatmul.msk.f32.vlgmr.msra.gmra.mxu2 %vm252_vm0, %v246_v3  ;;  %v245_v8 = vld [vmem:[%s230_s26 + $0x18] sm:$0xff] }
  0x11   : > { %496 = vmatmul.msk.f32.vlgmr.msra.gmra.mxu1 %vm252_vm0, %v244_v4  ;;  %500 = vmatmul.msk.f32.vlgmr.msra.gmra.mxu3 %vm252_vm0, %v248_v5  ;;  %v249_v9 = vld [vmem:[%s230_s26 + $0x38] sm:$0xff] }
  0x18   : > { %495 = vmatmul.msk.f32.gmra.mxu0 %vm252_vm0, %v243_v6  ;;  %499 = vmatmul.msk.f32.gmra.mxu2 %vm252_vm0, %v247_v7 }
  0x19   : > { %497 = vmatmul.msk.f32.gmra.mxu1 %vm252_vm0, %v245_v8  ;;  %501 = vmatmul.msk.f32.gmra.mxu3 %vm252_vm0, %v249_v9 }
  0x8d   : > { %v294_v10 = vpop.f32.mrf.mxu0 }
  0x8e   : > { %319 = vst.msk [vmem:[%s589_s29] sm:$0xff] %vm318_vm1, %v294_v10  ;;  %v300_v11 = vpop.f32.mrf.mxu1  ;;  %v350_v13 = vmul.f32 %v294_v10, %v294_v10  ;;  %v327_v16 = vsel %vm318_vm1, %v294_v10, 0.0 }
  0x8f   : > { %321 = vst.msk [vmem:[%s589_s29 + $0x10] sm:$0xff] %vm318_vm1, %v300_v11  ;;  %v352_v17 = vmul.f32 %v300_v11, %v300_v11  ;;  %v330_v24 = vsel %vm318_vm1, %v300_v11, 0.0 }
  0x90   : > { %v358_v23 = vsel %vm318_vm1, %v350_v13, 0.0 }
  0x91   : > { %v361_v29 = vsel %vm318_vm1, %v352_v17, 0.0 }
  0x93   : > { %v306_v12 = vpop.f32.mrf.mxu2 }
  0x94   : > { %323 = vst.msk [vmem:[%s589_s29 + $0x20] sm:$0xff] %vm318_vm1, %v306_v12  ;;  %v312_v14 = vpop.f32.mrf.mxu3  ;;  %v354_v30 = vmul.f32 %v306_v12, %v306_v12  ;;  %v334_v35 = vsel %vm318_vm1, %v306_v12, 0.0 }
  0x95   : > { %v297_v15 = vpop.f32.mrf.mxu0  ;;  %325 = vst.msk [vmem:[%s589_s29 + $0x30] sm:$0xff] %vm318_vm1, %v312_v14  ;;  %v356_v42 = vmul.f32 %v312_v14, %v312_v14  ;;  %v338_v47 = vsel %vm318_vm1, %v312_v14, 0.0 }
  0x96   : > { %320 = vst.msk [vmem:[%s589_s29 + $0x8] sm:$0xff] %vm318_vm1, %v297_v15  ;;  %v328_v18 = vsel %vm318_vm1, %v297_v15, 0.0  ;;  %v351_v19 = vmul.f32 %v297_v15, %v297_v15  ;;  %v303_v20 = vpop.f32.mrf.mxu1  ;;  %v365_v41 = vsel %vm318_vm1, %v354_v30, 0.0 }
  0x97   : > { %v329_v21 = vadd.f32 %v328_v18, %v327_v16  ;;  %322 = vst.msk [vmem:[%s589_s29 + $0x18] sm:$0xff] %vm318_vm1, %v303_v20  ;;  %v353_v22 = vmul.f32 %v303_v20, %v303_v20  ;;  %v332_v26 = vsel %vm318_vm1, %v303_v20, 0.0  ;;  %v369_v51 = vsel %vm318_vm1, %v356_v42, 0.0 }
  0x98   : > { %v359_v25 = vsel %vm318_vm1, %v351_v19, 0.0 }
  0x99   : > { %v360_v27 = vadd.f32 %v359_v25, %v358_v23  ;;  %v331_v28 = vadd.f32 %v330_v24, %v329_v21  ;;  %v363_v31 = vsel %vm318_vm1, %v353_v22, 0.0 }
  0x9b   : > { %v333_v32 = vadd.f32 %v332_v26, %v331_v28  ;;  %v362_v33 = vadd.f32 %v361_v29, %v360_v27  ;;  %v309_v34 = vpop.f32.mrf.mxu2 }
  0x9c   : > { %324 = vst.msk [vmem:[%s589_s29 + $0x28] sm:$0xff] %vm318_vm1, %v309_v34  ;;  %v336_v36 = vsel %vm318_vm1, %v309_v34, 0.0  ;;  %v355_v37 = vmul.f32 %v309_v34, %v309_v34  ;;  %v315_v38 = vpop.f32.mrf.mxu3 }
  0x9d   : > { %v364_v39 = vadd.f32 %v363_v31, %v362_v33  ;;  %v335_v40 = vadd.f32 %v334_v35, %v333_v32  ;;  %326 = vst.msk [vmem:[%s589_s29 + $0x38] sm:$0xff] %vm318_vm1, %v315_v38  ;;  %v357_v44 = vmul.f32 %v315_v38, %v315_v38  ;;  %v340_v48 = vsel %vm318_vm1, %v315_v38, 0.0 }
  0x9e   : > { %v367_v43 = vsel %vm318_vm1, %v355_v37, 0.0 }
  0x9f   : > { %v337_v45 = vadd.f32 %v336_v36, %v335_v40  ;;  %v366_v46 = vadd.f32 %v365_v41, %v364_v39  ;;  %v371_v52 = vsel %vm318_vm1, %v357_v44, 0.0 }
  0xa1   : > { %v368_v49 = vadd.f32 %v367_v43, %v366_v46  ;;  %v339_v50 = vadd.f32 %v338_v47, %v337_v45 }
  0xa3   : > { %v341_v53 = vadd.f32 %v340_v48, %v339_v50  ;;  %v370_v54 = vadd.f32 %v369_v51, %v368_v49 }
  0xa5   : > { %v342_v55 = vrot.slane %v341_v53, 4  ;;  %v372_v56 = vadd.f32 %v371_v52, %v370_v54 }
  0xa7   : > { %v343_v57 = vadd.f32 %v342_v55, %v341_v53  ;;  %v373_v58 = vrot.slane %v372_v56, 4 }
  0xa9   : > { %v344_v59 = vrot.slane %v343_v57, 2  ;;  %v374_v60 = vadd.f32 %v373_v58, %v372_v56 }
  0xab   : > { %v345_v61 = vadd.f32 %v344_v59, %v343_v57  ;;  %v375_v62 = vrot.slane %v374_v60, 2 }
  0xad   : > { %v346_v63 = vrot.slane %v345_v61, 1  ;;  %v376_v0 = vadd.f32 %v375_v62, %v374_v60 }
  0xaf   : > { %v347_v1 = vadd.f32 %v346_v63, %v345_v61  ;;  %v377_v2 = vrot.slane %v376_v0, 1 }
  0xb1   : > { %349 = vst.msk [vmem:[%s238_s7] sm:$0x1] %vm348_vm2, %v347_v1  ;;  %v378_v3 = vadd.f32 %v377_v2, %v376_v0 }
  0xb3   : > { %379 = vst.msk [vmem:[%s241_s10] sm:$0x1] %vm348_vm2, %v378_v3 }
  0xb4 PF: > { %s16_s18 = sadd.s32 1, %s526_s18  }
  0xb5   : > { %p13_p4 = scmp.ge.s32.totalorder %s16_s18, 4  }
  0xb7   :  { %15 = sbr.rel (!%p13_p4) target bundleno = 1 (0x1), region = 86 }

// kernel: _lambda_.23
= control target key start
LH: loop header
LB: loop body
LE: loop exit
PB: predicated region body
PF: predicated region fallthrough
CT: control target
= control target key end

     0   :  { %s1453_s18 = smov 0   ;;  %s2039_s0 = inlined_call_operand.vmem [shape: f32[2,82,16], index: 0, kind: input, shape index: {}]   ;;  %s2040_s1 = inlined_call_operand.vmem [shape: f32[9,16,16], index: 1, kind: input, shape index: {}]   ;;  %s2041_s2 = inlined_call_operand.vmem [shape: f32[1,1,16], index: 2, kind: input, shape index: {}]   ;;  %s2042_s3 = inlined_call_operand.vmem [shape: f32[2,64,16], index: 3, kind: output, shape index: {0}]   ;;  %s2043_s4 = inlined_call_operand.vmem [shape: f32[2,1,16], index: 4, kind: output, shape index: {1}]   ;;  %s2044_s5 = inlined_call_operand.vmem [shape: f32[2,1,16], index: 5, kind: output, shape index: {2}]  }
   0x1 LB: > { %s1301_s2 = sadd.s32 4294967295, %s1421_s18   ;;  %p1305_p0 = scmp.ge.s32.totalorder %s1421_s18, 1  ;;  %s1421_s18 = sphi %s1453_s18, %s16_s18  }
   0x2   : > { %p192_p1 = scmp.lt.s32.totalorder %s1421_s18, 3 }
   0x4   : > { %p193_p2 = pnand %p1305_p0, %p192_p1 }
   0x5   : > { %p226_p3 = scmp.lt.s32.totalorder (!%p193_p2), %s1301_s2, 1 }
   0x6   : > { %196 = sbr.rel (%p193_p2) target bundleno = 312 (0x138), region = 32 }
   0xb   : > { %v1310_v0 = vld [vmem:[%s2040_s1 + $0x18] sm:$0xff]  ;;  %v1309_v1 = vld [vmem:[%s2040_s1 + $0x10] sm:$0xff]  ;;  %v1328_v2 = vld [vmem:[%s2040_s1 + $0x28] sm:$0xff]  ;;  %s2154_s2 = smov (!%p226_p3, %s1301_s2), 1  ;;  %vm2045_vm0 = vcmask 1046528   ;;  %vm2046_vm1 = vcmask 130048   ;;  %v253_v24 = vlaneseq }
   0xc   : > { %1400 = vmatpush.msra.mxu1 %v1310_v0  ;;  %1401 = vmatpush.msra.mxu2 %v1310_v0  ;;  %v1338_v3 = vld [vmem:[%s2040_s1 + $0x38] sm:$0xff]  ;;  %v399_v4 = vld [vmem:[%s2040_s1 + $0x8] sm:$0xff]  ;;  %v1327_v5 = vld [vmem:[%s2040_s1 + $0x20] sm:$0xff]  ;;  %s1406_s6 = smul.u32 88, %s2154_s2  ;;  %vm2047_vm2 = vcmask 1045504   ;;  %s1399_s10 = sshll.u32 %s2154_s2, 6 }
   0xd   : > { %1402 = vmatpush.msra.mxu3 %v1310_v0  ;;  %461 = vmatpush.msra.mxu0 %v1310_v0  ;;  %v1337_v6 = vld [vmem:[%s2040_s1 + $0x30] sm:$0xff]  ;;  %v1348_v7 = vld [vmem:[%s2040_s1 + $0x48] sm:$0xff]  ;;  %v398_v8 = vld [vmem:[%s2040_s1] sm:$0xff]  ;;  %v1561_v37 = vshrl.u32 %v253_v24, 7  ;;  %s1972_s13 = scalar_lea.vmem %s2042_s3, %s1399_s10  ;;  %s238_s16 = scalar_lea.vmem %s2043_s4, %s2154_s2 }
   0xe   : > { %1403 = vmatpush.msra.mxu1 %v1309_v1  ;;  %1404 = vmatpush.msra.mxu2 %v1309_v1  ;;  %s1494_s15 = scalar_lea.vmem %s2039_s0, %s1406_s6  ;;  %v1347_v9 = vld [vmem:[%s2040_s1 + $0x40] sm:$0xff]  ;;  %v1368_v29 = vld [vmem:[%s2040_s1 + $0x68] sm:$0xff]  ;;  %v1378_v32 = vld [vmem:[%s2040_s1 + $0x78] sm:$0xff]  ;;  %s241_s20 = scalar_lea.vmem %s2044_s5, %s2154_s2 }
   0xf   : > { %1405 = vmatpush.msra.mxu3 %v1309_v1  ;;  %462 = vmatpush.msra.mxu0 %v1309_v1  ;;  %v1500_v10 = vld [vmem:[%s1494_s15 + $0x10] sm:$0xff]  ;;  %v1503_v11 = vld [vmem:[%s1494_s15 + $0x18] sm:$0xff]  ;;  %v1506_v12 = vld [vmem:[%s1494_s15 + $0x20] sm:$0xff]  ;;  %v266_v41 = vand.u32 7, %v1561_v37  ;;  %v255_v46 = vadd.s32 8, %v1561_v37  ;;  %v256_v58 = vadd.s32 16, %v1561_v37 }
  0x10   : > { %644 = vmatpush.msrb.mxu2 %v1328_v2  ;;  %526 = vmatpush.msrb.mxu1 %v399_v4  ;;  %v416_v13 = vrot.slane %v1500_v10, 1  ;;  %v418_v14 = vrot.slane %v1503_v11, 1  ;;  %v1511_v15 = vld [vmem:[%s1494_s15 + $0x28] sm:$0xff]  ;;  %v420_v16 = vrot.slane %v1506_v12, 1  ;;  %v1515_v17 = vld [vmem:[%s1494_s15 + $0x30] sm:$0xff]  ;;  %v1518_v18 = vld [vmem:[%s1494_s15 + $0x38] sm:$0xff] }
  0x11   : > { %728 = vmatpush.msrb.mxu3 %v1338_v3  ;;  %785 = vmatpush.msrb.mxu0 %v1348_v7  ;;  %v422_v19 = vrot.slane %v1511_v15, 1  ;;  %v424_v20 = vrot.slane %v1515_v17, 1  ;;  %v426_v21 = vrot.slane %v1518_v18, 1  ;;  %v242_v22 = vld [vmem:[%s1494_s15] sm:$0xff]  ;;  %v1525_v23 = vld [vmem:[%s1494_s15 + $0x8] sm:$0xff]  ;;  %v1358_v33 = vld [vmem:[%s2040_s1 + $0x58] sm:$0xff] }
  0x12   : > { %645 = vmatpush.msrb.mxu2 %v1327_v5  ;;  %527 = vmatpush.msrb.mxu1 %v398_v8  ;;  %v1528_v25 = vsel %vm2045_vm0, %v416_v13, %v418_v14  ;;  %v413_v26 = vrot.slane %v242_v22, 1  ;;  %v414_v27 = vrot.slane %v1525_v23, 1  ;;  %v1532_v28 = vld [vmem:[%s1494_s15 + $0x40] sm:$0xff]  ;;  %v1388_v35 = vld [vmem:[%s2040_s1 + $0x88] sm:$0xff]  ;;  %v1564_v38 = vsel %vm2045_vm0, %v418_v14, %v420_v16  ;;  %v1377_v55 = vld [vmem:[%s2040_s1 + $0x70] sm:$0xff] }
  0x13   : > { %729 = vmatpush.msrb.mxu3 %v1337_v6  ;;  %786 = vmatpush.msrb.mxu0 %v1347_v9  ;;  %v1540_v30 = vsel %vm2045_vm0, %v420_v16, %v422_v19  ;;  %v1543_v31 = vsel %vm2045_vm0, %v424_v20, %v426_v21  ;;  %v428_v36 = vrot.slane %v1532_v28, 1  ;;  %v1567_v39 = vsel %vm2045_vm0, %v422_v19, %v424_v20  ;;  %v1367_v54 = vld [vmem:[%s2040_s1 + $0x60] sm:$0xff]  ;;  %v1357_v56 = vld [vmem:[%s2040_s1 + $0x50] sm:$0xff] }
  0x14   : > { %1313 = vmatmul.msk.f32.vlgmr.msra.gmra.mxu1 %vm2046_vm1, %v1528_v25  ;;  %1315 = vmatmul.msk.f32.vlgmr.msra.gmra.mxu2 %vm2046_vm1, %v1540_v30  ;;  %v415_v34 = vsel %vm2045_vm0, %v413_v26, %v414_v27  ;;  %v570_v42 = vrot.slane %v242_v22, 2  ;;  %v571_v43 = vrot.slane %v1525_v23, 2  ;;  %v417_v44 = vsel %vm2045_vm0, %v414_v27, %v416_v13  ;;  %v1387_v2 = vld [vmem:[%s2040_s1 + $0x80] sm:$0xff] }
  0x15   : > { %1317 = vmatmul.msk.f32.vlgmr.msra.gmra.mxu3 %vm2046_vm1, %v1543_v31  ;;  %1311 = vmatmul.msk.f32.vlgmr.msra.gmra.mxu0 %vm2046_vm1, %v415_v34  ;;  %v1572_v40 = vsel %vm2045_vm0, %v426_v21, %v428_v36  ;;  %vm1583_vm3 = vcmp.ne.s32.totalorder %v266_v41, 0  ;;  %vm1589_vm4 = vcmp.ne.s32.totalorder %v266_v41, 7  ;;  %v273_v52 = vand.u32 7, %v255_v46 }
  0x16   : > { %956 = vmatpush.msra.mxu2 %v1368_v29  ;;  %1013 = vmatpush.msra.mxu3 %v1378_v32  ;;  %v572_v48 = vsel %vm2047_vm2, %v570_v42, %v571_v43  ;;  %v390_v49 = vsel %vm1583_vm3, %v242_v22, 0.0  ;;  %v679_v51 = vsel %vm1583_vm3, %v1525_v23, 0.0  ;;  %v573_v53 = vrot.slane %v1500_v10, 2 }
  0x17   : > { %872 = vmatpush.msra.mxu1 %v1358_v33  ;;  %1100 = vmatpush.msra.mxu0 %v1388_v35  ;;  %v595_v50 = vsel %vm1589_vm4, %v572_v48, 0.0  ;;  %vm1614_vm5 = vcmp.ne.s32.totalorder %v273_v52, 0  ;;  %vm1620_vm6 = vcmp.ne.s32.totalorder %v273_v52, 7  ;;  %v280_v0 = vand.u32 7, %v256_v58 }
  0x18   : > { %957 = vmatpush.msra.mxu2 %v1367_v54  ;;  %v1625_v60 = vsel %vm2047_vm2, %v571_v43, %v573_v53  ;;  %1014 = vmatpush.msra.mxu3 %v1377_v55  ;;  %v391_v61 = vsel %vm1614_vm5, %v1525_v23, 0.0  ;;  %v680_v63 = vsel %vm1614_vm5, %v1500_v10, 0.0  ;;  %v575_v1 = vrot.slane %v1503_v11, 2 }
  0x19   : > { %873 = vmatpush.msra.mxu1 %v1357_v56  ;;  %v596_v62 = vsel %vm1620_vm6, %v1625_v60, 0.0  ;;  %vm1643_vm7 = vcmp.ne.s32.totalorder %v280_v0, 0  ;;  %v257_v4 = vadd.s32 24, %v1561_v37  ;;  %vm1650_vm8 = vcmp.ne.s32.totalorder %v280_v0, 7  ;;  %1101 = vmatpush.msra.mxu0 %v1387_v2 }
  0x1a   : > { %v1655_v6 = vsel %vm2047_vm2, %v573_v53, %v575_v1  ;;  %v392_v7 = vsel %vm1643_vm7, %v1500_v10, 0.0  ;;  %v681_v9 = vsel %vm1643_vm7, %v1503_v11, 0.0  ;;  %v577_v14 = vrot.slane %v1506_v12, 2 }
  0x1b   : > { %v597_v8 = vsel %vm1650_vm8, %v1655_v6, 0.0  ;;  %v287_v13 = vand.u32 7, %v257_v4  ;;  %v258_v19 = vadd.s32 32, %v1561_v37  ;;  %v579_v27 = vrot.slane %v1511_v15, 2 }
  0x1c   : > { %1314 = vmatmul.msk.f32.gmra.mxu1 %vm2046_vm1, %v1564_v38  ;;  %1316 = vmatmul.msk.f32.gmra.mxu2 %vm2046_vm1, %v1567_v39  ;;  %v1682_v21 = vsel %vm2047_vm2, %v575_v1, %v577_v14  ;;  %v259_v32 = vadd.s32 40, %v1561_v37  ;;  %v907_v46 = vsel %vm1583_vm3, %v1500_v10, 0.0  ;;  %v2075_v48 = vmov 0  ;;  %v1780_v1 = vld [vmem:[%s1494_s15 + $0x48] sm:$0xff] }
  0x1d   : > { %1318 = vmatmul.msk.f32.gmra.mxu3 %vm2046_vm1, %v1572_v40  ;;  %1312 = vmatmul.msk.f32.gmra.mxu0 %vm2046_vm1, %v417_v44  ;;  %vm1670_vm9 = vcmp.ne.s32.totalorder %v287_v13, 0  ;;  %vm1677_vm10 = vcmp.ne.s32.totalorder %v287_v13, 7  ;;  %v294_v26 = vand.u32 7, %v258_v19  ;;  %v1709_v34 = vsel %vm2047_vm2, %v577_v14, %v579_v27 }
  0x1e   : > { %v393_v22 = vsel %vm1670_vm9, %v1503_v11, 0.0  ;;  %v598_v23 = vsel %vm1677_vm10, %v1682_v21, 0.0  ;;  %v682_v24 = vsel %vm1670_vm9, %v1506_v12, 0.0  ;;  %v301_v43 = vand.u32 7, %v259_v32 }
  0x1f   : > { %vm1697_vm11 = vcmp.ne.s32.totalorder %v294_v26, 0  ;;  %vm1704_vm12 = vcmp.ne.s32.totalorder %v294_v26, 7  ;;  %v583_v54 = vrot.slane %v1518_v18, 2  ;;  %v908_v55 = vsel %vm1614_vm5, %v1503_v11, 0.0  ;;  %v252_v26 = vld [vmem:[%s1494_s15 + $0x50] sm:$0x3] }
  0x20   : > { %v394_v35 = vsel %vm1697_vm11, %v1506_v12, 0.0  ;;  %v599_v41 = vsel %vm1704_vm12, %v1709_v34, 0.0  ;;  %v683_v42 = vsel %vm1697_vm11, %v1511_v15, 0.0  ;;  %vm1727_vm13 = vcmp.ne.s32.totalorder %v301_v43, 0 }
  0x21   : > { %v2076_v48 = vsel %vm1727_vm13, 4294967295, %v2075_v48  ;;  %vm1734_vm14 = vcmp.ne.s32.totalorder %v301_v43, 7  ;;  %v395_v10 = vsel %vm1727_vm13, %v1511_v15, 0.0  ;;  %v684_v52 = vsel %vm1727_vm13, %v1515_v17, 0.0 }
  0x22   : > { %v2079_v56 = vmov 0  ;;  %v261_v58 = vadd.s32 56, %v1561_v37  ;;  %v2083_v2 = vmov 0  ;;  %v2085_v4 = vmov 0 }
  0x23   : > { %v909_v47 = vsel %vm1643_vm7, %v1506_v12, 0.0  ;;  %v1053_v59 = vsel %vm1650_vm8, %v1709_v34, 0.0  ;;  %v910_v12 = vsel %vm1670_vm9, %v1511_v15, 0.0  ;;  %v911_v15 = vsel %vm1697_vm11, %v1515_v17, 0.0 }
  0x24   : > { %1319 = vmatmul.msk.f32.vlgmr.msrb.gmra.mxu1 %vm2046_vm1, %v390_v49  ;;  %1329 = vmatmul.msk.f32.vlgmr.msrb.gmra.mxu2 %vm2046_vm1, %v595_v50  ;;  %v260_v49 = vadd.s32 48, %v1561_v37  ;;  %v315_v0 = vand.u32 7, %v261_v58  ;;  %v585_v37 = vrot.slane %v1532_v28, 2  ;;  %v995_v29 = vrot.slane %v252_v26, 1 }
  0x25   : > { %1339 = vmatmul.msk.f32.vlgmr.msrb.gmra.mxu3 %vm2046_vm1, %v679_v51  ;;  %1349 = vmatmul.msk.f32.vlgmr.msrb.gmra.mxu0 %vm2046_vm1, %v417_v44  ;;  %v581_v44 = vrot.slane %v1515_v17, 2 }
  0x26   : > { %v308_v53 = vand.u32 7, %v260_v49  ;;  %vm1784_vm5 = vcmp.ne.s32.totalorder %v315_v0, 0  ;;  %vm1790_vm0 = vcmp.ne.s32.totalorder %v315_v0, 7 }
  0x27   : > { %v1739_v45 = vsel %vm2047_vm2, %v579_v27, %v581_v44  ;;  %v584_v57 = vsel %vm2047_vm2, %v581_v44, %v583_v54  ;;  %v2084_v2 = vsel %vm1784_vm5, 4294967295, %v2083_v2  ;;  %v2086_v4 = vsel %vm1790_vm0, 4294967295, %v2085_v4 }
  0x28   : > { %v600_v51 = vsel %vm1734_vm14, %v1739_v45, 0.0  ;;  %vm1757_vm15 = vcmp.ne.s32.totalorder %v308_v53, 0  ;;  %vm1764_vm3 = vcmp.ne.s32.totalorder %v308_v53, 7  ;;  %v686_v14 = vsel %vm1784_vm5, %v1532_v28, 0.0 }
  0x29   : > { %v2080_v56 = vsel %vm1757_vm15, 4294967295, %v2079_v56  ;;  %v396_v11 = vsel %vm1757_vm15, %v1515_v17, 0.0  ;;  %v1054_v3 = vsel %vm1677_vm10, %v1739_v45, 0.0  ;;  %v1055_v5 = vsel %vm1704_vm12, %v584_v57, 0.0 }
  0x2a   : > { %v1048_v27 = vrot.slane %v252_v26, 2 }
  0x2c   : > { %1320 = vmatmul.msk.f32.gmra.mxu1 %vm2046_vm1, %v391_v61  ;;  %1330 = vmatmul.msk.f32.gmra.mxu2 %vm2046_vm1, %v596_v62  ;;  %v2081_v61 = vmov 0  ;;  %v601_v62 = vsel %vm1764_vm3, %v584_v57, 0.0 }
  0x2d   : > { %1340 = vmatmul.msk.f32.gmra.mxu3 %vm2046_vm1, %v680_v63  ;;  %1350 = vmatmul.msk.f32.gmra.mxu0 %vm2046_vm1, %v1528_v25  ;;  %v2082_v61 = vsel %vm1764_vm3, 4294967295, %v2081_v61  ;;  %v685_v63 = vsel %vm1757_vm15, %v1518_v18, 0.0 }
  0x34   : > { %1321 = vmatmul.msk.f32.gmra.mxu1 %vm2046_vm1, %v392_v7  ;;  %1331 = vmatmul.msk.f32.gmra.mxu2 %vm2046_vm1, %v597_v8  ;;  %v586_v7 = vsel %vm2047_vm2, %v583_v54, %v585_v37  ;;  %v767_v8 = vrot.slane %v1780_v1, 1  ;;  %vm2088_vm2 = vcmask 130048  }
  0x35   : > { %1341 = vmatmul.msk.f32.gmra.mxu3 %vm2046_vm1, %v681_v9  ;;  %1351 = vmatmul.msk.f32.gmra.mxu0 %vm2046_vm1, %v1564_v38  ;;  %v397_v9 = vsel %vm1784_vm5, %v1518_v18, 0.0  ;;  %v602_v13 = vsel %vm1790_vm0, %v586_v7, 0.0  ;;  %vm2089_vm15 = vmmov %vm2088_vm2 }
  0x36   : > { %vm2090_vm3 = vmmov %vm2088_vm2 }
  0x37   : > { %vm2091_vm13 = vmmov %vm2088_vm2 }
  0x38   : > { %vm2092_vm5 = vmmov %vm2088_vm2 }
  0x39   : > { %vm2093_vm0 = vmmov %vm2088_vm2 }
  0x3a   : > { %vm2103_vm7 = vmmov %vm2093_vm0 }
  0x3b   : > { %vm2107_vm9 = vmmov %vm2093_vm0 }
  0x3c   : > { %1322 = vmatmul.msk.f32.gmra.mxu1 %vm2046_vm1, %v393_v22  ;;  %1332 = vmatmul.msk.f32.gmra.mxu2 %vm2046_vm1, %v598_v23  ;;  %v823_v22 = vsel %vm1589_vm4, %v1625_v60, 0.0  ;;  %v1051_v23 = vsel %vm1589_vm4, %v1655_v6, 0.0  ;;  %v1052_v60 = vsel %vm1620_vm6, %v1682_v21, 0.0  ;;  %vm2097_vm4 = vmmov %vm2093_vm0 }
  0x3d   : > { %1342 = vmatmul.msk.f32.gmra.mxu3 %vm2046_vm1, %v682_v24  ;;  %1352 = vmatmul.msk.f32.gmra.mxu0 %vm2046_vm1, %v1540_v30 }
  0x44   : > { %1323 = vmatmul.msk.f32.gmra.mxu1 %vm2046_vm1, %v394_v35  ;;  %1333 = vmatmul.msk.f32.gmra.mxu2 %vm2046_vm1, %v599_v41 }
  0x45   : > { %1343 = vmatmul.msk.f32.gmra.mxu3 %vm2046_vm1, %v683_v42  ;;  %1353 = vmatmul.msk.f32.gmra.mxu0 %vm2046_vm1, %v1567_v39 }
  0x4c   : > { %1324 = vmatmul.msk.f32.gmra.mxu1 %vm2046_vm1, %v395_v10  ;;  %1334 = vmatmul.msk.f32.gmra.mxu2 %vm2046_vm1, %v600_v51 }
  0x4d   : > { %1344 = vmatmul.msk.f32.gmra.mxu3 %vm2046_vm1, %v684_v52  ;;  %1354 = vmatmul.msk.f32.gmra.mxu0 %vm2046_vm1, %v1543_v31 }
  0x54   : > { %1325 = vmatmul.msk.f32.gmra.mxu1 %vm2046_vm1, %v396_v11  ;;  %1335 = vmatmul.msk.f32.gmra.mxu2 %vm2046_vm1, %v601_v62 }
  0x55   : > { %1345 = vmatmul.msk.f32.gmra.mxu3 %vm2046_vm1, %v685_v63  ;;  %1355 = vmatmul.msk.f32.gmra.mxu0 %vm2046_vm1, %v1572_v40  ;;  %vm2087_vm1 = vcmask 1046528  }
  0x56   : > { %v768_v19 = vsel %vm2087_vm1, %v428_v36, %v767_v8  ;;  %vm2094_vm1 = vmmov %vm2093_vm0  ;;  %v824_v36 = vsel %vm1620_vm6, %v1655_v6, 0.0  ;;  %v1056_v6 = vsel %vm1734_vm14, %v586_v7, 0.0 }
  0x57   : > { %vm2099_vm6 = vmmov %vm2093_vm0 }
  0x5c   : > { %1326 = vmatmul.msk.f32.gmra.mxu1 %vm2088_vm2, %v397_v9  ;;  %1336 = vmatmul.msk.f32.gmra.mxu2 %vm2089_vm15, %v602_v13  ;;  %vm2095_vm2 = vmmov %vm2093_vm0 }
  0x5d   : > { %1346 = vmatmul.msk.f32.gmra.mxu3 %vm2090_vm3, %v686_v14  ;;  %1356 = vmatmul.msk.f32.gmra.mxu0 %vm2091_vm13, %v768_v19  ;;  %vm2096_vm13 = vmmov %vm2093_vm0 }
  0x5e   : > { %vm2098_vm15 = vmmov %vm2093_vm0 }
  0x5f   : > { %vm2100_vm3 = vmmov %vm2093_vm0 }
  0x64   : > { %1359 = vmatmul.msk.f32.vlgmr.msra.gmra.mxu1 %vm2092_vm5, %v823_v22  ;;  %1369 = vmatmul.msk.f32.vlgmr.msra.gmra.mxu2 %vm2093_vm0, %v907_v46  ;;  %vm2101_vm5 = vmmov %vm2093_vm0 }
  0x65   : > { %1379 = vmatmul.msk.f32.vlgmr.msra.gmra.mxu3 %vm2094_vm1, %v1528_v25  ;;  %1389 = vmatmul.msk.f32.vlgmr.msra.gmra.mxu0 %vm2095_vm2, %v1051_v23  ;;  %v825_v25 = vsel %vm1650_vm8, %v1682_v21, 0.0  ;;  %vm2102_vm1 = vmmov %vm2093_vm0 }
  0x66   : > { %vm2104_vm8 = vmmov %vm2093_vm0 }
  0x67   : > { %vm2105_vm2 = vmmov %vm2093_vm0 }
  0x68   : > { %vm2112_vm11 = vmmov %vm2102_vm1 }
  0x6c   : > { %1360 = vmatmul.msk.f32.gmra.mxu1 %vm2096_vm13, %v824_v36  ;;  %1370 = vmatmul.msk.f32.gmra.mxu2 %vm2097_vm4, %v908_v55  ;;  %vm2106_vm13 = vmmov %vm2093_vm0 }
  0x6d   : > { %1380 = vmatmul.msk.f32.gmra.mxu3 %vm2098_vm15, %v1564_v38  ;;  %1390 = vmatmul.msk.f32.gmra.mxu0 %vm2093_vm0, %v1052_v60  ;;  %v826_v38 = vsel %vm1677_vm10, %v1709_v34, 0.0  ;;  %vm2108_vm10 = vmmov %vm2093_vm0 }
  0x6e   : > { %vm2109_vm4 = vmmov %vm2093_vm0 }
  0x6f   : > { %vm2110_vm15 = vmmov %vm2093_vm0  ;;  %vm2111_vm0 = vnez %v2076_v48 }
  0x70   : > { %v912_v17 = vsel %vm2111_vm0, %v1518_v18, 0.0  ;;  %vm2126_vm0 = vmmov %vm2105_vm2 }
  0x74   : > { %1361 = vmatmul.msk.f32.gmra.mxu1 %vm2099_vm6, %v825_v25  ;;  %1371 = vmatmul.msk.f32.gmra.mxu2 %vm2100_vm3, %v909_v47  ;;  %vm2114_vm6 = vmmov %vm2102_vm1 }
  0x75   : > { %1381 = vmatmul.msk.f32.gmra.mxu3 %vm2101_vm5, %v1540_v30  ;;  %1391 = vmatmul.msk.f32.gmra.mxu0 %vm2102_vm1, %v1053_v59  ;;  %v827_v30 = vsel %vm1704_vm12, %v1739_v45, 0.0  ;;  %vm2113_vm12 = vmmov %vm2102_vm1  ;;  %vm2116_vm5 = vnez %v2082_v61 }
  0x76   : > { %vm2115_vm3 = vmmov %vm2102_vm1  ;;  %v829_v20 = vsel %vm2116_vm5, %v586_v7, 0.0  ;;  %vm2117_vm1 = vnez %v2080_v56 }
  0x77   : > { %v913_v18 = vsel %vm2117_vm1, %v1532_v28, 0.0  ;;  %vm2132_vm1 = vmmov %vm2126_vm0 }
  0x7c   : > { %1362 = vmatmul.msk.f32.gmra.mxu1 %vm2103_vm7, %v826_v38  ;;  %1372 = vmatmul.msk.f32.gmra.mxu2 %vm2104_vm8, %v910_v12  ;;  %vm2119_vm7 = vmmov %vm2105_vm2 }
  0x7d   : > { %1382 = vmatmul.msk.f32.gmra.mxu3 %vm2105_vm2, %v1567_v39  ;;  %1392 = vmatmul.msk.f32.gmra.mxu0 %vm2106_vm13, %v1054_v3  ;;  %v828_v39 = vsel %vm1734_vm14, %v584_v57, 0.0  ;;  %vm2118_vm14 = vcmask 1045504   ;;  %vm2120_vm8 = vmmov %vm2105_vm2 }
  0x7e   : > { %vm2121_vm13 = vmmov %vm2105_vm2 }
  0x84   : > { %1363 = vmatmul.msk.f32.gmra.mxu1 %vm2107_vm9, %v827_v30  ;;  %1373 = vmatmul.msk.f32.gmra.mxu2 %vm2108_vm10, %v911_v15  ;;  %vm2122_vm9 = vmmov %vm2118_vm14  ;;  %vm2123_vm10 = vnez %v2086_v4 }
  0x85   : > { %1383 = vmatmul.msk.f32.gmra.mxu3 %vm2109_vm4, %v1543_v31  ;;  %1393 = vmatmul.msk.f32.gmra.mxu0 %vm2110_vm15, %v1055_v5  ;;  %v820_v31 = vrot.slane %v1780_v1, 2  ;;  %vm2124_vm4 = vnez %v2084_v2  ;;  %vm2125_vm15 = vcmask 1046528  }
  0x86   : > { %v914_v41 = vsel %vm2124_vm4, %v1780_v1, 0.0  ;;  %v996_v42 = vsel %vm2125_vm15, %v767_v8, %v995_v29  ;;  %vm2140_vm4 = vmmov %vm2126_vm0 }
  0x87   : > { %v821_v21 = vsel %vm2118_vm14, %v585_v37, %v820_v31  ;;  %v1049_v33 = vsel %vm2122_vm9, %v820_v31, %v1048_v27  ;;  %vm2133_vm14 = vmmov %vm2126_vm0 }
  0x88   : > { %v830_v35 = vsel %vm2123_vm10, %v821_v21, 0.0  ;;  %v1058_v44 = vsel %vm2123_vm10, %v1049_v33, 0.0  ;;  %vm2138_vm9 = vmmov %vm2126_vm0 }
  0x89   : > { %vm2139_vm10 = vmmov %vm2126_vm0 }
  0x8a   : > { %vm2141_vm15 = vmmov %vm2126_vm0 }
  0x8c   : > { %1364 = vmatmul.msk.f32.gmra.mxu1 %vm2112_vm11, %v828_v39  ;;  %1374 = vmatmul.msk.f32.gmra.mxu2 %vm2113_vm12, %v912_v17  ;;  %vm2127_vm11 = vmmov %vm2126_vm0 }
  0x8d   : > { %1384 = vmatmul.msk.f32.gmra.mxu3 %vm2114_vm6, %v1572_v40  ;;  %1394 = vmatmul.msk.f32.gmra.mxu0 %vm2115_vm3, %v1056_v6  ;;  %v1057_v40 = vsel %vm2116_vm5, %v821_v21, 0.0  ;;  %vm2128_vm12 = vmmov %vm2126_vm0 }
  0x8e   : > { %vm2129_vm6 = vmmov %vm2126_vm0 }
  0x8f   : > { %vm2130_vm3 = vmmov %vm2126_vm0 }
  0x90   : > { %vm2131_vm5 = vmmov %vm2126_vm0 }
  0x91   : > { %v1891_v16 = vpop.f32.mrf.mxu1 }
  0x92   : > { %v464_v24 = vpop.f32.mrf.mxu0 }
  0x94   : > { %1365 = vmatmul.msk.f32.gmra.mxu1 %vm2119_vm7, %v829_v20  ;;  %1375 = vmatmul.msk.f32.gmra.mxu2 %vm2120_vm8, %v913_v18  ;;  %vm2134_vm7 = vmmov %vm2126_vm0 }
  0x95   : > { %1385 = vmatmul.msk.f32.gmra.mxu3 %vm2105_vm2, %v768_v19  ;;  %1395 = vmatmul.msk.f32.gmra.mxu0 %vm2121_vm13, %v1057_v40  ;;  %vm2135_vm8 = vmmov %vm2126_vm0 }
  0x96   : > { %vm2136_vm2 = vmmov %vm2126_vm0 }
  0x97   : > { %v1908_v32 = vpop.f32.mrf.mxu2  ;;  %vm2137_vm13 = vmmov %vm2126_vm0 }
  0x98   : > { %v1910_v28 = vpop.f32.mrf.mxu3 }
  0x99   : > { %v1913_v34 = vpop.f32.mrf.mxu1 }
  0x9a   : > { %v467_v43 = vpop.f32.mrf.mxu0 }
  0x9c   : > { %1366 = vmatmul.msk.f32.gmra.mxu1 %vm2126_vm0, %v830_v35  ;;  %1376 = vmatmul.msk.f32.gmra.mxu2 %vm2127_vm11, %v914_v41  ;;  %vm2142_vm11 = vmmov %vm2126_vm0 }
  0x9d   : > { %1386 = vmatmul.msk.f32.gmra.mxu3 %vm2128_vm12, %v996_v42  ;;  %1396 = vmatmul.msk.f32.gmra.mxu0 %vm2129_vm6, %v1058_v44  ;;  %vm2143_vm12 = vmmov %vm2126_vm0 }
  0x9e   : > { %vm2144_vm6 = vmmov %vm2126_vm0 }
  0x9f   : > { %v1929_v46 = vpop.f32.mrf.mxu2 }
  0xa0   : > { %v1931_v48 = vpop.f32.mrf.mxu3 }
  0xa1   : > { %v529_v49 = vpop.f32.mrf.mxu1 }
  0xa2   : > { %v788_v50 = vpop.f32.mrf.mxu0  ;;  %v530_v36 = vadd.f32 %v529_v49, %v464_v24 }
  0xa7   : > { %v647_v45 = vpop.f32.mrf.mxu2 }
  0xa8   : > { %v731_v10 = vpop.f32.mrf.mxu3  ;;  %v671_v25 = vadd.f32 %v647_v45, %v530_v36 }
  0xa9   : > { %v532_v51 = vpop.f32.mrf.mxu1 }
  0xaa   : > { %v791_v52 = vpop.f32.mrf.mxu0  ;;  %v755_v38 = vadd.f32 %v731_v10, %v671_v25  ;;  %v533_v3 = vadd.f32 %v532_v51, %v467_v43 }
  0xac   : > { %v812_v15 = vadd.f32 %v788_v50, %v755_v38 }
  0xaf   : > { %v650_v53 = vpop.f32.mrf.mxu2 }
  0xb0   : > { %v734_v54 = vpop.f32.mrf.mxu3  ;;  %v672_v5 = vadd.f32 %v650_v53, %v533_v3 }
  0xb1   : > { %v535_v55 = vpop.f32.mrf.mxu1 }
  0xb2   : > { %v794_v56 = vpop.f32.mrf.mxu0  ;;  %v756_v31 = vadd.f32 %v734_v54, %v672_v5  ;;  %v536_v21 = vadd.f32 %v535_v55, %v1891_v16 }
  0xb4   : > { %v813_v40 = vadd.f32 %v791_v52, %v756_v31 }
  0xb7   : > { %v653_v58 = vpop.f32.mrf.mxu2 }
  0xb8   : > { %v737_v61 = vpop.f32.mrf.mxu3  ;;  %v673_v27 = vadd.f32 %v653_v58, %v536_v21 }
  0xb9   : > { %v538_v57 = vpop.f32.mrf.mxu1 }
  0xba   : > { %v1933_v11 = vpop.f32.mrf.mxu0  ;;  %v757_v42 = vadd.f32 %v737_v61, %v673_v27  ;;  %v539_v44 = vadd.f32 %v538_v57, %v1913_v34 }
  0xbc   : > { %v814_v45 = vadd.f32 %v794_v56, %v757_v42 }
  0xbf   : > { %v656_v62 = vpop.f32.mrf.mxu2 }
  0xc0   : > { %v740_v63 = vpop.f32.mrf.mxu3  ;;  %v674_v10 = vadd.f32 %v656_v62, %v539_v44 }
  0xc1   : > { %v1935_v0 = vpop.f32.mrf.mxu1 }
  0xc2   : > { %v1937_v37 = vpop.f32.mrf.mxu0  ;;  %v758_v38 = vadd.f32 %v740_v63, %v674_v10  ;;  %v542_v3 = vadd.f32 %v1935_v0, %v1908_v32 }
  0xc4   : > { %v815_v5 = vadd.f32 %v1933_v11, %v758_v38 }
  0xc7   : > { %v1939_v1 = vpop.f32.mrf.mxu2 }
  0xc8   : > { %v1941_v2 = vpop.f32.mrf.mxu3 }
  0xc9   : > { %v1943_v4 = vpop.f32.mrf.mxu1 }
  0xca   : > { %v1945_v7 = vpop.f32.mrf.mxu0 }
  0xcf   : > { %v1947_v8 = vpop.f32.mrf.mxu2 }
  0xd0   : > { %v1949_v9 = vpop.f32.mrf.mxu3 }
  0xd1   : > { %v1951_v13 = vpop.f32.mrf.mxu1 }
  0xd2   : > { %v1953_v14 = vpop.f32.mrf.mxu0 }
  0xd7   : > { %v1955_v19 = vpop.f32.mrf.mxu2 }
  0xd8   : > { %v1957_v22 = vpop.f32.mrf.mxu3 }
  0xd9   : > { %v1959_v23 = vpop.f32.mrf.mxu1 }
  0xda   : > { %v1961_v60 = vpop.f32.mrf.mxu0 }
  0xdf   : > { %v1963_v47 = vpop.f32.mrf.mxu2 }
  0xe0   : > { %v1965_v59 = vpop.f32.mrf.mxu3 }
  0xe1   : > { %v875_v12 = vpop.f32.mrf.mxu1 }
  0xe2   : > { %v1103_v30 = vpop.f32.mrf.mxu0  ;;  %v899_v39 = vadd.f32 %v875_v12, %v812_v15 }
  0xe7   : > { %v959_v17 = vpop.f32.mrf.mxu2 }
  0xe8   : > { %v1016_v6 = vpop.f32.mrf.mxu3  ;;  %v983_v20 = vadd.f32 %v959_v17, %v899_v39  ;;  %v675_v39 = vadd.f32 %v1939_v1, %v542_v3  ;;  %v545_v1 = vadd.f32 %v1943_v4, %v1929_v46 }
  0xe9   : > { %v878_v18 = vpop.f32.mrf.mxu1 }
  0xea   : > { %v1040_v24 = vadd.f32 %v1016_v6, %v983_v20  ;;  %v1106_v26 = vpop.f32.mrf.mxu0  ;;  %v900_v33 = vadd.f32 %v878_v18, %v813_v40 }
  0xec   : > { %v1127_v29 = vadd.f32 %v1103_v30, %v1040_v24  ;;  %v759_v24 = vadd.f32 %v1941_v2, %v675_v39 }
  0xee   : > { %1135 = vst.msk [vmem:[%s1972_s13] sm:$0xff] %vm2130_vm3, %v1127_v29  ;;  %v1166_v51 = vmul.f32 %v1127_v29, %v1127_v29  ;;  %v1143_v52 = vsel %vm2131_vm5, %v1127_v29, 0.0  ;;  %v816_v29 = vadd.f32 %v1937_v37, %v759_v24  ;;  %vm2145_vm3 = vmmov %vm2126_vm0 }
  0xef   : > { %v962_v35 = vpop.f32.mrf.mxu2  ;;  %vm2146_vm5 = vmmov %vm2126_vm0 }
  0xf0   : > { %v1019_v41 = vpop.f32.mrf.mxu3  ;;  %v984_v43 = vadd.f32 %v962_v35, %v900_v33  ;;  %v1174_v34 = vsel %vm2134_vm7, %v1166_v51, 0.0  ;;  %v676_v33 = vadd.f32 %v1947_v8, %v545_v1  ;;  %v548_v8 = vadd.f32 %v1951_v13, %v1910_v28  ;;  %vm2149_vm7 = vmmov %vm2126_vm0 }
  0xf1   : > { %v881_v16 = vpop.f32.mrf.mxu1 }
  0xf2   : > { %v1041_v49 = vadd.f32 %v1019_v41, %v984_v43  ;;  %v1109_v50 = vpop.f32.mrf.mxu0  ;;  %v901_v54 = vadd.f32 %v881_v16, %v814_v45  ;;  %v677_v51 = vadd.f32 %v1955_v19, %v548_v8  ;;  %v551_v19 = vadd.f32 %v1959_v23, %v1931_v48 }
  0xf4   : > { %v1128_v53 = vadd.f32 %v1106_v26, %v1041_v49  ;;  %v760_v49 = vadd.f32 %v1949_v9, %v676_v33 }
  0xf6   : > { %1136 = vst.msk [vmem:[%s1972_s13 + $0x8] sm:$0xff] %vm2132_vm1, %v1128_v53  ;;  %v1144_v55 = vsel %vm2133_vm14, %v1128_v53, 0.0  ;;  %v1167_v58 = vmul.f32 %v1128_v53, %v1128_v53  ;;  %v817_v10 = vadd.f32 %v1945_v7, %v760_v49  ;;  %vm2147_vm1 = vmmov %vm2126_vm0 }
  0xf7   : > { %v1145_v36 = vadd.f32 %v1144_v55, %v1143_v52  ;;  %v965_v61 = vpop.f32.mrf.mxu2  ;;  %vm2148_vm14 = vmmov %vm2126_vm0 }
  0xf8   : > { %v1022_v25 = vpop.f32.mrf.mxu3  ;;  %v1175_v56 = vsel %vm2135_vm8, %v1167_v58, 0.0  ;;  %v985_v57 = vadd.f32 %v965_v61, %v901_v54  ;;  %vm2150_vm8 = vmmov %vm2126_vm0 }
  0xf9   : > { %v884_v62 = vpop.f32.mrf.mxu1  ;;  %v1176_v12 = vadd.f32 %v1175_v56, %v1174_v34 }
  0xfa   : > { %v1042_v30 = vadd.f32 %v1022_v25, %v985_v57  ;;  %v1112_v15 = vpop.f32.mrf.mxu0  ;;  %v902_v6 = vadd.f32 %v884_v62, %v815_v5  ;;  %v761_v25 = vadd.f32 %v1957_v22, %v677_v51  ;;  %v678_v57 = vadd.f32 %v1963_v47, %v551_v19 }
  0xfc   : > { %v1129_v17 = vadd.f32 %v1109_v50, %v1042_v30  ;;  %v818_v56 = vadd.f32 %v1953_v14, %v761_v25 }
  0xfe   : > { %1137 = vst.msk [vmem:[%s1972_s13 + $0x10] sm:$0xff] %vm2136_vm2, %v1129_v17  ;;  %v1146_v63 = vsel %vm2137_vm13, %v1129_v17, 0.0  ;;  %v1168_v31 = vmul.f32 %v1129_v17, %v1129_v17  ;;  %v762_v17 = vadd.f32 %v1965_v59, %v678_v57  ;;  %vm2151_vm2 = vmmov %vm2126_vm0 }
  0xff   : > { %v1147_v20 = vadd.f32 %v1146_v63, %v1145_v36  ;;  %v968_v18 = vpop.f32.mrf.mxu2  ;;  %vm2152_vm13 = vmmov %vm2126_vm0 }
 0x100   : > { %v1025_v21 = vpop.f32.mrf.mxu3  ;;  %v1177_v32 = vsel %vm2138_vm9, %v1168_v31, 0.0  ;;  %v986_v0 = vadd.f32 %v968_v18, %v902_v6  ;;  %v819_v63 = vadd.f32 %v1961_v60, %v762_v17  ;;  %vm1164_vm9 = vcmask 122880  }
 0x101   : > { %v887_v26 = vpop.f32.mrf.mxu1  ;;  %v1178_v11 = vadd.f32 %v1177_v32, %v1176_v12 }
 0x102   : > { %v1043_v40 = vadd.f32 %v1025_v21, %v986_v0  ;;  %v1115_v27 = vpop.f32.mrf.mxu0  ;;  %v903_v41 = vadd.f32 %v887_v26, %v816_v29 }
 0x104   : > { %v1130_v35 = vadd.f32 %v1112_v15, %v1043_v40 }
 0x106   : > { %1138 = vst.msk [vmem:[%s1972_s13 + $0x18] sm:$0xff] %vm2139_vm10, %v1130_v35  ;;  %v1148_v2 = vsel %vm2140_vm4, %v1130_v35, 0.0  ;;  %v1169_v42 = vmul.f32 %v1130_v35, %v1130_v35 }
 0x107   : > { %v1149_v43 = vadd.f32 %v1148_v2, %v1147_v20  ;;  %v971_v16 = vpop.f32.mrf.mxu2 }
 0x108   : > { %v1028_v44 = vpop.f32.mrf.mxu3  ;;  %v1179_v46 = vsel %vm2141_vm15, %v1169_v42, 0.0  ;;  %v987_v4 = vadd.f32 %v971_v16, %v903_v41 }
 0x109   : > { %v890_v50 = vpop.f32.mrf.mxu1  ;;  %v1180_v37 = vadd.f32 %v1179_v46, %v1178_v11 }
 0x10a   : > { %v1044_v45 = vadd.f32 %v1028_v44, %v987_v4  ;;  %v1118_v52 = vpop.f32.mrf.mxu0  ;;  %v904_v54 = vadd.f32 %v890_v50, %v817_v10 }
 0x10c   : > { %v1131_v53 = vadd.f32 %v1115_v27, %v1044_v45 }
 0x10e   : > { %1139 = vst.msk [vmem:[%s1972_s13 + $0x20] sm:$0xff] %vm2126_vm0, %v1131_v53  ;;  %v1150_v9 = vsel %vm2142_vm11, %v1131_v53, 0.0  ;;  %v1170_v55 = vmul.f32 %v1131_v53, %v1131_v53 }
 0x10f   : > { %v1151_v58 = vadd.f32 %v1150_v9, %v1149_v43  ;;  %v974_v36 = vpop.f32.mrf.mxu2 }
 0x110   : > { %v1031_v61 = vpop.f32.mrf.mxu3  ;;  %v1181_v28 = vsel %vm2143_vm12, %v1170_v55, 0.0  ;;  %v988_v13 = vadd.f32 %v974_v36, %v904_v54 }
 0x111   : > { %v1182_v7 = vadd.f32 %v1181_v28, %v1180_v37  ;;  %v893_v38 = vpop.f32.mrf.mxu1 }
 0x112   : > { %v1045_v34 = vadd.f32 %v1031_v61, %v988_v13  ;;  %v905_v12 = vadd.f32 %v893_v38, %v818_v56  ;;  %v1121_v30 = vpop.f32.mrf.mxu0 }
 0x114   : > { %v1132_v62 = vadd.f32 %v1118_v52, %v1045_v34 }
 0x116   : > { %1140 = vst.msk [vmem:[%s1972_s13 + $0x28] sm:$0xff] %vm2144_vm6, %v1132_v62  ;;  %v1152_v22 = vsel %vm2145_vm3, %v1132_v62, 0.0  ;;  %v1171_v3 = vmul.f32 %v1132_v62, %v1132_v62 }
 0x117   : > { %v1153_v15 = vadd.f32 %v1152_v22, %v1151_v58  ;;  %v977_v5 = vpop.f32.mrf.mxu2 }
 0x118   : > { %v1034_v39 = vpop.f32.mrf.mxu3  ;;  %v1183_v48 = vsel %vm2146_vm5, %v1171_v3, 0.0  ;;  %v989_v23 = vadd.f32 %v977_v5, %v905_v12 }
 0x119   : > { %v1184_v14 = vadd.f32 %v1183_v48, %v1182_v7  ;;  %v896_v47 = vpop.f32.mrf.mxu1 }
 0x11a   : > { %v1046_v6 = vadd.f32 %v1034_v39, %v989_v23  ;;  %v906_v20 = vadd.f32 %v896_v47, %v819_v63  ;;  %v1124_v1 = vpop.f32.mrf.mxu0 }
 0x11c   : > { %v1133_v31 = vadd.f32 %v1121_v30, %v1046_v6 }
 0x11e   : > { %1141 = vst.msk [vmem:[%s1972_s13 + $0x30] sm:$0xff] %vm2147_vm1, %v1133_v31  ;;  %v1154_v18 = vsel %vm2148_vm14, %v1133_v31, 0.0  ;;  %v1172_v21 = vmul.f32 %v1133_v31, %v1133_v31 }
 0x11f   : > { %v1155_v24 = vadd.f32 %v1154_v18, %v1153_v15  ;;  %v980_v32 = vpop.f32.mrf.mxu2 }
 0x120   : > { %v1037_v0 = vpop.f32.mrf.mxu3  ;;  %v1185_v59 = vsel %vm2149_vm7, %v1172_v21, 0.0  ;;  %v990_v26 = vadd.f32 %v980_v32, %v906_v20 }
 0x121   : > { %v1186_v11 = vadd.f32 %v1185_v59, %v1184_v14 }
 0x122   : > { %v1047_v40 = vadd.f32 %v1037_v0, %v990_v26 }
 0x124   : > { %v1134_v27 = vadd.f32 %v1124_v1, %v1047_v40 }
 0x126   : > { %1142 = vst.msk [vmem:[%s1972_s13 + $0x38] sm:$0xff] %vm2150_vm8, %v1134_v27  ;;  %v1156_v60 = vsel %vm2151_vm2, %v1134_v27, 0.0  ;;  %v1173_v29 = vmul.f32 %v1134_v27, %v1134_v27 }
 0x127   : > { %v1157_v33 = vadd.f32 %v1156_v60, %v1155_v24 }
 0x128   : > { %v1187_v35 = vsel %vm2152_vm13, %v1173_v29, 0.0 }
 0x129   : > { %v1158_v41 = vrot.slane %v1157_v33, 4  ;;  %v1188_v2 = vadd.f32 %v1187_v35, %v1186_v11 }
 0x12b   : > { %v1159_v42 = vadd.f32 %v1158_v41, %v1157_v33  ;;  %v1189_v43 = vrot.slane %v1188_v2, 4 }
 0x12d   : > { %v1160_v16 = vrot.slane %v1159_v42, 2  ;;  %v1190_v44 = vadd.f32 %v1189_v43, %v1188_v2 }
 0x12f   : > { %v1161_v49 = vadd.f32 %v1160_v16, %v1159_v42  ;;  %v1191_v46 = vrot.slane %v1190_v44, 2 }
 0x131   : > { %v1162_v4 = vrot.slane %v1161_v49, 1  ;;  %v1192_v50 = vadd.f32 %v1191_v46, %v1190_v44 }
 0x133   : > { %v1163_v37 = vadd.f32 %v1162_v4, %v1161_v49  ;;  %v1193_v8 = vrot.slane %v1192_v50, 1 }
 0x135   : > { %1165 = vst.msk [vmem:[%s238_s16] sm:$0x1] %vm1164_vm9, %v1163_v37  ;;  %v1194_v45 = vadd.f32 %v1193_v8, %v1192_v50 }
 0x137   : > { %1195 = vst.msk [vmem:[%s241_s20] sm:$0x1] %vm1164_vm9, %v1194_v45 }
 0x138 PF: > { %s16_s18 = sadd.s32 1, %s1421_s18  }
 0x139   : > { %p13_p4 = scmp.ge.s32.totalorder %s16_s18, 4  }
 0x13b   :  { %15 = sbr.rel (!%p13_p4) target bundleno = 1 (0x1), region = 94 }

// kernel: _lambda_.30
= control target key start
LH: loop header
LB: loop body
LE: loop exit
PB: predicated region body
PF: predicated region fallthrough
CT: control target
= control target key end

     0   :  { %s106_s0 = inlined_call_operand.vmem [shape: f32[32,128], index: 0, kind: input, shape index: {}]   ;;  %s107_s1 = inlined_call_operand.vmem [shape: f32[1,128], index: 1, kind: input, shape index: {}]   ;;  %s108_s2 = inlined_call_operand.vmem [shape: f32[1,128], index: 2, kind: input, shape index: {}]   ;;  %s109_s3 = inlined_call_operand.vmem [shape: f32[32,128], index: 3, kind: output, shape index: {}]  }
   0x1   :  { %v14_v0 = vld [vmem:[%s106_s0] sm:$0xff]  ;;  %v15_v3 = vld [vmem:[%s106_s0 + $0x8] sm:$0xff]  ;;  %v16_v6 = vld [vmem:[%s106_s0 + $0x10] sm:$0xff] }
   0x2   :  { %v54_v1 = vld [vmem:[%s107_s1] ss:$0 sm:$0xff]  ;;  %v17_v7 = vld [vmem:[%s106_s0 + $0x18] sm:$0xff] }
   0x3   :  { %v55_v2 = vld [vmem:[%s108_s2] ss:$0 sm:$0xff]  ;;  %v22_v4 = vmul.f32 %v54_v1, %v14_v0  ;;  %v23_v5 = vmul.f32 %v54_v1, %v15_v3  ;;  %v24_v8 = vmul.f32 %v54_v1, %v16_v6  ;;  %v25_v9 = vmul.f32 %v54_v1, %v17_v7 }
   0x5   :  { %v30_v10 = vadd.f32 %v55_v2, %v22_v4  ;;  %v31_v11 = vadd.f32 %v55_v2, %v23_v5  ;;  %v32_v12 = vadd.f32 %v55_v2, %v24_v8  ;;  %v33_v13 = vadd.f32 %v55_v2, %v25_v9 }
   0x7   :  { %vm34_vm0 = vcmp.ge.f32.partialorder %v30_v10, 0.0  ;;  %v38_v14 = vmul.f32 0.2, %v30_v10  ;;  %vm35_vm1 = vcmp.ge.f32.partialorder %v31_v11, 0.0  ;;  %v39_v15 = vmul.f32 0.2, %v31_v11 }
   0x8   :  { %vm36_vm2 = vcmp.ge.f32.partialorder %v32_v12, 0.0  ;;  %v40_v16 = vmul.f32 0.2, %v32_v12  ;;  %vm37_vm3 = vcmp.ge.f32.partialorder %v33_v13, 0.0  ;;  %v41_v17 = vmul.f32 0.2, %v33_v13 }
   0x9   :  { %v42_v18 = vsel %vm34_vm0, %v30_v10, %v38_v14  ;;  %v43_v19 = vsel %vm35_vm1, %v31_v11, %v39_v15 }
   0xa   :  { %46 = vst [vmem:[%s109_s3] sm:$0xff] %v42_v18  ;;  %v44_v20 = vsel %vm36_vm2, %v32_v12, %v40_v16  ;;  %v45_v21 = vsel %vm37_vm3, %v33_v13, %v41_v17 }
   0xb   :  { %47 = vst [vmem:[%s109_s3 + $0x8] sm:$0xff] %v43_v19 }
   0xc   :  { %48 = vst [vmem:[%s109_s3 + $0x10] sm:$0xff] %v44_v20 }
   0xd   :  { %49 = vst [vmem:[%s109_s3 + $0x18] sm:$0xff] %v45_v21 }

// kernel: _lambda_.34
= control target key start
LH: loop header
LB: loop body
LE: loop exit
PB: predicated region body
PF: predicated region fallthrough
CT: control target
= control target key end

     0   :  { %s134_s0 = inlined_call_operand.vmem [shape: f32[32,128], index: 0, kind: input, shape index: {}]   ;;  %s135_s1 = inlined_call_operand.vmem [shape: f32[1,128], index: 1, kind: input, shape index: {}]   ;;  %s136_s2 = inlined_call_operand.vmem [shape: f32[1,128], index: 2, kind: input, shape index: {}]   ;;  %s137_s3 = inlined_call_operand.vmem [shape: f32[32,128], index: 3, kind: input, shape index: {}]   ;;  %s138_s4 = inlined_call_operand.vmem [shape: f32[32,128], index: 4, kind: output, shape index: {}]  }
   0x1   :  { %v17_v0 = vld [vmem:[%s134_s0] sm:$0xff]  ;;  %v18_v4 = vld [vmem:[%s134_s0 + $0x8] sm:$0xff]  ;;  %v19_v5 = vld [vmem:[%s134_s0 + $0x10] sm:$0xff] }
   0x2   :  { %v65_v1 = vld [vmem:[%s135_s1] ss:$0 sm:$0xff]  ;;  %v20_v8 = vld [vmem:[%s134_s0 + $0x18] sm:$0xff]  ;;  %v50_v15 = vld [vmem:[%s137_s3 + $0x8] sm:$0xff] }
   0x3   :  { %v66_v2 = vld [vmem:[%s136_s2] ss:$0 sm:$0xff]  ;;  %v25_v3 = vmul.f32 %v65_v1, %v17_v0  ;;  %v26_v6 = vmul.f32 %v65_v1, %v18_v4  ;;  %v27_v7 = vmul.f32 %v65_v1, %v19_v5  ;;  %v28_v10 = vmul.f32 %v65_v1, %v20_v8  ;;  %v51_v16 = vld [vmem:[%s137_s3 + $0x10] sm:$0xff]  ;;  %v52_v22 = vld [vmem:[%s137_s3 + $0x18] sm:$0xff] }
   0x4   :  { %v49_v14 = vld [vmem:[%s137_s3] sm:$0xff] }
   0x5   :  { %v33_v9 = vadd.f32 %v66_v2, %v25_v3  ;;  %v34_v11 = vadd.f32 %v66_v2, %v26_v6  ;;  %v35_v12 = vadd.f32 %v66_v2, %v27_v7  ;;  %v36_v17 = vadd.f32 %v66_v2, %v28_v10 }
   0x7   :  { %vm37_vm0 = vcmp.ge.f32.partialorder %v33_v9, 0.0  ;;  %v41_v13 = vmul.f32 0.2, %v33_v9  ;;  %vm38_vm1 = vcmp.ge.f32.partialorder %v34_v11, 0.0  ;;  %v42_v18 = vmul.f32 0.2, %v34_v11 }
   0x8   :  { %vm39_vm2 = vcmp.ge.f32.partialorder %v35_v12, 0.0  ;;  %v43_v19 = vmul.f32 0.2, %v35_v12  ;;  %vm40_vm3 = vcmp.ge.f32.partialorder %v36_v17, 0.0  ;;  %v44_v21 = vmul.f32 0.2, %v36_v17 }
   0x9   :  { %v45_v20 = vsel %vm37_vm0, %v33_v9, %v41_v13  ;;  %v46_v24 = vsel %vm38_vm1, %v34_v11, %v42_v18 }
   0xa   :  { %v53_v23 = vadd.f32 %v49_v14, %v45_v20  ;;  %v47_v25 = vsel %vm39_vm2, %v35_v12, %v43_v19  ;;  %v54_v26 = vadd.f32 %v50_v15, %v46_v24  ;;  %v48_v28 = vsel %vm40_vm3, %v36_v17, %v44_v21 }
   0xb   :  { %v55_v27 = vadd.f32 %v51_v16, %v47_v25  ;;  %v56_v29 = vadd.f32 %v52_v22, %v48_v28 }
   0xc   :  { %57 = vst [vmem:[%s138_s4] sm:$0xff] %v53_v23 }
   0xd   :  { %58 = vst [vmem:[%s138_s4 + $0x8] sm:$0xff] %v54_v26 }
   0xe   :  { %59 = vst [vmem:[%s138_s4 + $0x10] sm:$0xff] %v55_v27 }
   0xf   :  { %60 = vst [vmem:[%s138_s4 + $0x18] sm:$0xff] %v56_v29 }

// kernel: _lambda_.35
= control target key start
LH: loop header
LB: loop body
LE: loop exit
PB: predicated region body
PF: predicated region fallthrough
CT: control target
= control target key end

     0   :  { %s468_s18 = smov 0   ;;  %s508_s0 = inlined_call_operand.vmem [shape: f32[2,16,32], index: 0, kind: input, shape index: {}]   ;;  %s509_s1 = inlined_call_operand.vmem [shape: f32[1,32,128], index: 1, kind: input, shape index: {}]   ;;  %s510_s2 = inlined_call_operand.vmem [shape: f32[1,1,128], index: 2, kind: input, shape index: {}]   ;;  %s511_s3 = inlined_call_operand.vmem [shape: f32[2,16,128], index: 3, kind: output, shape index: {0}]   ;;  %s512_s4 = inlined_call_operand.vmem [shape: f32[2,1,128], index: 4, kind: output, shape index: {1}]   ;;  %s513_s5 = inlined_call_operand.vmem [shape: f32[2,1,128], index: 5, kind: output, shape index: {2}]  }
   0x1 LB: > { %s403_s2 = sadd.s32 4294967295, %s436_s18   ;;  %p407_p0 = scmp.ge.s32.totalorder %s436_s18, 1  ;;  %s436_s18 = sphi %s468_s18, %s16_s18  }
   0x2   : > { %p192_p1 = scmp.lt.s32.totalorder %s436_s18, 3 }
   0x4   : > { %p193_p2 = pnand %p407_p0, %p192_p1 }
   0x5   : > { %p226_p3 = scmp.lt.s32.totalorder (!%p193_p2), %s403_s2, 1 }
   0x6   : > { %196 = sbr.rel (%p193_p2) target bundleno = 162 (0xa2), region = 32 }
   0xb   : > { %v247_v0 = vld [vmem:[%s509_s1 + $0x18] sm:$0xff]  ;;  %v246_v1 = vld [vmem:[%s509_s1 + $0x10] sm:$0xff]  ;;  %v245_v2 = vld [vmem:[%s509_s1 + $0x8] sm:$0xff]  ;;  %s515_s2 = smov (!%p226_p3, %s403_s2), 1  ;;  %vm248_vm0 = vcmask 261120  }
   0xc   : > { %267 = vmatpush.msra.mxu0 %v247_v0  ;;  %418 = vmatpush.msra.mxu1 %v247_v0  ;;  %v244_v3 = vld [vmem:[%s509_s1] sm:$0xff]  ;;  %s416_s27 = sshll.u32 %s515_s2, 4  ;;  %s238_s11 = scalar_lea.vmem %s512_s4, %s515_s2 }
   0xd   : > { %s230_s30 = scalar_lea.vmem %s508_s0, %s416_s27  ;;  %s235_s8 = scalar_lea.vmem %s511_s3, %s416_s27 }
   0xe   : > { %268 = vmatpush.msra.mxu0 %v246_v1  ;;  %419 = vmatpush.msra.mxu1 %v246_v1  ;;  %v242_v4 = vld [vmem:[%s230_s30] sm:$0xff]  ;;  %v243_v5 = vld [vmem:[%s230_s30 + $0x8] sm:$0xff]  ;;  %s241_s14 = scalar_lea.vmem %s513_s5, %s515_s2 }
  0x10   : > { %269 = vmatpush.msra.mxu0 %v245_v2  ;;  %420 = vmatpush.msra.mxu1 %v245_v2 }
  0x12   : > { %270 = vmatpush.msra.mxu0 %v244_v3  ;;  %421 = vmatpush.msra.mxu1 %v244_v3 }
  0x13   : > { %412 = vmatmul.msk.f32.vlgmr.msra.gmra.mxu0 %vm248_vm0, %v242_v4  ;;  %413 = vmatmul.msk.f32.vlgmr.msra.gmra.mxu1 %vm248_vm0, %v243_v5 }
  0x90   : > { %v272_v6 = vpop.f32.mrf.mxu0  ;;  %v275_v7 = vpop.f32.mrf.mxu1 }
  0x91   : > { %278 = vst [vmem:[%s235_s8] sm:$0xff] %v272_v6  ;;  %v288_v8 = vmul.f32 %v272_v6, %v272_v6  ;;  %v280_v9 = vadd.f32 %v275_v7, %v272_v6  ;;  %v289_v10 = vmul.f32 %v275_v7, %v275_v7 }
  0x92   : > { %279 = vst [vmem:[%s235_s8 + $0x8] sm:$0xff] %v275_v7 }
  0x93   : > { %v281_v11 = vrot.slane %v280_v9, 4  ;;  %v290_v12 = vadd.f32 %v289_v10, %v288_v8 }
  0x95   : > { %v282_v13 = vadd.f32 %v281_v11, %v280_v9  ;;  %v291_v14 = vrot.slane %v290_v12, 4 }
  0x97   : > { %v283_v15 = vrot.slane %v282_v13, 2  ;;  %v292_v16 = vadd.f32 %v291_v14, %v290_v12 }
  0x99   : > { %v284_v17 = vadd.f32 %v283_v15, %v282_v13  ;;  %v293_v18 = vrot.slane %v292_v16, 2 }
  0x9b   : > { %v285_v19 = vrot.slane %v284_v17, 1  ;;  %v294_v20 = vadd.f32 %v293_v18, %v292_v16 }
  0x9d   : > { %v286_v21 = vadd.f32 %v285_v19, %v284_v17  ;;  %v295_v22 = vrot.slane %v294_v20, 1 }
  0x9f   : > { %287 = vst [vmem:[%s238_s11] sm:$0x1] %v286_v21  ;;  %v296_v23 = vadd.f32 %v295_v22, %v294_v20 }
  0xa1   : > { %297 = vst [vmem:[%s241_s14] sm:$0x1] %v296_v23 }
  0xa2 PF: > { %s16_s18 = sadd.s32 1, %s436_s18  }
  0xa3   : > { %p13_p4 = scmp.ge.s32.totalorder %s16_s18, 4  }
  0xa5   :  { %15 = sbr.rel (!%p13_p4) target bundleno = 1 (0x1), region = 86 }

// kernel: _lambda_.31
= control target key start
LH: loop header
LB: loop body
LE: loop exit
PB: predicated region body
PF: predicated region fallthrough
CT: control target
= control target key end

     0   :  { %s3905_s18 = smov 0   ;;  %s5621_s0 = inlined_call_operand.vmem [shape: f32[2,290,8], index: 0, kind: input, shape index: {}]   ;;  %s5622_s1 = inlined_call_operand.vmem [shape: f32[9,8,8], index: 1, kind: input, shape index: {}]   ;;  %s5623_s2 = inlined_call_operand.vmem [shape: f32[1,1,8], index: 2, kind: input, shape index: {}]   ;;  %s5624_s3 = inlined_call_operand.vmem [shape: f32[2,256,8], index: 3, kind: output, shape index: {0}]   ;;  %s5625_s4 = inlined_call_operand.vmem [shape: f32[2,1,8], index: 4, kind: output, shape index: {1}]   ;;  %s5626_s5 = inlined_call_operand.vmem [shape: f32[2,1,8], index: 5, kind: output, shape index: {2}]  }
   0x1 LB: > { %s3518_s2 = sadd.s32 4294967295, %s3873_s18   ;;  %p3522_p0 = scmp.ge.s32.totalorder %s3873_s18, 1  ;;  %s3873_s18 = sphi %s3905_s18, %s16_s18  }
   0x2   : > { %p192_p1 = scmp.lt.s32.totalorder %s3873_s18, 3 }
   0x4   : > { %p193_p2 = pnand %p3522_p0, %p192_p1 }
   0x6   : > { %196 = sbr.rel (%p193_p2) target bundleno = 746 (0x2ea), region = 32 }
   0xb   : > { %v3526_v0 = vld [vmem:[%s5622_s1 + $0x8] sm:$0xff]  ;;  %p226_p3 = scmp.lt.s32.totalorder %s3518_s2, 1  ;;  %v3591_v1 = vld [vmem:[%s5622_s1 + $0x10] sm:$0xff]  ;;  %v3624_v2 = vld [vmem:[%s5622_s1 + $0x18] sm:$0xff]  ;;  %vm5684_vm0 = vcmask 1046528   ;;  %vm958_vm1 = vcmask 64512  }
   0xc   : > { %3825 = vmatpush.msra.mxu1 %v3526_v0  ;;  %3826 = vmatpush.msra.mxu2 %v3526_v0  ;;  %v856_v3 = vld [vmem:[%s5622_s1] sm:$0xff]  ;;  %vm5688_vm3 = vcmask 1045504  }
   0xd   : > { %s6072_s2 = smov (!%p226_p3, %s3518_s2), 1  ;;  %3827 = vmatpush.msra.mxu3 %v3526_v0  ;;  %v3657_v4 = vld [vmem:[%s5622_s1 + $0x20] sm:$0xff]  ;;  %1038 = vmatpush.msra.mxu0 %v3526_v0 }
   0xe   : > { %1652 = vmatpush.msrb.mxu2 %v3591_v1  ;;  %1247 = vmatpush.msrb.mxu1 %v856_v3  ;;  %s3828_s29 = smul.u32 296, %s6072_s2  ;;  %s3824_s16 = sshll.u32 %s6072_s2, 8 }
   0xf   : > { %1927 = vmatpush.msrb.mxu3 %v3624_v2  ;;  %2084 = vmatpush.msrb.mxu0 %v3657_v4  ;;  %v279_v2 = vlaneseq  ;;  %s5281_s20 = scalar_lea.vmem %s5624_s3, %s3824_s16  ;;  %s238_s23 = scalar_lea.vmem %s5625_s4, %s6072_s2 }
  0x10   : > { %s3934_s7 = scalar_lea.vmem %s5621_s0, %s3828_s29  ;;  %s241_s26 = scalar_lea.vmem %s5626_s5, %s6072_s2 }
  0x11   : > { %v3937_v5 = vld [vmem:[%s3934_s7 + $0x40] sm:$0xff]  ;;  %v3940_v6 = vld [vmem:[%s3934_s7 + $0x48] sm:$0xff]  ;;  %v3961_v17 = vld [vmem:[%s3934_s7 + $0x50] sm:$0xff] }
  0x12   : > { %v3943_v7 = vld [vmem:[%s3934_s7 + $0x80] sm:$0xff]  ;;  %v5627_v8 = vrot.slane %v3937_v5, 1  ;;  %v910_v9 = vrot.slane %v3940_v6, 1  ;;  %v3948_v10 = vld [vmem:[%s3934_s7 + $0x88] sm:$0xff]  ;;  %v3972_v20 = vld [vmem:[%s3934_s7 + $0x90] sm:$0xff]  ;;  %v912_v27 = vrot.slane %v3961_v17, 1 }
  0x13   : > { %v5629_v11 = vrot.slane %v3943_v7, 1  ;;  %v3952_v12 = vld [vmem:[%s3934_s7 + $0xc0] sm:$0xff]  ;;  %v3955_v13 = vld [vmem:[%s3934_s7 + $0xc8] sm:$0xff]  ;;  %v926_v14 = vrot.slane %v3948_v10, 1  ;;  %v3979_v23 = vld [vmem:[%s3934_s7 + $0xd0] sm:$0xff]  ;;  %v928_v29 = vrot.slane %v3972_v20, 1 }
  0x14   : > { %v5628_v15 = vrot.slane %v3952_v12, 1  ;;  %v942_v16 = vrot.slane %v3955_v13, 1  ;;  %v3964_v18 = vld [vmem:[%s3934_s7] sm:$0xff]  ;;  %v3969_v19 = vsel %vm5684_vm0, %v5627_v8, %v910_v9  ;;  %v3975_v21 = vld [vmem:[%s3934_s7 + $0x8] sm:$0xff]  ;;  %v4000_v28 = vld [vmem:[%s3934_s7 + $0x10] sm:$0xff]  ;;  %v944_v31 = vrot.slane %v3979_v23, 1 }
  0x15   : > { %5765 = vst [vmem:[#allocation2_spill] sm:$0xff] %v3969_v19  ;;  %v893_v22 = vrot.slane %v3964_v18, 1  ;;  %3535 = vmatmul.msk.f32.vlgmr.msra.gmra.mxu1 %vm958_vm1, %v3969_v19  ;;  %v3986_v24 = vsel %vm5684_vm0, %v5629_v11, %v926_v14  ;;  %v894_v26 = vrot.slane %v3975_v21, 1  ;;  %v896_v32 = vrot.slane %v4000_v28, 1  ;;  %v4017_v36 = vld [vmem:[%s3934_s7 + $0x58] sm:$0xff]  ;;  %v4050_v48 = vld [vmem:[%s3934_s7 + $0x60] sm:$0xff] }
  0x16   : > { %5766 = vst [vmem:[#allocation3_spill] sm:$0xff] %v3986_v24  ;;  %v3991_v25 = vsel %vm5684_vm0, %v5628_v15, %v942_v16  ;;  %3543 = vmatmul.msk.f32.vlgmr.msra.gmra.mxu2 %vm958_vm1, %v3986_v24  ;;  %v4008_v33 = vsel %vm5684_vm0, %v910_v9, %v912_v27  ;;  %v4011_v34 = vsel %vm5684_vm0, %v926_v14, %v928_v29  ;;  %v4020_v37 = vld [vmem:[%s3934_s7 + $0x98] sm:$0xff]  ;;  %v914_v40 = vrot.slane %v4017_v36, 1  ;;  %v4053_v49 = vld [vmem:[%s3934_s7 + $0xa0] sm:$0xff]  ;;  %v4086_v60 = vld [vmem:[%s3934_s7 + $0x68] sm:$0xff] }
  0x17   : > { %3551 = vmatmul.msk.f32.vlgmr.msra.gmra.mxu3 %vm958_vm1, %v3991_v25  ;;  %v895_v30 = vsel %vm5684_vm0, %v893_v22, %v894_v26  ;;  %5767 = vst [vmem:[#allocation4_spill] sm:$0xff] %v4008_v33  ;;  %v4014_v35 = vsel %vm5684_vm0, %v942_v16, %v944_v31  ;;  %v4023_v38 = vld [vmem:[%s3934_s7 + $0xd8] sm:$0xff]  ;;  %v897_v39 = vsel %vm5684_vm0, %v894_v26, %v896_v32  ;;  %v930_v42 = vrot.slane %v4020_v37, 1  ;;  %v4056_v50 = vld [vmem:[%s3934_s7 + $0xe0] sm:$0xff]  ;;  %v4089_v61 = vld [vmem:[%s3934_s7 + $0xa8] sm:$0xff] }
  0x18   : > { %3527 = vmatmul.msk.f32.vlgmr.msra.gmra.mxu0 %vm958_vm1, %v895_v30  ;;  %5768 = vst [vmem:[#allocation5_spill] sm:$0xff] %v4011_v34  ;;  %v4034_v41 = vld [vmem:[%s3934_s7 + $0x18] sm:$0xff]  ;;  %v946_v43 = vrot.slane %v4023_v38, 1  ;;  %v4041_v45 = vsel %vm5684_vm0, %v912_v27, %v914_v40  ;;  %v916_v52 = vrot.slane %v4050_v48, 1  ;;  %v4069_v53 = vld [vmem:[%s3934_s7 + $0x20] sm:$0xff]  ;;  %v932_v54 = vrot.slane %v4053_v49, 1 }
  0x19   : > { %5769 = vst [vmem:[#allocation6_spill] sm:$0xff] %v4023_v38  ;;  %v898_v44 = vrot.slane %v4034_v41, 1  ;;  %v4044_v46 = vsel %vm5684_vm0, %v928_v29, %v930_v42  ;;  %v948_v55 = vrot.slane %v4056_v50, 1  ;;  %v900_v56 = vrot.slane %v4069_v53, 1  ;;  %v4092_v62 = vld [vmem:[%s3934_s7 + $0xe8] sm:$0xff]  ;;  %v4125_v29 = vld [vmem:[%s3934_s7 + $0x70] sm:$0xff] }
  0x1a   : > { %5770 = vst [vmem:[#allocation7_spill] sm:$0xff] %v4041_v45  ;;  %v4047_v47 = vsel %vm5684_vm0, %v944_v31, %v946_v43  ;;  %v4077_v57 = vsel %vm5684_vm0, %v914_v40, %v916_v52  ;;  %v4080_v58 = vsel %vm5684_vm0, %v930_v42, %v932_v54  ;;  %v918_v0 = vrot.slane %v4086_v60, 1  ;;  %v4105_v1 = vld [vmem:[%s3934_s7 + $0x28] sm:$0xff]  ;;  %v4128_v30 = vld [vmem:[%s3934_s7 + $0xb0] sm:$0xff]  ;;  %v4177_v15 = vld [vmem:[%s3934_s7 + $0x78] sm:$0xff] }
  0x1b   : > { %5771 = vst [vmem:[#allocation8_spill] sm:$0xff] %v4056_v50  ;;  %v4061_v51 = vsel %vm5684_vm0, %v896_v32, %v898_v44  ;;  %v4083_v59 = vsel %vm5684_vm0, %v946_v43, %v948_v55  ;;  %v4097_v63 = vsel %vm5684_vm0, %v898_v44, %v900_v56  ;;  %v934_v3 = vrot.slane %v4089_v61, 1  ;;  %v4131_v31 = vld [vmem:[%s3934_s7 + $0xf0] sm:$0xff]  ;;  %v4216_v50 = vld [vmem:[%s3934_s7 + $0x100] sm:$0xff] }
  0x1c   : > { %5772 = vst [vmem:[#allocation9_spill] sm:$0xff] %v4077_v57  ;;  %v950_v4 = vrot.slane %v4092_v62, 1  ;;  %v4111_v9 = vshrl.u32 %v279_v2, 7  ;;  %v902_v14 = vrot.slane %v4105_v1, 1  ;;  %v4115_v16 = vsel %vm5684_vm0, %v916_v52, %v918_v0  ;;  %v4143_v40 = vld [vmem:[%s3934_s7 + $0x30] sm:$0xff]  ;;  %v3756_v52 = vld [vmem:[%s5622_s1 + $0x38] sm:$0xff] }
  0x1d   : > { %3536 = vmatmul.msk.f32.gmra.mxu1 %vm958_vm1, %v4008_v33  ;;  %5773 = vst [vmem:[#allocation10_spill] sm:$0xff] %v4083_v59  ;;  %v4119_v26 = vsel %vm5684_vm0, %v932_v54, %v934_v3  ;;  %v920_v43 = vrot.slane %v4125_v29, 1  ;;  %v3723_v44 = vld [vmem:[%s5622_s1 + $0x30] sm:$0xff]  ;;  %v3690_v54 = vld [vmem:[%s5622_s1 + $0x28] sm:$0xff]  ;;  %2797 = vmatpush.msra.mxu3 %v3756_v52  ;;  %v904_v2 = vrot.slane %v4143_v40, 1  ;;  %v4183_v52 = vld [vmem:[%s3934_s7 + $0xf8] sm:$0xff] }
  0x1e   : > { %3544 = vmatmul.msk.f32.gmra.mxu2 %vm958_vm1, %v4011_v34  ;;  %5774 = vst [vmem:[#allocation11_spill] sm:$0xff] %v4092_v62  ;;  %v316_v22 = vand.u32 15, %v4111_v9  ;;  %v4122_v27 = vsel %vm5684_vm0, %v948_v55, %v950_v4  ;;  %v936_v55 = vrot.slane %v4128_v30, 1  ;;  %2365 = vmatpush.msra.mxu1 %v3690_v54 }
  0x1f   : > { %3552 = vmatmul.msk.f32.gmra.mxu3 %vm958_vm1, %v4014_v35  ;;  %5775 = vst [vmem:[#allocation12_spill] sm:$0xff] %v4115_v16  ;;  %2640 = vmatpush.msra.mxu2 %v3723_v44  ;;  %v4180_v44 = vld [vmem:[%s3934_s7 + $0xb8] sm:$0xff]  ;;  %v4188_v54 = vsel %vm5684_vm0, %v902_v14, %v904_v2 }
  0x20   : > { %3528 = vmatmul.msk.f32.gmra.mxu0 %vm958_vm1, %v897_v39  ;;  %5776 = vst [vmem:[#allocation13_spill] sm:$0xff] %v4122_v27  ;;  %vm4133_vm2 = vcmp.ne.s32.totalorder %v316_v22, 0  ;;  %v4140_v39 = vsel %vm5684_vm0, %v900_v56, %v902_v14  ;;  %v952_v56 = vrot.slane %v4131_v31, 1  ;;  %v4168_v22 = vsel %vm5684_vm0, %v918_v0, %v920_v43 }
  0x21   : > { %5777 = vst [vmem:[#allocation14_spill] sm:$0xff] %v4131_v31  ;;  %v4171_v42 = vsel %vm5684_vm0, %v934_v3, %v936_v55  ;;  %v922_v0 = vrot.slane %v4177_v15, 1  ;;  %v4196_v3 = vld [vmem:[%s3934_s7 + $0x38] sm:$0xff]  ;;  %v938_v11 = vrot.slane %v4180_v44, 1  ;;  %v954_v31 = vrot.slane %v4183_v52, 1 }
  0x22   : > { %5780 = vst [vmem:[#allocation15_spill] sm:$0xff] %v4168_v22  ;;  %v4174_v8 = vsel %vm5684_vm0, %v950_v4, %v952_v56  ;;  %v3789_v4 = vld [vmem:[%s5622_s1 + $0x40] sm:$0xff]  ;;  %v906_v14 = vrot.slane %v4196_v3, 1 }
  0x23   : > { %5781 = vst [vmem:[#allocation16_spill] sm:$0xff] %v4174_v8  ;;  %3078 = vmatpush.msra.mxu0 %v3789_v4  ;;  %v4210_v62 = vsel %vm5684_vm0, %v936_v55, %v938_v11  ;;  %v5786_v55 = vrot.slane %v3943_v7, 1 }
  0x24   : > { %5782 = vst [vmem:[#allocation17_spill] sm:$0xff] %v4183_v52  ;;  %v4221_v4 = vsel %vm5684_vm0, %v904_v2, %v906_v14  ;;  %v5788_v52 = vrot.slane %v3952_v12, 1 }
  0x25   : > { %3537 = vmatmul.msk.f32.gmra.mxu1 %vm958_vm1, %v4041_v45  ;;  %5785 = vst [vmem:[#allocation20_spill] sm:$0xff] %v4216_v50 }
  0x26   : > { %3545 = vmatmul.msk.f32.gmra.mxu2 %vm958_vm1, %v4044_v46  ;;  %v4238_v2 = vsel %vm5684_vm0, %v938_v11, %v5788_v52  ;;  %v1410_v11 = vrot.slane %v3964_v18, 2  ;;  %v1411_v52 = vrot.slane %v3975_v21, 2 }
  0x27   : > { %3553 = vmatmul.msk.f32.gmra.mxu3 %vm958_vm1, %v4047_v47 }
  0x28   : > { %3529 = vmatmul.msk.f32.gmra.mxu0 %vm958_vm1, %v4061_v51 }
  0x2d   : > { %3538 = vmatmul.msk.f32.gmra.mxu1 %vm958_vm1, %v4077_v57 }
  0x2e   : > { %3546 = vmatmul.msk.f32.gmra.mxu2 %vm958_vm1, %v4080_v58 }
  0x2f   : > { %3554 = vmatmul.msk.f32.gmra.mxu3 %vm958_vm1, %v4083_v59 }
  0x30   : > { %3530 = vmatmul.msk.f32.gmra.mxu0 %vm958_vm1, %v4097_v63 }
  0x35   : > { %3539 = vmatmul.msk.f32.gmra.mxu1 %vm958_vm1, %v4115_v16 }
  0x36   : > { %3547 = vmatmul.msk.f32.gmra.mxu2 %vm958_vm1, %v4119_v26 }
  0x37   : > { %3555 = vmatmul.msk.f32.gmra.mxu3 %vm958_vm1, %v4122_v27  ;;  %v4213_v27 = vsel %vm5684_vm0, %v952_v56, %v954_v31  ;;  %v4233_v56 = vsel %vm5684_vm0, %v922_v0, %v5786_v55 }
  0x38   : > { %3531 = vmatmul.msk.f32.gmra.mxu0 %vm958_vm1, %v4140_v39  ;;  %5784 = vst [vmem:[#allocation19_spill] sm:$0xff] %v4213_v27 }
  0x39   : > { %5787 = vst [vmem:[#allocation21_spill] sm:$0xff] %v4233_v56 }
  0x3d   : > { %3540 = vmatmul.msk.f32.gmra.mxu1 %vm958_vm1, %v4168_v22 }
  0x3e   : > { %3548 = vmatmul.msk.f32.gmra.mxu2 %vm958_vm1, %v4171_v42 }
  0x3f   : > { %3556 = vmatmul.msk.f32.gmra.mxu3 %vm958_vm1, %v4174_v8  ;;  %v4207_v8 = vsel %vm5684_vm0, %v920_v43, %v922_v0  ;;  %v5648_v43 = vrot.slane %v4216_v50, 1  ;;  %v1412_v0 = vsel %vm5688_vm3, %v1410_v11, %v1411_v52  ;;  %v282_v50 = vadd.s32 16, %v4111_v9 }
  0x40   : > { %3532 = vmatmul.msk.f32.gmra.mxu0 %vm958_vm1, %v4188_v54  ;;  %5783 = vst [vmem:[#allocation18_spill] sm:$0xff] %v4207_v8 }
  0x41   : > { %v4243_v59 = vsel %vm5684_vm0, %v954_v31, %v5648_v43  ;;  %v281_v31 = vadd.s32 8, %v4111_v9  ;;  %v1413_v43 = vrot.slane %v4000_v28, 2 }
  0x42   : > { %5789 = vst [vmem:[#allocation22_spill] sm:$0xff] %v4243_v59 }
  0x43   : > { %v323_v55 = vand.u32 15, %v281_v31  ;;  %v330_v31 = vand.u32 15, %v282_v50 }
  0x45   : > { %3541 = vmatmul.msk.f32.gmra.mxu1 %vm958_vm1, %v4207_v8  ;;  %vm4273_vm4 = vcmp.ne.s32.totalorder %v323_v55, 15  ;;  %vm4287_vm5 = vcmp.ne.s32.totalorder %v330_v31, 0  ;;  %v1417_v55 = vrot.slane %v4069_v53, 2  ;;  %v5799_v31 = vmov 0 }
  0x46   : > { %3549 = vmatmul.msk.f32.gmra.mxu2 %vm958_vm1, %v4210_v62 }
  0x47   : > { %3557 = vmatmul.msk.f32.gmra.mxu3 %vm958_vm1, %v4213_v27  ;;  %v5790_v27 = vrot.slane %v3937_v5, 1 }
  0x48   : > { %3533 = vmatmul.msk.f32.gmra.mxu0 %vm958_vm1, %v4221_v4 }
  0x49   : > { %v4250_v38 = vsel %vm5684_vm0, %v906_v14, %v5790_v27  ;;  %v824_v27 = vsel %vm4133_vm2, %v3964_v18, 0.0  ;;  %v1782_v14 = vsel %vm4133_vm2, %v4000_v28, 0.0  ;;  %v1414_v18 = vsel %vm5688_vm3, %v1411_v52, %v1413_v43 }
  0x4a   : > { %5791 = vst [vmem:[#allocation23_spill] sm:$0xff] %v4250_v38  ;;  %v1508_v11 = vsel %vm4273_vm4, %v1414_v18, 0.0  ;;  %v1415_v52 = vrot.slane %v4034_v41, 2 }
  0x4c   : > { %v4299_v50 = vsel %vm5688_vm3, %v1413_v43, %v1415_v52  ;;  %v4315_v43 = vsel %vm5688_vm3, %v1415_v52, %v1417_v55  ;;  %v1419_v52 = vrot.slane %v4105_v1, 2 }
  0x4d   : > { %3542 = vmatmul.msk.f32.gmra.mxu1 %vm958_vm1, %v4233_v56  ;;  %v2221_v32 = vsel %vm4273_vm4, %v4315_v43, 0.0 }
  0x4e   : > { %3550 = vmatmul.msk.f32.gmra.mxu2 %vm958_vm1, %v4238_v2 }
  0x4f   : > { %3558 = vmatmul.msk.f32.gmra.mxu3 %vm958_vm1, %v4243_v59 }
  0x50   : > { %3534 = vmatmul.msk.f32.gmra.mxu0 %vm958_vm1, %v4250_v38 }
  0x55   : > { %3559 = vmatmul.msk.f32.vlgmr.msrb.gmra.mxu1 %vm958_vm1, %v824_v27 }
  0x56   : > { %3592 = vmatmul.msk.f32.vlgmr.msrb.gmra.mxu2 %vm958_vm1, %v1412_v0  ;;  %v1784_v0 = vsel %vm4287_vm5, %v4069_v53, 0.0 }
  0x57   : > { %3625 = vmatmul.msk.f32.vlgmr.msrb.gmra.mxu3 %vm958_vm1, %v1782_v14 }
  0x58   : > { %3658 = vmatmul.msk.f32.vlgmr.msrb.gmra.mxu0 %vm958_vm1, %v4061_v51  ;;  %v283_v51 = vadd.s32 24, %v4111_v9 }
  0x5a   : > { %v337_v14 = vand.u32 15, %v283_v51  ;;  %v285_v51 = vadd.s32 40, %v4111_v9 }
  0x5c   : > { %vm4310_vm6 = vcmp.ne.s32.totalorder %v337_v14, 15  ;;  %v351_v14 = vand.u32 15, %v285_v51 }
  0x5d   : > { %3560 = vmatmul.msk.f32.gmra.mxu1 %vm958_vm1, %v3975_v21  ;;  %v826_v21 = vsel %vm4287_vm5, %v4000_v28, 0.0  ;;  %v5796_v28 = vmov 0  ;;  %v1510_v18 = vsel %vm4310_vm6, %v4315_v43, 0.0 }
  0x5e   : > { %3593 = vmatmul.msk.f32.gmra.mxu2 %vm958_vm1, %v1508_v11  ;;  %v5797_v28 = vsel %vm4310_vm6, 4294967295, %v5796_v28  ;;  %vm4350_vm8 = vcmp.ne.s32.totalorder %v351_v14, 15  ;;  %v287_v14 = vadd.s32 56, %v4111_v9 }
  0x5f   : > { %3626 = vmatmul.msk.f32.gmra.mxu3 %vm958_vm1, %v4034_v41  ;;  %5798 = vst [vmem:[#allocation24_spill] sm:$0xff] %v5797_v28  ;;  %v1437_v28 = vrot.slane %v4125_v29, 2 }
  0x60   : > { %3659 = vmatmul.msk.f32.gmra.mxu0 %vm958_vm1, %v4097_v63  ;;  %v284_v63 = vadd.s32 32, %v4111_v9 }
  0x62   : > { %v344_v11 = vand.u32 15, %v284_v63  ;;  %v1421_v63 = vrot.slane %v4143_v40, 2 }
  0x64   : > { %vm4327_vm7 = vcmp.ne.s32.totalorder %v344_v11, 0  ;;  %v5802_v11 = vmov 0 }
  0x65   : > { %3561 = vmatmul.msk.f32.gmra.mxu1 %vm958_vm1, %v826_v21  ;;  %v5800_v31 = vsel %vm4327_vm7, 4294967295, %v5799_v31  ;;  %v4339_v21 = vsel %vm5688_vm3, %v1417_v55, %v1419_v52  ;;  %v5803_v11 = vsel %vm4350_vm8, 4294967295, %v5802_v11  ;;  %v4355_v55 = vsel %vm5688_vm3, %v1419_v52, %v1421_v63 }
  0x66   : > { %3594 = vmatmul.msk.f32.gmra.mxu2 %vm958_vm1, %v4299_v50  ;;  %5801 = vst [vmem:[#allocation25_spill] sm:$0xff] %v5800_v31  ;;  %v1512_v51 = vsel %vm4350_vm8, %v4355_v55, 0.0  ;;  %v1423_v52 = vrot.slane %v4196_v3, 2  ;;  %v288_v31 = vadd.s32 64, %v4111_v9 }
  0x67   : > { %3627 = vmatmul.msk.f32.gmra.mxu3 %vm958_vm1, %v1784_v0  ;;  %v1786_v0 = vsel %vm4327_vm7, %v4143_v40, 0.0  ;;  %5804 = vst [vmem:[#allocation26_spill] sm:$0xff] %v5803_v11  ;;  %v1425_v11 = vrot.slane %v3937_v5, 2 }
  0x68   : > { %3660 = vmatmul.msk.f32.gmra.mxu0 %vm958_vm1, %v4140_v39 }
  0x6d   : > { %3562 = vmatmul.msk.f32.gmra.mxu1 %vm958_vm1, %v4034_v41  ;;  %v828_v41 = vsel %vm4327_vm7, %v4069_v53, 0.0 }
  0x6e   : > { %3595 = vmatmul.msk.f32.gmra.mxu2 %vm958_vm1, %v1510_v18  ;;  %v286_v18 = vadd.s32 48, %v4111_v9 }
  0x6f   : > { %3628 = vmatmul.msk.f32.gmra.mxu3 %vm958_vm1, %v4105_v1 }
  0x70   : > { %3661 = vmatmul.msk.f32.gmra.mxu0 %vm958_vm1, %v4188_v54 }
  0x75   : > { %3563 = vmatmul.msk.f32.gmra.mxu1 %vm958_vm1, %v828_v41  ;;  %v358_v41 = vand.u32 15, %v286_v18  ;;  %v4379_v18 = vsel %vm5688_vm3, %v1421_v63, %v1423_v52  ;;  %v4395_v63 = vsel %vm5688_vm3, %v1423_v52, %v1425_v11  ;;  %v1427_v52 = vrot.slane %v3940_v6, 2 }
  0x76   : > { %3596 = vmatmul.msk.f32.gmra.mxu2 %vm958_vm1, %v4339_v21  ;;  %5808 = vst [vmem:[#allocation28_spill] sm:$0xff] %v4379_v18 }
  0x77   : > { %3629 = vmatmul.msk.f32.gmra.mxu3 %vm958_vm1, %v1786_v0  ;;  %vm4367_vm9 = vcmp.ne.s32.totalorder %v358_v41, 0  ;;  %v5805_v0 = vmov 0  ;;  %v365_v41 = vand.u32 15, %v287_v14  ;;  %5812 = vst [vmem:[#allocation30_spill] sm:$0xff] %v4395_v63 }
  0x78   : > { %3662 = vmatmul.msk.f32.gmra.mxu0 %vm958_vm1, %v4221_v4  ;;  %v5806_v0 = vsel %vm4367_vm9, 4294967295, %v5805_v0 }
  0x79   : > { %5807 = vst [vmem:[#allocation27_spill] sm:$0xff] %v5806_v0  ;;  %vm4390_vm10 = vcmp.ne.s32.totalorder %v365_v41, 15  ;;  %v289_v41 = vadd.s32 72, %v4111_v9  ;;  %v1429_v0 = vrot.slane %v3961_v17, 2 }
  0x7a   : > { %v1514_v14 = vsel %vm4390_vm10, %v4395_v63, 0.0 }
  0x7d   : > { %3564 = vmatmul.msk.f32.gmra.mxu1 %vm958_vm1, %v4105_v1  ;;  %v830_v1 = vsel %vm4367_vm9, %v4143_v40, 0.0  ;;  %v5809_v40 = vmov 0 }
  0x7e   : > { %3597 = vmatmul.msk.f32.gmra.mxu2 %vm958_vm1, %v1512_v51  ;;  %v1788_v51 = vsel %vm4367_vm9, %v3937_v5, 0.0  ;;  %v5810_v40 = vsel %vm4390_vm10, 4294967295, %v5809_v40 }
  0x7f   : > { %3630 = vmatmul.msk.f32.gmra.mxu3 %vm958_vm1, %v4196_v3  ;;  %5811 = vst [vmem:[#allocation29_spill] sm:$0xff] %v5810_v40  ;;  %v379_v40 = vand.u32 15, %v289_v41 }
  0x80   : > { %3663 = vmatmul.msk.f32.gmra.mxu0 %vm958_vm1, %v4250_v38  ;;  %v1433_v38 = vrot.slane %v4050_v48, 2 }
  0x81   : > { %vm4434_vm12 = vcmp.ne.s32.totalorder %v379_v40, 15 }
  0x85   : > { %3565 = vmatmul.msk.f32.gmra.mxu1 %vm958_vm1, %v830_v1  ;;  %v372_v1 = vand.u32 15, %v288_v31 }
  0x86   : > { %3598 = vmatmul.msk.f32.gmra.mxu2 %vm958_vm1, %v4379_v18 }
  0x87   : > { %3631 = vmatmul.msk.f32.gmra.mxu3 %vm958_vm1, %v1788_v51  ;;  %vm4407_vm11 = vcmp.ne.s32.totalorder %v372_v1, 0  ;;  %v5813_v51 = vmov 0 }
  0x88   : > { %3664 = vmatmul.msk.f32.gmra.mxu0 %vm958_vm1, %v3969_v19  ;;  %v5814_v51 = vsel %vm4407_vm11, 4294967295, %v5813_v51  ;;  %v1790_v1 = vsel %vm4407_vm11, %v3961_v17, 0.0 }
  0x89   : > { %5815 = vst [vmem:[#allocation31_spill] sm:$0xff] %v5814_v51  ;;  %v4439_v51 = vsel %vm5688_vm3, %v1427_v52, %v1429_v0 }
  0x8a   : > { %5820 = vst [vmem:[#allocation34_spill] sm:$0xff] %v4439_v51 }
  0x8d   : > { %3566 = vmatmul.msk.f32.gmra.mxu1 %vm958_vm1, %v4196_v3  ;;  %v832_v3 = vsel %vm4407_vm11, %v3937_v5, 0.0  ;;  %v290_v5 = vadd.s32 80, %v4111_v9 }
  0x8e   : > { %3599 = vmatmul.msk.f32.gmra.mxu2 %vm958_vm1, %v1514_v14  ;;  %v4421_v14 = vsel %vm5688_vm3, %v1425_v11, %v1427_v52  ;;  %v5817_v11 = vmov 0  ;;  %v5822_v52 = vmov 0 }
  0x8f   : > { %3632 = vmatmul.msk.f32.gmra.mxu3 %vm958_vm1, %v3940_v6  ;;  %5816 = vst [vmem:[#allocation32_spill] sm:$0xff] %v4421_v14  ;;  %v5818_v11 = vsel %vm4434_vm12, 4294967295, %v5817_v11  ;;  %v386_v40 = vand.u32 15, %v290_v5  ;;  %v291_v5 = vadd.s32 88, %v4111_v9 }
  0x90   : > { %3665 = vmatmul.msk.f32.gmra.mxu0 %vm958_vm1, %v4008_v33  ;;  %5819 = vst [vmem:[#allocation33_spill] sm:$0xff] %v5818_v11 }
  0x91   : > { %vm4459_vm13 = vcmp.ne.s32.totalorder %v386_v40, 0 }
  0x92   : > { %v4415_v31 = vpop.f32.mrf.mxu1  ;;  %v5823_v52 = vsel %vm4459_vm13, 4294967295, %v5822_v52 }
  0x93   : > { %5824 = vst [vmem:[#allocation36_spill] sm:$0xff] %v5823_v52 }
  0x95   : > { %3567 = vmatmul.msk.f32.gmra.mxu1 %vm958_vm1, %v832_v3  ;;  %v4428_v33 = vpop.f32.mrf.mxu0 }
  0x96   : > { %3600 = vmatmul.msk.f32.gmra.mxu2 %vm958_vm1, %v4421_v14 }
  0x97   : > { %3633 = vmatmul.msk.f32.gmra.mxu3 %vm958_vm1, %v1790_v1  ;;  %v1516_v1 = vsel %vm4434_vm12, %v4439_v51, 0.0  ;;  %v1792_v51 = vsel %vm4459_vm13, %v4050_v48, 0.0 }
  0x98   : > { %3666 = vmatmul.msk.f32.gmra.mxu0 %vm958_vm1, %v4041_v45 }
  0x99   : > { %v4443_v41 = vpop.f32.mrf.mxu2 }
  0x9a   : > { %v4445_v3 = vpop.f32.mrf.mxu3  ;;  %v4447_v19 = vpop.f32.mrf.mxu1 }
  0x9b   : > { %5821 = vst [vmem:[#allocation35_spill] sm:$0xff] %v4445_v3  ;;  %v1431_v3 = vrot.slane %v4017_v36, 2 }
  0x9d   : > { %3568 = vmatmul.msk.f32.gmra.mxu1 %vm958_vm1, %v3940_v6  ;;  %v4454_v14 = vpop.f32.mrf.mxu0  ;;  %v4477_v40 = vsel %vm5688_vm3, %v1429_v0, %v1431_v3  ;;  %v5827_v0 = vmov 0  ;;  %v4495_v52 = vsel %vm5688_vm3, %v1431_v3, %v1433_v38  ;;  %v5833_v3 = vmov 0 }
  0x9e   : > { %3601 = vmatmul.msk.f32.gmra.mxu2 %vm958_vm1, %v1516_v1  ;;  %v834_v1 = vsel %vm4459_vm13, %v3961_v17, 0.0  ;;  %5826 = vst [vmem:[#allocation38_spill] sm:$0xff] %v4477_v40  ;;  %v292_v17 = vadd.s32 96, %v4111_v9 }
  0x9f   : > { %3634 = vmatmul.msk.f32.gmra.mxu3 %vm958_vm1, %v4017_v36  ;;  %5830 = vst [vmem:[#allocation40_spill] sm:$0xff] %v4495_v52 }
  0xa0   : > { %3667 = vmatmul.msk.f32.gmra.mxu0 %vm958_vm1, %v4077_v57  ;;  %v393_v57 = vand.u32 15, %v291_v5 }
  0xa1   : > { %v4467_v11 = vpop.f32.mrf.mxu2 }
  0xa2   : > { %v4469_v6 = vpop.f32.mrf.mxu3  ;;  %v4471_v45 = vpop.f32.mrf.mxu1  ;;  %vm4490_vm14 = vcmp.ne.s32.totalorder %v393_v57, 15  ;;  %v400_v57 = vand.u32 15, %v292_v17  ;;  %v293_v17 = vadd.s32 104, %v4111_v9 }
  0xa3   : > { %5825 = vst [vmem:[#allocation37_spill] sm:$0xff] %v4469_v6  ;;  %v5828_v0 = vsel %vm4490_vm14, 4294967295, %v5827_v0 }
  0xa4   : > { %5829 = vst [vmem:[#allocation39_spill] sm:$0xff] %v5828_v0  ;;  %vm4515_vm15 = vcmp.ne.s32.totalorder %v400_v57, 0 }
  0xa5   : > { %3569 = vmatmul.msk.f32.gmra.mxu1 %vm958_vm1, %v834_v1  ;;  %v4484_v63 = vpop.f32.mrf.mxu0  ;;  %v5834_v3 = vsel %vm4515_vm15, 4294967295, %v5833_v3 }
  0xa6   : > { %3602 = vmatmul.msk.f32.gmra.mxu2 %vm958_vm1, %v4477_v40  ;;  %5835 = vst [vmem:[#allocation43_spill] sm:$0xff] %v5834_v3 }
  0xa7   : > { %3635 = vmatmul.msk.f32.gmra.mxu3 %vm958_vm1, %v1792_v51  ;;  %v1518_v51 = vsel %vm4490_vm14, %v4495_v52, 0.0  ;;  %v1794_v52 = vsel %vm4515_vm15, %v4125_v29, 0.0 }
  0xa8   : > { %3668 = vmatmul.msk.f32.gmra.mxu0 %vm958_vm1, %v4115_v16 }
  0xa9   : > { %v4499_v5 = vpop.f32.mrf.mxu2 }
  0xaa   : > { %5831 = vst [vmem:[#allocation41_spill] sm:$0xff] %v4499_v5  ;;  %v4501_v1 = vpop.f32.mrf.mxu3  ;;  %v4503_v6 = vpop.f32.mrf.mxu1 }
  0xab   : > { %5832 = vst [vmem:[#allocation42_spill] sm:$0xff] %v4501_v1  ;;  %v1435_v1 = vrot.slane %v4086_v60, 2 }
  0xad   : > { %3570 = vmatmul.msk.f32.gmra.mxu1 %vm958_vm1, %v4017_v36  ;;  %v4510_v40 = vpop.f32.mrf.mxu0  ;;  %v4533_v57 = vsel %vm5688_vm3, %v1433_v38, %v1435_v1  ;;  %v5839_v38 = vmov 0  ;;  %v4551_v3 = vsel %vm5688_vm3, %v1435_v1, %v1437_v28  ;;  %v5845_v1 = vmov 0 }
  0xae   : > { %3603 = vmatmul.msk.f32.gmra.mxu2 %vm958_vm1, %v1518_v51  ;;  %v836_v51 = vsel %vm4515_vm15, %v4050_v48, 0.0  ;;  %5838 = vst [vmem:[#allocation46_spill] sm:$0xff] %v4533_v57  ;;  %v294_v48 = vadd.s32 112, %v4111_v9  ;;  %vm5855_vm15 = vcmask 1045504  }
  0xaf   : > { %3636 = vmatmul.msk.f32.gmra.mxu3 %vm958_vm1, %v4086_v60  ;;  %5842 = vst [vmem:[#allocation48_spill] sm:$0xff] %v4551_v3 }
  0xb0   : > { %3669 = vmatmul.msk.f32.gmra.mxu0 %vm958_vm1, %v4168_v22  ;;  %v407_v22 = vand.u32 15, %v293_v17 }
  0xb1   : > { %v4523_v0 = vpop.f32.mrf.mxu2 }
  0xb2   : > { %5836 = vst [vmem:[#allocation44_spill] sm:$0xff] %v4523_v0  ;;  %v4525_v36 = vpop.f32.mrf.mxu3  ;;  %v4527_v16 = vpop.f32.mrf.mxu1  ;;  %vm4546_vm0 = vcmp.ne.s32.totalorder %v407_v22, 15  ;;  %v414_v22 = vand.u32 15, %v294_v48  ;;  %v295_v48 = vadd.s32 120, %v4111_v9 }
  0xb3   : > { %5837 = vst [vmem:[#allocation45_spill] sm:$0xff] %v4525_v36  ;;  %v5840_v38 = vsel %vm4546_vm0, 4294967295, %v5839_v38 }
  0xb4   : > { %5841 = vst [vmem:[#allocation47_spill] sm:$0xff] %v5840_v38  ;;  %vm4571_vm3 = vcmp.ne.s32.totalorder %v414_v22, 0 }
  0xb5   : > { %3571 = vmatmul.msk.f32.gmra.mxu1 %vm958_vm1, %v836_v51  ;;  %v4540_v0 = vpop.f32.mrf.mxu0  ;;  %v5846_v1 = vsel %vm4571_vm3, 4294967295, %v5845_v1 }
  0xb6   : > { %3604 = vmatmul.msk.f32.gmra.mxu2 %vm958_vm1, %v4533_v57  ;;  %5847 = vst [vmem:[#allocation51_spill] sm:$0xff] %v5846_v1 }
  0xb7   : > { %3637 = vmatmul.msk.f32.gmra.mxu3 %vm958_vm1, %v1794_v52  ;;  %v1520_v52 = vsel %vm4546_vm0, %v4551_v3, 0.0  ;;  %vm5850_vm0 = vcmask 1045504   ;;  %v1796_v3 = vsel %vm4571_vm3, %v3943_v7, 0.0 }
  0xb8   : > { %3670 = vmatmul.msk.f32.gmra.mxu0 %vm958_vm1, %v4207_v8 }
  0xb9   : > { %v4555_v17 = vpop.f32.mrf.mxu2 }
  0xba   : > { %5843 = vst [vmem:[#allocation49_spill] sm:$0xff] %v4555_v17  ;;  %v4557_v51 = vpop.f32.mrf.mxu3  ;;  %v4559_v36 = vpop.f32.mrf.mxu1  ;;  %v1441_v17 = vrot.slane %v3943_v7, 2 }
  0xbb   : > { %5844 = vst [vmem:[#allocation50_spill] sm:$0xff] %v4557_v51  ;;  %v1439_v51 = vrot.slane %v4177_v15, 2 }
  0xbd   : > { %3572 = vmatmul.msk.f32.gmra.mxu1 %vm958_vm1, %v4086_v60  ;;  %v4566_v57 = vpop.f32.mrf.mxu0  ;;  %v4589_v22 = vsel %vm5850_vm0, %v1437_v28, %v1439_v51  ;;  %v5852_v28 = vmov 0  ;;  %v4607_v1 = vsel %vm5855_vm15, %v1439_v51, %v1441_v17  ;;  %v5859_v51 = vmov 0 }
  0xbe   : > { %3605 = vmatmul.msk.f32.gmra.mxu2 %vm958_vm1, %v1520_v52  ;;  %v838_v52 = vsel %vm4571_vm3, %v4125_v29, 0.0  ;;  %5851 = vst [vmem:[#allocation54_spill] sm:$0xff] %v4589_v22  ;;  %v296_v29 = vadd.s32 128, %v4111_v9  ;;  %vm5946_vm3 = vcmask 1046528  }
  0xbf   : > { %3638 = vmatmul.msk.f32.gmra.mxu3 %vm958_vm1, %v4177_v15  ;;  %5856 = vst [vmem:[#allocation56_spill] sm:$0xff] %v4607_v1 }
  0xc0   : > { %3671 = vmatmul.msk.f32.gmra.mxu0 %vm958_vm1, %v4233_v56  ;;  %v421_v56 = vand.u32 15, %v295_v48 }
  0xc1   : > { %v4579_v38 = vpop.f32.mrf.mxu2 }
  0xc2   : > { %5848 = vst [vmem:[#allocation52_spill] sm:$0xff] %v4579_v38  ;;  %v4581_v60 = vpop.f32.mrf.mxu3  ;;  %v4583_v8 = vpop.f32.mrf.mxu1  ;;  %vm4602_vm0 = vcmp.ne.s32.totalorder %v421_v56, 15  ;;  %v428_v56 = vand.u32 15, %v296_v29  ;;  %v297_v29 = vadd.s32 136, %v4111_v9 }
  0xc3   : > { %5849 = vst [vmem:[#allocation53_spill] sm:$0xff] %v4581_v60  ;;  %v5853_v28 = vsel %vm4602_vm0, 4294967295, %v5852_v28 }
  0xc4   : > { %5854 = vst [vmem:[#allocation55_spill] sm:$0xff] %v5853_v28  ;;  %vm4627_vm15 = vcmp.ne.s32.totalorder %v428_v56, 0 }
  0xc5   : > { %3573 = vmatmul.msk.f32.gmra.mxu1 %vm958_vm1, %v838_v52  ;;  %v4596_v38 = vpop.f32.mrf.mxu0  ;;  %v5860_v51 = vsel %vm4627_vm15, 4294967295, %v5859_v51 }
  0xc6   : > { %3606 = vmatmul.msk.f32.gmra.mxu2 %vm958_vm1, %v4589_v22  ;;  %5861 = vst [vmem:[#allocation59_spill] sm:$0xff] %v5860_v51 }
  0xc7   : > { %3639 = vmatmul.msk.f32.gmra.mxu3 %vm958_vm1, %v1796_v3  ;;  %v1522_v3 = vsel %vm4602_vm0, %v4607_v1, 0.0  ;;  %vm5864_vm0 = vcmask 1045504   ;;  %v1798_v1 = vsel %vm4627_vm15, %v3972_v20, 0.0 }
  0xc8   : > { %3672 = vmatmul.msk.f32.gmra.mxu0 %vm958_vm1, %v3986_v24 }
  0xc9   : > { %v4611_v48 = vpop.f32.mrf.mxu2 }
  0xca   : > { %5857 = vst [vmem:[#allocation57_spill] sm:$0xff] %v4611_v48  ;;  %v4613_v52 = vpop.f32.mrf.mxu3  ;;  %v4615_v60 = vpop.f32.mrf.mxu1  ;;  %v435_v48 = vand.u32 15, %v297_v29 }
  0xcb   : > { %5858 = vst [vmem:[#allocation58_spill] sm:$0xff] %v4613_v52  ;;  %v1443_v52 = vrot.slane %v3948_v10, 2 }
  0xcd   : > { %3574 = vmatmul.msk.f32.gmra.mxu1 %vm958_vm1, %v4177_v15  ;;  %v4622_v22 = vpop.f32.mrf.mxu0  ;;  %v4643_v56 = vsel %vm5864_vm0, %v1441_v17, %v1443_v52  ;;  %vm4655_vm0 = vcmp.ne.s32.totalorder %v435_v48, 15 }
  0xce   : > { %3607 = vmatmul.msk.f32.gmra.mxu2 %vm958_vm1, %v1522_v3  ;;  %v840_v3 = vsel %vm4627_vm15, %v3943_v7, 0.0  ;;  %5865 = vst [vmem:[#allocation62_spill] sm:$0xff] %v4643_v56  ;;  %v298_v7 = vadd.s32 144, %v4111_v9  ;;  %vm5869_vm15 = vcmask 1045504  }
  0xcf   : > { %3640 = vmatmul.msk.f32.gmra.mxu3 %vm958_vm1, %v3948_v10 }
  0xd0   : > { %3673 = vmatmul.msk.f32.gmra.mxu0 %vm958_vm1, %v4011_v34  ;;  %v1445_v34 = vrot.slane %v3972_v20, 2  ;;  %v442_v5 = vand.u32 15, %v298_v7 }
  0xd1   : > { %v4635_v28 = vpop.f32.mrf.mxu2 }
  0xd2   : > { %5862 = vst [vmem:[#allocation60_spill] sm:$0xff] %v4635_v28  ;;  %v4637_v15 = vpop.f32.mrf.mxu3  ;;  %v1249_v24 = vpop.f32.mrf.mxu1  ;;  %v4660_v29 = vsel %vm5869_vm15, %v1443_v52, %v1445_v34  ;;  %vm4674_vm15 = vcmp.ne.s32.totalorder %v442_v5, 0  ;;  %v5871_v52 = vmov 0 }
  0xd3   : > { %5863 = vst [vmem:[#allocation61_spill] sm:$0xff] %v4637_v15  ;;  %v1250_v17 = vadd.f32 %v1249_v24, %v4428_v33  ;;  %v5866_v15 = vmov 0  ;;  %v5872_v52 = vsel %vm4674_vm15, 4294967295, %v5871_v52  ;;  %v842_v5 = vsel %vm4674_vm15, %v3972_v20, 0.0 }
  0xd4   : > { %v5867_v15 = vsel %vm4655_vm0, 4294967295, %v5866_v15  ;;  %v300_v20 = vadd.s32 160, %v4111_v9 }
  0xd5   : > { %3575 = vmatmul.msk.f32.gmra.mxu1 %vm958_vm1, %v840_v3  ;;  %v2086_v28 = vpop.f32.mrf.mxu0  ;;  %5868 = vst [vmem:[#allocation63_spill] sm:$0xff] %v5867_v15  ;;  %v1449_v15 = vrot.slane %v4053_v49, 2 }
  0xd6   : > { %3608 = vmatmul.msk.f32.gmra.mxu2 %vm958_vm1, %v4643_v56 }
  0xd7   : > { %3641 = vmatmul.msk.f32.gmra.mxu3 %vm958_vm1, %v1798_v1  ;;  %v1524_v1 = vsel %vm4655_vm0, %v4660_v29, 0.0  ;;  %vm5873_vm0 = vcmask 1045504  }
  0xd8   : > { %3674 = vmatmul.msk.f32.gmra.mxu0 %vm958_vm1, %v4044_v46 }
  0xd9   : > { %v1654_v3 = vpop.f32.mrf.mxu2 }
  0xda   : > { %v1929_v51 = vpop.f32.mrf.mxu3  ;;  %v1750_v18 = vadd.f32 %v1654_v3, %v1250_v17  ;;  %v1252_v56 = vpop.f32.mrf.mxu1  ;;  %v1447_v17 = vrot.slane %v4020_v37, 2 }
  0xdb   : > { %v1253_v7 = vadd.f32 %v1252_v56, %v4454_v14  ;;  %v1800_v14 = vsel %vm4674_vm15, %v4053_v49, 0.0  ;;  %vm5877_vm15 = vcmask 1045504  }
  0xdc   : > { %v2025_v24 = vadd.f32 %v1929_v51, %v1750_v18 }
  0xdd   : > { %3576 = vmatmul.msk.f32.gmra.mxu1 %vm958_vm1, %v3948_v10  ;;  %v2089_v33 = vpop.f32.mrf.mxu0  ;;  %v299_v10 = vadd.s32 152, %v4111_v9 }
  0xde   : > { %v4669_v48 = vadd.f32 %v2086_v28, %v2025_v24  ;;  %3609 = vmatmul.msk.f32.gmra.mxu2 %vm958_vm1, %v1524_v1  ;;  %v4687_v1 = vsel %vm5873_vm0, %v1445_v34, %v1447_v17 }
  0xdf   : > { %3642 = vmatmul.msk.f32.gmra.mxu3 %vm958_vm1, %v4020_v37  ;;  %v449_v24 = vand.u32 15, %v299_v10  ;;  %v4706_v10 = vsel %vm5877_vm15, %v1447_v17, %v1449_v15  ;;  %v5879_v17 = vmov 0 }
  0xe0   : > { %5870 = vst [vmem:[#allocation64_spill] sm:$0xff] %v4669_v48  ;;  %3675 = vmatmul.msk.f32.gmra.mxu0 %vm958_vm1, %v4080_v58 }
  0xe1   : > { %v1657_v18 = vpop.f32.mrf.mxu2  ;;  %vm4701_vm0 = vcmp.ne.s32.totalorder %v449_v24, 15 }
  0xe2   : > { %v1932_v28 = vpop.f32.mrf.mxu3  ;;  %v1751_v51 = vadd.f32 %v1657_v18, %v1253_v7  ;;  %v1255_v3 = vpop.f32.mrf.mxu1  ;;  %v5874_v18 = vmov 0 }
  0xe3   : > { %v1256_v34 = vadd.f32 %v1255_v3, %v4484_v63  ;;  %v5875_v18 = vsel %vm4701_vm0, 4294967295, %v5874_v18 }
  0xe4   : > { %v2026_v56 = vadd.f32 %v1932_v28, %v1751_v51  ;;  %5876 = vst [vmem:[#allocation65_spill] sm:$0xff] %v5875_v18  ;;  %v1453_v18 = vrot.slane %v4128_v30, 2 }
  0xe5   : > { %3577 = vmatmul.msk.f32.gmra.mxu1 %vm958_vm1, %v842_v5  ;;  %v2092_v48 = vpop.f32.mrf.mxu0 }
  0xe6   : > { %v4694_v7 = vadd.f32 %v2089_v33, %v2026_v56  ;;  %3610 = vmatmul.msk.f32.gmra.mxu2 %vm958_vm1, %v4687_v1  ;;  %v456_v56 = vand.u32 15, %v300_v20 }
  0xe7   : > { %3643 = vmatmul.msk.f32.gmra.mxu3 %vm958_vm1, %v1800_v14  ;;  %v1526_v14 = vsel %vm4701_vm0, %v4706_v10, 0.0  ;;  %vm5881_vm0 = vcmask 1045504  }
  0xe8   : > { %3676 = vmatmul.msk.f32.gmra.mxu0 %vm958_vm1, %v4119_v26  ;;  %vm4720_vm15 = vcmp.ne.s32.totalorder %v456_v56, 0 }
  0xe9   : > { %v1660_v33 = vpop.f32.mrf.mxu2  ;;  %v5880_v17 = vsel %vm4720_vm15, 4294967295, %v5879_v17 }
  0xea   : > { %v1935_v28 = vpop.f32.mrf.mxu3  ;;  %v1752_v51 = vadd.f32 %v1660_v33, %v1256_v34  ;;  %v1258_v5 = vpop.f32.mrf.mxu1  ;;  %v1451_v34 = vrot.slane %v4089_v61, 2 }
  0xeb   : > { %v1259_v20 = vadd.f32 %v1258_v5, %v4510_v40  ;;  %v1802_v40 = vsel %vm4720_vm15, %v4128_v30, 0.0 }
  0xec   : > { %v2027_v63 = vadd.f32 %v1935_v28, %v1752_v51  ;;  %v4733_v56 = vsel %vm5881_vm0, %v1449_v15, %v1451_v34 }
  0xed   : > { %3578 = vmatmul.msk.f32.gmra.mxu1 %vm958_vm1, %v4020_v37  ;;  %v2095_v3 = vpop.f32.mrf.mxu0  ;;  %v301_v37 = vadd.s32 168, %v4111_v9 }
  0xee   : > { %v4715_v24 = vadd.f32 %v2092_v48, %v2027_v63  ;;  %3611 = vmatmul.msk.f32.gmra.mxu2 %vm958_vm1, %v1526_v14  ;;  %v844_v14 = vsel %vm4720_vm15, %v4053_v49, 0.0  ;;  %v302_v49 = vadd.s32 176, %v4111_v9  ;;  %vm5885_vm15 = vcmask 1045504  }
  0xef   : > { %3644 = vmatmul.msk.f32.gmra.mxu3 %vm958_vm1, %v4089_v61  ;;  %v463_v63 = vand.u32 15, %v301_v37  ;;  %v4752_v37 = vsel %vm5885_vm15, %v1451_v34, %v1453_v18  ;;  %v5887_v34 = vmov 0 }
  0xf0   : > { %5878 = vst [vmem:[#allocation66_spill] sm:$0xff] %v4715_v24  ;;  %3677 = vmatmul.msk.f32.gmra.mxu0 %vm958_vm1, %v4171_v42 }
  0xf1   : > { %v1663_v48 = vpop.f32.mrf.mxu2  ;;  %vm4747_vm0 = vcmp.ne.s32.totalorder %v463_v63, 15 }
  0xf2   : > { %v1938_v33 = vpop.f32.mrf.mxu3  ;;  %v1753_v28 = vadd.f32 %v1663_v48, %v1259_v20  ;;  %v1261_v51 = vpop.f32.mrf.mxu1  ;;  %v5882_v48 = vmov 0 }
  0xf3   : > { %v1262_v15 = vadd.f32 %v1261_v51, %v4540_v0  ;;  %v5883_v48 = vsel %vm4747_vm0, 4294967295, %v5882_v48 }
  0xf4   : > { %v2028_v5 = vadd.f32 %v1938_v33, %v1753_v28  ;;  %5884 = vst [vmem:[#allocation67_spill] sm:$0xff] %v5883_v48  ;;  %v1457_v48 = vrot.slane %v3952_v12, 2 }
  0xf5   : > { %3579 = vmatmul.msk.f32.gmra.mxu1 %vm958_vm1, %v844_v14  ;;  %v2098_v24 = vpop.f32.mrf.mxu0 }
  0xf6   : > { %v4740_v20 = vadd.f32 %v2095_v3, %v2028_v5  ;;  %3612 = vmatmul.msk.f32.gmra.mxu2 %vm958_vm1, %v4733_v56  ;;  %v470_v5 = vand.u32 15, %v302_v49 }
  0xf7   : > { %3645 = vmatmul.msk.f32.gmra.mxu3 %vm958_vm1, %v1802_v40  ;;  %v1528_v40 = vsel %vm4747_vm0, %v4752_v37, 0.0  ;;  %vm5889_vm0 = vcmask 1045504  }
  0xf8   : > { %3678 = vmatmul.msk.f32.gmra.mxu0 %vm958_vm1, %v4210_v62  ;;  %vm4766_vm15 = vcmp.ne.s32.totalorder %v470_v5, 0 }
  0xf9   : > { %v1666_v3 = vpop.f32.mrf.mxu2  ;;  %v5888_v34 = vsel %vm4766_vm15, 4294967295, %v5887_v34 }
  0xfa   : > { %v1941_v33 = vpop.f32.mrf.mxu3  ;;  %v1754_v28 = vadd.f32 %v1666_v3, %v1262_v15  ;;  %v1264_v14 = vpop.f32.mrf.mxu1  ;;  %v1455_v15 = vrot.slane %v4180_v44, 2 }
  0xfb   : > { %v1265_v49 = vadd.f32 %v1264_v14, %v4566_v57  ;;  %v1804_v57 = vsel %vm4766_vm15, %v3952_v12, 0.0 }
  0xfc   : > { %v2029_v0 = vadd.f32 %v1941_v33, %v1754_v28  ;;  %v4779_v5 = vsel %vm5889_vm0, %v1453_v18, %v1455_v15 }
  0xfd   : > { %3580 = vmatmul.msk.f32.gmra.mxu1 %vm958_vm1, %v4089_v61  ;;  %v2101_v51 = vpop.f32.mrf.mxu0  ;;  %v303_v61 = vadd.s32 184, %v4111_v9 }
  0xfe   : > { %v4761_v63 = vadd.f32 %v2098_v24, %v2029_v0  ;;  %3613 = vmatmul.msk.f32.gmra.mxu2 %vm958_vm1, %v1528_v40  ;;  %v846_v40 = vsel %vm4766_vm15, %v4128_v30, 0.0  ;;  %v304_v30 = vadd.s32 192, %v4111_v9  ;;  %vm5893_vm15 = vcmask 1045504  }
  0xff   : > { %3646 = vmatmul.msk.f32.gmra.mxu3 %vm958_vm1, %v4180_v44  ;;  %v477_v0 = vand.u32 15, %v303_v61  ;;  %v4798_v61 = vsel %vm5893_vm15, %v1455_v15, %v1457_v48  ;;  %v5895_v15 = vmov 0 }
 0x100   : > { %5886 = vst [vmem:[#allocation68_spill] sm:$0xff] %v4761_v63  ;;  %3679 = vmatmul.msk.f32.gmra.mxu0 %vm958_vm1, %v4238_v2 }
 0x101   : > { %v1669_v24 = vpop.f32.mrf.mxu2  ;;  %vm4793_vm0 = vcmp.ne.s32.totalorder %v477_v0, 15 }
 0x102   : > { %v1944_v3 = vpop.f32.mrf.mxu3  ;;  %v1755_v33 = vadd.f32 %v1669_v24, %v1265_v49  ;;  %v1267_v28 = vpop.f32.mrf.mxu1  ;;  %v5890_v24 = vmov 0 }
 0x103   : > { %v1268_v18 = vadd.f32 %v1267_v28, %v4596_v38  ;;  %v5891_v24 = vsel %vm4793_vm0, 4294967295, %v5890_v24 }
 0x104   : > { %v2030_v14 = vadd.f32 %v1944_v3, %v1755_v33  ;;  %5892 = vst [vmem:[#allocation69_spill] sm:$0xff] %v5891_v24  ;;  %v1461_v24 = vrot.slane %v3979_v23, 2 }
 0x105   : > { %3581 = vmatmul.msk.f32.gmra.mxu1 %vm958_vm1, %v846_v40  ;;  %v2104_v63 = vpop.f32.mrf.mxu0 }
 0x106   : > { %v4786_v49 = vadd.f32 %v2101_v51, %v2030_v14  ;;  %3614 = vmatmul.msk.f32.gmra.mxu2 %vm958_vm1, %v4779_v5  ;;  %v484_v14 = vand.u32 15, %v304_v30 }
 0x107   : > { %3647 = vmatmul.msk.f32.gmra.mxu3 %vm958_vm1, %v1804_v57  ;;  %v1530_v57 = vsel %vm4793_vm0, %v4798_v61, 0.0  ;;  %vm5898_vm0 = vcmask 1045504  }
 0x108   : > { %3680 = vmatmul.msk.f32.gmra.mxu0 %vm958_vm1, %v3991_v25  ;;  %vm4812_vm15 = vcmp.ne.s32.totalorder %v484_v14, 0 }
 0x109   : > { %v1672_v51 = vpop.f32.mrf.mxu2  ;;  %v5896_v15 = vsel %vm4812_vm15, 4294967295, %v5895_v15 }
 0x10a   : > { %v1947_v3 = vpop.f32.mrf.mxu3  ;;  %v1756_v33 = vadd.f32 %v1672_v51, %v1268_v18  ;;  %v1270_v40 = vpop.f32.mrf.mxu1  ;;  %5897 = vst [vmem:[#allocation71_spill] sm:$0xff] %v5896_v15  ;;  %v1459_v18 = vrot.slane %v3955_v13, 2 }
 0x10b   : > { %v1271_v30 = vadd.f32 %v1270_v40, %v4622_v22  ;;  %v1806_v22 = vsel %vm4812_vm15, %v3979_v23, 0.0 }
 0x10c   : > { %v2031_v38 = vadd.f32 %v1947_v3, %v1756_v33  ;;  %v4825_v14 = vsel %vm5898_vm0, %v1457_v48, %v1459_v18 }
 0x10d   : > { %3582 = vmatmul.msk.f32.gmra.mxu1 %vm958_vm1, %v4180_v44  ;;  %v2107_v28 = vpop.f32.mrf.mxu0  ;;  %v305_v44 = vadd.s32 200, %v4111_v9 }
 0x10e   : > { %v4807_v0 = vadd.f32 %v2104_v63, %v2031_v38  ;;  %3615 = vmatmul.msk.f32.gmra.mxu2 %vm958_vm1, %v1530_v57  ;;  %v848_v57 = vsel %vm4812_vm15, %v3952_v12, 0.0  ;;  %v306_v12 = vadd.s32 208, %v4111_v9  ;;  %vm5903_vm15 = vcmask 1045504  }
 0x10f   : > { %3648 = vmatmul.msk.f32.gmra.mxu3 %vm958_vm1, %v3955_v13  ;;  %v491_v38 = vand.u32 15, %v305_v44  ;;  %v4844_v23 = vsel %vm5903_vm15, %v1459_v18, %v1461_v24 }
 0x110   : > { %5894 = vst [vmem:[#allocation70_spill] sm:$0xff] %v4807_v0  ;;  %3681 = vmatmul.msk.f32.gmra.mxu0 %vm958_vm1, %v4014_v35 }
 0x111   : > { %v1675_v63 = vpop.f32.mrf.mxu2  ;;  %vm4839_vm0 = vcmp.ne.s32.totalorder %v491_v38, 15  ;;  %v5906_v38 = vmov 0 }
 0x112   : > { %v1950_v51 = vpop.f32.mrf.mxu3  ;;  %v1757_v3 = vadd.f32 %v1675_v63, %v1271_v30  ;;  %v1273_v33 = vpop.f32.mrf.mxu1  ;;  %v5900_v63 = vmov 0 }
 0x113   : > { %v1274_v48 = vadd.f32 %v1273_v33, %v4415_v31  ;;  %v5901_v63 = vsel %vm4839_vm0, 4294967295, %v5900_v63 }
 0x114   : > { %v2032_v40 = vadd.f32 %v1950_v51, %v1757_v3  ;;  %5902 = vst [vmem:[#allocation73_spill] sm:$0xff] %v5901_v63 }
 0x115   : > { %3583 = vmatmul.msk.f32.gmra.mxu1 %vm958_vm1, %v848_v57  ;;  %v2110_v0 = vpop.f32.mrf.mxu0  ;;  %v1532_v57 = vsel %vm4839_vm0, %v4844_v23, 0.0  ;;  %vm5910_vm0 = vcmask 1045504  }
 0x116   : > { %v4832_v30 = vadd.f32 %v2107_v28, %v2032_v40  ;;  %3616 = vmatmul.msk.f32.gmra.mxu2 %vm958_vm1, %v4825_v14  ;;  %v5905_v40 = vld [vmem:[#allocation6_spill] sm:$0xff] }
 0x117   : > { %3649 = vmatmul.msk.f32.gmra.mxu3 %vm958_vm1, %v1806_v22  ;;  %v498_v22 = vand.u32 15, %v306_v12 }
 0x118   : > { %5899 = vst [vmem:[#allocation72_spill] sm:$0xff] %v4832_v30  ;;  %3682 = vmatmul.msk.f32.gmra.mxu0 %vm958_vm1, %v4047_v47 }
 0x119   : > { %v1678_v28 = vpop.f32.mrf.mxu2  ;;  %vm4858_vm15 = vcmp.ne.s32.totalorder %v498_v22, 0 }
 0x11a   : > { %v1953_v44 = vpop.f32.mrf.mxu3  ;;  %v1758_v51 = vadd.f32 %v1678_v28, %v1274_v48  ;;  %v1276_v3 = vpop.f32.mrf.mxu1  ;;  %v5907_v38 = vsel %vm4858_vm15, 4294967295, %v5906_v38  ;;  %v1463_v48 = vrot.slane %v5905_v40, 2  ;;  %v5909_v28 = vld [vmem:[#allocation10_spill] sm:$0xff] }
 0x11b   : > { %5908 = vst [vmem:[#allocation6_spill] sm:$0xff] %v5907_v38  ;;  %v1277_v12 = vadd.f32 %v1276_v3, %v4447_v19 }
 0x11c   : > { %v2033_v31 = vadd.f32 %v1953_v44, %v1758_v51  ;;  %v4874_v63 = vsel %vm5910_vm0, %v1461_v24, %v1463_v48  ;;  %v308_v24 = vadd.s32 224, %v4111_v9 }
 0x11d   : > { %3584 = vmatmul.msk.f32.gmra.mxu1 %vm958_vm1, %v3955_v13  ;;  %v2113_v33 = vpop.f32.mrf.mxu0  ;;  %v307_v13 = vadd.s32 216, %v4111_v9 }
 0x11e   : > { %v4853_v18 = vadd.f32 %v2110_v0, %v2033_v31  ;;  %3617 = vmatmul.msk.f32.gmra.mxu2 %vm958_vm1, %v1532_v57  ;;  %v4868_v31 = vld [vmem:[%s3934_s7 + $0xd0] sm:$0xff] }
 0x11f   : > { %3650 = vmatmul.msk.f32.gmra.mxu3 %vm958_vm1, %v5905_v40  ;;  %v850_v22 = vsel %vm4858_vm15, %v4868_v31, 0.0  ;;  %v5911_v40 = vld [vmem:[#allocation8_spill] sm:$0xff] }
 0x120   : > { %5904 = vst [vmem:[#allocation74_spill] sm:$0xff] %v4853_v18  ;;  %3683 = vmatmul.msk.f32.gmra.mxu0 %vm958_vm1, %v5909_v28  ;;  %v1808_v19 = vsel %vm4858_vm15, %v5911_v40, 0.0  ;;  %v505_v18 = vand.u32 15, %v307_v13  ;;  %v1465_v15 = vrot.slane %v5911_v40, 2  ;;  %vm5916_vm15 = vcmask 1045504  }
 0x121   : > { %v1681_v0 = vpop.f32.mrf.mxu2 }
 0x122   : > { %v1956_v44 = vpop.f32.mrf.mxu3  ;;  %v1759_v51 = vadd.f32 %v1681_v0, %v1277_v12  ;;  %v1279_v57 = vpop.f32.mrf.mxu1  ;;  %vm4888_vm0 = vcmp.ne.s32.totalorder %v505_v18, 15  ;;  %v4893_v13 = vsel %vm5916_vm15, %v1463_v48, %v1465_v15  ;;  %v4901_v18 = vld [vmem:[%s3934_s7 + $0xd8] sm:$0xff] }
 0x123   : > { %v1280_v38 = vadd.f32 %v1279_v57, %v4471_v45 }
 0x124   : > { %v2034_v3 = vadd.f32 %v1956_v44, %v1759_v51  ;;  %v5913_v44 = vmov 0  ;;  %v5917_v51 = vld [vmem:[#allocation13_spill] sm:$0xff] }
 0x125   : > { %3585 = vmatmul.msk.f32.gmra.mxu1 %vm958_vm1, %v850_v22  ;;  %v2116_v12 = vpop.f32.mrf.mxu0  ;;  %v5914_v44 = vsel %vm4888_vm0, 4294967295, %v5913_v44 }
 0x126   : > { %v4881_v0 = vadd.f32 %v2113_v33, %v2034_v3  ;;  %3618 = vmatmul.msk.f32.gmra.mxu2 %vm958_vm1, %v4874_v63  ;;  %5915 = vst [vmem:[#allocation75_spill] sm:$0xff] %v5914_v44 }
 0x127   : > { %3651 = vmatmul.msk.f32.gmra.mxu3 %vm958_vm1, %v1808_v19  ;;  %v1534_v19 = vsel %vm4888_vm0, %v4893_v13, 0.0  ;;  %vm5925_vm0 = vcmask 1045504  }
 0x128   : > { %5912 = vst [vmem:[#allocation8_spill] sm:$0xff] %v4881_v0  ;;  %3684 = vmatmul.msk.f32.gmra.mxu0 %vm958_vm1, %v5917_v51  ;;  %v512_v0 = vand.u32 15, %v308_v24  ;;  %v5919_v51 = vld [vmem:[#allocation11_spill] sm:$0xff] }
 0x129   : > { %v1684_v33 = vpop.f32.mrf.mxu2  ;;  %v1467_v24 = vrot.slane %v5919_v51, 2 }
 0x12a   : > { %v1959_v22 = vpop.f32.mrf.mxu3  ;;  %v1760_v40 = vadd.f32 %v1684_v33, %v1280_v38  ;;  %v1282_v3 = vpop.f32.mrf.mxu1  ;;  %vm4910_vm15 = vcmp.ne.s32.totalorder %v512_v0, 0  ;;  %v5920_v38 = vmov 0 }
 0x12b   : > { %v5921_v38 = vsel %vm4910_vm15, 4294967295, %v5920_v38  ;;  %v1283_v33 = vadd.f32 %v1282_v3, %v4503_v6  ;;  %v4926_v30 = vsel %vm5925_vm0, %v1465_v15, %v1467_v24  ;;  %v310_v15 = vadd.s32 240, %v4111_v9 }
 0x12c   : > { %v2035_v45 = vadd.f32 %v1959_v22, %v1760_v40  ;;  %5922 = vst [vmem:[#allocation11_spill] sm:$0xff] %v5921_v38  ;;  %v5923_v22 = vld [vmem:[#allocation16_spill] sm:$0xff]  ;;  %v309_v40 = vadd.s32 232, %v4111_v9 }
 0x12d   : > { %3586 = vmatmul.msk.f32.gmra.mxu1 %vm958_vm1, %v4901_v18  ;;  %v2119_v48 = vpop.f32.mrf.mxu0  ;;  %5926 = vst [vmem:[#allocation78_spill] sm:$0xff] %v4926_v30 }
 0x12e   : > { %v4905_v57 = vadd.f32 %v2116_v12, %v2035_v45  ;;  %3619 = vmatmul.msk.f32.gmra.mxu2 %vm958_vm1, %v1534_v19 }
 0x12f   : > { %3652 = vmatmul.msk.f32.gmra.mxu3 %vm958_vm1, %v5919_v51  ;;  %v5927_v51 = vld [vmem:[#allocation14_spill] sm:$0xff] }
 0x130   : > { %5918 = vst [vmem:[#allocation76_spill] sm:$0xff] %v4905_v57  ;;  %3685 = vmatmul.msk.f32.gmra.mxu0 %vm958_vm1, %v5923_v22  ;;  %v4920_v57 = vld [vmem:[%s3934_s7 + $0xe0] sm:$0xff]  ;;  %v1810_v6 = vsel %vm4910_vm15, %v5927_v51, 0.0  ;;  %v519_v22 = vand.u32 15, %v309_v40  ;;  %v1469_v28 = vrot.slane %v5927_v51, 2 }
 0x131   : > { %v1687_v12 = vpop.f32.mrf.mxu2  ;;  %5924 = vst [vmem:[#allocation77_spill] sm:$0xff] %v4920_v57  ;;  %v852_v0 = vsel %vm4910_vm15, %v4920_v57, 0.0  ;;  %vm5932_vm15 = vcmask 1045504  }
 0x132   : > { %v1962_v45 = vpop.f32.mrf.mxu3  ;;  %v1761_v44 = vadd.f32 %v1687_v12, %v1283_v33  ;;  %v1285_v19 = vpop.f32.mrf.mxu1  ;;  %vm4940_vm0 = vcmp.ne.s32.totalorder %v519_v22, 15  ;;  %v4945_v40 = vsel %vm5932_vm15, %v1467_v24, %v1469_v28 }
 0x133   : > { %v1286_v38 = vadd.f32 %v1285_v19, %v4527_v16  ;;  %5933 = vst [vmem:[#allocation80_spill] sm:$0xff] %v4945_v40  ;;  %v526_v16 = vand.u32 15, %v310_v15  ;;  %v4953_v19 = vld [vmem:[%s3934_s7 + $0xe8] sm:$0xff] }
 0x134   : > { %v2036_v3 = vadd.f32 %v1962_v45, %v1761_v44  ;;  %v5929_v44 = vmov 0  ;;  %v5934_v45 = vld [vmem:[#allocation19_spill] sm:$0xff]  ;;  %5935 = vst [vmem:[#allocation81_spill] sm:$0xff] %v4953_v19 }
 0x135   : > { %3587 = vmatmul.msk.f32.gmra.mxu1 %vm958_vm1, %v852_v0  ;;  %v2122_v33 = vpop.f32.mrf.mxu0  ;;  %v5930_v44 = vsel %vm4940_vm0, 4294967295, %v5929_v44  ;;  %vm4965_vm15 = vcmp.ne.s32.totalorder %v526_v16, 0  ;;  %v4976_v16 = vld [vmem:[%s3934_s7 + $0xf0] sm:$0xff] }
 0x136   : > { %v4933_v12 = vadd.f32 %v2119_v48, %v2036_v3  ;;  %3620 = vmatmul.msk.f32.gmra.mxu2 %vm958_vm1, %v4926_v30  ;;  %5931 = vst [vmem:[#allocation79_spill] sm:$0xff] %v5930_v44 }
 0x137   : > { %3653 = vmatmul.msk.f32.gmra.mxu3 %vm958_vm1, %v1810_v6  ;;  %v1536_v6 = vsel %vm4940_vm0, %v4945_v40, 0.0  ;;  %5942 = vst [vmem:[#allocation83_spill] sm:$0xff] %v4976_v16  ;;  %vm5943_vm0 = vcmask 1045504  }
 0x138   : > { %5928 = vst [vmem:[#allocation14_spill] sm:$0xff] %v4933_v12  ;;  %3686 = vmatmul.msk.f32.gmra.mxu0 %vm958_vm1, %v5934_v45  ;;  %v5937_v45 = vld [vmem:[#allocation17_spill] sm:$0xff] }
 0x139   : > { %v1690_v48 = vpop.f32.mrf.mxu2  ;;  %v1471_v15 = vrot.slane %v5937_v45, 2 }
 0x13a   : > { %v1965_v0 = vpop.f32.mrf.mxu3  ;;  %v1762_v51 = vadd.f32 %v1690_v48, %v1286_v38  ;;  %v1288_v3 = vpop.f32.mrf.mxu1  ;;  %v4963_v38 = vld [vmem:[%s3934_s7 + $0x108] sm:$0xff]  ;;  %v5938_v48 = vmov 0 }
 0x13b   : > { %v5939_v48 = vsel %vm4965_vm15, 4294967295, %v5938_v48  ;;  %v2061_v44 = vrot.slane %v4963_v38, 1 }
 0x13c   : > { %v2037_v22 = vadd.f32 %v1965_v0, %v1762_v51  ;;  %5940 = vst [vmem:[#allocation17_spill] sm:$0xff] %v5939_v48  ;;  %v1289_v0 = vadd.f32 %v1288_v3, %v4559_v36  ;;  %v5941_v51 = vld [vmem:[#allocation22_spill] sm:$0xff]  ;;  %v4982_v36 = vsel %vm5943_vm0, %v1469_v28, %v1471_v15  ;;  %v5944_v3 = vld [vmem:[#allocation20_spill] sm:$0xff] }
 0x13d   : > { %3588 = vmatmul.msk.f32.gmra.mxu1 %vm958_vm1, %v4953_v19  ;;  %v2125_v24 = vpop.f32.mrf.mxu0  ;;  %v5760_v30 = vrot.slane %v5944_v3, 2  ;;  %v5000_v28 = vld [vmem:[%s3934_s7 + $0x110] sm:$0xff] }
 0x13e   : > { %v4957_v12 = vadd.f32 %v2122_v33, %v2037_v22  ;;  %3621 = vmatmul.msk.f32.gmra.mxu2 %vm958_vm1, %v1536_v6  ;;  %v311_v33 = vadd.s32 248, %v4111_v9  ;;  %v1812_v9 = vsel %vm4965_vm15, %v5944_v3, 0.0 }
 0x13f   : > { %3654 = vmatmul.msk.f32.gmra.mxu3 %vm958_vm1, %v5937_v45  ;;  %v854_v45 = vsel %vm4965_vm15, %v4976_v16, 0.0 }
 0x140   : > { %5936 = vst [vmem:[#allocation82_spill] sm:$0xff] %v4957_v12  ;;  %3687 = vmatmul.msk.f32.gmra.mxu0 %vm958_vm1, %v5941_v51  ;;  %v533_v40 = vand.u32 15, %v311_v33  ;;  %v5948_v33 = vmov 0 }
 0x141   : > { %v1693_v22 = vpop.f32.mrf.mxu2 }
 0x142   : > { %v1968_v6 = vpop.f32.mrf.mxu3  ;;  %v1763_v12 = vadd.f32 %v1693_v22, %v1289_v0  ;;  %v1291_v19 = vpop.f32.mrf.mxu1  ;;  %v5945_v22 = vrot.slane %v5944_v3, 1  ;;  %vm5003_vm0 = vcmp.ne.s32.totalorder %v533_v40, 15 }
 0x143   : > { %v5949_v33 = vsel %vm5003_vm0, 4294967295, %v5948_v33 }
 0x144   : > { %v2038_v51 = vadd.f32 %v1968_v6, %v1763_v12  ;;  %v4992_v57 = vsel %vm5946_vm3, %v5945_v22, %v2061_v44  ;;  %v1292_v12 = vadd.f32 %v1291_v19, %v4583_v8  ;;  %5950 = vst [vmem:[#allocation84_spill] sm:$0xff] %v5949_v33  ;;  %vm5951_vm3 = vcmask 1045504   ;;  %v5019_v19 = vld [vmem:[%s3934_s7 + $0xf8] sm:$0xff] }
 0x145   : > { %3589 = vmatmul.msk.f32.gmra.mxu1 %vm958_vm1, %v854_v45  ;;  %v2128_v0 = vpop.f32.mrf.mxu0  ;;  %v5010_v6 = vsel %vm5951_vm3, %v1471_v15, %v5760_v30  ;;  %v5764_v45 = vrot.slane %v5000_v28, 1  ;;  %vm5952_vm3 = vcmask 1046528  }
 0x146   : > { %v4994_v16 = vadd.f32 %v2125_v24, %v2038_v51  ;;  %3622 = vmatmul.msk.f32.gmra.mxu2 %vm958_vm1, %v4982_v36  ;;  %v1538_v8 = vsel %vm5003_vm0, %v5010_v6, 0.0 }
 0x147   : > { %3655 = vmatmul.msk.f32.gmra.mxu3 %vm958_vm1, %v1812_v9  ;;  %v5026_v30 = vsel %vm5952_vm3, %v2061_v44, %v5764_v45  ;;  %v3852_v45 = vld [vmem:[%s3934_s7 + $0x70] sm:$0xff] }
 0x148   : > { %5947 = vst [vmem:[#allocation20_spill] sm:$0xff] %v4994_v16  ;;  %3688 = vmatmul.msk.f32.gmra.mxu0 %vm958_vm1, %v4992_v57 }
 0x149   : > { %v1696_v24 = vpop.f32.mrf.mxu2 }
 0x14a   : > { %v1971_v51 = vpop.f32.mrf.mxu3  ;;  %v1764_v9 = vadd.f32 %v1696_v24, %v1292_v12  ;;  %v1294_v22 = vpop.f32.mrf.mxu1 }
 0x14b   : > { %v1295_v12 = vadd.f32 %v1294_v22, %v4615_v60 }
 0x14c   : > { %v2039_v40 = vadd.f32 %v1971_v51, %v1764_v9 }
 0x14d   : > { %3590 = vmatmul.msk.f32.gmra.mxu1 %vm958_vm1, %v5019_v19  ;;  %v2131_v15 = vpop.f32.mrf.mxu0 }
 0x14e   : > { %v5028_v48 = vadd.f32 %v2128_v0, %v2039_v40  ;;  %3623 = vmatmul.msk.f32.gmra.mxu2 %vm958_vm1, %v1538_v8  ;;  %v5953_v8 = vsel %vm4133_vm2, %v4069_v53, 0.0 }
 0x14f   : > { %3656 = vmatmul.msk.f32.gmra.mxu3 %vm958_vm1, %v4963_v38 }
 0x150   : > { %3689 = vmatmul.msk.f32.gmra.mxu0 %vm958_vm1, %v5026_v30 }
 0x151   : > { %v1699_v24 = vpop.f32.mrf.mxu2 }
 0x152   : > { %v1974_v51 = vpop.f32.mrf.mxu3  ;;  %v1765_v9 = vadd.f32 %v1699_v24, %v1295_v12  ;;  %v1297_v33 = vpop.f32.mrf.mxu1 }
 0x153   : > { %v1298_v60 = vadd.f32 %v1297_v33, %v4443_v41  ;;  %v3843_v33 = vld [vmem:[%s3934_s7 + $0x28] sm:$0xff] }
 0x154   : > { %v2040_v16 = vadd.f32 %v1974_v51, %v1765_v9 }
 0x155   : > { %3691 = vmatmul.msk.f32.vlgmr.msra.gmra.mxu1 %vm958_vm1, %v4299_v50  ;;  %v2134_v44 = vpop.f32.mrf.mxu0 }
 0x156   : > { %v5038_v0 = vadd.f32 %v2131_v15, %v2040_v16  ;;  %3724 = vmatmul.msk.f32.vlgmr.msra.gmra.mxu2 %vm958_vm1, %v5953_v8  ;;  %v3844_v8 = vld [vmem:[%s3934_s7 + $0x30] sm:$0xff] }
 0x157   : > { %3757 = vmatmul.msk.f32.vlgmr.msra.gmra.mxu3 %vm958_vm1, %v4140_v39  ;;  %v2934_v39 = vsel %vm4273_vm4, %v4355_v55, 0.0  ;;  %v2497_v59 = vsel %vm4287_vm5, %v3844_v8, 0.0 }
 0x158   : > { %3790 = vmatmul.msk.f32.vlgmr.msra.gmra.mxu0 %vm958_vm1, %v4339_v21 }
 0x159   : > { %v1702_v22 = vpop.f32.mrf.mxu2 }
 0x15a   : > { %v1977_v50 = vpop.f32.mrf.mxu3  ;;  %v1766_v40 = vadd.f32 %v1702_v22, %v1298_v60  ;;  %v1300_v12 = vpop.f32.mrf.mxu1 }
 0x15b   : > { %v1301_v15 = vadd.f32 %v1300_v12, %v4467_v11 }
 0x15c   : > { %v2041_v53 = vadd.f32 %v1977_v50, %v1766_v40  ;;  %v5955_v50 = vld [vmem:[#allocation28_spill] sm:$0xff] }
 0x15d   : > { %3692 = vmatmul.msk.f32.gmra.mxu1 %vm958_vm1, %v2221_v32  ;;  %v2137_v16 = vpop.f32.mrf.mxu0 }
 0x15e   : > { %v5057_v41 = vadd.f32 %v2134_v44, %v2041_v53  ;;  %3725 = vmatmul.msk.f32.gmra.mxu2 %vm958_vm1, %v3843_v33  ;;  %v2223_v53 = vsel %vm4310_vm6, %v4355_v55, 0.0  ;;  %v5957_v33 = vld [vmem:[#allocation30_spill] sm:$0xff] }
 0x15f   : > { %3758 = vmatmul.msk.f32.gmra.mxu3 %vm958_vm1, %v4188_v54  ;;  %v5954_v54 = vld [vmem:[#allocation41_spill] sm:$0xff] }
 0x160   : > { %3791 = vmatmul.msk.f32.gmra.mxu0 %vm958_vm1, %v2934_v39 }
 0x161   : > { %v1705_v43 = vpop.f32.mrf.mxu2 }
 0x162   : > { %v1980_v24 = vpop.f32.mrf.mxu3  ;;  %v1767_v51 = vadd.f32 %v1705_v43, %v1301_v15  ;;  %v1303_v9 = vpop.f32.mrf.mxu1  ;;  %v3845_v43 = vld [vmem:[%s3934_s7 + $0x38] sm:$0xff] }
 0x163   : > { %v1304_v11 = vadd.f32 %v1303_v9, %v5954_v54  ;;  %v3846_v54 = vld [vmem:[%s3934_s7 + $0x40] sm:$0xff] }
 0x164   : > { %v2042_v44 = vadd.f32 %v1980_v24, %v1767_v51  ;;  %v5958_v24 = vld [vmem:[#allocation23_spill] sm:$0xff]  ;;  %v5959_v51 = vld [vmem:[#allocation44_spill] sm:$0xff] }
 0x165   : > { %3693 = vmatmul.msk.f32.gmra.mxu1 %vm958_vm1, %v4339_v21  ;;  %v2140_v60 = vpop.f32.mrf.mxu0  ;;  %v5962_v21 = vld [vmem:[#allocation49_spill] sm:$0xff] }
 0x166   : > { %v5070_v22 = vadd.f32 %v2137_v16, %v2042_v44  ;;  %3726 = vmatmul.msk.f32.gmra.mxu2 %vm958_vm1, %v2497_v59 }
 0x167   : > { %3759 = vmatmul.msk.f32.gmra.mxu3 %vm958_vm1, %v4221_v4  ;;  %v2936_v4 = vsel %vm4310_vm6, %v5957_v33, 0.0 }
 0x168   : > { %3792 = vmatmul.msk.f32.gmra.mxu0 %vm958_vm1, %v5955_v50 }
 0x169   : > { %v1708_v27 = vpop.f32.mrf.mxu2 }
 0x16a   : > { %v1983_v40 = vpop.f32.mrf.mxu3  ;;  %v1768_v12 = vadd.f32 %v1708_v27, %v1304_v11  ;;  %v1306_v32 = vpop.f32.mrf.mxu1  ;;  %v2499_v27 = vsel %vm4327_vm7, %v3846_v54, 0.0  ;;  %v3847_v54 = vld [vmem:[%s3934_s7 + $0x48] sm:$0xff]  ;;  %v5966_v11 = vld [vmem:[#allocation4_spill] sm:$0xff] }
 0x16b   : > { %v1307_v9 = vadd.f32 %v1306_v32, %v5959_v51  ;;  %v5961_v32 = vld [vmem:[#allocation2_spill] sm:$0xff] }
 0x16c   : > { %v2043_v16 = vadd.f32 %v1983_v40, %v1768_v12 }
 0x16d   : > { %3694 = vmatmul.msk.f32.gmra.mxu1 %vm958_vm1, %v2223_v53  ;;  %v2143_v39 = vpop.f32.mrf.mxu0 }
 0x16e   : > { %v5085_v15 = vadd.f32 %v2140_v60, %v2043_v16  ;;  %3727 = vmatmul.msk.f32.gmra.mxu2 %vm958_vm1, %v3845_v43  ;;  %v5963_v16 = vld [vmem:[#allocation32_spill] sm:$0xff] }
 0x16f   : > { %3760 = vmatmul.msk.f32.gmra.mxu3 %vm958_vm1, %v5958_v24 }
 0x170   : > { %3793 = vmatmul.msk.f32.gmra.mxu0 %vm958_vm1, %v2936_v4 }
 0x171   : > { %v1711_v55 = vpop.f32.mrf.mxu2 }
 0x172   : > { %v1986_v8 = vpop.f32.mrf.mxu3  ;;  %v1769_v59 = vadd.f32 %v1711_v55, %v1307_v9  ;;  %v1309_v44 = vpop.f32.mrf.mxu1 }
 0x173   : > { %v1310_v53 = vadd.f32 %v1309_v44, %v5962_v21 }
 0x174   : > { %v2044_v60 = vadd.f32 %v1986_v8, %v1769_v59  ;;  %v5965_v8 = vld [vmem:[#allocation34_spill] sm:$0xff] }
 0x175   : > { %3695 = vmatmul.msk.f32.gmra.mxu1 %vm958_vm1, %v5955_v50  ;;  %v2146_v40 = vpop.f32.mrf.mxu0  ;;  %v2938_v59 = vsel %vm4350_vm8, %v5965_v8, 0.0 }
 0x176   : > { %v5098_v12 = vadd.f32 %v2143_v39, %v2044_v60  ;;  %3728 = vmatmul.msk.f32.gmra.mxu2 %vm958_vm1, %v2499_v27  ;;  %v2225_v39 = vsel %vm4350_vm8, %v5957_v33, 0.0  ;;  %v5967_v27 = vld [vmem:[#allocation52_spill] sm:$0xff] }
 0x177   : > { %3761 = vmatmul.msk.f32.gmra.mxu3 %vm958_vm1, %v5961_v32 }
 0x178   : > { %3794 = vmatmul.msk.f32.gmra.mxu0 %vm958_vm1, %v5963_v16 }
 0x179   : > { %v1714_v4 = vpop.f32.mrf.mxu2 }
 0x17a   : > { %v1989_v43 = vpop.f32.mrf.mxu3  ;;  %v1770_v24 = vadd.f32 %v1714_v4, %v1310_v53  ;;  %v1312_v51 = vpop.f32.mrf.mxu1  ;;  %v3848_v4 = vld [vmem:[%s3934_s7 + $0x50] sm:$0xff] }
 0x17b   : > { %v1313_v60 = vadd.f32 %v1312_v51, %v5967_v27  ;;  %v5969_v51 = vld [vmem:[#allocation7_spill] sm:$0xff] }
 0x17c   : > { %v2045_v9 = vadd.f32 %v1989_v43, %v1770_v24  ;;  %v2501_v24 = vsel %vm4367_vm9, %v3848_v4, 0.0  ;;  %v5973_v4 = vld [vmem:[#allocation40_spill] sm:$0xff]  ;;  %vm6016_vm9 = vnez %v5872_v52 }
 0x17d   : > { %3696 = vmatmul.msk.f32.gmra.mxu1 %vm958_vm1, %v2225_v39  ;;  %v2149_v55 = vpop.f32.mrf.mxu0 }
 0x17e   : > { %v5113_v44 = vadd.f32 %v2146_v40, %v2045_v9  ;;  %3729 = vmatmul.msk.f32.gmra.mxu2 %vm958_vm1, %v3847_v54  ;;  %v5970_v9 = vld [vmem:[#allocation57_spill] sm:$0xff]  ;;  %v5971_v54 = vld [vmem:[#allocation38_spill] sm:$0xff] }
 0x17f   : > { %3762 = vmatmul.msk.f32.gmra.mxu3 %vm958_vm1, %v5966_v11 }
 0x180   : > { %3795 = vmatmul.msk.f32.gmra.mxu0 %vm958_vm1, %v2938_v59 }
 0x181   : > { %v1717_v33 = vpop.f32.mrf.mxu2 }
 0x182   : > { %v1992_v32 = vpop.f32.mrf.mxu3  ;;  %v1771_v21 = vadd.f32 %v1717_v33, %v1313_v60  ;;  %v1315_v53 = vpop.f32.mrf.mxu1 }
 0x183   : > { %v1316_v59 = vadd.f32 %v1315_v53, %v5970_v9  ;;  %v2940_v53 = vsel %vm4390_vm10, %v5973_v4, 0.0 }
 0x184   : > { %v2046_v40 = vadd.f32 %v1992_v32, %v1771_v21 }
 0x185   : > { %3697 = vmatmul.msk.f32.gmra.mxu1 %vm958_vm1, %v5963_v16  ;;  %v2152_v50 = vpop.f32.mrf.mxu0 }
 0x186   : > { %v5126_v39 = vadd.f32 %v2149_v55, %v2046_v40  ;;  %3730 = vmatmul.msk.f32.gmra.mxu2 %vm958_vm1, %v2501_v24  ;;  %v2227_v55 = vsel %vm4390_vm10, %v5965_v8, 0.0  ;;  %v3849_v24 = vld [vmem:[%s3934_s7 + $0x58] sm:$0xff] }
 0x187   : > { %3763 = vmatmul.msk.f32.gmra.mxu3 %vm958_vm1, %v5969_v51  ;;  %v5974_v40 = vld [vmem:[#allocation9_spill] sm:$0xff]  ;;  %v5975_v51 = vld [vmem:[#allocation60_spill] sm:$0xff] }
 0x188   : > { %3796 = vmatmul.msk.f32.gmra.mxu0 %vm958_vm1, %v5971_v54 }
 0x189   : > { %v1720_v11 = vpop.f32.mrf.mxu2 }
 0x18a   : > { %v1995_v27 = vpop.f32.mrf.mxu3  ;;  %v1772_v60 = vadd.f32 %v1720_v11, %v1316_v59  ;;  %v1318_v33 = vpop.f32.mrf.mxu1 }
 0x18b   : > { %v1319_v9 = vadd.f32 %v1318_v33, %v5975_v51  ;;  %v5978_v33 = vld [vmem:[#allocation12_spill] sm:$0xff]  ;;  %v5980_v51 = vld [vmem:[#allocation46_spill] sm:$0xff] }
 0x18c   : > { %v2047_v32 = vadd.f32 %v1995_v27, %v1772_v60  ;;  %v3850_v60 = vld [vmem:[%s3934_s7 + $0x60] sm:$0xff] }
 0x18d   : > { %3698 = vmatmul.msk.f32.gmra.mxu1 %vm958_vm1, %v2227_v55  ;;  %v2155_v21 = vpop.f32.mrf.mxu0  ;;  %v2503_v16 = vsel %vm4407_vm11, %v3850_v60, 0.0  ;;  %vm6020_vm11 = vnez %v5880_v17 }
 0x18e   : > { %v5141_v43 = vadd.f32 %v2152_v50, %v2047_v32  ;;  %3731 = vmatmul.msk.f32.gmra.mxu2 %vm958_vm1, %v3849_v24 }
 0x18f   : > { %3764 = vmatmul.msk.f32.gmra.mxu3 %vm958_vm1, %v5974_v40 }
 0x190   : > { %3797 = vmatmul.msk.f32.gmra.mxu0 %vm958_vm1, %v2940_v53  ;;  %v5979_v53 = vld [vmem:[#allocation35_spill] sm:$0xff] }
 0x191   : > { %v1723_v8 = vpop.f32.mrf.mxu2 }
 0x192   : > { %v1998_v59 = vpop.f32.mrf.mxu3  ;;  %v1773_v11 = vadd.f32 %v1723_v8, %v1319_v9  ;;  %v1321_v27 = vpop.f32.mrf.mxu1 }
 0x193   : > { %v1322_v40 = vadd.f32 %v1321_v27, %v5979_v53  ;;  %v5984_v53 = vld [vmem:[#allocation15_spill] sm:$0xff] }
 0x194   : > { %v2048_v50 = vadd.f32 %v1998_v59, %v1773_v11 }
 0x195   : > { %3699 = vmatmul.msk.f32.gmra.mxu1 %vm958_vm1, %v5971_v54  ;;  %v2158_v32 = vpop.f32.mrf.mxu0  ;;  %v2505_v54 = vsel %vm4459_vm13, %v3852_v45, 0.0  ;;  %vm6024_vm13 = vnez %v5888_v34 }
 0x196   : > { %v5154_v24 = vadd.f32 %v2155_v21, %v2048_v50  ;;  %3732 = vmatmul.msk.f32.gmra.mxu2 %vm958_vm1, %v2503_v16  ;;  %v2229_v21 = vsel %vm4434_vm12, %v5973_v4, 0.0  ;;  %v5982_v16 = vld [vmem:[#allocation48_spill] sm:$0xff] }
 0x197   : > { %3765 = vmatmul.msk.f32.gmra.mxu3 %vm958_vm1, %v5978_v33  ;;  %v2942_v27 = vsel %vm4434_vm12, %v5982_v16, 0.0  ;;  %v3851_v33 = vld [vmem:[%s3934_s7 + $0x68] sm:$0xff] }
 0x198   : > { %5977 = vst [vmem:[#allocation41_spill] sm:$0xff] %v5154_v24  ;;  %3798 = vmatmul.msk.f32.gmra.mxu0 %vm958_vm1, %v5980_v51 }
 0x199   : > { %v1726_v9 = vpop.f32.mrf.mxu2 }
 0x19a   : > { %v2001_v8 = vpop.f32.mrf.mxu3  ;;  %v1774_v59 = vadd.f32 %v1726_v9, %v1322_v40  ;;  %v1324_v11 = vpop.f32.mrf.mxu1  ;;  %v5985_v40 = vld [vmem:[#allocation37_spill] sm:$0xff] }
 0x19b   : > { %v1325_v9 = vadd.f32 %v1324_v11, %v5985_v40  ;;  %v5988_v11 = vld [vmem:[#allocation18_spill] sm:$0xff] }
 0x19c   : > { %v2049_v60 = vadd.f32 %v2001_v8, %v1774_v59  ;;  %v5990_v40 = vld [vmem:[#allocation54_spill] sm:$0xff] }
 0x19d   : > { %3700 = vmatmul.msk.f32.gmra.mxu1 %vm958_vm1, %v2229_v21  ;;  %v2161_v55 = vpop.f32.mrf.mxu0 }
 0x19e   : > { %v5169_v50 = vadd.f32 %v2158_v32, %v2049_v60  ;;  %3733 = vmatmul.msk.f32.gmra.mxu2 %vm958_vm1, %v3851_v33 }
 0x19f   : > { %3766 = vmatmul.msk.f32.gmra.mxu3 %vm958_vm1, %v5984_v53 }
 0x1a0   : > { %5983 = vst [vmem:[#allocation28_spill] sm:$0xff] %v5169_v50  ;;  %3799 = vmatmul.msk.f32.gmra.mxu0 %vm958_vm1, %v2942_v27  ;;  %v5989_v27 = vld [vmem:[#allocation42_spill] sm:$0xff]  ;;  %v5995_v50 = vld [vmem:[#allocation43_spill] sm:$0xff] }
 0x1a1   : > { %v1729_v4 = vpop.f32.mrf.mxu2  ;;  %vm5996_vm2 = vnez %v5995_v50 }
 0x1a2   : > { %v2004_v8 = vpop.f32.mrf.mxu3  ;;  %v1775_v59 = vadd.f32 %v1729_v4, %v1325_v9  ;;  %v1327_v21 = vpop.f32.mrf.mxu1 }
 0x1a3   : > { %v1328_v53 = vadd.f32 %v1327_v21, %v5989_v27  ;;  %v5993_v27 = vld [vmem:[#allocation21_spill] sm:$0xff] }
 0x1a4   : > { %v2050_v32 = vadd.f32 %v2004_v8, %v1775_v59 }
 0x1a5   : > { %3701 = vmatmul.msk.f32.gmra.mxu1 %vm958_vm1, %v5980_v51  ;;  %v2164_v60 = vpop.f32.mrf.mxu0 }
 0x1a6   : > { %v5182_v33 = vadd.f32 %v2161_v55, %v2050_v32  ;;  %3734 = vmatmul.msk.f32.gmra.mxu2 %vm958_vm1, %v2505_v54  ;;  %v2231_v55 = vsel %vm4490_vm14, %v5982_v16, 0.0  ;;  %v5992_v54 = vld [vmem:[#allocation56_spill] sm:$0xff] }
 0x1a7   : > { %3767 = vmatmul.msk.f32.gmra.mxu3 %vm958_vm1, %v5988_v11  ;;  %v2944_v21 = vsel %vm4490_vm14, %v5992_v54, 0.0  ;;  %v3853_v11 = vld [vmem:[%s3934_s7 + $0x78] sm:$0xff] }
 0x1a8   : > { %5987 = vst [vmem:[#allocation24_spill] sm:$0xff] %v5182_v33  ;;  %3800 = vmatmul.msk.f32.gmra.mxu0 %vm958_vm1, %v5990_v40  ;;  %v3854_v33 = vld [vmem:[%s3934_s7 + $0x80] sm:$0xff] }
 0x1a9   : > { %v1732_v24 = vpop.f32.mrf.mxu2  ;;  %v2507_v51 = vsel %vm5996_vm2, %v3854_v33, 0.0 }
 0x1aa   : > { %v2007_v45 = vpop.f32.mrf.mxu3  ;;  %v1776_v9 = vadd.f32 %v1732_v24, %v1328_v53  ;;  %v1330_v4 = vpop.f32.mrf.mxu1  ;;  %v5994_v53 = vld [vmem:[#allocation45_spill] sm:$0xff] }
 0x1ab   : > { %v1331_v24 = vadd.f32 %v1330_v4, %v5994_v53  ;;  %v5998_v4 = vld [vmem:[#allocation3_spill] sm:$0xff]  ;;  %v6000_v53 = vld [vmem:[#allocation62_spill] sm:$0xff] }
 0x1ac   : > { %v2051_v8 = vadd.f32 %v2007_v45, %v1776_v9 }
 0x1ad   : > { %3702 = vmatmul.msk.f32.gmra.mxu1 %vm958_vm1, %v2231_v55  ;;  %v2167_v59 = vpop.f32.mrf.mxu0 }
 0x1ae   : > { %v5197_v32 = vadd.f32 %v2164_v60, %v2051_v8  ;;  %3735 = vmatmul.msk.f32.gmra.mxu2 %vm958_vm1, %v3853_v11 }
 0x1af   : > { %3768 = vmatmul.msk.f32.gmra.mxu3 %vm958_vm1, %v5993_v27 }
 0x1b0   : > { %3801 = vmatmul.msk.f32.gmra.mxu0 %vm958_vm1, %v2944_v21  ;;  %v5999_v21 = vld [vmem:[#allocation50_spill] sm:$0xff] }
 0x1b1   : > { %v1735_v16 = vpop.f32.mrf.mxu2 }
 0x1b2   : > { %v2010_v45 = vpop.f32.mrf.mxu3  ;;  %v1777_v9 = vadd.f32 %v1735_v16, %v1331_v24  ;;  %v1333_v55 = vpop.f32.mrf.mxu1 }
 0x1b3   : > { %v1334_v27 = vadd.f32 %v1333_v55, %v5999_v21  ;;  %v6004_v21 = vld [vmem:[#allocation53_spill] sm:$0xff] }
 0x1b4   : > { %v2052_v60 = vadd.f32 %v2010_v45, %v1777_v9 }
 0x1b5   : > { %3703 = vmatmul.msk.f32.gmra.mxu1 %vm958_vm1, %v5990_v40  ;;  %v2170_v8 = vpop.f32.mrf.mxu0  ;;  %v6001_v40 = vld [vmem:[#allocation47_spill] sm:$0xff] }
 0x1b6   : > { %v5210_v11 = vadd.f32 %v2167_v59, %v2052_v60  ;;  %3736 = vmatmul.msk.f32.gmra.mxu2 %vm958_vm1, %v2507_v51  ;;  %vm6002_vm4 = vnez %v6001_v40  ;;  %v3855_v60 = vld [vmem:[%s3934_s7 + $0x88] sm:$0xff] }
 0x1b7   : > { %3769 = vmatmul.msk.f32.gmra.mxu3 %vm958_vm1, %v5998_v4  ;;  %v2233_v59 = vsel %vm6002_vm4, %v5992_v54, 0.0  ;;  %v2946_v55 = vsel %vm6002_vm4, %v4660_v29, 0.0  ;;  %v6003_v4 = vld [vmem:[#allocation5_spill] sm:$0xff] }
 0x1b8   : > { %5997 = vst [vmem:[#allocation30_spill] sm:$0xff] %v5210_v11  ;;  %3802 = vmatmul.msk.f32.gmra.mxu0 %vm958_vm1, %v6000_v53  ;;  %v6005_v11 = vld [vmem:[#allocation51_spill] sm:$0xff] }
 0x1b9   : > { %v1738_v50 = vpop.f32.mrf.mxu2  ;;  %vm6006_vm5 = vnez %v6005_v11 }
 0x1ba   : > { %v2013_v33 = vpop.f32.mrf.mxu3  ;;  %v1778_v24 = vadd.f32 %v1738_v50, %v1334_v27  ;;  %v1336_v16 = vpop.f32.mrf.mxu1 }
 0x1bb   : > { %v1337_v27 = vadd.f32 %v1336_v16, %v6004_v21  ;;  %v6007_v16 = vld [vmem:[#allocation58_spill] sm:$0xff] }
 0x1bc   : > { %v2053_v45 = vadd.f32 %v2013_v33, %v1778_v24 }
 0x1bd   : > { %3704 = vmatmul.msk.f32.gmra.mxu1 %vm958_vm1, %v2233_v59  ;;  %v2173_v9 = vpop.f32.mrf.mxu0  ;;  %v3856_v59 = vld [vmem:[%s3934_s7 + $0x90] sm:$0xff] }
 0x1be   : > { %v5225_v51 = vadd.f32 %v2170_v8, %v2053_v45  ;;  %3737 = vmatmul.msk.f32.gmra.mxu2 %vm958_vm1, %v3855_v60  ;;  %v2509_v40 = vsel %vm6006_vm5, %v3856_v59, 0.0  ;;  %v6010_v59 = vld [vmem:[#allocation61_spill] sm:$0xff] }
 0x1bf   : > { %3770 = vmatmul.msk.f32.gmra.mxu3 %vm958_vm1, %v6003_v4 }
 0x1c0   : > { %3803 = vmatmul.msk.f32.gmra.mxu0 %vm958_vm1, %v2946_v55 }
 0x1c1   : > { %v1741_v54 = vpop.f32.mrf.mxu2 }
 0x1c2   : > { %v2016_v50 = vpop.f32.mrf.mxu3  ;;  %v1779_v33 = vadd.f32 %v1741_v54, %v1337_v27  ;;  %v1339_v24 = vpop.f32.mrf.mxu1 }
 0x1c3   : > { %v1340_v55 = vadd.f32 %v1339_v24, %v6007_v16  ;;  %v3857_v24 = vld [vmem:[%s3934_s7 + $0x98] sm:$0xff] }
 0x1c4   : > { %v2054_v8 = vadd.f32 %v2016_v50, %v1779_v33 }
 0x1c5   : > { %3705 = vmatmul.msk.f32.gmra.mxu1 %vm958_vm1, %v6000_v53  ;;  %v2176_v45 = vpop.f32.mrf.mxu0  ;;  %v6008_v53 = vld [vmem:[#allocation55_spill] sm:$0xff] }
 0x1c6   : > { %v5238_v60 = vadd.f32 %v2173_v9, %v2054_v8  ;;  %3738 = vmatmul.msk.f32.gmra.mxu2 %vm958_vm1, %v2509_v40  ;;  %vm6009_vm6 = vnez %v6008_v53 }
 0x1c7   : > { %3771 = vmatmul.msk.f32.gmra.mxu3 %vm958_vm1, %v4044_v46  ;;  %v2235_v9 = vsel %vm6009_vm6, %v4660_v29, 0.0  ;;  %v2948_v46 = vsel %vm6009_vm6, %v4706_v10, 0.0 }
 0x1c8   : > { %3804 = vmatmul.msk.f32.gmra.mxu0 %vm958_vm1, %v4687_v1 }
 0x1c9   : > { %v1744_v11 = vpop.f32.mrf.mxu2 }
 0x1ca   : > { %v2019_v4 = vpop.f32.mrf.mxu3  ;;  %v1780_v21 = vadd.f32 %v1744_v11, %v1340_v55  ;;  %v1342_v27 = vpop.f32.mrf.mxu1  ;;  %v3858_v11 = vld [vmem:[%s3934_s7 + $0xa0] sm:$0xff] }
 0x1cb   : > { %v1343_v40 = vadd.f32 %v1342_v27, %v6010_v59 }
 0x1cc   : > { %v2055_v54 = vadd.f32 %v2019_v4, %v1780_v21  ;;  %v6011_v4 = vld [vmem:[#allocation59_spill] sm:$0xff] }
 0x1cd   : > { %3706 = vmatmul.msk.f32.gmra.mxu1 %vm958_vm1, %v2235_v9  ;;  %v2179_v50 = vpop.f32.mrf.mxu0  ;;  %vm6012_vm7 = vnez %v6011_v4 }
 0x1ce   : > { %v5253_v33 = vadd.f32 %v2176_v45, %v2055_v54  ;;  %3739 = vmatmul.msk.f32.gmra.mxu2 %vm958_vm1, %v3857_v24  ;;  %v2511_v45 = vsel %vm6012_vm7, %v3858_v11, 0.0  ;;  %vm6054_vm7 = vcmask 1045504  }
 0x1cf   : > { %3772 = vmatmul.msk.f32.gmra.mxu3 %vm958_vm1, %v4080_v58  ;;  %v6013_v58 = vld [vmem:[#allocation64_spill] sm:$0xff] }
 0x1d0   : > { %3805 = vmatmul.msk.f32.gmra.mxu0 %vm958_vm1, %v2948_v46 }
 0x1d1   : > { %v1747_v29 = vpop.f32.mrf.mxu2 }
 0x1d2   : > { %v2022_v8 = vpop.f32.mrf.mxu3  ;;  %v1781_v16 = vadd.f32 %v1747_v29, %v1343_v40  ;;  %v2367_v55 = vpop.f32.mrf.mxu1 }
 0x1d3   : > { %v2463_v27 = vadd.f32 %v2367_v55, %v6013_v58 }
 0x1d4   : > { %v2056_v21 = vadd.f32 %v2022_v8, %v1781_v16  ;;  %v3859_v16 = vld [vmem:[%s3934_s7 + $0xa8] sm:$0xff] }
 0x1d5   : > { %3707 = vmatmul.msk.f32.gmra.mxu1 %vm958_vm1, %v4687_v1  ;;  %v3080_v53 = vpop.f32.mrf.mxu0  ;;  %v6014_v1 = vld [vmem:[#allocation63_spill] sm:$0xff] }
 0x1d6   : > { %v5266_v9 = vadd.f32 %v2179_v50, %v2056_v21  ;;  %3740 = vmatmul.msk.f32.gmra.mxu2 %vm958_vm1, %v2511_v45  ;;  %vm6015_vm8 = vnez %v6014_v1  ;;  %v3860_v21 = vld [vmem:[%s3934_s7 + $0xb0] sm:$0xff] }
 0x1d7   : > { %3773 = vmatmul.msk.f32.gmra.mxu3 %vm958_vm1, %v4119_v26  ;;  %v2237_v50 = vsel %vm6015_vm8, %v4706_v10, 0.0  ;;  %v2950_v29 = vsel %vm6015_vm8, %v4752_v37, 0.0 }
 0x1d8   : > { %3806 = vmatmul.msk.f32.gmra.mxu0 %vm958_vm1, %v4733_v56 }
 0x1d9   : > { %v2642_v54 = vpop.f32.mrf.mxu2 }
 0x1da   : > { %v2799_v46 = vpop.f32.mrf.mxu3  ;;  %v2738_v24 = vadd.f32 %v2642_v54, %v2463_v27  ;;  %v2370_v59 = vpop.f32.mrf.mxu1 }
 0x1db   : > { %v2464_v10 = vadd.f32 %v2370_v59, %v4694_v7 }
 0x1dc   : > { %v2895_v40 = vadd.f32 %v2799_v46, %v2738_v24  ;;  %v6017_v46 = vld [vmem:[#allocation66_spill] sm:$0xff] }
 0x1dd   : > { %3708 = vmatmul.msk.f32.gmra.mxu1 %vm958_vm1, %v2237_v50  ;;  %v3083_v26 = vpop.f32.mrf.mxu0 }
 0x1de   : > { %v3176_v8 = vadd.f32 %v3080_v53, %v2895_v40  ;;  %3741 = vmatmul.msk.f32.gmra.mxu2 %vm958_vm1, %v3859_v16  ;;  %v2513_v53 = vsel %vm6016_vm9, %v3860_v21, 0.0  ;;  %v3861_v21 = vld [vmem:[%s3934_s7 + $0xb8] sm:$0xff]  ;;  %vm6058_vm9 = vmmov %vm6054_vm7 }
 0x1df   : > { %3774 = vmatmul.msk.f32.gmra.mxu3 %vm958_vm1, %v4171_v42 }
 0x1e0   : > { %3208 = vst.msk [vmem:[%s5281_s20] sm:$0xff] %vm958_vm1, %v3176_v8  ;;  %3807 = vmatmul.msk.f32.gmra.mxu0 %vm958_vm1, %v2950_v29  ;;  %v3311_v27 = vmul.f32 %v3176_v8, %v3176_v8  ;;  %v3240_v54 = vsel %vm958_vm1, %v3176_v8, 0.0  ;;  %v6018_v8 = vld [vmem:[#allocation65_spill] sm:$0xff] }
 0x1e1   : > { %v2645_v55 = vpop.f32.mrf.mxu2  ;;  %vm6019_vm10 = vnez %v6018_v8 }
 0x1e2   : > { %v2802_v11 = vpop.f32.mrf.mxu3  ;;  %v2739_v4 = vadd.f32 %v2645_v55, %v2464_v10  ;;  %v2373_v45 = vpop.f32.mrf.mxu1  ;;  %v3343_v40 = vsel %vm958_vm1, %v3311_v27, 0.0  ;;  %v2239_v16 = vsel %vm6019_vm10, %v4752_v37, 0.0 }
 0x1e3   : > { %v2465_v24 = vadd.f32 %v2373_v45, %v6017_v46 }
 0x1e4   : > { %v2896_v58 = vadd.f32 %v2802_v11, %v2739_v4  ;;  %v2952_v4 = vsel %vm6019_vm10, %v4798_v61, 0.0  ;;  %vm6062_vm10 = vcmask 1046528  }
 0x1e5   : > { %3709 = vmatmul.msk.f32.gmra.mxu1 %vm958_vm1, %v4733_v56  ;;  %v3086_v42 = vpop.f32.mrf.mxu0 }
 0x1e6   : > { %v3177_v7 = vadd.f32 %v3083_v26, %v2896_v58  ;;  %3742 = vmatmul.msk.f32.gmra.mxu2 %vm958_vm1, %v2513_v53 }
 0x1e7   : > { %3775 = vmatmul.msk.f32.gmra.mxu3 %vm958_vm1, %v4210_v62 }
 0x1e8   : > { %3209 = vst.msk [vmem:[%s5281_s20 + $0x8] sm:$0xff] %vm958_vm1, %v3177_v7  ;;  %v3241_v52 = vsel %vm958_vm1, %v3177_v7, 0.0  ;;  %v3312_v59 = vmul.f32 %v3177_v7, %v3177_v7  ;;  %3808 = vmatmul.msk.f32.gmra.mxu0 %vm958_vm1, %v4779_v5 }
 0x1e9   : > { %v3242_v56 = vadd.f32 %v3241_v52, %v3240_v54  ;;  %v2648_v1 = vpop.f32.mrf.mxu2 }
 0x1ea   : > { %v2805_v50 = vpop.f32.mrf.mxu3  ;;  %v3344_v62 = vsel %vm958_vm1, %v3312_v59, 0.0  ;;  %v2740_v26 = vadd.f32 %v2648_v1, %v2465_v24  ;;  %v2376_v29 = vpop.f32.mrf.mxu1  ;;  %v3862_v59 = vld [vmem:[%s3934_s7 + $0xc0] sm:$0xff] }
 0x1eb   : > { %v3345_v10 = vadd.f32 %v3344_v62, %v3343_v40  ;;  %v2466_v53 = vadd.f32 %v2376_v29, %v4740_v20 }
 0x1ec   : > { %v2897_v55 = vadd.f32 %v2805_v50, %v2740_v26 }
 0x1ed   : > { %3710 = vmatmul.msk.f32.gmra.mxu1 %vm958_vm1, %v2239_v16  ;;  %v3089_v11 = vpop.f32.mrf.mxu0 }
 0x1ee   : > { %v3178_v45 = vadd.f32 %v3086_v42, %v2897_v55  ;;  %3743 = vmatmul.msk.f32.gmra.mxu2 %vm958_vm1, %v3861_v21 }
 0x1ef   : > { %3776 = vmatmul.msk.f32.gmra.mxu3 %vm958_vm1, %v4238_v2  ;;  %v2515_v2 = vsel %vm6020_vm11, %v3862_v59, 0.0  ;;  %vm6063_vm11 = vmmov %vm6054_vm7 }
 0x1f0   : > { %3210 = vst.msk [vmem:[%s5281_s20 + $0x10] sm:$0xff] %vm958_vm1, %v3178_v45  ;;  %v3243_v37 = vsel %vm958_vm1, %v3178_v45, 0.0  ;;  %v3313_v58 = vmul.f32 %v3178_v45, %v3178_v45  ;;  %3809 = vmatmul.msk.f32.gmra.mxu0 %vm958_vm1, %v2952_v4 }
 0x1f1   : > { %v3244_v27 = vadd.f32 %v3243_v37, %v3242_v56  ;;  %v2651_v7 = vpop.f32.mrf.mxu2  ;;  %v6021_v56 = vld [vmem:[#allocation68_spill] sm:$0xff]  ;;  %v3863_v37 = vld [vmem:[%s3934_s7 + $0xc8] sm:$0xff] }
 0x1f2   : > { %v2808_v42 = vpop.f32.mrf.mxu3  ;;  %v3346_v54 = vsel %vm958_vm1, %v3313_v58, 0.0  ;;  %v2741_v46 = vadd.f32 %v2651_v7, %v2466_v53  ;;  %v2379_v24 = vpop.f32.mrf.mxu1 }
 0x1f3   : > { %v3347_v52 = vadd.f32 %v3346_v54, %v3345_v10  ;;  %v2467_v40 = vadd.f32 %v2379_v24, %v6021_v56 }
 0x1f4   : > { %v2898_v20 = vadd.f32 %v2808_v42, %v2741_v46 }
 0x1f5   : > { %3711 = vmatmul.msk.f32.gmra.mxu1 %vm958_vm1, %v4779_v5  ;;  %v3092_v1 = vpop.f32.mrf.mxu0 }
 0x1f6   : > { %v3179_v50 = vadd.f32 %v3089_v11, %v2898_v20  ;;  %3744 = vmatmul.msk.f32.gmra.mxu2 %vm958_vm1, %v2515_v2 }
 0x1f7   : > { %3777 = vmatmul.msk.f32.gmra.mxu3 %vm958_vm1, %v3991_v25  ;;  %v6022_v25 = vld [vmem:[#allocation67_spill] sm:$0xff] }
 0x1f8   : > { %3211 = vst.msk [vmem:[%s5281_s20 + $0x18] sm:$0xff] %vm958_vm1, %v3179_v50  ;;  %v3245_v62 = vsel %vm958_vm1, %v3179_v50, 0.0  ;;  %v3314_v17 = vmul.f32 %v3179_v50, %v3179_v50  ;;  %3810 = vmatmul.msk.f32.gmra.mxu0 %vm958_vm1, %v4825_v14  ;;  %vm6023_vm12 = vnez %v6022_v25 }
 0x1f9   : > { %v3246_v26 = vadd.f32 %v3245_v62, %v3244_v27  ;;  %v2654_v5 = vpop.f32.mrf.mxu2  ;;  %v2241_v55 = vsel %vm6023_vm12, %v4798_v61, 0.0  ;;  %v2954_v21 = vsel %vm6023_vm12, %v4844_v23, 0.0  ;;  %vm6066_vm12 = vmmov %vm6062_vm10 }
 0x1fa   : > { %v2811_v29 = vpop.f32.mrf.mxu3  ;;  %v3348_v8 = vsel %vm958_vm1, %v3314_v17, 0.0  ;;  %v2742_v16 = vadd.f32 %v2654_v5, %v2467_v40  ;;  %v2382_v10 = vpop.f32.mrf.mxu1 }
 0x1fb   : > { %v3349_v11 = vadd.f32 %v3348_v8, %v3347_v52  ;;  %v2468_v58 = vadd.f32 %v2382_v10, %v4786_v49 }
 0x1fc   : > { %v2899_v4 = vadd.f32 %v2811_v29, %v2742_v16 }
 0x1fd   : > { %3712 = vmatmul.msk.f32.gmra.mxu1 %vm958_vm1, %v2241_v55  ;;  %v3095_v45 = vpop.f32.mrf.mxu0  ;;  %v6028_v55 = vld [vmem:[#allocation10_spill] sm:$0xff] }
 0x1fe   : > { %v3180_v53 = vadd.f32 %v3092_v1, %v2899_v4  ;;  %3745 = vmatmul.msk.f32.gmra.mxu2 %vm958_vm1, %v3863_v37  ;;  %v6025_v1 = vld [vmem:[#allocation70_spill] sm:$0xff] }
 0x1ff   : > { %3778 = vmatmul.msk.f32.gmra.mxu3 %vm958_vm1, %v4014_v35  ;;  %v2517_v35 = vsel %vm6024_vm13, %v4868_v31, 0.0 }
 0x200   : > { %3212 = vst.msk [vmem:[%s5281_s20 + $0x20] sm:$0xff] %vm958_vm1, %v3180_v53  ;;  %v3247_v61 = vsel %vm958_vm1, %v3180_v53, 0.0  ;;  %v3315_v27 = vmul.f32 %v3180_v53, %v3180_v53  ;;  %3811 = vmatmul.msk.f32.gmra.mxu0 %vm958_vm1, %v2954_v21 }
 0x201   : > { %v3248_v7 = vadd.f32 %v3247_v61, %v3246_v26  ;;  %v2657_v42 = vpop.f32.mrf.mxu2 }
 0x202   : > { %v2814_v54 = vpop.f32.mrf.mxu3  ;;  %v3350_v46 = vsel %vm958_vm1, %v3315_v27, 0.0  ;;  %v2743_v24 = vadd.f32 %v2657_v42, %v2468_v58  ;;  %v2385_v52 = vpop.f32.mrf.mxu1  ;;  %v6031_v42 = vld [vmem:[#allocation71_spill] sm:$0xff] }
 0x203   : > { %v3351_v59 = vadd.f32 %v3350_v46, %v3349_v11  ;;  %v2469_v50 = vadd.f32 %v2385_v52, %v6025_v1  ;;  %v6029_v11 = vld [vmem:[#allocation72_spill] sm:$0xff]  ;;  %vm6032_vm3 = vnez %v6031_v42  ;;  %v6035_v1 = vld [vmem:[#allocation78_spill] sm:$0xff] }
 0x204   : > { %v2900_v49 = vadd.f32 %v2814_v54, %v2743_v24 }
 0x205   : > { %3713 = vmatmul.msk.f32.gmra.mxu1 %vm958_vm1, %v4825_v14  ;;  %v3098_v2 = vpop.f32.mrf.mxu0 }
 0x206   : > { %v3181_v20 = vadd.f32 %v3095_v45, %v2900_v49  ;;  %3746 = vmatmul.msk.f32.gmra.mxu2 %vm958_vm1, %v2517_v35  ;;  %v6034_v35 = vld [vmem:[#allocation74_spill] sm:$0xff] }
 0x207   : > { %3779 = vmatmul.msk.f32.gmra.mxu3 %vm958_vm1, %v4047_v47  ;;  %v6026_v47 = vld [vmem:[#allocation69_spill] sm:$0xff] }
 0x208   : > { %3213 = vst.msk [vmem:[%s5281_s20 + $0x28] sm:$0xff] %vm958_vm1, %v3181_v20  ;;  %v3249_v56 = vsel %vm958_vm1, %v3181_v20, 0.0  ;;  %v3316_v40 = vmul.f32 %v3181_v20, %v3181_v20  ;;  %3812 = vmatmul.msk.f32.gmra.mxu0 %vm958_vm1, %v4874_v63  ;;  %vm6027_vm14 = vnez %v6026_v47 }
 0x209   : > { %v3250_v34 = vadd.f32 %v3249_v56, %v3248_v7  ;;  %v2660_v14 = vpop.f32.mrf.mxu2  ;;  %v2243_v5 = vsel %vm6027_vm14, %v4844_v23, 0.0  ;;  %v2956_v10 = vsel %vm6027_vm14, %v4893_v13, 0.0  ;;  %v6030_v7 = vld [vmem:[#allocation77_spill] sm:$0xff] }
 0x20a   : > { %v2817_v31 = vpop.f32.mrf.mxu3  ;;  %v3352_v62 = vsel %vm958_vm1, %v3316_v40, 0.0  ;;  %v2744_v17 = vadd.f32 %v2660_v14, %v2469_v50  ;;  %v2388_v26 = vpop.f32.mrf.mxu1  ;;  %v2519_v54 = vsel %vm6032_vm3, %v6030_v7, 0.0 }
 0x20b   : > { %v3353_v29 = vadd.f32 %v3352_v62, %v3351_v59  ;;  %v2470_v4 = vadd.f32 %v2388_v26, %v6029_v11  ;;  %v6033_v59 = vld [vmem:[#allocation13_spill] sm:$0xff] }
 0x20c   : > { %v2901_v8 = vadd.f32 %v2817_v31, %v2744_v17  ;;  %v6036_v31 = vld [vmem:[#allocation73_spill] sm:$0xff] }
 0x20d   : > { %3714 = vmatmul.msk.f32.gmra.mxu1 %vm958_vm1, %v2243_v5  ;;  %v3101_v16 = vpop.f32.mrf.mxu0  ;;  %vm6037_vm2 = vnez %v6036_v31  ;;  %v6038_v5 = vld [vmem:[#allocation80_spill] sm:$0xff] }
 0x20e   : > { %v3182_v25 = vadd.f32 %v3098_v2, %v2901_v8  ;;  %3747 = vmatmul.msk.f32.gmra.mxu2 %vm958_vm1, %v4901_v18  ;;  %v2245_v62 = vsel %vm6037_vm2, %v4893_v13, 0.0 }
 0x20f   : > { %3780 = vmatmul.msk.f32.gmra.mxu3 %vm958_vm1, %v6028_v55 }
 0x210   : > { %3214 = vst.msk [vmem:[%s5281_s20 + $0x30] sm:$0xff] %vm958_vm1, %v3182_v25  ;;  %v3251_v23 = vsel %vm958_vm1, %v3182_v25, 0.0  ;;  %v3317_v45 = vmul.f32 %v3182_v25, %v3182_v25  ;;  %3813 = vmatmul.msk.f32.gmra.mxu0 %vm958_vm1, %v2956_v10  ;;  %v6040_v10 = vld [vmem:[#allocation16_spill] sm:$0xff] }
 0x211   : > { %v3252_v21 = vadd.f32 %v3251_v23, %v3250_v34  ;;  %v2663_v53 = vpop.f32.mrf.mxu2  ;;  %v6041_v25 = vld [vmem:[#allocation8_spill] sm:$0xff] }
 0x212   : > { %v2820_v37 = vpop.f32.mrf.mxu3  ;;  %v3354_v58 = vsel %vm958_vm1, %v3317_v45, 0.0  ;;  %v2745_v61 = vadd.f32 %v2663_v53, %v2470_v4  ;;  %v2391_v18 = vpop.f32.mrf.mxu1 }
 0x213   : > { %v3355_v27 = vadd.f32 %v3354_v58, %v3353_v29  ;;  %v2471_v49 = vadd.f32 %v2391_v18, %v6034_v35  ;;  %v2958_v29 = vsel %vm6037_vm2, %v6038_v5, 0.0  ;;  %v6043_v18 = vld [vmem:[#allocation6_spill] sm:$0xff] }
 0x214   : > { %v2902_v46 = vadd.f32 %v2820_v37, %v2745_v61  ;;  %v6042_v61 = vld [vmem:[#allocation83_spill] sm:$0xff]  ;;  %vm6044_vm4 = vnez %v6043_v18  ;;  %v2216_v18 = vrot.slane %v5000_v28, 2 }
 0x215   : > { %3715 = vmatmul.msk.f32.gmra.mxu1 %vm958_vm1, %v4874_v63  ;;  %v3104_v24 = vpop.f32.mrf.mxu0 }
 0x216   : > { %v3183_v52 = vadd.f32 %v3101_v16, %v2902_v46  ;;  %3748 = vmatmul.msk.f32.gmra.mxu2 %vm958_vm1, %v2519_v54  ;;  %v6039_v16 = vld [vmem:[#allocation81_spill] sm:$0xff]  ;;  %v6045_v46 = vld [vmem:[#allocation19_spill] sm:$0xff] }
 0x217   : > { %3781 = vmatmul.msk.f32.gmra.mxu3 %vm958_vm1, %v6033_v59 }
 0x218   : > { %3215 = vst.msk [vmem:[%s5281_s20 + $0x38] sm:$0xff] %vm958_vm1, %v3183_v52  ;;  %v3253_v2 = vsel %vm958_vm1, %v3183_v52, 0.0  ;;  %v3318_v20 = vmul.f32 %v3183_v52, %v3183_v52  ;;  %3814 = vmatmul.msk.f32.gmra.mxu0 %vm958_vm1, %v6035_v1 }
 0x219   : > { %v3254_v50 = vadd.f32 %v3253_v2, %v3252_v21  ;;  %v2666_v63 = vpop.f32.mrf.mxu2 }
 0x21a   : > { %v2823_v56 = vpop.f32.mrf.mxu3  ;;  %v3356_v40 = vsel %vm958_vm1, %v3318_v20, 0.0  ;;  %v2746_v34 = vadd.f32 %v2666_v63, %v2471_v49  ;;  %v2394_v14 = vpop.f32.mrf.mxu1 }
 0x21b   : > { %v3357_v17 = vadd.f32 %v3356_v40, %v3355_v27  ;;  %v2472_v55 = vadd.f32 %v2394_v14, %v6041_v25  ;;  %v2521_v27 = vsel %vm6044_vm4, %v6042_v61, 0.0 }
 0x21c   : > { %v2903_v26 = vadd.f32 %v2823_v56, %v2746_v34  ;;  %v6047_v56 = vld [vmem:[#allocation75_spill] sm:$0xff] }
 0x21d   : > { %3716 = vmatmul.msk.f32.gmra.mxu1 %vm958_vm1, %v2245_v62  ;;  %v3107_v47 = vpop.f32.mrf.mxu0  ;;  %vm6048_vm5 = vnez %v6047_v56 }
 0x21e   : > { %v3184_v8 = vadd.f32 %v3104_v24, %v2903_v26  ;;  %3749 = vmatmul.msk.f32.gmra.mxu2 %vm958_vm1, %v6039_v16  ;;  %v6046_v24 = vld [vmem:[#allocation76_spill] sm:$0xff]  ;;  %v2247_v40 = vsel %vm6048_vm5, %v6038_v5, 0.0  ;;  %v2960_v62 = vsel %vm6048_vm5, %v5010_v6, 0.0  ;;  %v6049_v26 = vld [vmem:[#allocation22_spill] sm:$0xff]  ;;  %v2214_v16 = vrot.slane %v4963_v38, 2 }
 0x21f   : > { %3782 = vmatmul.msk.f32.gmra.mxu3 %vm958_vm1, %v6040_v10  ;;  %v6053_v38 = vrot.slane %v5944_v3, 2 }
 0x220   : > { %3216 = vst.msk [vmem:[%s5281_s20 + $0x40] sm:$0xff] %vm958_vm1, %v3184_v8  ;;  %v3255_v13 = vsel %vm958_vm1, %v3184_v8, 0.0  ;;  %v3319_v11 = vmul.f32 %v3184_v8, %v3184_v8  ;;  %3815 = vmatmul.msk.f32.gmra.mxu0 %vm958_vm1, %v2958_v29 }
 0x221   : > { %v3256_v4 = vadd.f32 %v3255_v13, %v3254_v50  ;;  %v2669_v23 = vpop.f32.mrf.mxu2 }
 0x222   : > { %v2826_v45 = vpop.f32.mrf.mxu3  ;;  %v3358_v21 = vsel %vm958_vm1, %v3319_v11, 0.0  ;;  %v2747_v53 = vadd.f32 %v2669_v23, %v2472_v55  ;;  %v2397_v37 = vpop.f32.mrf.mxu1  ;;  %v3864_v23 = vld [vmem:[%s3934_s7 + $0x100] sm:$0xff] }
 0x223   : > { %v3359_v58 = vadd.f32 %v3358_v21, %v3357_v17  ;;  %v2473_v52 = vadd.f32 %v2397_v37, %v6046_v24 }
 0x224   : > { %v2904_v7 = vadd.f32 %v2826_v45, %v2747_v53  ;;  %v6051_v45 = vld [vmem:[#allocation11_spill] sm:$0xff] }
 0x225   : > { %3717 = vmatmul.msk.f32.gmra.mxu1 %vm958_vm1, %v6035_v1  ;;  %v3110_v42 = vpop.f32.mrf.mxu0  ;;  %vm6052_vm6 = vnez %v6051_v45 }
 0x226   : > { %v3185_v54 = vadd.f32 %v3107_v47, %v2904_v7  ;;  %3750 = vmatmul.msk.f32.gmra.mxu2 %vm958_vm1, %v2521_v27  ;;  %v6050_v47 = vld [vmem:[#allocation14_spill] sm:$0xff]  ;;  %v2523_v21 = vsel %vm6052_vm6, %v3864_v23, 0.0 }
 0x227   : > { %3783 = vmatmul.msk.f32.gmra.mxu3 %vm958_vm1, %v6045_v46  ;;  %v6055_v27 = vld [vmem:[#allocation82_spill] sm:$0xff] }
 0x228   : > { %3217 = vst.msk [vmem:[%s5281_s20 + $0x48] sm:$0xff] %vm958_vm1, %v3185_v54  ;;  %v3257_v59 = vsel %vm958_vm1, %v3185_v54, 0.0  ;;  %v3320_v35 = vmul.f32 %v3185_v54, %v3185_v54  ;;  %3816 = vmatmul.msk.f32.gmra.mxu0 %vm958_vm1, %v4982_v36 }
 0x229   : > { %v3258_v49 = vadd.f32 %v3257_v59, %v3256_v4  ;;  %v2672_v2 = vpop.f32.mrf.mxu2  ;;  %v6056_v59 = vld [vmem:[#allocation79_spill] sm:$0xff] }
 0x22a   : > { %v2829_v20 = vpop.f32.mrf.mxu3  ;;  %v3360_v1 = vsel %vm958_vm1, %v3320_v35, 0.0  ;;  %v2748_v50 = vadd.f32 %v2672_v2, %v2473_v52  ;;  %v2400_v63 = vpop.f32.mrf.mxu1  ;;  %vm6057_vm8 = vnez %v6056_v59 }
 0x22b   : > { %v3361_v34 = vadd.f32 %v3360_v1, %v3359_v58  ;;  %v2474_v29 = vadd.f32 %v2400_v63, %v6050_v47  ;;  %v2215_v58 = vsel %vm6054_vm7, %v6053_v38, %v2214_v16  ;;  %v2249_v35 = vsel %vm6057_vm8, %v5010_v6, 0.0  ;;  %v277_v1 = vld [vmem:[%s3934_s7 + $0x118] sm:$0xff] }
 0x22c   : > { %v2905_v14 = vadd.f32 %v2829_v20, %v2748_v50  ;;  %v2774_v6 = vrot.slane %v277_v1, 1 }
 0x22d   : > { %3718 = vmatmul.msk.f32.gmra.mxu1 %vm958_vm1, %v2247_v40  ;;  %v3113_v31 = vpop.f32.mrf.mxu0  ;;  %v3865_v40 = vld [vmem:[%s3934_s7 + $0x108] sm:$0xff] }
 0x22e   : > { %v3186_v17 = vadd.f32 %v3110_v42, %v2905_v14  ;;  %3751 = vmatmul.msk.f32.gmra.mxu2 %vm958_vm1, %v5019_v19 }
 0x22f   : > { %3784 = vmatmul.msk.f32.gmra.mxu3 %vm958_vm1, %v6049_v26 }
 0x230   : > { %3218 = vst.msk [vmem:[%s5281_s20 + $0x50] sm:$0xff] %vm958_vm1, %v3186_v17  ;;  %v3259_v5 = vsel %vm958_vm1, %v3186_v17, 0.0  ;;  %v3321_v8 = vmul.f32 %v3186_v17, %v3186_v17  ;;  %3817 = vmatmul.msk.f32.gmra.mxu0 %vm958_vm1, %v2960_v62 }
 0x231   : > { %v3260_v10 = vadd.f32 %v3259_v5, %v3258_v49  ;;  %v2675_v25 = vpop.f32.mrf.mxu2  ;;  %v2217_v49 = vsel %vm6058_vm9, %v2214_v16, %v2216_v18 }
 0x232   : > { %v2832_v55 = vpop.f32.mrf.mxu3  ;;  %v3362_v19 = vsel %vm958_vm1, %v3321_v8, 0.0  ;;  %v2749_v13 = vadd.f32 %v2675_v25, %v2474_v29  ;;  %v2403_v11 = vpop.f32.mrf.mxu1  ;;  %v2962_v63 = vsel %vm6057_vm8, %v2217_v49, 0.0  ;;  %v2927_v29 = vrot.slane %v277_v1, 2 }
 0x233   : > { %v3363_v4 = vadd.f32 %v3362_v19, %v3361_v34  ;;  %v2475_v7 = vadd.f32 %v2403_v11, %v6055_v27  ;;  %v6059_v34 = vld [vmem:[#allocation20_spill] sm:$0xff]  ;;  %v6061_v19 = vrot.slane %v5000_v28, 1 }
 0x234   : > { %v2906_v53 = vadd.f32 %v2832_v55, %v2749_v13  ;;  %v2928_v45 = vsel %vm6063_vm11, %v2216_v18, %v2927_v29 }
 0x235   : > { %3719 = vmatmul.msk.f32.gmra.mxu1 %vm958_vm1, %v4982_v36  ;;  %v3116_v37 = vpop.f32.mrf.mxu0  ;;  %v2775_v13 = vsel %vm6062_vm10, %v6061_v19, %v2774_v6 }
 0x236   : > { %v3187_v61 = vadd.f32 %v3113_v31, %v2906_v53  ;;  %3752 = vmatmul.msk.f32.gmra.mxu2 %vm958_vm1, %v2523_v21 }
 0x237   : > { %3785 = vmatmul.msk.f32.gmra.mxu3 %vm958_vm1, %v4992_v57 }
 0x238   : > { %3219 = vst.msk [vmem:[%s5281_s20 + $0x58] sm:$0xff] %vm958_vm1, %v3187_v61  ;;  %v3261_v36 = vsel %vm958_vm1, %v3187_v61, 0.0  ;;  %v3322_v42 = vmul.f32 %v3187_v61, %v3187_v61  ;;  %3818 = vmatmul.msk.f32.gmra.mxu0 %vm958_vm1, %v2215_v58 }
 0x239   : > { %v3262_v3 = vadd.f32 %v3261_v36, %v3260_v10  ;;  %v2678_v54 = vpop.f32.mrf.mxu2  ;;  %v3866_v10 = vld [vmem:[%s3934_s7 + $0x110] sm:$0xff] }
 0x23a   : > { %v2835_v46 = vpop.f32.mrf.mxu3  ;;  %v3364_v24 = vsel %vm958_vm1, %v3322_v42, 0.0  ;;  %v2750_v52 = vadd.f32 %v2678_v54, %v2475_v7  ;;  %v2406_v57 = vpop.f32.mrf.mxu1  ;;  %v2525_v55 = vsel %vm4965_vm15, %v3866_v10, 0.0  ;;  %v2251_v54 = vsel %vm5003_vm0, %v2217_v49, 0.0  ;;  %vm6065_vm15 = vmmov %vm6054_vm7 }
 0x23b   : > { %v3365_v2 = vadd.f32 %v3364_v24, %v3363_v4  ;;  %v2476_v14 = vadd.f32 %v2406_v57, %v6059_v34  ;;  %v278_v4 = vld [vmem:[%s3934_s7 + $0x120] sm:$0x3] }
 0x23c   : > { %v2907_v20 = vadd.f32 %v2835_v46, %v2750_v52  ;;  %v2929_v53 = vrot.slane %v278_v4, 2 }
 0x23d   : > { %3720 = vmatmul.msk.f32.gmra.mxu1 %vm958_vm1, %v2249_v35  ;;  %v3119_v50 = vpop.f32.mrf.mxu0 }
 0x23e   : > { %v3188_v56 = vadd.f32 %v3116_v37, %v2907_v20  ;;  %3753 = vmatmul.msk.f32.gmra.mxu2 %vm958_vm1, %v3865_v40  ;;  %v2776_v37 = vrot.slane %v278_v4, 1 }
 0x23f   : > { %3786 = vmatmul.msk.f32.gmra.mxu3 %vm958_vm1, %v5026_v30 }
 0x240   : > { %3220 = vst.msk [vmem:[%s5281_s20 + $0x60] sm:$0xff] %vm958_vm1, %v3188_v56  ;;  %v3263_v31 = vsel %vm958_vm1, %v3188_v56, 0.0  ;;  %v3323_v62 = vmul.f32 %v3188_v56, %v3188_v56  ;;  %3819 = vmatmul.msk.f32.gmra.mxu0 %vm958_vm1, %v2962_v63  ;;  %v2777_v24 = vsel %vm6066_vm12, %v2774_v6, %v2776_v37 }
 0x241   : > { %v3264_v17 = vadd.f32 %v3263_v31, %v3262_v3  ;;  %v2681_v26 = vpop.f32.mrf.mxu2 }
 0x242   : > { %v2838_v47 = vpop.f32.mrf.mxu3  ;;  %v3366_v5 = vsel %vm958_vm1, %v3323_v62, 0.0  ;;  %v2751_v8 = vadd.f32 %v2681_v26, %v2476_v14  ;;  %v2409_v16 = vpop.f32.mrf.mxu1 }
 0x243   : > { %v3367_v30 = vadd.f32 %v3366_v5, %v3365_v2  ;;  %v2477_v38 = vadd.f32 %v2409_v16, %v5028_v48  ;;  %v2930_v48 = vsel %vm6065_vm15, %v2927_v29, %v2929_v53 }
 0x244   : > { %v2908_v11 = vadd.f32 %v2838_v47, %v2751_v8  ;;  %v2964_v59 = vsel %vm5003_vm0, %v2930_v48, 0.0  ;;  %vm3309_vm0 = vcmask 57344  }
 0x245   : > { %3721 = vmatmul.msk.f32.gmra.mxu1 %vm958_vm1, %v2215_v58  ;;  %v3122_v23 = vpop.f32.mrf.mxu0 }
 0x246   : > { %v3189_v21 = vadd.f32 %v3119_v50, %v2908_v11  ;;  %3754 = vmatmul.msk.f32.gmra.mxu2 %vm958_vm1, %v2525_v55 }
 0x247   : > { %3787 = vmatmul.msk.f32.gmra.mxu3 %vm958_vm1, %v2775_v13 }
 0x248   : > { %3221 = vst.msk [vmem:[%s5281_s20 + $0x68] sm:$0xff] %vm958_vm1, %v3189_v21  ;;  %v3265_v28 = vsel %vm958_vm1, %v3189_v21, 0.0  ;;  %v3324_v61 = vmul.f32 %v3189_v21, %v3189_v21  ;;  %3820 = vmatmul.msk.f32.gmra.mxu0 %vm958_vm1, %v2928_v45 }
 0x249   : > { %v3266_v58 = vadd.f32 %v3265_v28, %v3264_v17  ;;  %v2684_v27 = vpop.f32.mrf.mxu2 }
 0x24a   : > { %v2841_v7 = vpop.f32.mrf.mxu3  ;;  %v3368_v18 = vsel %vm958_vm1, %v3324_v61, 0.0  ;;  %v2752_v36 = vadd.f32 %v2684_v27, %v2477_v38  ;;  %v2412_v42 = vpop.f32.mrf.mxu1 }
 0x24b   : > { %v3369_v46 = vadd.f32 %v3368_v18, %v3367_v30  ;;  %v2478_v2 = vadd.f32 %v2412_v42, %v5038_v0 }
 0x24c   : > { %v2909_v52 = vadd.f32 %v2841_v7, %v2752_v36 }
 0x24d   : > { %3722 = vmatmul.msk.f32.gmra.mxu1 %vm958_vm1, %v2251_v54  ;;  %v3125_v57 = vpop.f32.mrf.mxu0 }
 0x24e   : > { %v3190_v35 = vadd.f32 %v3122_v23, %v2909_v52  ;;  %3755 = vmatmul.msk.f32.gmra.mxu2 %vm958_vm1, %v277_v1 }
 0x24f   : > { %3788 = vmatmul.msk.f32.gmra.mxu3 %vm958_vm1, %v2777_v24 }
 0x250   : > { %3222 = vst.msk [vmem:[%s5281_s20 + $0x70] sm:$0xff] %vm958_vm1, %v3190_v35  ;;  %v3267_v49 = vsel %vm958_vm1, %v3190_v35, 0.0  ;;  %v3325_v20 = vmul.f32 %v3190_v35, %v3190_v35  ;;  %3821 = vmatmul.msk.f32.gmra.mxu0 %vm958_vm1, %v2964_v59 }
 0x251   : > { %v3268_v50 = vadd.f32 %v3267_v49, %v3266_v58  ;;  %v2687_v63 = vpop.f32.mrf.mxu2 }
 0x252   : > { %v2844_v56 = vpop.f32.mrf.mxu3  ;;  %v3370_v40 = vsel %vm958_vm1, %v3325_v20, 0.0  ;;  %v2753_v6 = vadd.f32 %v2687_v63, %v2478_v2  ;;  %v2415_v34 = vpop.f32.mrf.mxu1 }
 0x253   : > { %v3371_v1 = vadd.f32 %v3370_v40, %v3369_v46  ;;  %v2479_v0 = vadd.f32 %v2415_v34, %v5057_v41 }
 0x254   : > { %v2910_v14 = vadd.f32 %v2844_v56, %v2753_v6 }
 0x255   : > { %v3128_v31 = vpop.f32.mrf.mxu0 }
 0x256   : > { %v3191_v62 = vadd.f32 %v3125_v57, %v2910_v14 }
 0x258   : > { %3223 = vst.msk [vmem:[%s5281_s20 + $0x78] sm:$0xff] %vm958_vm1, %v3191_v62  ;;  %v3269_v17 = vsel %vm958_vm1, %v3191_v62, 0.0  ;;  %v3326_v26 = vmul.f32 %v3191_v62, %v3191_v62 }
 0x259   : > { %v3270_v47 = vadd.f32 %v3269_v17, %v3268_v50  ;;  %v2690_v29 = vpop.f32.mrf.mxu2 }
 0x25a   : > { %v2847_v5 = vpop.f32.mrf.mxu3  ;;  %v3372_v8 = vsel %vm958_vm1, %v3326_v26, 0.0  ;;  %v2754_v16 = vadd.f32 %v2690_v29, %v2479_v0  ;;  %v2418_v30 = vpop.f32.mrf.mxu1 }
 0x25b   : > { %v3373_v10 = vadd.f32 %v3372_v8, %v3371_v1  ;;  %v2480_v13 = vadd.f32 %v2418_v30, %v5070_v22 }
 0x25c   : > { %v2911_v25 = vadd.f32 %v2847_v5, %v2754_v16 }
 0x25d   : > { %v3131_v55 = vpop.f32.mrf.mxu0 }
 0x25e   : > { %v3192_v19 = vadd.f32 %v3128_v31, %v2911_v25 }
 0x260   : > { %3224 = vst.msk [vmem:[%s5281_s20 + $0x80] sm:$0xff] %vm958_vm1, %v3192_v19  ;;  %v3271_v41 = vsel %vm958_vm1, %v3192_v19, 0.0  ;;  %v3327_v11 = vmul.f32 %v3192_v19, %v3192_v19 }
 0x261   : > { %v3272_v4 = vadd.f32 %v3271_v41, %v3270_v47  ;;  %v2693_v23 = vpop.f32.mrf.mxu2 }
 0x262   : > { %v2850_v45 = vpop.f32.mrf.mxu3  ;;  %v3374_v21 = vsel %vm958_vm1, %v3327_v11, 0.0  ;;  %v2755_v53 = vadd.f32 %v2693_v23, %v2480_v13  ;;  %v2421_v37 = vpop.f32.mrf.mxu1 }
 0x263   : > { %v3375_v38 = vadd.f32 %v3374_v21, %v3373_v10  ;;  %v2481_v27 = vadd.f32 %v2421_v37, %v5085_v15 }
 0x264   : > { %v2912_v28 = vadd.f32 %v2850_v45, %v2755_v53 }
 0x265   : > { %v3134_v61 = vpop.f32.mrf.mxu0 }
 0x266   : > { %v3193_v58 = vadd.f32 %v3131_v55, %v2912_v28 }
 0x268   : > { %3225 = vst.msk [vmem:[%s5281_s20 + $0x88] sm:$0xff] %vm958_vm1, %v3193_v58  ;;  %v3273_v22 = vsel %vm958_vm1, %v3193_v58, 0.0  ;;  %v3328_v7 = vmul.f32 %v3193_v58, %v3193_v58 }
 0x269   : > { %v3274_v18 = vadd.f32 %v3273_v22, %v3272_v4  ;;  %v2696_v36 = vpop.f32.mrf.mxu2 }
 0x26a   : > { %v2853_v42 = vpop.f32.mrf.mxu3  ;;  %v3376_v3 = vsel %vm958_vm1, %v3328_v7, 0.0  ;;  %v2756_v54 = vadd.f32 %v2696_v36, %v2481_v27  ;;  %v2424_v48 = vpop.f32.mrf.mxu1 }
 0x26b   : > { %v3377_v46 = vadd.f32 %v3376_v3, %v3375_v38  ;;  %v2482_v59 = vadd.f32 %v2424_v48, %v5098_v12 }
 0x26c   : > { %v2913_v24 = vadd.f32 %v2853_v42, %v2756_v54  ;;  %v6067_v54 = vld [vmem:[#allocation41_spill] sm:$0xff] }
 0x26d   : > { %v3137_v52 = vpop.f32.mrf.mxu0 }
 0x26e   : > { %v3194_v57 = vadd.f32 %v3134_v61, %v2913_v24 }
 0x270   : > { %3226 = vst.msk [vmem:[%s5281_s20 + $0x90] sm:$0xff] %vm958_vm1, %v3194_v57  ;;  %v3275_v15 = vsel %vm958_vm1, %v3194_v57, 0.0  ;;  %v3329_v35 = vmul.f32 %v3194_v57, %v3194_v57 }
 0x271   : > { %v3276_v2 = vadd.f32 %v3275_v15, %v3274_v18  ;;  %v2699_v49 = vpop.f32.mrf.mxu2 }
 0x272   : > { %v2856_v20 = vpop.f32.mrf.mxu3  ;;  %v3378_v50 = vsel %vm958_vm1, %v3329_v35, 0.0  ;;  %v2757_v63 = vadd.f32 %v2699_v49, %v2482_v59  ;;  %v2427_v56 = vpop.f32.mrf.mxu1 }
 0x273   : > { %v3379_v40 = vadd.f32 %v3378_v50, %v3377_v46  ;;  %v2483_v14 = vadd.f32 %v2427_v56, %v5113_v44 }
 0x274   : > { %v2914_v6 = vadd.f32 %v2856_v20, %v2757_v63  ;;  %v6068_v63 = vld [vmem:[#allocation28_spill] sm:$0xff] }
 0x275   : > { %v3140_v34 = vpop.f32.mrf.mxu0 }
 0x276   : > { %v3195_v1 = vadd.f32 %v3137_v52, %v2914_v6 }
 0x278   : > { %3227 = vst.msk [vmem:[%s5281_s20 + $0x98] sm:$0xff] %vm958_vm1, %v3195_v1  ;;  %v3277_v12 = vsel %vm958_vm1, %v3195_v1, 0.0  ;;  %v3330_v31 = vmul.f32 %v3195_v1, %v3195_v1 }
 0x279   : > { %v3278_v62 = vadd.f32 %v3277_v12, %v3276_v2  ;;  %v2702_v0 = vpop.f32.mrf.mxu2 }
 0x27a   : > { %v2859_v17 = vpop.f32.mrf.mxu3  ;;  %v3380_v26 = vsel %vm958_vm1, %v3330_v31, 0.0  ;;  %v2758_v47 = vadd.f32 %v2702_v0, %v2483_v14  ;;  %v2430_v29 = vpop.f32.mrf.mxu1 }
 0x27b   : > { %v3381_v5 = vadd.f32 %v3380_v26, %v3379_v40  ;;  %v2484_v10 = vadd.f32 %v2430_v29, %v5126_v39  ;;  %v6069_v29 = vld [vmem:[#allocation24_spill] sm:$0xff] }
 0x27c   : > { %v2915_v8 = vadd.f32 %v2859_v17, %v2758_v47 }
 0x27d   : > { %v3143_v16 = vpop.f32.mrf.mxu0 }
 0x27e   : > { %v3196_v30 = vadd.f32 %v3140_v34, %v2915_v8 }
 0x280   : > { %3228 = vst.msk [vmem:[%s5281_s20 + $0xa0] sm:$0xff] %vm958_vm1, %v3196_v30  ;;  %v3279_v44 = vsel %vm958_vm1, %v3196_v30, 0.0  ;;  %v3331_v25 = vmul.f32 %v3196_v30, %v3196_v30 }
 0x281   : > { %v3280_v55 = vadd.f32 %v3279_v44, %v3278_v62  ;;  %v2705_v19 = vpop.f32.mrf.mxu2 }
 0x282   : > { %v2862_v13 = vpop.f32.mrf.mxu3  ;;  %v3382_v41 = vsel %vm958_vm1, %v3331_v25, 0.0  ;;  %v2759_v11 = vadd.f32 %v2705_v19, %v2484_v10  ;;  %v2433_v4 = vpop.f32.mrf.mxu1 }
 0x283   : > { %v3383_v23 = vadd.f32 %v3382_v41, %v3381_v5  ;;  %v2485_v37 = vadd.f32 %v2433_v4, %v5141_v43 }
 0x284   : > { %v2916_v45 = vadd.f32 %v2862_v13, %v2759_v11 }
 0x285   : > { %v3146_v21 = vpop.f32.mrf.mxu0 }
 0x286   : > { %v3197_v53 = vadd.f32 %v3143_v16, %v2916_v45 }
 0x288   : > { %3229 = vst.msk [vmem:[%s5281_s20 + $0xa8] sm:$0xff] %vm958_vm1, %v3197_v53  ;;  %v3281_v39 = vsel %vm958_vm1, %v3197_v53, 0.0  ;;  %v3332_v38 = vmul.f32 %v3197_v53, %v3197_v53 }
 0x289   : > { %v3282_v28 = vadd.f32 %v3281_v39, %v3280_v55  ;;  %v2708_v61 = vpop.f32.mrf.mxu2 }
 0x28a   : > { %v2865_v58 = vpop.f32.mrf.mxu3  ;;  %v3384_v27 = vsel %vm958_vm1, %v3332_v38, 0.0  ;;  %v2760_v22 = vadd.f32 %v2708_v61, %v2485_v37  ;;  %v2436_v7 = vpop.f32.mrf.mxu1 }
 0x28b   : > { %v3385_v18 = vadd.f32 %v3384_v27, %v3383_v23  ;;  %v2486_v48 = vadd.f32 %v2436_v7, %v6067_v54 }
 0x28c   : > { %v2917_v36 = vadd.f32 %v2865_v58, %v2760_v22 }
 0x28d   : > { %v3149_v42 = vpop.f32.mrf.mxu0 }
 0x28e   : > { %v3198_v3 = vadd.f32 %v3146_v21, %v2917_v36 }
 0x290   : > { %3230 = vst.msk [vmem:[%s5281_s20 + $0xb0] sm:$0xff] %vm958_vm1, %v3198_v3  ;;  %v3283_v43 = vsel %vm958_vm1, %v3198_v3, 0.0  ;;  %v3333_v46 = vmul.f32 %v3198_v3, %v3198_v3 }
 0x291   : > { %v3284_v24 = vadd.f32 %v3283_v43, %v3282_v28  ;;  %v2711_v52 = vpop.f32.mrf.mxu2 }
 0x292   : > { %v2868_v57 = vpop.f32.mrf.mxu3  ;;  %v3386_v59 = vsel %vm958_vm1, %v3333_v46, 0.0  ;;  %v2761_v15 = vadd.f32 %v2711_v52, %v2486_v48  ;;  %v2439_v35 = vpop.f32.mrf.mxu1 }
 0x293   : > { %v3387_v2 = vadd.f32 %v3386_v59, %v3385_v18  ;;  %v2487_v56 = vadd.f32 %v2439_v35, %v6068_v63  ;;  %v6070_v18 = vld [vmem:[#allocation30_spill] sm:$0xff] }
 0x294   : > { %v2918_v49 = vadd.f32 %v2868_v57, %v2761_v15 }
 0x295   : > { %v3152_v20 = vpop.f32.mrf.mxu0 }
 0x296   : > { %v3199_v50 = vadd.f32 %v3149_v42, %v2918_v49 }
 0x298   : > { %3231 = vst.msk [vmem:[%s5281_s20 + $0xb8] sm:$0xff] %vm958_vm1, %v3199_v50  ;;  %v3285_v40 = vsel %vm958_vm1, %v3199_v50, 0.0  ;;  %v3334_v6 = vmul.f32 %v3199_v50, %v3199_v50 }
 0x299   : > { %v3286_v34 = vadd.f32 %v3285_v40, %v3284_v24  ;;  %v2714_v1 = vpop.f32.mrf.mxu2 }
 0x29a   : > { %v2871_v14 = vpop.f32.mrf.mxu3  ;;  %v3388_v12 = vsel %vm958_vm1, %v3334_v6, 0.0  ;;  %v2762_v31 = vadd.f32 %v2714_v1, %v2487_v56  ;;  %v2442_v62 = vpop.f32.mrf.mxu1 }
 0x29b   : > { %v3389_v0 = vadd.f32 %v3388_v12, %v3387_v2  ;;  %v2488_v5 = vadd.f32 %v2442_v62, %v6069_v29 }
 0x29c   : > { %v2919_v17 = vadd.f32 %v2871_v14, %v2762_v31 }
 0x29d   : > { %v3155_v26 = vpop.f32.mrf.mxu0 }
 0x29e   : > { %v3200_v47 = vadd.f32 %v3152_v20, %v2919_v17 }
 0x2a0   : > { %3232 = vst.msk [vmem:[%s5281_s20 + $0xc0] sm:$0xff] %vm958_vm1, %v3200_v47  ;;  %v3287_v8 = vsel %vm958_vm1, %v3200_v47, 0.0  ;;  %v3335_v16 = vmul.f32 %v3200_v47, %v3200_v47 }
 0x2a1   : > { %v3288_v30 = vadd.f32 %v3287_v8, %v3286_v34  ;;  %v2717_v10 = vpop.f32.mrf.mxu2 }
 0x2a2   : > { %v2874_v44 = vpop.f32.mrf.mxu3  ;;  %v3390_v25 = vsel %vm958_vm1, %v3335_v16, 0.0  ;;  %v2763_v55 = vadd.f32 %v2717_v10, %v2488_v5  ;;  %v2445_v19 = vpop.f32.mrf.mxu1 }
 0x2a3   : > { %v3391_v13 = vadd.f32 %v3390_v25, %v3389_v0  ;;  %v2489_v23 = vadd.f32 %v2445_v19, %v5197_v32 }
 0x2a4   : > { %v2920_v41 = vadd.f32 %v2874_v44, %v2763_v55 }
 0x2a5   : > { %v3158_v11 = vpop.f32.mrf.mxu0 }
 0x2a6   : > { %v3201_v4 = vadd.f32 %v3155_v26, %v2920_v41 }
 0x2a8   : > { %3233 = vst.msk [vmem:[%s5281_s20 + $0xc8] sm:$0xff] %vm958_vm1, %v3201_v4  ;;  %v3289_v45 = vsel %vm958_vm1, %v3201_v4, 0.0  ;;  %v3336_v21 = vmul.f32 %v3201_v4, %v3201_v4 }
 0x2a9   : > { %v3290_v53 = vadd.f32 %v3289_v45, %v3288_v30  ;;  %v2720_v37 = vpop.f32.mrf.mxu2 }
 0x2aa   : > { %v2877_v39 = vpop.f32.mrf.mxu3  ;;  %v3392_v38 = vsel %vm958_vm1, %v3336_v21, 0.0  ;;  %v2764_v28 = vadd.f32 %v2720_v37, %v2489_v23  ;;  %v2448_v61 = vpop.f32.mrf.mxu1 }
 0x2ab   : > { %v3393_v58 = vadd.f32 %v3392_v38, %v3391_v13  ;;  %v2490_v36 = vadd.f32 %v2448_v61, %v6070_v18 }
 0x2ac   : > { %v2921_v27 = vadd.f32 %v2877_v39, %v2764_v28 }
 0x2ad   : > { %v3161_v22 = vpop.f32.mrf.mxu0 }
 0x2ae   : > { %v3202_v7 = vadd.f32 %v3158_v11, %v2921_v27 }
 0x2b0   : > { %3234 = vst.msk [vmem:[%s5281_s20 + $0xd0] sm:$0xff] %vm958_vm1, %v3202_v7  ;;  %v3291_v32 = vsel %vm958_vm1, %v3202_v7, 0.0  ;;  %v3337_v42 = vmul.f32 %v3202_v7, %v3202_v7 }
 0x2b1   : > { %v3292_v3 = vadd.f32 %v3291_v32, %v3290_v53  ;;  %v2723_v54 = vpop.f32.mrf.mxu2 }
 0x2b2   : > { %v2880_v48 = vpop.f32.mrf.mxu3  ;;  %v3394_v43 = vsel %vm958_vm1, %v3337_v42, 0.0  ;;  %v2765_v46 = vadd.f32 %v2723_v54, %v2490_v36  ;;  %v2451_v24 = vpop.f32.mrf.mxu1 }
 0x2b3   : > { %v3395_v52 = vadd.f32 %v3394_v43, %v3393_v58  ;;  %v2491_v35 = vadd.f32 %v2451_v24, %v5225_v51 }
 0x2b4   : > { %v2922_v57 = vadd.f32 %v2880_v48, %v2765_v46 }
 0x2b5   : > { %v3164_v59 = vpop.f32.mrf.mxu0 }
 0x2b6   : > { %v3203_v15 = vadd.f32 %v3161_v22, %v2922_v57 }
 0x2b8   : > { %3235 = vst.msk [vmem:[%s5281_s20 + $0xd8] sm:$0xff] %vm958_vm1, %v3203_v15  ;;  %v3293_v2 = vsel %vm958_vm1, %v3203_v15, 0.0  ;;  %v3338_v49 = vmul.f32 %v3203_v15, %v3203_v15 }
 0x2b9   : > { %v3294_v20 = vadd.f32 %v3293_v2, %v3292_v3  ;;  %v2726_v50 = vpop.f32.mrf.mxu2 }
 0x2ba   : > { %v2883_v63 = vpop.f32.mrf.mxu3  ;;  %v3396_v56 = vsel %vm958_vm1, %v3338_v49, 0.0  ;;  %v2766_v40 = vadd.f32 %v2726_v50, %v2491_v35  ;;  %v2454_v6 = vpop.f32.mrf.mxu1 }
 0x2bb   : > { %v3397_v34 = vadd.f32 %v3396_v56, %v3395_v52  ;;  %v2492_v31 = vadd.f32 %v2454_v6, %v5238_v60 }
 0x2bc   : > { %v2923_v1 = vadd.f32 %v2883_v63, %v2766_v40 }
 0x2bd   : > { %v3167_v12 = vpop.f32.mrf.mxu0 }
 0x2be   : > { %v3204_v14 = vadd.f32 %v3164_v59, %v2923_v1 }
 0x2c0   : > { %3236 = vst.msk [vmem:[%s5281_s20 + $0xe0] sm:$0xff] %vm958_vm1, %v3204_v14  ;;  %v3295_v51 = vsel %vm958_vm1, %v3204_v14, 0.0  ;;  %v3339_v62 = vmul.f32 %v3204_v14, %v3204_v14 }
 0x2c1   : > { %v3296_v0 = vadd.f32 %v3295_v51, %v3294_v20  ;;  %v2729_v17 = vpop.f32.mrf.mxu2 }
 0x2c2   : > { %v2886_v26 = vpop.f32.mrf.mxu3  ;;  %v3398_v47 = vsel %vm958_vm1, %v3339_v62, 0.0  ;;  %v2767_v29 = vadd.f32 %v2729_v17, %v2492_v31  ;;  %v2457_v8 = vpop.f32.mrf.mxu1 }
 0x2c3   : > { %v3399_v5 = vadd.f32 %v3398_v47, %v3397_v34  ;;  %v2493_v10 = vadd.f32 %v2457_v8, %v5253_v33 }
 0x2c4   : > { %v2924_v16 = vadd.f32 %v2886_v26, %v2767_v29 }
 0x2c5   : > { %v3170_v25 = vpop.f32.mrf.mxu0 }
 0x2c6   : > { %v3205_v30 = vadd.f32 %v3167_v12, %v2924_v16 }
 0x2c8   : > { %3237 = vst.msk [vmem:[%s5281_s20 + $0xe8] sm:$0xff] %vm958_vm1, %v3205_v30  ;;  %v3297_v60 = vsel %vm958_vm1, %v3205_v30, 0.0  ;;  %v3340_v44 = vmul.f32 %v3205_v30, %v3205_v30 }
 0x2c9   : > { %v3298_v55 = vadd.f32 %v3297_v60, %v3296_v0  ;;  %v2732_v19 = vpop.f32.mrf.mxu2 }
 0x2ca   : > { %v2889_v13 = vpop.f32.mrf.mxu3  ;;  %v3400_v41 = vsel %vm958_vm1, %v3340_v44, 0.0  ;;  %v2768_v11 = vadd.f32 %v2732_v19, %v2493_v10  ;;  %v2460_v45 = vpop.f32.mrf.mxu1 }
 0x2cb   : > { %v3401_v4 = vadd.f32 %v3400_v41, %v3399_v5  ;;  %v2494_v53 = vadd.f32 %v2460_v45, %v5266_v9 }
 0x2cc   : > { %v2925_v23 = vadd.f32 %v2889_v13, %v2768_v11 }
 0x2cd   : > { %v3173_v22 = vpop.f32.mrf.mxu0 }
 0x2ce   : > { %v3206_v21 = vadd.f32 %v3170_v25, %v2925_v23 }
 0x2d0   : > { %3238 = vst.msk [vmem:[%s5281_s20 + $0xf0] sm:$0xff] %vm958_vm1, %v3206_v21  ;;  %v3299_v33 = vsel %vm958_vm1, %v3206_v21, 0.0  ;;  %v3341_v37 = vmul.f32 %v3206_v21, %v3206_v21 }
 0x2d1   : > { %v3300_v39 = vadd.f32 %v3299_v33, %v3298_v55  ;;  %v2735_v38 = vpop.f32.mrf.mxu2 }
 0x2d2   : > { %v2892_v28 = vpop.f32.mrf.mxu3  ;;  %v3402_v61 = vsel %vm958_vm1, %v3341_v37, 0.0  ;;  %v2769_v58 = vadd.f32 %v2735_v38, %v2494_v53 }
 0x2d3   : > { %v3403_v27 = vadd.f32 %v3402_v61, %v3401_v4 }
 0x2d4   : > { %v2926_v7 = vadd.f32 %v2892_v28, %v2769_v58 }
 0x2d6   : > { %v3207_v18 = vadd.f32 %v3173_v22, %v2926_v7 }
 0x2d8   : > { %3239 = vst.msk [vmem:[%s5281_s20 + $0xf8] sm:$0xff] %vm958_vm1, %v3207_v18  ;;  %v3301_v9 = vsel %vm958_vm1, %v3207_v18, 0.0  ;;  %v3342_v36 = vmul.f32 %v3207_v18, %v3207_v18 }
 0x2d9   : > { %v3302_v32 = vadd.f32 %v3301_v9, %v3300_v39 }
 0x2da   : > { %v3404_v42 = vsel %vm958_vm1, %v3342_v36, 0.0 }
 0x2db   : > { %v3303_v3 = vrot.slane %v3302_v32, 4  ;;  %v3405_v54 = vadd.f32 %v3404_v42, %v3403_v27 }
 0x2dd   : > { %v3304_v48 = vadd.f32 %v3303_v3, %v3302_v32  ;;  %v3406_v43 = vrot.slane %v3405_v54, 4 }
 0x2df   : > { %v3305_v46 = vrot.slane %v3304_v48, 2  ;;  %v3407_v24 = vadd.f32 %v3406_v43, %v3405_v54 }
 0x2e1   : > { %v3306_v52 = vadd.f32 %v3305_v46, %v3304_v48  ;;  %v3408_v57 = vrot.slane %v3407_v24, 2 }
 0x2e3   : > { %v3307_v59 = vrot.slane %v3306_v52, 1  ;;  %v3409_v15 = vadd.f32 %v3408_v57, %v3407_v24 }
 0x2e5   : > { %v3308_v35 = vadd.f32 %v3307_v59, %v3306_v52  ;;  %v3410_v2 = vrot.slane %v3409_v15, 1 }
 0x2e7   : > { %3310 = vst.msk [vmem:[%s238_s23] sm:$0x1] %vm3309_vm0, %v3308_v35  ;;  %v3411_v49 = vadd.f32 %v3410_v2, %v3409_v15 }
 0x2e9   : > { %3412 = vst.msk [vmem:[%s241_s26] sm:$0x1] %vm3309_vm0, %v3411_v49 }
 0x2ea PF: > { %s16_s18 = sadd.s32 1, %s3873_s18  }
 0x2eb   : > { %p13_p4 = scmp.ge.s32.totalorder %s16_s18, 4  }
 0x2ed   :  { %15 = sbr.rel (!%p13_p4) target bundleno = 1 (0x1), region = 94 }

// kernel: _lambda_.37
= control target key start
LH: loop header
LB: loop body
LE: loop exit
PB: predicated region body
PF: predicated region fallthrough
CT: control target
= control target key end

     0   :  { %11 = vsyncpa [#allocation3], 0  ;;  %s5965_s0 = inlined_call_operand.vmem [shape: f32[2,290,8], index: 0, kind: input, shape index: {}]   ;;  %s5966_s1 = inlined_call_operand.vmem [shape: f32[9,8,3], index: 1, kind: input, shape index: {}]   ;;  %s5967_s2 = inlined_call_operand.vmem [shape: f32[1,1,3], index: 2, kind: input, shape index: {}]   ;;  %s5968_s3 = inlined_call_operand.vmem [shape: f32[2,256,3], index: 3, kind: output, shape index: {0}]   ;;  %s5969_s4 = inlined_call_operand.hbm [shape: f32[2,1,3], index: 4, kind: output, shape index: {1}]   ;;  %s5970_s5 = inlined_call_operand.hbm [shape: f32[2,1,3], index: 5, kind: output, shape index: {2}]  }
   0x1   :  { %13 = vsyncpa [#allocation3 + $0x1], 0 }
   0x2   :  { %14 = vsyncpa [#allocation5], 0 }
   0x3   :  { %16 = vsyncpa [#allocation5 + $0x1], 0  ;;  %s4110_s18 = smov 0   ;;  %s4112_s19 = smov 0  }
   0x4   :  { %s4114_s20 = smov 0   ;;  %s4116_s21 = smov 0  }
   0x5 LB: > { %s4131_s22 = sadd.s32 4294967295, %s4078_s21   ;;  %s3598_s23 = sadd.s32 4294967294, %s4078_s21   ;;  %s4078_s21 = sphi %s4116_s21, %s6420_s21   ;;  %s4074_s20 = sphi %s4114_s20, %s6419_s20   ;;  %s4070_s19 = sphi %s4112_s19, %s6418_s19   ;;  %s4066_s18 = sphi %s4110_s18, %s6417_s18  }
   0x6   : > { %s4135_s24 = sadd.s32 1, %s4078_s21   ;;  %s123_s25 = sadd.s32 1, %s4074_s20 }
   0x7   : > { %s120_s26 = ssub.s32 %s4078_s21, %s4135_s24  ;;  %p133_p0 = scmp.ne.s32.totalorder %s4074_s20, %s4070_s19 }
   0x8   : > { %p121_p1 = scmp.eq.s32.totalorder %s120_s26, 0  ;;  %p134_p2 = scmp.eq.s32.totalorder %s4131_s22, 1 }
   0x9   : > { %p139_p3 = scmp.ne.s32.totalorder %s4070_s19, %s4066_s18  ;;  %p140_p4 = scmp.eq.s32.totalorder %s3598_s23, 1 }
   0xa   : > { %s4146_s27 = scalar_select %p121_p1, %s4074_s20, %s123_s25  }
   0xb   : > { %p4148_p5 = por %p134_p2, %p133_p0  ;;  %p4152_p6 = por %p140_p4, %p139_p3 }
   0xc   : > { %p3601_p7 = scmp.ge.s32.totalorder %s4078_s21, 1  ;;  %p198_p8 = scmp.lt.s32.totalorder %s4078_s21, 3 }
   0xe   : > { %p199_p9 = pnand %p3601_p7, %p198_p8 }
  0x10   : > { %202 = sbr.rel (%p199_p9) target bundleno = 771 (0x303), region = 32 }
  0x15   : > { %v3605_v0 = vld [vmem:[%s5966_s1 + $0x8] sm:$0xff]  ;;  %p234_p10 = scmp.lt.s32.totalorder %s4131_s22, 1  ;;  %v3670_v1 = vld [vmem:[%s5966_s1 + $0x10] sm:$0xff]  ;;  %v3703_v2 = vld [vmem:[%s5966_s1 + $0x18] sm:$0xff]  ;;  %vm6028_vm0 = vcmask 1046528   ;;  %vm960_vm1 = vcmask 64512   ;;  %s3473_s7 = scalar_lea.hbm %s5969_s4, %s4131_s22 }
  0x16   : > { %3904 = vmatpush.msra.mxu1 %v3605_v0  ;;  %3905 = vmatpush.msra.mxu2 %v3605_v0  ;;  %v858_v3 = vld [vmem:[%s5966_s1] sm:$0xff]  ;;  %vm6032_vm3 = vcmask 1045504   ;;  %s5894_s26 = sand.u32 1, %s4070_s19   ;;  %s3486_s10 = scalar_lea.hbm %s5970_s5, %s4131_s22 }
  0x17   : > { %s4172_s13 = scalar_select %p234_p10, %s4131_s22, 1  ;;  %3906 = vmatpush.msra.mxu3 %v3605_v0  ;;  %v3736_v4 = vld [vmem:[%s5966_s1 + $0x20] sm:$0xff]  ;;  %1040 = vmatpush.msra.mxu0 %v3605_v0 }
  0x18   : > { %1654 = vmatpush.msrb.mxu2 %v3670_v1  ;;  %1249 = vmatpush.msrb.mxu1 %v858_v3  ;;  %s227_s11 = scalar_lea.vmem [#allocation2], %s5894_s26  ;;  %s5907_s14 = sshll.u32 %s3473_s7, 4  ;;  %s3478_s14 = int_to_ptr.hbm [resolvable:$true] %s5907_s14 }
  0x19   : > { %1929 = vmatpush.msrb.mxu3 %v3703_v2  ;;  %s3907_s16 = smul.u32 296, %s4172_s13  ;;  %2086 = vmatpush.msrb.mxu0 %v3736_v4  ;;  %v281_v2 = vlaneseq  ;;  %s3903_s12 = sshll.u32 %s4172_s13, 8 }
  0x1a   : > { %s5541_s17 = scalar_lea.vmem %s5968_s3, %s3903_s12  ;;  %s5905_s12 = sshll.u32 %s227_s11, 4  ;;  %s3476_s12 = int_to_ptr.vmem [resolvable:$true] %s5905_s12 }
  0x1b   : > { %s4181_s25 = scalar_lea.vmem %s5965_s0, %s3907_s16  ;;  %s233_s15 = scalar_lea.vmem [#allocation4], %s5894_s26 }
  0x1c   : > { %v4184_v5 = vld [vmem:[%s4181_s25 + $0x40] sm:$0xff]  ;;  %v4187_v6 = vld [vmem:[%s4181_s25 + $0x48] sm:$0xff]  ;;  %v4208_v17 = vld [vmem:[%s4181_s25 + $0x50] sm:$0xff]  ;;  %s5910_s13 = sshll.u32 %s233_s15, 4  ;;  %s5912_s16 = sshll.u32 %s3486_s10, 4  ;;  %s3489_s13 = int_to_ptr.vmem [resolvable:$true] %s5910_s13  ;;  %s3491_s16 = int_to_ptr.hbm [resolvable:$true] %s5912_s16 }
  0x1d   : > { %v4190_v7 = vld [vmem:[%s4181_s25 + $0x80] sm:$0xff]  ;;  %v5971_v8 = vrot.slane %v4184_v5, 1  ;;  %v912_v9 = vrot.slane %v4187_v6, 1  ;;  %v4195_v10 = vld [vmem:[%s4181_s25 + $0x88] sm:$0xff]  ;;  %v4219_v20 = vld [vmem:[%s4181_s25 + $0x90] sm:$0xff]  ;;  %v914_v27 = vrot.slane %v4208_v17, 1 }
  0x1e   : > { %v5973_v11 = vrot.slane %v4190_v7, 1  ;;  %v4199_v12 = vld [vmem:[%s4181_s25 + $0xc0] sm:$0xff]  ;;  %v4202_v13 = vld [vmem:[%s4181_s25 + $0xc8] sm:$0xff]  ;;  %v928_v14 = vrot.slane %v4195_v10, 1  ;;  %v4226_v23 = vld [vmem:[%s4181_s25 + $0xd0] sm:$0xff]  ;;  %v930_v29 = vrot.slane %v4219_v20, 1 }
  0x1f   : > { %v5972_v15 = vrot.slane %v4199_v12, 1  ;;  %v944_v16 = vrot.slane %v4202_v13, 1  ;;  %v4211_v18 = vld [vmem:[%s4181_s25] sm:$0xff]  ;;  %v4216_v19 = vsel %vm6028_vm0, %v5971_v8, %v912_v9  ;;  %v4222_v21 = vld [vmem:[%s4181_s25 + $0x8] sm:$0xff]  ;;  %v4247_v28 = vld [vmem:[%s4181_s25 + $0x10] sm:$0xff]  ;;  %v946_v31 = vrot.slane %v4226_v23, 1 }
  0x20   : > { %6111 = vst [vmem:[#allocation8_spill] sm:$0xff] %v4216_v19  ;;  %v895_v22 = vrot.slane %v4211_v18, 1  ;;  %3614 = vmatmul.msk.f32.vlgmr.msra.gmra.mxu1 %vm960_vm1, %v4216_v19  ;;  %v4233_v24 = vsel %vm6028_vm0, %v5973_v11, %v928_v14  ;;  %v896_v26 = vrot.slane %v4222_v21, 1  ;;  %v898_v32 = vrot.slane %v4247_v28, 1  ;;  %v4264_v36 = vld [vmem:[%s4181_s25 + $0x58] sm:$0xff]  ;;  %v4297_v48 = vld [vmem:[%s4181_s25 + $0x60] sm:$0xff] }
  0x21   : > { %6112 = vst [vmem:[#allocation9_spill] sm:$0xff] %v4233_v24  ;;  %v4238_v25 = vsel %vm6028_vm0, %v5972_v15, %v944_v16  ;;  %3622 = vmatmul.msk.f32.vlgmr.msra.gmra.mxu2 %vm960_vm1, %v4233_v24  ;;  %v4255_v33 = vsel %vm6028_vm0, %v912_v9, %v914_v27  ;;  %v4258_v34 = vsel %vm6028_vm0, %v928_v14, %v930_v29  ;;  %v4267_v37 = vld [vmem:[%s4181_s25 + $0x98] sm:$0xff]  ;;  %v916_v40 = vrot.slane %v4264_v36, 1  ;;  %v4300_v49 = vld [vmem:[%s4181_s25 + $0xa0] sm:$0xff]  ;;  %v4333_v60 = vld [vmem:[%s4181_s25 + $0x68] sm:$0xff]  ;;  %s3458_s22 = scalar_lea.sflag [#allocation3], %s5894_s26 }
  0x22   : > { %3630 = vmatmul.msk.f32.vlgmr.msra.gmra.mxu3 %vm960_vm1, %v4238_v25  ;;  %v897_v30 = vsel %vm6028_vm0, %v895_v22, %v896_v26  ;;  %6113 = vst [vmem:[#allocation10_spill] sm:$0xff] %v4255_v33  ;;  %v4261_v35 = vsel %vm6028_vm0, %v944_v16, %v946_v31  ;;  %v4270_v38 = vld [vmem:[%s4181_s25 + $0xd8] sm:$0xff]  ;;  %v899_v39 = vsel %vm6028_vm0, %v896_v26, %v898_v32  ;;  %v932_v42 = vrot.slane %v4267_v37, 1  ;;  %v4303_v50 = vld [vmem:[%s4181_s25 + $0xe0] sm:$0xff]  ;;  %v4336_v61 = vld [vmem:[%s4181_s25 + $0xa8] sm:$0xff]  ;;  %s4004_s6 = scalar_lea.hbm %s5969_s4, 2 }
  0x23   : > { %3606 = vmatmul.msk.f32.vlgmr.msra.gmra.mxu0 %vm960_vm1, %v897_v30  ;;  %6114 = vst [vmem:[#allocation11_spill] sm:$0xff] %v4258_v34  ;;  %v4281_v41 = vld [vmem:[%s4181_s25 + $0x18] sm:$0xff]  ;;  %v948_v43 = vrot.slane %v4270_v38, 1  ;;  %v4288_v45 = vsel %vm6028_vm0, %v914_v27, %v916_v40  ;;  %v918_v52 = vrot.slane %v4297_v48, 1  ;;  %v4316_v53 = vld [vmem:[%s4181_s25 + $0x20] sm:$0xff]  ;;  %v934_v54 = vrot.slane %v4300_v49, 1 }
  0x24   : > { %6115 = vst [vmem:[#allocation12_spill] sm:$0xff] %v4270_v38  ;;  %v900_v44 = vrot.slane %v4281_v41, 1  ;;  %v4291_v46 = vsel %vm6028_vm0, %v930_v29, %v932_v42  ;;  %v950_v55 = vrot.slane %v4303_v50, 1  ;;  %v902_v56 = vrot.slane %v4316_v53, 1  ;;  %v4339_v62 = vld [vmem:[%s4181_s25 + $0xe8] sm:$0xff]  ;;  %v4372_v29 = vld [vmem:[%s4181_s25 + $0x70] sm:$0xff] }
  0x25   : > { %6116 = vst [vmem:[#allocation13_spill] sm:$0xff] %v4288_v45  ;;  %v4294_v47 = vsel %vm6028_vm0, %v946_v31, %v948_v43  ;;  %v4324_v57 = vsel %vm6028_vm0, %v916_v40, %v918_v52  ;;  %v4327_v58 = vsel %vm6028_vm0, %v932_v42, %v934_v54  ;;  %v920_v0 = vrot.slane %v4333_v60, 1  ;;  %v4352_v1 = vld [vmem:[%s4181_s25 + $0x28] sm:$0xff]  ;;  %v4375_v30 = vld [vmem:[%s4181_s25 + $0xb0] sm:$0xff]  ;;  %v4424_v15 = vld [vmem:[%s4181_s25 + $0x78] sm:$0xff] }
  0x26   : > { %6117 = vst [vmem:[#allocation14_spill] sm:$0xff] %v4303_v50  ;;  %v4308_v51 = vsel %vm6028_vm0, %v898_v32, %v900_v44  ;;  %v4330_v59 = vsel %vm6028_vm0, %v948_v43, %v950_v55  ;;  %v4344_v63 = vsel %vm6028_vm0, %v900_v44, %v902_v56  ;;  %v936_v3 = vrot.slane %v4336_v61, 1  ;;  %v4378_v31 = vld [vmem:[%s4181_s25 + $0xf0] sm:$0xff]  ;;  %v4463_v50 = vld [vmem:[%s4181_s25 + $0x100] sm:$0xff] }
  0x27   : > { %6118 = vst [vmem:[#allocation15_spill] sm:$0xff] %v4324_v57  ;;  %v952_v4 = vrot.slane %v4339_v62, 1  ;;  %v4358_v9 = vshrl.u32 %v281_v2, 7  ;;  %v904_v14 = vrot.slane %v4352_v1, 1  ;;  %v4362_v16 = vsel %vm6028_vm0, %v918_v52, %v920_v0  ;;  %v4390_v40 = vld [vmem:[%s4181_s25 + $0x30] sm:$0xff]  ;;  %v3835_v52 = vld [vmem:[%s5966_s1 + $0x38] sm:$0xff] }
  0x28   : > { %3615 = vmatmul.msk.f32.gmra.mxu1 %vm960_vm1, %v4255_v33  ;;  %6119 = vst [vmem:[#allocation16_spill] sm:$0xff] %v4330_v59  ;;  %v4366_v26 = vsel %vm6028_vm0, %v934_v54, %v936_v3  ;;  %v922_v43 = vrot.slane %v4372_v29, 1  ;;  %v3802_v44 = vld [vmem:[%s5966_s1 + $0x30] sm:$0xff]  ;;  %v3769_v54 = vld [vmem:[%s5966_s1 + $0x28] sm:$0xff]  ;;  %2799 = vmatpush.msra.mxu3 %v3835_v52  ;;  %v906_v2 = vrot.slane %v4390_v40, 1  ;;  %v4430_v52 = vld [vmem:[%s4181_s25 + $0xf8] sm:$0xff] }
  0x29   : > { %3623 = vmatmul.msk.f32.gmra.mxu2 %vm960_vm1, %v4258_v34  ;;  %6120 = vst [vmem:[#allocation17_spill] sm:$0xff] %v4339_v62  ;;  %v318_v22 = vand.u32 15, %v4358_v9  ;;  %v4369_v27 = vsel %vm6028_vm0, %v950_v55, %v952_v4  ;;  %v938_v55 = vrot.slane %v4375_v30, 1  ;;  %2367 = vmatpush.msra.mxu1 %v3769_v54 }
  0x2a   : > { %3631 = vmatmul.msk.f32.gmra.mxu3 %vm960_vm1, %v4261_v35  ;;  %6121 = vst [vmem:[#allocation18_spill] sm:$0xff] %v4362_v16  ;;  %2642 = vmatpush.msra.mxu2 %v3802_v44  ;;  %v4427_v44 = vld [vmem:[%s4181_s25 + $0xb8] sm:$0xff]  ;;  %v4435_v54 = vsel %vm6028_vm0, %v904_v14, %v906_v2 }
  0x2b   : > { %3607 = vmatmul.msk.f32.gmra.mxu0 %vm960_vm1, %v899_v39  ;;  %6122 = vst [vmem:[#allocation19_spill] sm:$0xff] %v4369_v27  ;;  %vm4380_vm2 = vcmp.ne.s32.totalorder %v318_v22, 0  ;;  %v4387_v39 = vsel %vm6028_vm0, %v902_v56, %v904_v14  ;;  %v954_v56 = vrot.slane %v4378_v31, 1  ;;  %v4415_v22 = vsel %vm6028_vm0, %v920_v0, %v922_v43 }
  0x2c   : > { %6123 = vst [vmem:[#allocation20_spill] sm:$0xff] %v4378_v31  ;;  %v4418_v42 = vsel %vm6028_vm0, %v936_v3, %v938_v55  ;;  %v924_v0 = vrot.slane %v4424_v15, 1  ;;  %v4443_v3 = vld [vmem:[%s4181_s25 + $0x38] sm:$0xff]  ;;  %v940_v11 = vrot.slane %v4427_v44, 1  ;;  %v956_v31 = vrot.slane %v4430_v52, 1 }
  0x2d   : > { %6126 = vst [vmem:[#allocation21_spill] sm:$0xff] %v4415_v22  ;;  %v4421_v8 = vsel %vm6028_vm0, %v952_v4, %v954_v56  ;;  %v3868_v4 = vld [vmem:[%s5966_s1 + $0x40] sm:$0xff]  ;;  %v908_v14 = vrot.slane %v4443_v3, 1 }
  0x2e   : > { %6127 = vst [vmem:[#allocation22_spill] sm:$0xff] %v4421_v8  ;;  %3080 = vmatpush.msra.mxu0 %v3868_v4  ;;  %v4457_v62 = vsel %vm6028_vm0, %v938_v55, %v940_v11  ;;  %v6132_v55 = vrot.slane %v4190_v7, 1 }
  0x2f   : > { %6128 = vst [vmem:[#allocation23_spill] sm:$0xff] %v4430_v52  ;;  %v4468_v4 = vsel %vm6028_vm0, %v906_v2, %v908_v14  ;;  %v6134_v52 = vrot.slane %v4199_v12, 1 }
  0x30   : > { %3616 = vmatmul.msk.f32.gmra.mxu1 %vm960_vm1, %v4288_v45  ;;  %6131 = vst [vmem:[#allocation26_spill] sm:$0xff] %v4463_v50 }
  0x31   : > { %3624 = vmatmul.msk.f32.gmra.mxu2 %vm960_vm1, %v4291_v46  ;;  %v4485_v2 = vsel %vm6028_vm0, %v940_v11, %v6134_v52  ;;  %v1412_v11 = vrot.slane %v4211_v18, 2  ;;  %v1413_v52 = vrot.slane %v4222_v21, 2 }
  0x32   : > { %3632 = vmatmul.msk.f32.gmra.mxu3 %vm960_vm1, %v4294_v47 }
  0x33   : > { %3608 = vmatmul.msk.f32.gmra.mxu0 %vm960_vm1, %v4308_v51 }
  0x38   : > { %3617 = vmatmul.msk.f32.gmra.mxu1 %vm960_vm1, %v4324_v57 }
  0x39   : > { %3625 = vmatmul.msk.f32.gmra.mxu2 %vm960_vm1, %v4327_v58 }
  0x3a   : > { %3633 = vmatmul.msk.f32.gmra.mxu3 %vm960_vm1, %v4330_v59 }
  0x3b   : > { %3609 = vmatmul.msk.f32.gmra.mxu0 %vm960_vm1, %v4344_v63 }
  0x40   : > { %3618 = vmatmul.msk.f32.gmra.mxu1 %vm960_vm1, %v4362_v16 }
  0x41   : > { %3626 = vmatmul.msk.f32.gmra.mxu2 %vm960_vm1, %v4366_v26 }
  0x42   : > { %3634 = vmatmul.msk.f32.gmra.mxu3 %vm960_vm1, %v4369_v27  ;;  %v4460_v27 = vsel %vm6028_vm0, %v954_v56, %v956_v31  ;;  %v4480_v56 = vsel %vm6028_vm0, %v924_v0, %v6132_v55 }
  0x43   : > { %3610 = vmatmul.msk.f32.gmra.mxu0 %vm960_vm1, %v4387_v39  ;;  %6130 = vst [vmem:[#allocation25_spill] sm:$0xff] %v4460_v27 }
  0x44   : > { %6133 = vst [vmem:[#allocation27_spill] sm:$0xff] %v4480_v56 }
  0x48   : > { %3619 = vmatmul.msk.f32.gmra.mxu1 %vm960_vm1, %v4415_v22 }
  0x49   : > { %3627 = vmatmul.msk.f32.gmra.mxu2 %vm960_vm1, %v4418_v42 }
  0x4a   : > { %3635 = vmatmul.msk.f32.gmra.mxu3 %vm960_vm1, %v4421_v8  ;;  %v4454_v8 = vsel %vm6028_vm0, %v922_v43, %v924_v0  ;;  %v5992_v43 = vrot.slane %v4463_v50, 1  ;;  %v1414_v0 = vsel %vm6032_vm3, %v1412_v11, %v1413_v52  ;;  %v284_v50 = vadd.s32 16, %v4358_v9 }
  0x4b   : > { %3611 = vmatmul.msk.f32.gmra.mxu0 %vm960_vm1, %v4435_v54  ;;  %6129 = vst [vmem:[#allocation24_spill] sm:$0xff] %v4454_v8 }
  0x4c   : > { %v4490_v59 = vsel %vm6028_vm0, %v956_v31, %v5992_v43  ;;  %v283_v31 = vadd.s32 8, %v4358_v9  ;;  %v1415_v43 = vrot.slane %v4247_v28, 2 }
  0x4d   : > { %6135 = vst [vmem:[#allocation28_spill] sm:$0xff] %v4490_v59 }
  0x4e   : > { %v325_v55 = vand.u32 15, %v283_v31  ;;  %v332_v31 = vand.u32 15, %v284_v50 }
  0x50   : > { %3620 = vmatmul.msk.f32.gmra.mxu1 %vm960_vm1, %v4454_v8  ;;  %vm4520_vm4 = vcmp.ne.s32.totalorder %v325_v55, 15  ;;  %vm4534_vm5 = vcmp.ne.s32.totalorder %v332_v31, 0  ;;  %v1419_v55 = vrot.slane %v4316_v53, 2  ;;  %v6145_v31 = vmov 0 }
  0x51   : > { %3628 = vmatmul.msk.f32.gmra.mxu2 %vm960_vm1, %v4457_v62 }
  0x52   : > { %3636 = vmatmul.msk.f32.gmra.mxu3 %vm960_vm1, %v4460_v27  ;;  %v6136_v27 = vrot.slane %v4184_v5, 1 }
  0x53   : > { %3612 = vmatmul.msk.f32.gmra.mxu0 %vm960_vm1, %v4468_v4 }
  0x54   : > { %v4497_v38 = vsel %vm6028_vm0, %v908_v14, %v6136_v27  ;;  %v826_v27 = vsel %vm4380_vm2, %v4211_v18, 0.0  ;;  %v1784_v14 = vsel %vm4380_vm2, %v4247_v28, 0.0  ;;  %v1416_v18 = vsel %vm6032_vm3, %v1413_v52, %v1415_v43 }
  0x55   : > { %6137 = vst [vmem:[#allocation29_spill] sm:$0xff] %v4497_v38  ;;  %v1510_v11 = vsel %vm4520_vm4, %v1416_v18, 0.0  ;;  %v1417_v52 = vrot.slane %v4281_v41, 2 }
  0x57   : > { %v4546_v50 = vsel %vm6032_vm3, %v1415_v43, %v1417_v52  ;;  %v4562_v43 = vsel %vm6032_vm3, %v1417_v52, %v1419_v55  ;;  %v1421_v52 = vrot.slane %v4352_v1, 2 }
  0x58   : > { %3621 = vmatmul.msk.f32.gmra.mxu1 %vm960_vm1, %v4480_v56  ;;  %v2223_v32 = vsel %vm4520_vm4, %v4562_v43, 0.0 }
  0x59   : > { %3629 = vmatmul.msk.f32.gmra.mxu2 %vm960_vm1, %v4485_v2 }
  0x5a   : > { %3637 = vmatmul.msk.f32.gmra.mxu3 %vm960_vm1, %v4490_v59 }
  0x5b   : > { %3613 = vmatmul.msk.f32.gmra.mxu0 %vm960_vm1, %v4497_v38 }
  0x60   : > { %3638 = vmatmul.msk.f32.vlgmr.msrb.gmra.mxu1 %vm960_vm1, %v826_v27 }
  0x61   : > { %3671 = vmatmul.msk.f32.vlgmr.msrb.gmra.mxu2 %vm960_vm1, %v1414_v0  ;;  %v1786_v0 = vsel %vm4534_vm5, %v4316_v53, 0.0 }
  0x62   : > { %3704 = vmatmul.msk.f32.vlgmr.msrb.gmra.mxu3 %vm960_vm1, %v1784_v14 }
  0x63   : > { %3737 = vmatmul.msk.f32.vlgmr.msrb.gmra.mxu0 %vm960_vm1, %v4308_v51  ;;  %v285_v51 = vadd.s32 24, %v4358_v9 }
  0x65   : > { %v339_v14 = vand.u32 15, %v285_v51  ;;  %v287_v51 = vadd.s32 40, %v4358_v9 }
  0x67   : > { %vm4557_vm6 = vcmp.ne.s32.totalorder %v339_v14, 15  ;;  %v353_v14 = vand.u32 15, %v287_v51 }
  0x68   : > { %3639 = vmatmul.msk.f32.gmra.mxu1 %vm960_vm1, %v4222_v21  ;;  %v828_v21 = vsel %vm4534_vm5, %v4247_v28, 0.0  ;;  %v6142_v28 = vmov 0  ;;  %v1512_v18 = vsel %vm4557_vm6, %v4562_v43, 0.0 }
  0x69   : > { %3672 = vmatmul.msk.f32.gmra.mxu2 %vm960_vm1, %v1510_v11  ;;  %v6143_v28 = vsel %vm4557_vm6, 4294967295, %v6142_v28  ;;  %vm4597_vm8 = vcmp.ne.s32.totalorder %v353_v14, 15  ;;  %v289_v14 = vadd.s32 56, %v4358_v9 }
  0x6a   : > { %3705 = vmatmul.msk.f32.gmra.mxu3 %vm960_vm1, %v4281_v41  ;;  %6144 = vst [vmem:[#allocation30_spill] sm:$0xff] %v6143_v28  ;;  %v1439_v28 = vrot.slane %v4372_v29, 2 }
  0x6b   : > { %3738 = vmatmul.msk.f32.gmra.mxu0 %vm960_vm1, %v4344_v63  ;;  %v286_v63 = vadd.s32 32, %v4358_v9 }
  0x6d   : > { %v346_v11 = vand.u32 15, %v286_v63  ;;  %v1423_v63 = vrot.slane %v4390_v40, 2 }
  0x6f   : > { %vm4574_vm7 = vcmp.ne.s32.totalorder %v346_v11, 0  ;;  %v6148_v11 = vmov 0 }
  0x70   : > { %3640 = vmatmul.msk.f32.gmra.mxu1 %vm960_vm1, %v828_v21  ;;  %v6146_v31 = vsel %vm4574_vm7, 4294967295, %v6145_v31  ;;  %v4586_v21 = vsel %vm6032_vm3, %v1419_v55, %v1421_v52  ;;  %v6149_v11 = vsel %vm4597_vm8, 4294967295, %v6148_v11  ;;  %v4602_v55 = vsel %vm6032_vm3, %v1421_v52, %v1423_v63 }
  0x71   : > { %3673 = vmatmul.msk.f32.gmra.mxu2 %vm960_vm1, %v4546_v50  ;;  %6147 = vst [vmem:[#allocation31_spill] sm:$0xff] %v6146_v31  ;;  %v1514_v51 = vsel %vm4597_vm8, %v4602_v55, 0.0  ;;  %v1425_v52 = vrot.slane %v4443_v3, 2  ;;  %v290_v31 = vadd.s32 64, %v4358_v9 }
  0x72   : > { %3706 = vmatmul.msk.f32.gmra.mxu3 %vm960_vm1, %v1786_v0  ;;  %v1788_v0 = vsel %vm4574_vm7, %v4390_v40, 0.0  ;;  %6150 = vst [vmem:[#allocation32_spill] sm:$0xff] %v6149_v11  ;;  %v1427_v11 = vrot.slane %v4184_v5, 2 }
  0x73   : > { %3739 = vmatmul.msk.f32.gmra.mxu0 %vm960_vm1, %v4387_v39 }
  0x78   : > { %3641 = vmatmul.msk.f32.gmra.mxu1 %vm960_vm1, %v4281_v41  ;;  %v830_v41 = vsel %vm4574_vm7, %v4316_v53, 0.0 }
  0x79   : > { %3674 = vmatmul.msk.f32.gmra.mxu2 %vm960_vm1, %v1512_v18  ;;  %v288_v18 = vadd.s32 48, %v4358_v9 }
  0x7a   : > { %3707 = vmatmul.msk.f32.gmra.mxu3 %vm960_vm1, %v4352_v1 }
  0x7b   : > { %3740 = vmatmul.msk.f32.gmra.mxu0 %vm960_vm1, %v4435_v54 }
  0x80   : > { %3642 = vmatmul.msk.f32.gmra.mxu1 %vm960_vm1, %v830_v41  ;;  %v360_v41 = vand.u32 15, %v288_v18  ;;  %v4626_v18 = vsel %vm6032_vm3, %v1423_v63, %v1425_v52  ;;  %v4642_v63 = vsel %vm6032_vm3, %v1425_v52, %v1427_v11  ;;  %v1429_v52 = vrot.slane %v4187_v6, 2 }
  0x81   : > { %3675 = vmatmul.msk.f32.gmra.mxu2 %vm960_vm1, %v4586_v21  ;;  %6154 = vst [vmem:[#allocation34_spill] sm:$0xff] %v4626_v18 }
  0x82   : > { %3708 = vmatmul.msk.f32.gmra.mxu3 %vm960_vm1, %v1788_v0  ;;  %vm4614_vm9 = vcmp.ne.s32.totalorder %v360_v41, 0  ;;  %v6151_v0 = vmov 0  ;;  %v367_v41 = vand.u32 15, %v289_v14  ;;  %6158 = vst [vmem:[#allocation36_spill] sm:$0xff] %v4642_v63 }
  0x83   : > { %3741 = vmatmul.msk.f32.gmra.mxu0 %vm960_vm1, %v4468_v4  ;;  %v6152_v0 = vsel %vm4614_vm9, 4294967295, %v6151_v0 }
  0x84   : > { %6153 = vst [vmem:[#allocation33_spill] sm:$0xff] %v6152_v0  ;;  %vm4637_vm10 = vcmp.ne.s32.totalorder %v367_v41, 15  ;;  %v291_v41 = vadd.s32 72, %v4358_v9  ;;  %v1431_v0 = vrot.slane %v4208_v17, 2 }
  0x85   : > { %v1516_v14 = vsel %vm4637_vm10, %v4642_v63, 0.0 }
  0x88   : > { %3643 = vmatmul.msk.f32.gmra.mxu1 %vm960_vm1, %v4352_v1  ;;  %v832_v1 = vsel %vm4614_vm9, %v4390_v40, 0.0  ;;  %v6155_v40 = vmov 0 }
  0x89   : > { %3676 = vmatmul.msk.f32.gmra.mxu2 %vm960_vm1, %v1514_v51  ;;  %v1790_v51 = vsel %vm4614_vm9, %v4184_v5, 0.0  ;;  %v6156_v40 = vsel %vm4637_vm10, 4294967295, %v6155_v40 }
  0x8a   : > { %3709 = vmatmul.msk.f32.gmra.mxu3 %vm960_vm1, %v4443_v3  ;;  %6157 = vst [vmem:[#allocation35_spill] sm:$0xff] %v6156_v40  ;;  %v381_v40 = vand.u32 15, %v291_v41 }
  0x8b   : > { %3742 = vmatmul.msk.f32.gmra.mxu0 %vm960_vm1, %v4497_v38  ;;  %v1435_v38 = vrot.slane %v4297_v48, 2 }
  0x8c   : > { %vm4681_vm12 = vcmp.ne.s32.totalorder %v381_v40, 15 }
  0x90   : > { %3644 = vmatmul.msk.f32.gmra.mxu1 %vm960_vm1, %v832_v1  ;;  %v374_v1 = vand.u32 15, %v290_v31 }
  0x91   : > { %3677 = vmatmul.msk.f32.gmra.mxu2 %vm960_vm1, %v4626_v18 }
  0x92   : > { %3710 = vmatmul.msk.f32.gmra.mxu3 %vm960_vm1, %v1790_v51  ;;  %vm4654_vm11 = vcmp.ne.s32.totalorder %v374_v1, 0  ;;  %v6159_v51 = vmov 0 }
  0x93   : > { %3743 = vmatmul.msk.f32.gmra.mxu0 %vm960_vm1, %v4216_v19  ;;  %v6160_v51 = vsel %vm4654_vm11, 4294967295, %v6159_v51  ;;  %v1792_v1 = vsel %vm4654_vm11, %v4208_v17, 0.0 }
  0x94   : > { %6161 = vst [vmem:[#allocation37_spill] sm:$0xff] %v6160_v51  ;;  %v4686_v51 = vsel %vm6032_vm3, %v1429_v52, %v1431_v0 }
  0x95   : > { %6166 = vst [vmem:[#allocation40_spill] sm:$0xff] %v4686_v51 }
  0x98   : > { %3645 = vmatmul.msk.f32.gmra.mxu1 %vm960_vm1, %v4443_v3  ;;  %v834_v3 = vsel %vm4654_vm11, %v4184_v5, 0.0  ;;  %v292_v5 = vadd.s32 80, %v4358_v9 }
  0x99   : > { %3678 = vmatmul.msk.f32.gmra.mxu2 %vm960_vm1, %v1516_v14  ;;  %v4668_v14 = vsel %vm6032_vm3, %v1427_v11, %v1429_v52  ;;  %v6163_v11 = vmov 0  ;;  %v6168_v52 = vmov 0 }
  0x9a   : > { %3711 = vmatmul.msk.f32.gmra.mxu3 %vm960_vm1, %v4187_v6  ;;  %6162 = vst [vmem:[#allocation38_spill] sm:$0xff] %v4668_v14  ;;  %v6164_v11 = vsel %vm4681_vm12, 4294967295, %v6163_v11  ;;  %v388_v40 = vand.u32 15, %v292_v5  ;;  %v293_v5 = vadd.s32 88, %v4358_v9 }
  0x9b   : > { %3744 = vmatmul.msk.f32.gmra.mxu0 %vm960_vm1, %v4255_v33  ;;  %6165 = vst [vmem:[#allocation39_spill] sm:$0xff] %v6164_v11 }
  0x9c   : > { %vm4706_vm13 = vcmp.ne.s32.totalorder %v388_v40, 0 }
  0x9d   : > { %v4662_v31 = vpop.f32.mrf.mxu1  ;;  %v6169_v52 = vsel %vm4706_vm13, 4294967295, %v6168_v52 }
  0x9e   : > { %6170 = vst [vmem:[#allocation42_spill] sm:$0xff] %v6169_v52 }
  0xa0   : > { %3646 = vmatmul.msk.f32.gmra.mxu1 %vm960_vm1, %v834_v3  ;;  %v4675_v33 = vpop.f32.mrf.mxu0 }
  0xa1   : > { %3679 = vmatmul.msk.f32.gmra.mxu2 %vm960_vm1, %v4668_v14 }
  0xa2   : > { %3712 = vmatmul.msk.f32.gmra.mxu3 %vm960_vm1, %v1792_v1  ;;  %v1518_v1 = vsel %vm4681_vm12, %v4686_v51, 0.0  ;;  %v1794_v51 = vsel %vm4706_vm13, %v4297_v48, 0.0 }
  0xa3   : > { %3745 = vmatmul.msk.f32.gmra.mxu0 %vm960_vm1, %v4288_v45 }
  0xa4   : > { %v4690_v41 = vpop.f32.mrf.mxu2 }
  0xa5   : > { %v4692_v3 = vpop.f32.mrf.mxu3  ;;  %v4694_v19 = vpop.f32.mrf.mxu1 }
  0xa6   : > { %6167 = vst [vmem:[#allocation41_spill] sm:$0xff] %v4692_v3  ;;  %v1433_v3 = vrot.slane %v4264_v36, 2 }
  0xa8   : > { %3647 = vmatmul.msk.f32.gmra.mxu1 %vm960_vm1, %v4187_v6  ;;  %v4701_v14 = vpop.f32.mrf.mxu0  ;;  %v4724_v40 = vsel %vm6032_vm3, %v1431_v0, %v1433_v3  ;;  %v6173_v0 = vmov 0  ;;  %v4742_v52 = vsel %vm6032_vm3, %v1433_v3, %v1435_v38  ;;  %v6179_v3 = vmov 0 }
  0xa9   : > { %3680 = vmatmul.msk.f32.gmra.mxu2 %vm960_vm1, %v1518_v1  ;;  %v836_v1 = vsel %vm4706_vm13, %v4208_v17, 0.0  ;;  %6172 = vst [vmem:[#allocation44_spill] sm:$0xff] %v4724_v40  ;;  %v294_v17 = vadd.s32 96, %v4358_v9 }
  0xaa   : > { %3713 = vmatmul.msk.f32.gmra.mxu3 %vm960_vm1, %v4264_v36  ;;  %6176 = vst [vmem:[#allocation46_spill] sm:$0xff] %v4742_v52 }
  0xab   : > { %3746 = vmatmul.msk.f32.gmra.mxu0 %vm960_vm1, %v4324_v57  ;;  %v395_v57 = vand.u32 15, %v293_v5 }
  0xac   : > { %v4714_v11 = vpop.f32.mrf.mxu2 }
  0xad   : > { %v4716_v6 = vpop.f32.mrf.mxu3  ;;  %v4718_v45 = vpop.f32.mrf.mxu1  ;;  %vm4737_vm14 = vcmp.ne.s32.totalorder %v395_v57, 15  ;;  %v402_v57 = vand.u32 15, %v294_v17  ;;  %v295_v17 = vadd.s32 104, %v4358_v9 }
  0xae   : > { %6171 = vst [vmem:[#allocation43_spill] sm:$0xff] %v4716_v6  ;;  %v6174_v0 = vsel %vm4737_vm14, 4294967295, %v6173_v0 }
  0xaf   : > { %6175 = vst [vmem:[#allocation45_spill] sm:$0xff] %v6174_v0  ;;  %vm4762_vm15 = vcmp.ne.s32.totalorder %v402_v57, 0 }
  0xb0   : > { %3648 = vmatmul.msk.f32.gmra.mxu1 %vm960_vm1, %v836_v1  ;;  %v4731_v63 = vpop.f32.mrf.mxu0  ;;  %v6180_v3 = vsel %vm4762_vm15, 4294967295, %v6179_v3 }
  0xb1   : > { %3681 = vmatmul.msk.f32.gmra.mxu2 %vm960_vm1, %v4724_v40  ;;  %6181 = vst [vmem:[#allocation49_spill] sm:$0xff] %v6180_v3 }
  0xb2   : > { %3714 = vmatmul.msk.f32.gmra.mxu3 %vm960_vm1, %v1794_v51  ;;  %v1520_v51 = vsel %vm4737_vm14, %v4742_v52, 0.0  ;;  %v1796_v52 = vsel %vm4762_vm15, %v4372_v29, 0.0 }
  0xb3   : > { %3747 = vmatmul.msk.f32.gmra.mxu0 %vm960_vm1, %v4362_v16 }
  0xb4   : > { %v4746_v5 = vpop.f32.mrf.mxu2 }
  0xb5   : > { %6177 = vst [vmem:[#allocation47_spill] sm:$0xff] %v4746_v5  ;;  %v4748_v1 = vpop.f32.mrf.mxu3  ;;  %v4750_v6 = vpop.f32.mrf.mxu1 }
  0xb6   : > { %6178 = vst [vmem:[#allocation48_spill] sm:$0xff] %v4748_v1  ;;  %v1437_v1 = vrot.slane %v4333_v60, 2 }
  0xb8   : > { %3649 = vmatmul.msk.f32.gmra.mxu1 %vm960_vm1, %v4264_v36  ;;  %v4757_v40 = vpop.f32.mrf.mxu0  ;;  %v4780_v57 = vsel %vm6032_vm3, %v1435_v38, %v1437_v1  ;;  %v6185_v38 = vmov 0  ;;  %v4798_v3 = vsel %vm6032_vm3, %v1437_v1, %v1439_v28  ;;  %v6191_v1 = vmov 0 }
  0xb9   : > { %3682 = vmatmul.msk.f32.gmra.mxu2 %vm960_vm1, %v1520_v51  ;;  %v838_v51 = vsel %vm4762_vm15, %v4297_v48, 0.0  ;;  %6184 = vst [vmem:[#allocation52_spill] sm:$0xff] %v4780_v57  ;;  %v296_v48 = vadd.s32 112, %v4358_v9  ;;  %vm6201_vm15 = vcmask 1045504  }
  0xba   : > { %3715 = vmatmul.msk.f32.gmra.mxu3 %vm960_vm1, %v4333_v60  ;;  %6188 = vst [vmem:[#allocation54_spill] sm:$0xff] %v4798_v3 }
  0xbb   : > { %3748 = vmatmul.msk.f32.gmra.mxu0 %vm960_vm1, %v4415_v22  ;;  %v409_v22 = vand.u32 15, %v295_v17 }
  0xbc   : > { %v4770_v0 = vpop.f32.mrf.mxu2 }
  0xbd   : > { %6182 = vst [vmem:[#allocation50_spill] sm:$0xff] %v4770_v0  ;;  %v4772_v36 = vpop.f32.mrf.mxu3  ;;  %v4774_v16 = vpop.f32.mrf.mxu1  ;;  %vm4793_vm0 = vcmp.ne.s32.totalorder %v409_v22, 15  ;;  %v416_v22 = vand.u32 15, %v296_v48  ;;  %v297_v48 = vadd.s32 120, %v4358_v9 }
  0xbe   : > { %6183 = vst [vmem:[#allocation51_spill] sm:$0xff] %v4772_v36  ;;  %v6186_v38 = vsel %vm4793_vm0, 4294967295, %v6185_v38 }
  0xbf   : > { %6187 = vst [vmem:[#allocation53_spill] sm:$0xff] %v6186_v38  ;;  %vm4818_vm3 = vcmp.ne.s32.totalorder %v416_v22, 0 }
  0xc0   : > { %3650 = vmatmul.msk.f32.gmra.mxu1 %vm960_vm1, %v838_v51  ;;  %v4787_v0 = vpop.f32.mrf.mxu0  ;;  %v6192_v1 = vsel %vm4818_vm3, 4294967295, %v6191_v1 }
  0xc1   : > { %3683 = vmatmul.msk.f32.gmra.mxu2 %vm960_vm1, %v4780_v57  ;;  %6193 = vst [vmem:[#allocation57_spill] sm:$0xff] %v6192_v1 }
  0xc2   : > { %3716 = vmatmul.msk.f32.gmra.mxu3 %vm960_vm1, %v1796_v52  ;;  %v1522_v52 = vsel %vm4793_vm0, %v4798_v3, 0.0  ;;  %vm6196_vm0 = vcmask 1045504   ;;  %v1798_v3 = vsel %vm4818_vm3, %v4190_v7, 0.0 }
  0xc3   : > { %3749 = vmatmul.msk.f32.gmra.mxu0 %vm960_vm1, %v4454_v8 }
  0xc4   : > { %v4802_v17 = vpop.f32.mrf.mxu2 }
  0xc5   : > { %6189 = vst [vmem:[#allocation55_spill] sm:$0xff] %v4802_v17  ;;  %v4804_v51 = vpop.f32.mrf.mxu3  ;;  %v4806_v36 = vpop.f32.mrf.mxu1  ;;  %v1443_v17 = vrot.slane %v4190_v7, 2 }
  0xc6   : > { %6190 = vst [vmem:[#allocation56_spill] sm:$0xff] %v4804_v51  ;;  %v1441_v51 = vrot.slane %v4424_v15, 2 }
  0xc8   : > { %3651 = vmatmul.msk.f32.gmra.mxu1 %vm960_vm1, %v4333_v60  ;;  %v4813_v57 = vpop.f32.mrf.mxu0  ;;  %v4836_v22 = vsel %vm6196_vm0, %v1439_v28, %v1441_v51  ;;  %v6198_v28 = vmov 0  ;;  %v4854_v1 = vsel %vm6201_vm15, %v1441_v51, %v1443_v17  ;;  %v6205_v51 = vmov 0 }
  0xc9   : > { %3684 = vmatmul.msk.f32.gmra.mxu2 %vm960_vm1, %v1522_v52  ;;  %v840_v52 = vsel %vm4818_vm3, %v4372_v29, 0.0  ;;  %6197 = vst [vmem:[#allocation60_spill] sm:$0xff] %v4836_v22  ;;  %v298_v29 = vadd.s32 128, %v4358_v9  ;;  %vm6292_vm3 = vcmask 1046528  }
  0xca   : > { %3717 = vmatmul.msk.f32.gmra.mxu3 %vm960_vm1, %v4424_v15  ;;  %6202 = vst [vmem:[#allocation62_spill] sm:$0xff] %v4854_v1 }
  0xcb   : > { %3750 = vmatmul.msk.f32.gmra.mxu0 %vm960_vm1, %v4480_v56  ;;  %v423_v56 = vand.u32 15, %v297_v48 }
  0xcc   : > { %v4826_v38 = vpop.f32.mrf.mxu2 }
  0xcd   : > { %6194 = vst [vmem:[#allocation58_spill] sm:$0xff] %v4826_v38  ;;  %v4828_v60 = vpop.f32.mrf.mxu3  ;;  %v4830_v8 = vpop.f32.mrf.mxu1  ;;  %vm4849_vm0 = vcmp.ne.s32.totalorder %v423_v56, 15  ;;  %v430_v56 = vand.u32 15, %v298_v29  ;;  %v299_v29 = vadd.s32 136, %v4358_v9 }
  0xce   : > { %6195 = vst [vmem:[#allocation59_spill] sm:$0xff] %v4828_v60  ;;  %v6199_v28 = vsel %vm4849_vm0, 4294967295, %v6198_v28 }
  0xcf   : > { %6200 = vst [vmem:[#allocation61_spill] sm:$0xff] %v6199_v28  ;;  %vm4874_vm15 = vcmp.ne.s32.totalorder %v430_v56, 0 }
  0xd0   : > { %3652 = vmatmul.msk.f32.gmra.mxu1 %vm960_vm1, %v840_v52  ;;  %v4843_v38 = vpop.f32.mrf.mxu0  ;;  %v6206_v51 = vsel %vm4874_vm15, 4294967295, %v6205_v51 }
  0xd1   : > { %3685 = vmatmul.msk.f32.gmra.mxu2 %vm960_vm1, %v4836_v22  ;;  %6207 = vst [vmem:[#allocation65_spill] sm:$0xff] %v6206_v51 }
  0xd2   : > { %3718 = vmatmul.msk.f32.gmra.mxu3 %vm960_vm1, %v1798_v3  ;;  %v1524_v3 = vsel %vm4849_vm0, %v4854_v1, 0.0  ;;  %vm6210_vm0 = vcmask 1045504   ;;  %v1800_v1 = vsel %vm4874_vm15, %v4219_v20, 0.0 }
  0xd3   : > { %3751 = vmatmul.msk.f32.gmra.mxu0 %vm960_vm1, %v4233_v24 }
  0xd4   : > { %v4858_v48 = vpop.f32.mrf.mxu2 }
  0xd5   : > { %6203 = vst [vmem:[#allocation63_spill] sm:$0xff] %v4858_v48  ;;  %v4860_v52 = vpop.f32.mrf.mxu3  ;;  %v4862_v60 = vpop.f32.mrf.mxu1  ;;  %v437_v48 = vand.u32 15, %v299_v29 }
  0xd6   : > { %6204 = vst [vmem:[#allocation64_spill] sm:$0xff] %v4860_v52  ;;  %v1445_v52 = vrot.slane %v4195_v10, 2 }
  0xd8   : > { %3653 = vmatmul.msk.f32.gmra.mxu1 %vm960_vm1, %v4424_v15  ;;  %v4869_v22 = vpop.f32.mrf.mxu0  ;;  %v4890_v56 = vsel %vm6210_vm0, %v1443_v17, %v1445_v52  ;;  %vm4902_vm0 = vcmp.ne.s32.totalorder %v437_v48, 15 }
  0xd9   : > { %3686 = vmatmul.msk.f32.gmra.mxu2 %vm960_vm1, %v1524_v3  ;;  %v842_v3 = vsel %vm4874_vm15, %v4190_v7, 0.0  ;;  %6211 = vst [vmem:[#allocation68_spill] sm:$0xff] %v4890_v56  ;;  %v300_v7 = vadd.s32 144, %v4358_v9  ;;  %vm6215_vm15 = vcmask 1045504  }
  0xda   : > { %3719 = vmatmul.msk.f32.gmra.mxu3 %vm960_vm1, %v4195_v10 }
  0xdb   : > { %3752 = vmatmul.msk.f32.gmra.mxu0 %vm960_vm1, %v4258_v34  ;;  %v1447_v34 = vrot.slane %v4219_v20, 2  ;;  %v444_v5 = vand.u32 15, %v300_v7 }
  0xdc   : > { %v4882_v28 = vpop.f32.mrf.mxu2 }
  0xdd   : > { %6208 = vst [vmem:[#allocation66_spill] sm:$0xff] %v4882_v28  ;;  %v4884_v15 = vpop.f32.mrf.mxu3  ;;  %v1251_v24 = vpop.f32.mrf.mxu1  ;;  %v4907_v29 = vsel %vm6215_vm15, %v1445_v52, %v1447_v34  ;;  %vm4921_vm15 = vcmp.ne.s32.totalorder %v444_v5, 0  ;;  %v6217_v52 = vmov 0 }
  0xde   : > { %6209 = vst [vmem:[#allocation67_spill] sm:$0xff] %v4884_v15  ;;  %v1252_v17 = vadd.f32 %v1251_v24, %v4675_v33  ;;  %v6212_v15 = vmov 0  ;;  %v6218_v52 = vsel %vm4921_vm15, 4294967295, %v6217_v52  ;;  %v844_v5 = vsel %vm4921_vm15, %v4219_v20, 0.0 }
  0xdf   : > { %v6213_v15 = vsel %vm4902_vm0, 4294967295, %v6212_v15  ;;  %v302_v20 = vadd.s32 160, %v4358_v9 }
  0xe0   : > { %3654 = vmatmul.msk.f32.gmra.mxu1 %vm960_vm1, %v842_v3  ;;  %v2088_v28 = vpop.f32.mrf.mxu0  ;;  %6214 = vst [vmem:[#allocation69_spill] sm:$0xff] %v6213_v15  ;;  %v1451_v15 = vrot.slane %v4300_v49, 2 }
  0xe1   : > { %3687 = vmatmul.msk.f32.gmra.mxu2 %vm960_vm1, %v4890_v56 }
  0xe2   : > { %3720 = vmatmul.msk.f32.gmra.mxu3 %vm960_vm1, %v1800_v1  ;;  %v1526_v1 = vsel %vm4902_vm0, %v4907_v29, 0.0  ;;  %vm6219_vm0 = vcmask 1045504  }
  0xe3   : > { %3753 = vmatmul.msk.f32.gmra.mxu0 %vm960_vm1, %v4291_v46 }
  0xe4   : > { %v1656_v3 = vpop.f32.mrf.mxu2 }
  0xe5   : > { %v1931_v51 = vpop.f32.mrf.mxu3  ;;  %v1752_v18 = vadd.f32 %v1656_v3, %v1252_v17  ;;  %v1254_v56 = vpop.f32.mrf.mxu1  ;;  %v1449_v17 = vrot.slane %v4267_v37, 2 }
  0xe6   : > { %v1255_v7 = vadd.f32 %v1254_v56, %v4701_v14  ;;  %v1802_v14 = vsel %vm4921_vm15, %v4300_v49, 0.0  ;;  %vm6223_vm15 = vcmask 1045504  }
  0xe7   : > { %v2027_v24 = vadd.f32 %v1931_v51, %v1752_v18 }
  0xe8   : > { %3655 = vmatmul.msk.f32.gmra.mxu1 %vm960_vm1, %v4195_v10  ;;  %v2091_v33 = vpop.f32.mrf.mxu0  ;;  %v301_v10 = vadd.s32 152, %v4358_v9 }
  0xe9   : > { %v4916_v48 = vadd.f32 %v2088_v28, %v2027_v24  ;;  %3688 = vmatmul.msk.f32.gmra.mxu2 %vm960_vm1, %v1526_v1  ;;  %v4934_v1 = vsel %vm6219_vm0, %v1447_v34, %v1449_v17 }
  0xea   : > { %3721 = vmatmul.msk.f32.gmra.mxu3 %vm960_vm1, %v4267_v37  ;;  %v451_v24 = vand.u32 15, %v301_v10  ;;  %v4953_v10 = vsel %vm6223_vm15, %v1449_v17, %v1451_v15  ;;  %v6225_v17 = vmov 0 }
  0xeb   : > { %6216 = vst [vmem:[#allocation70_spill] sm:$0xff] %v4916_v48  ;;  %3754 = vmatmul.msk.f32.gmra.mxu0 %vm960_vm1, %v4327_v58 }
  0xec   : > { %v1659_v18 = vpop.f32.mrf.mxu2  ;;  %vm4948_vm0 = vcmp.ne.s32.totalorder %v451_v24, 15 }
  0xed   : > { %v1934_v28 = vpop.f32.mrf.mxu3  ;;  %v1753_v51 = vadd.f32 %v1659_v18, %v1255_v7  ;;  %v1257_v3 = vpop.f32.mrf.mxu1  ;;  %v6220_v18 = vmov 0 }
  0xee   : > { %v1258_v34 = vadd.f32 %v1257_v3, %v4731_v63  ;;  %v6221_v18 = vsel %vm4948_vm0, 4294967295, %v6220_v18 }
  0xef   : > { %v2028_v56 = vadd.f32 %v1934_v28, %v1753_v51  ;;  %6222 = vst [vmem:[#allocation71_spill] sm:$0xff] %v6221_v18  ;;  %v1455_v18 = vrot.slane %v4375_v30, 2 }
  0xf0   : > { %3656 = vmatmul.msk.f32.gmra.mxu1 %vm960_vm1, %v844_v5  ;;  %v2094_v48 = vpop.f32.mrf.mxu0 }
  0xf1   : > { %v4941_v7 = vadd.f32 %v2091_v33, %v2028_v56  ;;  %3689 = vmatmul.msk.f32.gmra.mxu2 %vm960_vm1, %v4934_v1  ;;  %v458_v56 = vand.u32 15, %v302_v20 }
  0xf2   : > { %3722 = vmatmul.msk.f32.gmra.mxu3 %vm960_vm1, %v1802_v14  ;;  %v1528_v14 = vsel %vm4948_vm0, %v4953_v10, 0.0  ;;  %vm6227_vm0 = vcmask 1045504  }
  0xf3   : > { %3755 = vmatmul.msk.f32.gmra.mxu0 %vm960_vm1, %v4366_v26  ;;  %vm4967_vm15 = vcmp.ne.s32.totalorder %v458_v56, 0 }
  0xf4   : > { %v1662_v33 = vpop.f32.mrf.mxu2  ;;  %v6226_v17 = vsel %vm4967_vm15, 4294967295, %v6225_v17 }
  0xf5   : > { %v1937_v28 = vpop.f32.mrf.mxu3  ;;  %v1754_v51 = vadd.f32 %v1662_v33, %v1258_v34  ;;  %v1260_v5 = vpop.f32.mrf.mxu1  ;;  %v1453_v34 = vrot.slane %v4336_v61, 2 }
  0xf6   : > { %v1261_v20 = vadd.f32 %v1260_v5, %v4757_v40  ;;  %v1804_v40 = vsel %vm4967_vm15, %v4375_v30, 0.0 }
  0xf7   : > { %v2029_v63 = vadd.f32 %v1937_v28, %v1754_v51  ;;  %v4980_v56 = vsel %vm6227_vm0, %v1451_v15, %v1453_v34 }
  0xf8   : > { %3657 = vmatmul.msk.f32.gmra.mxu1 %vm960_vm1, %v4267_v37  ;;  %v2097_v3 = vpop.f32.mrf.mxu0  ;;  %v303_v37 = vadd.s32 168, %v4358_v9 }
  0xf9   : > { %v4962_v24 = vadd.f32 %v2094_v48, %v2029_v63  ;;  %3690 = vmatmul.msk.f32.gmra.mxu2 %vm960_vm1, %v1528_v14  ;;  %v846_v14 = vsel %vm4967_vm15, %v4300_v49, 0.0  ;;  %v304_v49 = vadd.s32 176, %v4358_v9  ;;  %vm6231_vm15 = vcmask 1045504  }
  0xfa   : > { %3723 = vmatmul.msk.f32.gmra.mxu3 %vm960_vm1, %v4336_v61  ;;  %v465_v63 = vand.u32 15, %v303_v37  ;;  %v4999_v37 = vsel %vm6231_vm15, %v1453_v34, %v1455_v18  ;;  %v6233_v34 = vmov 0 }
  0xfb   : > { %6224 = vst [vmem:[#allocation72_spill] sm:$0xff] %v4962_v24  ;;  %3756 = vmatmul.msk.f32.gmra.mxu0 %vm960_vm1, %v4418_v42 }
  0xfc   : > { %v1665_v48 = vpop.f32.mrf.mxu2  ;;  %vm4994_vm0 = vcmp.ne.s32.totalorder %v465_v63, 15 }
  0xfd   : > { %v1940_v33 = vpop.f32.mrf.mxu3  ;;  %v1755_v28 = vadd.f32 %v1665_v48, %v1261_v20  ;;  %v1263_v51 = vpop.f32.mrf.mxu1  ;;  %v6228_v48 = vmov 0 }
  0xfe   : > { %v1264_v15 = vadd.f32 %v1263_v51, %v4787_v0  ;;  %v6229_v48 = vsel %vm4994_vm0, 4294967295, %v6228_v48 }
  0xff   : > { %v2030_v5 = vadd.f32 %v1940_v33, %v1755_v28  ;;  %6230 = vst [vmem:[#allocation73_spill] sm:$0xff] %v6229_v48  ;;  %v1459_v48 = vrot.slane %v4199_v12, 2 }
 0x100   : > { %3658 = vmatmul.msk.f32.gmra.mxu1 %vm960_vm1, %v846_v14  ;;  %v2100_v24 = vpop.f32.mrf.mxu0 }
 0x101   : > { %v4987_v20 = vadd.f32 %v2097_v3, %v2030_v5  ;;  %3691 = vmatmul.msk.f32.gmra.mxu2 %vm960_vm1, %v4980_v56  ;;  %v472_v5 = vand.u32 15, %v304_v49 }
 0x102   : > { %3724 = vmatmul.msk.f32.gmra.mxu3 %vm960_vm1, %v1804_v40  ;;  %v1530_v40 = vsel %vm4994_vm0, %v4999_v37, 0.0  ;;  %vm6235_vm0 = vcmask 1045504  }
 0x103   : > { %3757 = vmatmul.msk.f32.gmra.mxu0 %vm960_vm1, %v4457_v62  ;;  %vm5013_vm15 = vcmp.ne.s32.totalorder %v472_v5, 0 }
 0x104   : > { %v1668_v3 = vpop.f32.mrf.mxu2  ;;  %v6234_v34 = vsel %vm5013_vm15, 4294967295, %v6233_v34 }
 0x105   : > { %v1943_v33 = vpop.f32.mrf.mxu3  ;;  %v1756_v28 = vadd.f32 %v1668_v3, %v1264_v15  ;;  %v1266_v14 = vpop.f32.mrf.mxu1  ;;  %v1457_v15 = vrot.slane %v4427_v44, 2 }
 0x106   : > { %v1267_v49 = vadd.f32 %v1266_v14, %v4813_v57  ;;  %v1806_v57 = vsel %vm5013_vm15, %v4199_v12, 0.0 }
 0x107   : > { %v2031_v0 = vadd.f32 %v1943_v33, %v1756_v28  ;;  %v5026_v5 = vsel %vm6235_vm0, %v1455_v18, %v1457_v15 }
 0x108   : > { %3659 = vmatmul.msk.f32.gmra.mxu1 %vm960_vm1, %v4336_v61  ;;  %v2103_v51 = vpop.f32.mrf.mxu0  ;;  %v305_v61 = vadd.s32 184, %v4358_v9 }
 0x109   : > { %v5008_v63 = vadd.f32 %v2100_v24, %v2031_v0  ;;  %3692 = vmatmul.msk.f32.gmra.mxu2 %vm960_vm1, %v1530_v40  ;;  %v848_v40 = vsel %vm5013_vm15, %v4375_v30, 0.0  ;;  %v306_v30 = vadd.s32 192, %v4358_v9  ;;  %vm6239_vm15 = vcmask 1045504  }
 0x10a   : > { %3725 = vmatmul.msk.f32.gmra.mxu3 %vm960_vm1, %v4427_v44  ;;  %v479_v0 = vand.u32 15, %v305_v61  ;;  %v5045_v61 = vsel %vm6239_vm15, %v1457_v15, %v1459_v48  ;;  %v6241_v15 = vmov 0 }
 0x10b   : > { %6232 = vst [vmem:[#allocation74_spill] sm:$0xff] %v5008_v63  ;;  %3758 = vmatmul.msk.f32.gmra.mxu0 %vm960_vm1, %v4485_v2 }
 0x10c   : > { %v1671_v24 = vpop.f32.mrf.mxu2  ;;  %vm5040_vm0 = vcmp.ne.s32.totalorder %v479_v0, 15 }
 0x10d   : > { %v1946_v3 = vpop.f32.mrf.mxu3  ;;  %v1757_v33 = vadd.f32 %v1671_v24, %v1267_v49  ;;  %v1269_v28 = vpop.f32.mrf.mxu1  ;;  %v6236_v24 = vmov 0 }
 0x10e   : > { %v1270_v18 = vadd.f32 %v1269_v28, %v4843_v38  ;;  %v6237_v24 = vsel %vm5040_vm0, 4294967295, %v6236_v24 }
 0x10f   : > { %v2032_v14 = vadd.f32 %v1946_v3, %v1757_v33  ;;  %6238 = vst [vmem:[#allocation75_spill] sm:$0xff] %v6237_v24  ;;  %v1463_v24 = vrot.slane %v4226_v23, 2 }
 0x110   : > { %3660 = vmatmul.msk.f32.gmra.mxu1 %vm960_vm1, %v848_v40  ;;  %v2106_v63 = vpop.f32.mrf.mxu0 }
 0x111   : > { %v5033_v49 = vadd.f32 %v2103_v51, %v2032_v14  ;;  %3693 = vmatmul.msk.f32.gmra.mxu2 %vm960_vm1, %v5026_v5  ;;  %v486_v14 = vand.u32 15, %v306_v30 }
 0x112   : > { %3726 = vmatmul.msk.f32.gmra.mxu3 %vm960_vm1, %v1806_v57  ;;  %v1532_v57 = vsel %vm5040_vm0, %v5045_v61, 0.0  ;;  %vm6244_vm0 = vcmask 1045504  }
 0x113   : > { %3759 = vmatmul.msk.f32.gmra.mxu0 %vm960_vm1, %v4238_v25  ;;  %vm5059_vm15 = vcmp.ne.s32.totalorder %v486_v14, 0 }
 0x114   : > { %v1674_v51 = vpop.f32.mrf.mxu2  ;;  %v6242_v15 = vsel %vm5059_vm15, 4294967295, %v6241_v15 }
 0x115   : > { %v1949_v3 = vpop.f32.mrf.mxu3  ;;  %v1758_v33 = vadd.f32 %v1674_v51, %v1270_v18  ;;  %v1272_v40 = vpop.f32.mrf.mxu1  ;;  %6243 = vst [vmem:[#allocation77_spill] sm:$0xff] %v6242_v15  ;;  %v1461_v18 = vrot.slane %v4202_v13, 2 }
 0x116   : > { %v1273_v30 = vadd.f32 %v1272_v40, %v4869_v22  ;;  %v1808_v22 = vsel %vm5059_vm15, %v4226_v23, 0.0 }
 0x117   : > { %v2033_v38 = vadd.f32 %v1949_v3, %v1758_v33  ;;  %v5072_v14 = vsel %vm6244_vm0, %v1459_v48, %v1461_v18 }
 0x118   : > { %3661 = vmatmul.msk.f32.gmra.mxu1 %vm960_vm1, %v4427_v44  ;;  %v2109_v28 = vpop.f32.mrf.mxu0  ;;  %v307_v44 = vadd.s32 200, %v4358_v9 }
 0x119   : > { %v5054_v0 = vadd.f32 %v2106_v63, %v2033_v38  ;;  %3694 = vmatmul.msk.f32.gmra.mxu2 %vm960_vm1, %v1532_v57  ;;  %v850_v57 = vsel %vm5059_vm15, %v4199_v12, 0.0  ;;  %v308_v12 = vadd.s32 208, %v4358_v9  ;;  %vm6249_vm15 = vcmask 1045504  }
 0x11a   : > { %3727 = vmatmul.msk.f32.gmra.mxu3 %vm960_vm1, %v4202_v13  ;;  %v493_v38 = vand.u32 15, %v307_v44  ;;  %v5091_v23 = vsel %vm6249_vm15, %v1461_v18, %v1463_v24 }
 0x11b   : > { %6240 = vst [vmem:[#allocation76_spill] sm:$0xff] %v5054_v0  ;;  %3760 = vmatmul.msk.f32.gmra.mxu0 %vm960_vm1, %v4261_v35 }
 0x11c   : > { %v1677_v63 = vpop.f32.mrf.mxu2  ;;  %vm5086_vm0 = vcmp.ne.s32.totalorder %v493_v38, 15  ;;  %v6252_v38 = vmov 0 }
 0x11d   : > { %v1952_v51 = vpop.f32.mrf.mxu3  ;;  %v1759_v3 = vadd.f32 %v1677_v63, %v1273_v30  ;;  %v1275_v33 = vpop.f32.mrf.mxu1  ;;  %v6246_v63 = vmov 0 }
 0x11e   : > { %v1276_v48 = vadd.f32 %v1275_v33, %v4662_v31  ;;  %v6247_v63 = vsel %vm5086_vm0, 4294967295, %v6246_v63 }
 0x11f   : > { %v2034_v40 = vadd.f32 %v1952_v51, %v1759_v3  ;;  %6248 = vst [vmem:[#allocation79_spill] sm:$0xff] %v6247_v63 }
 0x120   : > { %3662 = vmatmul.msk.f32.gmra.mxu1 %vm960_vm1, %v850_v57  ;;  %v2112_v0 = vpop.f32.mrf.mxu0  ;;  %v1534_v57 = vsel %vm5086_vm0, %v5091_v23, 0.0  ;;  %vm6256_vm0 = vcmask 1045504  }
 0x121   : > { %v5079_v30 = vadd.f32 %v2109_v28, %v2034_v40  ;;  %3695 = vmatmul.msk.f32.gmra.mxu2 %vm960_vm1, %v5072_v14  ;;  %v6251_v40 = vld [vmem:[#allocation12_spill] sm:$0xff] }
 0x122   : > { %3728 = vmatmul.msk.f32.gmra.mxu3 %vm960_vm1, %v1808_v22  ;;  %v500_v22 = vand.u32 15, %v308_v12 }
 0x123   : > { %6245 = vst [vmem:[#allocation78_spill] sm:$0xff] %v5079_v30  ;;  %3761 = vmatmul.msk.f32.gmra.mxu0 %vm960_vm1, %v4294_v47 }
 0x124   : > { %v1680_v28 = vpop.f32.mrf.mxu2  ;;  %vm5105_vm15 = vcmp.ne.s32.totalorder %v500_v22, 0 }
 0x125   : > { %v1955_v44 = vpop.f32.mrf.mxu3  ;;  %v1760_v51 = vadd.f32 %v1680_v28, %v1276_v48  ;;  %v1278_v3 = vpop.f32.mrf.mxu1  ;;  %v6253_v38 = vsel %vm5105_vm15, 4294967295, %v6252_v38  ;;  %v1465_v48 = vrot.slane %v6251_v40, 2  ;;  %v6255_v28 = vld [vmem:[#allocation16_spill] sm:$0xff] }
 0x126   : > { %6254 = vst [vmem:[#allocation12_spill] sm:$0xff] %v6253_v38  ;;  %v1279_v12 = vadd.f32 %v1278_v3, %v4694_v19 }
 0x127   : > { %v2035_v31 = vadd.f32 %v1955_v44, %v1760_v51  ;;  %v5121_v63 = vsel %vm6256_vm0, %v1463_v24, %v1465_v48  ;;  %v310_v24 = vadd.s32 224, %v4358_v9 }
 0x128   : > { %3663 = vmatmul.msk.f32.gmra.mxu1 %vm960_vm1, %v4202_v13  ;;  %v2115_v33 = vpop.f32.mrf.mxu0  ;;  %v309_v13 = vadd.s32 216, %v4358_v9 }
 0x129   : > { %v5100_v18 = vadd.f32 %v2112_v0, %v2035_v31  ;;  %3696 = vmatmul.msk.f32.gmra.mxu2 %vm960_vm1, %v1534_v57  ;;  %v5115_v31 = vld [vmem:[%s4181_s25 + $0xd0] sm:$0xff] }
 0x12a   : > { %3729 = vmatmul.msk.f32.gmra.mxu3 %vm960_vm1, %v6251_v40  ;;  %v852_v22 = vsel %vm5105_vm15, %v5115_v31, 0.0  ;;  %v6257_v40 = vld [vmem:[#allocation14_spill] sm:$0xff] }
 0x12b   : > { %6250 = vst [vmem:[#allocation80_spill] sm:$0xff] %v5100_v18  ;;  %3762 = vmatmul.msk.f32.gmra.mxu0 %vm960_vm1, %v6255_v28  ;;  %v1810_v19 = vsel %vm5105_vm15, %v6257_v40, 0.0  ;;  %v507_v18 = vand.u32 15, %v309_v13  ;;  %v1467_v15 = vrot.slane %v6257_v40, 2  ;;  %vm6262_vm15 = vcmask 1045504  }
 0x12c   : > { %v1683_v0 = vpop.f32.mrf.mxu2 }
 0x12d   : > { %v1958_v44 = vpop.f32.mrf.mxu3  ;;  %v1761_v51 = vadd.f32 %v1683_v0, %v1279_v12  ;;  %v1281_v57 = vpop.f32.mrf.mxu1  ;;  %vm5135_vm0 = vcmp.ne.s32.totalorder %v507_v18, 15  ;;  %v5140_v13 = vsel %vm6262_vm15, %v1465_v48, %v1467_v15  ;;  %v5148_v18 = vld [vmem:[%s4181_s25 + $0xd8] sm:$0xff] }
 0x12e   : > { %v1282_v38 = vadd.f32 %v1281_v57, %v4718_v45 }
 0x12f   : > { %v2036_v3 = vadd.f32 %v1958_v44, %v1761_v51  ;;  %v6259_v44 = vmov 0  ;;  %v6263_v51 = vld [vmem:[#allocation19_spill] sm:$0xff] }
 0x130   : > { %3664 = vmatmul.msk.f32.gmra.mxu1 %vm960_vm1, %v852_v22  ;;  %v2118_v12 = vpop.f32.mrf.mxu0  ;;  %v6260_v44 = vsel %vm5135_vm0, 4294967295, %v6259_v44 }
 0x131   : > { %v5128_v0 = vadd.f32 %v2115_v33, %v2036_v3  ;;  %3697 = vmatmul.msk.f32.gmra.mxu2 %vm960_vm1, %v5121_v63  ;;  %6261 = vst [vmem:[#allocation81_spill] sm:$0xff] %v6260_v44 }
 0x132   : > { %3730 = vmatmul.msk.f32.gmra.mxu3 %vm960_vm1, %v1810_v19  ;;  %v1536_v19 = vsel %vm5135_vm0, %v5140_v13, 0.0  ;;  %vm6271_vm0 = vcmask 1045504  }
 0x133   : > { %6258 = vst [vmem:[#allocation14_spill] sm:$0xff] %v5128_v0  ;;  %3763 = vmatmul.msk.f32.gmra.mxu0 %vm960_vm1, %v6263_v51  ;;  %v514_v0 = vand.u32 15, %v310_v24  ;;  %v6265_v51 = vld [vmem:[#allocation17_spill] sm:$0xff] }
 0x134   : > { %v1686_v33 = vpop.f32.mrf.mxu2  ;;  %v1469_v24 = vrot.slane %v6265_v51, 2 }
 0x135   : > { %v1961_v22 = vpop.f32.mrf.mxu3  ;;  %v1762_v40 = vadd.f32 %v1686_v33, %v1282_v38  ;;  %v1284_v3 = vpop.f32.mrf.mxu1  ;;  %vm5157_vm15 = vcmp.ne.s32.totalorder %v514_v0, 0  ;;  %v6266_v38 = vmov 0 }
 0x136   : > { %v6267_v38 = vsel %vm5157_vm15, 4294967295, %v6266_v38  ;;  %v1285_v33 = vadd.f32 %v1284_v3, %v4750_v6  ;;  %v5173_v30 = vsel %vm6271_vm0, %v1467_v15, %v1469_v24  ;;  %v312_v15 = vadd.s32 240, %v4358_v9 }
 0x137   : > { %v2037_v45 = vadd.f32 %v1961_v22, %v1762_v40  ;;  %6268 = vst [vmem:[#allocation17_spill] sm:$0xff] %v6267_v38  ;;  %v6269_v22 = vld [vmem:[#allocation22_spill] sm:$0xff]  ;;  %v311_v40 = vadd.s32 232, %v4358_v9 }
 0x138   : > { %3665 = vmatmul.msk.f32.gmra.mxu1 %vm960_vm1, %v5148_v18  ;;  %v2121_v48 = vpop.f32.mrf.mxu0  ;;  %6272 = vst [vmem:[#allocation84_spill] sm:$0xff] %v5173_v30 }
 0x139   : > { %v5152_v57 = vadd.f32 %v2118_v12, %v2037_v45  ;;  %3698 = vmatmul.msk.f32.gmra.mxu2 %vm960_vm1, %v1536_v19 }
 0x13a   : > { %3731 = vmatmul.msk.f32.gmra.mxu3 %vm960_vm1, %v6265_v51  ;;  %v6273_v51 = vld [vmem:[#allocation20_spill] sm:$0xff] }
 0x13b   : > { %6264 = vst [vmem:[#allocation82_spill] sm:$0xff] %v5152_v57  ;;  %3764 = vmatmul.msk.f32.gmra.mxu0 %vm960_vm1, %v6269_v22  ;;  %v5167_v57 = vld [vmem:[%s4181_s25 + $0xe0] sm:$0xff]  ;;  %v1812_v6 = vsel %vm5157_vm15, %v6273_v51, 0.0  ;;  %v521_v22 = vand.u32 15, %v311_v40  ;;  %v1471_v28 = vrot.slane %v6273_v51, 2 }
 0x13c   : > { %v1689_v12 = vpop.f32.mrf.mxu2  ;;  %6270 = vst [vmem:[#allocation83_spill] sm:$0xff] %v5167_v57  ;;  %v854_v0 = vsel %vm5157_vm15, %v5167_v57, 0.0  ;;  %vm6278_vm15 = vcmask 1045504  }
 0x13d   : > { %v1964_v45 = vpop.f32.mrf.mxu3  ;;  %v1763_v44 = vadd.f32 %v1689_v12, %v1285_v33  ;;  %v1287_v19 = vpop.f32.mrf.mxu1  ;;  %vm5187_vm0 = vcmp.ne.s32.totalorder %v521_v22, 15  ;;  %v5192_v40 = vsel %vm6278_vm15, %v1469_v24, %v1471_v28 }
 0x13e   : > { %v1288_v38 = vadd.f32 %v1287_v19, %v4774_v16  ;;  %6279 = vst [vmem:[#allocation86_spill] sm:$0xff] %v5192_v40  ;;  %v528_v16 = vand.u32 15, %v312_v15  ;;  %v5200_v19 = vld [vmem:[%s4181_s25 + $0xe8] sm:$0xff] }
 0x13f   : > { %v2038_v3 = vadd.f32 %v1964_v45, %v1763_v44  ;;  %v6275_v44 = vmov 0  ;;  %v6280_v45 = vld [vmem:[#allocation25_spill] sm:$0xff]  ;;  %6281 = vst [vmem:[#allocation87_spill] sm:$0xff] %v5200_v19 }
 0x140   : > { %3666 = vmatmul.msk.f32.gmra.mxu1 %vm960_vm1, %v854_v0  ;;  %v2124_v33 = vpop.f32.mrf.mxu0  ;;  %v6276_v44 = vsel %vm5187_vm0, 4294967295, %v6275_v44  ;;  %vm5212_vm15 = vcmp.ne.s32.totalorder %v528_v16, 0  ;;  %v5223_v16 = vld [vmem:[%s4181_s25 + $0xf0] sm:$0xff] }
 0x141   : > { %v5180_v12 = vadd.f32 %v2121_v48, %v2038_v3  ;;  %3699 = vmatmul.msk.f32.gmra.mxu2 %vm960_vm1, %v5173_v30  ;;  %6277 = vst [vmem:[#allocation85_spill] sm:$0xff] %v6276_v44 }
 0x142   : > { %3732 = vmatmul.msk.f32.gmra.mxu3 %vm960_vm1, %v1812_v6  ;;  %v1538_v6 = vsel %vm5187_vm0, %v5192_v40, 0.0  ;;  %6288 = vst [vmem:[#allocation89_spill] sm:$0xff] %v5223_v16  ;;  %vm6289_vm0 = vcmask 1045504  }
 0x143   : > { %6274 = vst [vmem:[#allocation20_spill] sm:$0xff] %v5180_v12  ;;  %3765 = vmatmul.msk.f32.gmra.mxu0 %vm960_vm1, %v6280_v45  ;;  %v6283_v45 = vld [vmem:[#allocation23_spill] sm:$0xff] }
 0x144   : > { %v1692_v48 = vpop.f32.mrf.mxu2  ;;  %v1473_v15 = vrot.slane %v6283_v45, 2 }
 0x145   : > { %v1967_v0 = vpop.f32.mrf.mxu3  ;;  %v1764_v51 = vadd.f32 %v1692_v48, %v1288_v38  ;;  %v1290_v3 = vpop.f32.mrf.mxu1  ;;  %v5210_v38 = vld [vmem:[%s4181_s25 + $0x108] sm:$0xff]  ;;  %v6284_v48 = vmov 0 }
 0x146   : > { %v6285_v48 = vsel %vm5212_vm15, 4294967295, %v6284_v48  ;;  %v2063_v44 = vrot.slane %v5210_v38, 1 }
 0x147   : > { %v2039_v22 = vadd.f32 %v1967_v0, %v1764_v51  ;;  %6286 = vst [vmem:[#allocation23_spill] sm:$0xff] %v6285_v48  ;;  %v1291_v0 = vadd.f32 %v1290_v3, %v4806_v36  ;;  %v6287_v51 = vld [vmem:[#allocation28_spill] sm:$0xff]  ;;  %v5229_v36 = vsel %vm6289_vm0, %v1471_v28, %v1473_v15  ;;  %v6290_v3 = vld [vmem:[#allocation26_spill] sm:$0xff] }
 0x148   : > { %3667 = vmatmul.msk.f32.gmra.mxu1 %vm960_vm1, %v5200_v19  ;;  %v2127_v24 = vpop.f32.mrf.mxu0  ;;  %v6104_v30 = vrot.slane %v6290_v3, 2  ;;  %v5247_v28 = vld [vmem:[%s4181_s25 + $0x110] sm:$0xff] }
 0x149   : > { %v5204_v12 = vadd.f32 %v2124_v33, %v2039_v22  ;;  %3700 = vmatmul.msk.f32.gmra.mxu2 %vm960_vm1, %v1538_v6  ;;  %v313_v33 = vadd.s32 248, %v4358_v9  ;;  %v1814_v9 = vsel %vm5212_vm15, %v6290_v3, 0.0 }
 0x14a   : > { %3733 = vmatmul.msk.f32.gmra.mxu3 %vm960_vm1, %v6283_v45  ;;  %v856_v45 = vsel %vm5212_vm15, %v5223_v16, 0.0 }
 0x14b   : > { %6282 = vst [vmem:[#allocation88_spill] sm:$0xff] %v5204_v12  ;;  %3766 = vmatmul.msk.f32.gmra.mxu0 %vm960_vm1, %v6287_v51  ;;  %v535_v40 = vand.u32 15, %v313_v33  ;;  %v6294_v33 = vmov 0 }
 0x14c   : > { %v1695_v22 = vpop.f32.mrf.mxu2 }
 0x14d   : > { %v1970_v6 = vpop.f32.mrf.mxu3  ;;  %v1765_v12 = vadd.f32 %v1695_v22, %v1291_v0  ;;  %v1293_v19 = vpop.f32.mrf.mxu1  ;;  %v6291_v22 = vrot.slane %v6290_v3, 1  ;;  %vm5250_vm0 = vcmp.ne.s32.totalorder %v535_v40, 15 }
 0x14e   : > { %v6295_v33 = vsel %vm5250_vm0, 4294967295, %v6294_v33 }
 0x14f   : > { %v2040_v51 = vadd.f32 %v1970_v6, %v1765_v12  ;;  %v5239_v57 = vsel %vm6292_vm3, %v6291_v22, %v2063_v44  ;;  %v1294_v12 = vadd.f32 %v1293_v19, %v4830_v8  ;;  %6296 = vst [vmem:[#allocation90_spill] sm:$0xff] %v6295_v33  ;;  %vm6297_vm3 = vcmask 1045504   ;;  %v5266_v19 = vld [vmem:[%s4181_s25 + $0xf8] sm:$0xff] }
 0x150   : > { %3668 = vmatmul.msk.f32.gmra.mxu1 %vm960_vm1, %v856_v45  ;;  %v2130_v0 = vpop.f32.mrf.mxu0  ;;  %v5257_v6 = vsel %vm6297_vm3, %v1473_v15, %v6104_v30  ;;  %v6108_v45 = vrot.slane %v5247_v28, 1  ;;  %vm6298_vm3 = vcmask 1046528  }
 0x151   : > { %v5241_v16 = vadd.f32 %v2127_v24, %v2040_v51  ;;  %3701 = vmatmul.msk.f32.gmra.mxu2 %vm960_vm1, %v5229_v36  ;;  %v1540_v8 = vsel %vm5250_vm0, %v5257_v6, 0.0 }
 0x152   : > { %3734 = vmatmul.msk.f32.gmra.mxu3 %vm960_vm1, %v1814_v9  ;;  %v5273_v30 = vsel %vm6298_vm3, %v2063_v44, %v6108_v45  ;;  %v3968_v45 = vld [vmem:[%s4181_s25 + $0x70] sm:$0xff] }
 0x153   : > { %6293 = vst [vmem:[#allocation26_spill] sm:$0xff] %v5241_v16  ;;  %3767 = vmatmul.msk.f32.gmra.mxu0 %vm960_vm1, %v5239_v57 }
 0x154   : > { %v1698_v24 = vpop.f32.mrf.mxu2 }
 0x155   : > { %v1973_v51 = vpop.f32.mrf.mxu3  ;;  %v1766_v9 = vadd.f32 %v1698_v24, %v1294_v12  ;;  %v1296_v22 = vpop.f32.mrf.mxu1 }
 0x156   : > { %v1297_v12 = vadd.f32 %v1296_v22, %v4862_v60 }
 0x157   : > { %v2041_v40 = vadd.f32 %v1973_v51, %v1766_v9 }
 0x158   : > { %3669 = vmatmul.msk.f32.gmra.mxu1 %vm960_vm1, %v5266_v19  ;;  %v2133_v15 = vpop.f32.mrf.mxu0 }
 0x159   : > { %v5275_v48 = vadd.f32 %v2130_v0, %v2041_v40  ;;  %3702 = vmatmul.msk.f32.gmra.mxu2 %vm960_vm1, %v1540_v8  ;;  %v6299_v8 = vsel %vm4380_vm2, %v4316_v53, 0.0 }
 0x15a   : > { %3735 = vmatmul.msk.f32.gmra.mxu3 %vm960_vm1, %v5210_v38 }
 0x15b   : > { %3768 = vmatmul.msk.f32.gmra.mxu0 %vm960_vm1, %v5273_v30 }
 0x15c   : > { %v1701_v24 = vpop.f32.mrf.mxu2 }
 0x15d   : > { %v1976_v51 = vpop.f32.mrf.mxu3  ;;  %v1767_v9 = vadd.f32 %v1701_v24, %v1297_v12  ;;  %v1299_v33 = vpop.f32.mrf.mxu1 }
 0x15e   : > { %v1300_v60 = vadd.f32 %v1299_v33, %v4690_v41  ;;  %v3959_v33 = vld [vmem:[%s4181_s25 + $0x28] sm:$0xff] }
 0x15f   : > { %v2042_v16 = vadd.f32 %v1976_v51, %v1767_v9 }
 0x160   : > { %3770 = vmatmul.msk.f32.vlgmr.msra.gmra.mxu1 %vm960_vm1, %v4546_v50  ;;  %v2136_v44 = vpop.f32.mrf.mxu0 }
 0x161   : > { %v5285_v0 = vadd.f32 %v2133_v15, %v2042_v16  ;;  %3803 = vmatmul.msk.f32.vlgmr.msra.gmra.mxu2 %vm960_vm1, %v6299_v8  ;;  %v3960_v8 = vld [vmem:[%s4181_s25 + $0x30] sm:$0xff] }
 0x162   : > { %3836 = vmatmul.msk.f32.vlgmr.msra.gmra.mxu3 %vm960_vm1, %v4387_v39  ;;  %v2936_v39 = vsel %vm4520_vm4, %v4602_v55, 0.0  ;;  %v2499_v59 = vsel %vm4534_vm5, %v3960_v8, 0.0 }
 0x163   : > { %3869 = vmatmul.msk.f32.vlgmr.msra.gmra.mxu0 %vm960_vm1, %v4586_v21 }
 0x164   : > { %v1704_v22 = vpop.f32.mrf.mxu2 }
 0x165   : > { %v1979_v50 = vpop.f32.mrf.mxu3  ;;  %v1768_v40 = vadd.f32 %v1704_v22, %v1300_v60  ;;  %v1302_v12 = vpop.f32.mrf.mxu1 }
 0x166   : > { %v1303_v15 = vadd.f32 %v1302_v12, %v4714_v11 }
 0x167   : > { %v2043_v53 = vadd.f32 %v1979_v50, %v1768_v40  ;;  %v6301_v50 = vld [vmem:[#allocation34_spill] sm:$0xff] }
 0x168   : > { %3771 = vmatmul.msk.f32.gmra.mxu1 %vm960_vm1, %v2223_v32  ;;  %v2139_v16 = vpop.f32.mrf.mxu0 }
 0x169   : > { %v5304_v41 = vadd.f32 %v2136_v44, %v2043_v53  ;;  %3804 = vmatmul.msk.f32.gmra.mxu2 %vm960_vm1, %v3959_v33  ;;  %v2225_v53 = vsel %vm4557_vm6, %v4602_v55, 0.0  ;;  %v6303_v33 = vld [vmem:[#allocation36_spill] sm:$0xff] }
 0x16a   : > { %3837 = vmatmul.msk.f32.gmra.mxu3 %vm960_vm1, %v4435_v54  ;;  %v6300_v54 = vld [vmem:[#allocation47_spill] sm:$0xff] }
 0x16b   : > { %3870 = vmatmul.msk.f32.gmra.mxu0 %vm960_vm1, %v2936_v39 }
 0x16c   : > { %v1707_v43 = vpop.f32.mrf.mxu2 }
 0x16d   : > { %v1982_v24 = vpop.f32.mrf.mxu3  ;;  %v1769_v51 = vadd.f32 %v1707_v43, %v1303_v15  ;;  %v1305_v9 = vpop.f32.mrf.mxu1  ;;  %v3961_v43 = vld [vmem:[%s4181_s25 + $0x38] sm:$0xff] }
 0x16e   : > { %v1306_v11 = vadd.f32 %v1305_v9, %v6300_v54  ;;  %v3962_v54 = vld [vmem:[%s4181_s25 + $0x40] sm:$0xff] }
 0x16f   : > { %v2044_v44 = vadd.f32 %v1982_v24, %v1769_v51  ;;  %v6304_v24 = vld [vmem:[#allocation29_spill] sm:$0xff]  ;;  %v6305_v51 = vld [vmem:[#allocation50_spill] sm:$0xff] }
 0x170   : > { %3772 = vmatmul.msk.f32.gmra.mxu1 %vm960_vm1, %v4586_v21  ;;  %v2142_v60 = vpop.f32.mrf.mxu0  ;;  %v6308_v21 = vld [vmem:[#allocation55_spill] sm:$0xff] }
 0x171   : > { %v5317_v22 = vadd.f32 %v2139_v16, %v2044_v44  ;;  %3805 = vmatmul.msk.f32.gmra.mxu2 %vm960_vm1, %v2499_v59 }
 0x172   : > { %3838 = vmatmul.msk.f32.gmra.mxu3 %vm960_vm1, %v4468_v4  ;;  %v2938_v4 = vsel %vm4557_vm6, %v6303_v33, 0.0 }
 0x173   : > { %3871 = vmatmul.msk.f32.gmra.mxu0 %vm960_vm1, %v6301_v50 }
 0x174   : > { %v1710_v27 = vpop.f32.mrf.mxu2 }
 0x175   : > { %v1985_v40 = vpop.f32.mrf.mxu3  ;;  %v1770_v12 = vadd.f32 %v1710_v27, %v1306_v11  ;;  %v1308_v32 = vpop.f32.mrf.mxu1  ;;  %v2501_v27 = vsel %vm4574_vm7, %v3962_v54, 0.0  ;;  %v3963_v54 = vld [vmem:[%s4181_s25 + $0x48] sm:$0xff]  ;;  %v6312_v11 = vld [vmem:[#allocation10_spill] sm:$0xff] }
 0x176   : > { %v1309_v9 = vadd.f32 %v1308_v32, %v6305_v51  ;;  %v6307_v32 = vld [vmem:[#allocation8_spill] sm:$0xff] }
 0x177   : > { %v2045_v16 = vadd.f32 %v1985_v40, %v1770_v12 }
 0x178   : > { %3773 = vmatmul.msk.f32.gmra.mxu1 %vm960_vm1, %v2225_v53  ;;  %v2145_v39 = vpop.f32.mrf.mxu0 }
 0x179   : > { %v5332_v15 = vadd.f32 %v2142_v60, %v2045_v16  ;;  %3806 = vmatmul.msk.f32.gmra.mxu2 %vm960_vm1, %v3961_v43  ;;  %v6309_v16 = vld [vmem:[#allocation38_spill] sm:$0xff] }
 0x17a   : > { %3839 = vmatmul.msk.f32.gmra.mxu3 %vm960_vm1, %v6304_v24 }
 0x17b   : > { %3872 = vmatmul.msk.f32.gmra.mxu0 %vm960_vm1, %v2938_v4 }
 0x17c   : > { %v1713_v55 = vpop.f32.mrf.mxu2 }
 0x17d   : > { %v1988_v8 = vpop.f32.mrf.mxu3  ;;  %v1771_v59 = vadd.f32 %v1713_v55, %v1309_v9  ;;  %v1311_v44 = vpop.f32.mrf.mxu1 }
 0x17e   : > { %v1312_v53 = vadd.f32 %v1311_v44, %v6308_v21 }
 0x17f   : > { %v2046_v60 = vadd.f32 %v1988_v8, %v1771_v59  ;;  %v6311_v8 = vld [vmem:[#allocation40_spill] sm:$0xff] }
 0x180   : > { %3774 = vmatmul.msk.f32.gmra.mxu1 %vm960_vm1, %v6301_v50  ;;  %v2148_v40 = vpop.f32.mrf.mxu0  ;;  %v2940_v59 = vsel %vm4597_vm8, %v6311_v8, 0.0 }
 0x181   : > { %v5345_v12 = vadd.f32 %v2145_v39, %v2046_v60  ;;  %3807 = vmatmul.msk.f32.gmra.mxu2 %vm960_vm1, %v2501_v27  ;;  %v2227_v39 = vsel %vm4597_vm8, %v6303_v33, 0.0  ;;  %v6313_v27 = vld [vmem:[#allocation58_spill] sm:$0xff] }
 0x182   : > { %3840 = vmatmul.msk.f32.gmra.mxu3 %vm960_vm1, %v6307_v32 }
 0x183   : > { %3873 = vmatmul.msk.f32.gmra.mxu0 %vm960_vm1, %v6309_v16 }
 0x184   : > { %v1716_v4 = vpop.f32.mrf.mxu2 }
 0x185   : > { %v1991_v43 = vpop.f32.mrf.mxu3  ;;  %v1772_v24 = vadd.f32 %v1716_v4, %v1312_v53  ;;  %v1314_v51 = vpop.f32.mrf.mxu1  ;;  %v3964_v4 = vld [vmem:[%s4181_s25 + $0x50] sm:$0xff] }
 0x186   : > { %v1315_v60 = vadd.f32 %v1314_v51, %v6313_v27  ;;  %v6315_v51 = vld [vmem:[#allocation13_spill] sm:$0xff] }
 0x187   : > { %v2047_v9 = vadd.f32 %v1991_v43, %v1772_v24  ;;  %v2503_v24 = vsel %vm4614_vm9, %v3964_v4, 0.0  ;;  %v6319_v4 = vld [vmem:[#allocation46_spill] sm:$0xff]  ;;  %vm3246_vm9 = vcmask 23552  }
 0x188   : > { %3775 = vmatmul.msk.f32.gmra.mxu1 %vm960_vm1, %v2227_v39  ;;  %v2151_v55 = vpop.f32.mrf.mxu0 }
 0x189   : > { %v5360_v44 = vadd.f32 %v2148_v40, %v2047_v9  ;;  %3808 = vmatmul.msk.f32.gmra.mxu2 %vm960_vm1, %v3963_v54  ;;  %v6316_v9 = vld [vmem:[#allocation63_spill] sm:$0xff]  ;;  %v6317_v54 = vld [vmem:[#allocation44_spill] sm:$0xff] }
 0x18a   : > { %3841 = vmatmul.msk.f32.gmra.mxu3 %vm960_vm1, %v6312_v11 }
 0x18b   : > { %3874 = vmatmul.msk.f32.gmra.mxu0 %vm960_vm1, %v2940_v59 }
 0x18c   : > { %v1719_v33 = vpop.f32.mrf.mxu2 }
 0x18d   : > { %v1994_v32 = vpop.f32.mrf.mxu3  ;;  %v1773_v21 = vadd.f32 %v1719_v33, %v1315_v60  ;;  %v1317_v53 = vpop.f32.mrf.mxu1 }
 0x18e   : > { %v1318_v59 = vadd.f32 %v1317_v53, %v6316_v9  ;;  %v2942_v53 = vsel %vm4637_vm10, %v6319_v4, 0.0 }
 0x18f   : > { %v2048_v40 = vadd.f32 %v1994_v32, %v1773_v21 }
 0x190   : > { %3776 = vmatmul.msk.f32.gmra.mxu1 %vm960_vm1, %v6309_v16  ;;  %v2154_v50 = vpop.f32.mrf.mxu0 }
 0x191   : > { %v5373_v39 = vadd.f32 %v2151_v55, %v2048_v40  ;;  %3809 = vmatmul.msk.f32.gmra.mxu2 %vm960_vm1, %v2503_v24  ;;  %v2229_v55 = vsel %vm4637_vm10, %v6311_v8, 0.0  ;;  %v3965_v24 = vld [vmem:[%s4181_s25 + $0x58] sm:$0xff]  ;;  %vm6362_vm10 = vnez %v6218_v52 }
 0x192   : > { %3842 = vmatmul.msk.f32.gmra.mxu3 %vm960_vm1, %v6315_v51  ;;  %v6320_v40 = vld [vmem:[#allocation15_spill] sm:$0xff]  ;;  %v6321_v51 = vld [vmem:[#allocation66_spill] sm:$0xff] }
 0x193   : > { %3875 = vmatmul.msk.f32.gmra.mxu0 %vm960_vm1, %v6317_v54 }
 0x194   : > { %v1722_v11 = vpop.f32.mrf.mxu2 }
 0x195   : > { %v1997_v27 = vpop.f32.mrf.mxu3  ;;  %v1774_v60 = vadd.f32 %v1722_v11, %v1318_v59  ;;  %v1320_v33 = vpop.f32.mrf.mxu1 }
 0x196   : > { %v1321_v9 = vadd.f32 %v1320_v33, %v6321_v51  ;;  %v6324_v33 = vld [vmem:[#allocation18_spill] sm:$0xff]  ;;  %v6326_v51 = vld [vmem:[#allocation52_spill] sm:$0xff] }
 0x197   : > { %v2049_v32 = vadd.f32 %v1997_v27, %v1774_v60  ;;  %v3966_v60 = vld [vmem:[%s4181_s25 + $0x60] sm:$0xff] }
 0x198   : > { %3777 = vmatmul.msk.f32.gmra.mxu1 %vm960_vm1, %v2229_v55  ;;  %v2157_v21 = vpop.f32.mrf.mxu0  ;;  %v2505_v16 = vsel %vm4654_vm11, %v3966_v60, 0.0 }
 0x199   : > { %v5388_v43 = vadd.f32 %v2154_v50, %v2049_v32  ;;  %3810 = vmatmul.msk.f32.gmra.mxu2 %vm960_vm1, %v3965_v24 }
 0x19a   : > { %3843 = vmatmul.msk.f32.gmra.mxu3 %vm960_vm1, %v6320_v40 }
 0x19b   : > { %3876 = vmatmul.msk.f32.gmra.mxu0 %vm960_vm1, %v2942_v53  ;;  %v6325_v53 = vld [vmem:[#allocation41_spill] sm:$0xff] }
 0x19c   : > { %v1725_v8 = vpop.f32.mrf.mxu2 }
 0x19d   : > { %v2000_v59 = vpop.f32.mrf.mxu3  ;;  %v1775_v11 = vadd.f32 %v1725_v8, %v1321_v9  ;;  %v1323_v27 = vpop.f32.mrf.mxu1 }
 0x19e   : > { %v1324_v40 = vadd.f32 %v1323_v27, %v6325_v53  ;;  %v6330_v53 = vld [vmem:[#allocation21_spill] sm:$0xff] }
 0x19f   : > { %v2050_v50 = vadd.f32 %v2000_v59, %v1775_v11 }
 0x1a0   : > { %3778 = vmatmul.msk.f32.gmra.mxu1 %vm960_vm1, %v6317_v54  ;;  %v2160_v32 = vpop.f32.mrf.mxu0  ;;  %v2507_v54 = vsel %vm4706_vm13, %v3968_v45, 0.0 }
 0x1a1   : > { %v5401_v24 = vadd.f32 %v2157_v21, %v2050_v50  ;;  %3811 = vmatmul.msk.f32.gmra.mxu2 %vm960_vm1, %v2505_v16  ;;  %v2231_v21 = vsel %vm4681_vm12, %v6319_v4, 0.0  ;;  %v6328_v16 = vld [vmem:[#allocation54_spill] sm:$0xff] }
 0x1a2   : > { %3844 = vmatmul.msk.f32.gmra.mxu3 %vm960_vm1, %v6324_v33  ;;  %v2944_v27 = vsel %vm4681_vm12, %v6328_v16, 0.0  ;;  %v3967_v33 = vld [vmem:[%s4181_s25 + $0x68] sm:$0xff]  ;;  %vm6366_vm12 = vnez %v6226_v17 }
 0x1a3   : > { %6323 = vst [vmem:[#allocation47_spill] sm:$0xff] %v5401_v24  ;;  %3877 = vmatmul.msk.f32.gmra.mxu0 %vm960_vm1, %v6326_v51 }
 0x1a4   : > { %v1728_v9 = vpop.f32.mrf.mxu2 }
 0x1a5   : > { %v2003_v8 = vpop.f32.mrf.mxu3  ;;  %v1776_v59 = vadd.f32 %v1728_v9, %v1324_v40  ;;  %v1326_v11 = vpop.f32.mrf.mxu1  ;;  %v6331_v40 = vld [vmem:[#allocation43_spill] sm:$0xff] }
 0x1a6   : > { %v1327_v9 = vadd.f32 %v1326_v11, %v6331_v40  ;;  %v6334_v11 = vld [vmem:[#allocation24_spill] sm:$0xff] }
 0x1a7   : > { %v2051_v60 = vadd.f32 %v2003_v8, %v1776_v59  ;;  %v6336_v40 = vld [vmem:[#allocation60_spill] sm:$0xff] }
 0x1a8   : > { %3779 = vmatmul.msk.f32.gmra.mxu1 %vm960_vm1, %v2231_v21  ;;  %v2163_v55 = vpop.f32.mrf.mxu0 }
 0x1a9   : > { %v5416_v50 = vadd.f32 %v2160_v32, %v2051_v60  ;;  %3812 = vmatmul.msk.f32.gmra.mxu2 %vm960_vm1, %v3967_v33 }
 0x1aa   : > { %3845 = vmatmul.msk.f32.gmra.mxu3 %vm960_vm1, %v6330_v53 }
 0x1ab   : > { %6329 = vst [vmem:[#allocation34_spill] sm:$0xff] %v5416_v50  ;;  %3878 = vmatmul.msk.f32.gmra.mxu0 %vm960_vm1, %v2944_v27  ;;  %v6335_v27 = vld [vmem:[#allocation48_spill] sm:$0xff]  ;;  %v6341_v50 = vld [vmem:[#allocation49_spill] sm:$0xff] }
 0x1ac   : > { %v1731_v4 = vpop.f32.mrf.mxu2  ;;  %vm6342_vm2 = vnez %v6341_v50 }
 0x1ad   : > { %v2006_v8 = vpop.f32.mrf.mxu3  ;;  %v1777_v59 = vadd.f32 %v1731_v4, %v1327_v9  ;;  %v1329_v21 = vpop.f32.mrf.mxu1 }
 0x1ae   : > { %v1330_v53 = vadd.f32 %v1329_v21, %v6335_v27  ;;  %v6339_v27 = vld [vmem:[#allocation27_spill] sm:$0xff] }
 0x1af   : > { %v2052_v32 = vadd.f32 %v2006_v8, %v1777_v59 }
 0x1b0   : > { %3780 = vmatmul.msk.f32.gmra.mxu1 %vm960_vm1, %v6326_v51  ;;  %v2166_v60 = vpop.f32.mrf.mxu0 }
 0x1b1   : > { %v5429_v33 = vadd.f32 %v2163_v55, %v2052_v32  ;;  %3813 = vmatmul.msk.f32.gmra.mxu2 %vm960_vm1, %v2507_v54  ;;  %v2233_v55 = vsel %vm4737_vm14, %v6328_v16, 0.0  ;;  %v6338_v54 = vld [vmem:[#allocation62_spill] sm:$0xff] }
 0x1b2   : > { %3846 = vmatmul.msk.f32.gmra.mxu3 %vm960_vm1, %v6334_v11  ;;  %v2946_v21 = vsel %vm4737_vm14, %v6338_v54, 0.0  ;;  %v3969_v11 = vld [vmem:[%s4181_s25 + $0x78] sm:$0xff]  ;;  %vm6370_vm14 = vnez %v6234_v34 }
 0x1b3   : > { %6333 = vst [vmem:[#allocation30_spill] sm:$0xff] %v5429_v33  ;;  %3879 = vmatmul.msk.f32.gmra.mxu0 %vm960_vm1, %v6336_v40  ;;  %v3970_v33 = vld [vmem:[%s4181_s25 + $0x80] sm:$0xff] }
 0x1b4   : > { %v1734_v24 = vpop.f32.mrf.mxu2  ;;  %v2509_v51 = vsel %vm6342_vm2, %v3970_v33, 0.0 }
 0x1b5   : > { %v2009_v45 = vpop.f32.mrf.mxu3  ;;  %v1778_v9 = vadd.f32 %v1734_v24, %v1330_v53  ;;  %v1332_v4 = vpop.f32.mrf.mxu1  ;;  %v6340_v53 = vld [vmem:[#allocation51_spill] sm:$0xff] }
 0x1b6   : > { %v1333_v24 = vadd.f32 %v1332_v4, %v6340_v53  ;;  %v6344_v4 = vld [vmem:[#allocation9_spill] sm:$0xff]  ;;  %v6346_v53 = vld [vmem:[#allocation68_spill] sm:$0xff] }
 0x1b7   : > { %v2053_v8 = vadd.f32 %v2009_v45, %v1778_v9 }
 0x1b8   : > { %3781 = vmatmul.msk.f32.gmra.mxu1 %vm960_vm1, %v2233_v55  ;;  %v2169_v59 = vpop.f32.mrf.mxu0 }
 0x1b9   : > { %v5444_v32 = vadd.f32 %v2166_v60, %v2053_v8  ;;  %3814 = vmatmul.msk.f32.gmra.mxu2 %vm960_vm1, %v3969_v11 }
 0x1ba   : > { %3847 = vmatmul.msk.f32.gmra.mxu3 %vm960_vm1, %v6339_v27 }
 0x1bb   : > { %3880 = vmatmul.msk.f32.gmra.mxu0 %vm960_vm1, %v2946_v21  ;;  %v6345_v21 = vld [vmem:[#allocation56_spill] sm:$0xff] }
 0x1bc   : > { %v1737_v16 = vpop.f32.mrf.mxu2 }
 0x1bd   : > { %v2012_v45 = vpop.f32.mrf.mxu3  ;;  %v1779_v9 = vadd.f32 %v1737_v16, %v1333_v24  ;;  %v1335_v55 = vpop.f32.mrf.mxu1 }
 0x1be   : > { %v1336_v27 = vadd.f32 %v1335_v55, %v6345_v21  ;;  %v6350_v21 = vld [vmem:[#allocation59_spill] sm:$0xff] }
 0x1bf   : > { %v2054_v60 = vadd.f32 %v2012_v45, %v1779_v9 }
 0x1c0   : > { %3782 = vmatmul.msk.f32.gmra.mxu1 %vm960_vm1, %v6336_v40  ;;  %v2172_v8 = vpop.f32.mrf.mxu0  ;;  %v6347_v40 = vld [vmem:[#allocation53_spill] sm:$0xff] }
 0x1c1   : > { %v5457_v11 = vadd.f32 %v2169_v59, %v2054_v60  ;;  %3815 = vmatmul.msk.f32.gmra.mxu2 %vm960_vm1, %v2509_v51  ;;  %vm6348_vm4 = vnez %v6347_v40  ;;  %v3971_v60 = vld [vmem:[%s4181_s25 + $0x88] sm:$0xff] }
 0x1c2   : > { %3848 = vmatmul.msk.f32.gmra.mxu3 %vm960_vm1, %v6344_v4  ;;  %v2235_v59 = vsel %vm6348_vm4, %v6338_v54, 0.0  ;;  %v2948_v55 = vsel %vm6348_vm4, %v4907_v29, 0.0  ;;  %v6349_v4 = vld [vmem:[#allocation11_spill] sm:$0xff] }
 0x1c3   : > { %6343 = vst [vmem:[#allocation36_spill] sm:$0xff] %v5457_v11  ;;  %3881 = vmatmul.msk.f32.gmra.mxu0 %vm960_vm1, %v6346_v53  ;;  %v6351_v11 = vld [vmem:[#allocation57_spill] sm:$0xff] }
 0x1c4   : > { %v1740_v50 = vpop.f32.mrf.mxu2  ;;  %vm6352_vm5 = vnez %v6351_v11 }
 0x1c5   : > { %v2015_v33 = vpop.f32.mrf.mxu3  ;;  %v1780_v24 = vadd.f32 %v1740_v50, %v1336_v27  ;;  %v1338_v16 = vpop.f32.mrf.mxu1 }
 0x1c6   : > { %v1339_v27 = vadd.f32 %v1338_v16, %v6350_v21  ;;  %v6353_v16 = vld [vmem:[#allocation64_spill] sm:$0xff] }
 0x1c7   : > { %v2055_v45 = vadd.f32 %v2015_v33, %v1780_v24 }
 0x1c8   : > { %3783 = vmatmul.msk.f32.gmra.mxu1 %vm960_vm1, %v2235_v59  ;;  %v2175_v9 = vpop.f32.mrf.mxu0  ;;  %v3972_v59 = vld [vmem:[%s4181_s25 + $0x90] sm:$0xff] }
 0x1c9   : > { %v5472_v51 = vadd.f32 %v2172_v8, %v2055_v45  ;;  %3816 = vmatmul.msk.f32.gmra.mxu2 %vm960_vm1, %v3971_v60  ;;  %v2511_v40 = vsel %vm6352_vm5, %v3972_v59, 0.0  ;;  %v6356_v59 = vld [vmem:[#allocation67_spill] sm:$0xff] }
 0x1ca   : > { %3849 = vmatmul.msk.f32.gmra.mxu3 %vm960_vm1, %v6349_v4 }
 0x1cb   : > { %3882 = vmatmul.msk.f32.gmra.mxu0 %vm960_vm1, %v2948_v55 }
 0x1cc   : > { %v1743_v54 = vpop.f32.mrf.mxu2 }
 0x1cd   : > { %v2018_v50 = vpop.f32.mrf.mxu3  ;;  %v1781_v33 = vadd.f32 %v1743_v54, %v1339_v27  ;;  %v1341_v24 = vpop.f32.mrf.mxu1 }
 0x1ce   : > { %v1342_v55 = vadd.f32 %v1341_v24, %v6353_v16  ;;  %v3973_v24 = vld [vmem:[%s4181_s25 + $0x98] sm:$0xff] }
 0x1cf   : > { %v2056_v8 = vadd.f32 %v2018_v50, %v1781_v33 }
 0x1d0   : > { %3784 = vmatmul.msk.f32.gmra.mxu1 %vm960_vm1, %v6346_v53  ;;  %v2178_v45 = vpop.f32.mrf.mxu0  ;;  %v6354_v53 = vld [vmem:[#allocation61_spill] sm:$0xff] }
 0x1d1   : > { %v5485_v60 = vadd.f32 %v2175_v9, %v2056_v8  ;;  %3817 = vmatmul.msk.f32.gmra.mxu2 %vm960_vm1, %v2511_v40  ;;  %vm6355_vm6 = vnez %v6354_v53 }
 0x1d2   : > { %3850 = vmatmul.msk.f32.gmra.mxu3 %vm960_vm1, %v4291_v46  ;;  %v2237_v9 = vsel %vm6355_vm6, %v4907_v29, 0.0  ;;  %v2950_v46 = vsel %vm6355_vm6, %v4953_v10, 0.0 }
 0x1d3   : > { %3883 = vmatmul.msk.f32.gmra.mxu0 %vm960_vm1, %v4934_v1 }
 0x1d4   : > { %v1746_v11 = vpop.f32.mrf.mxu2 }
 0x1d5   : > { %v2021_v4 = vpop.f32.mrf.mxu3  ;;  %v1782_v21 = vadd.f32 %v1746_v11, %v1342_v55  ;;  %v1344_v27 = vpop.f32.mrf.mxu1  ;;  %v3974_v11 = vld [vmem:[%s4181_s25 + $0xa0] sm:$0xff] }
 0x1d6   : > { %v1345_v40 = vadd.f32 %v1344_v27, %v6356_v59 }
 0x1d7   : > { %v2057_v54 = vadd.f32 %v2021_v4, %v1782_v21  ;;  %v6357_v4 = vld [vmem:[#allocation65_spill] sm:$0xff] }
 0x1d8   : > { %3785 = vmatmul.msk.f32.gmra.mxu1 %vm960_vm1, %v2237_v9  ;;  %v2181_v50 = vpop.f32.mrf.mxu0  ;;  %vm6358_vm7 = vnez %v6357_v4 }
 0x1d9   : > { %v5500_v33 = vadd.f32 %v2178_v45, %v2057_v54  ;;  %3818 = vmatmul.msk.f32.gmra.mxu2 %vm960_vm1, %v3973_v24  ;;  %v2513_v45 = vsel %vm6358_vm7, %v3974_v11, 0.0 }
 0x1da   : > { %3851 = vmatmul.msk.f32.gmra.mxu3 %vm960_vm1, %v4327_v58  ;;  %v6359_v58 = vld [vmem:[#allocation70_spill] sm:$0xff] }
 0x1db   : > { %3884 = vmatmul.msk.f32.gmra.mxu0 %vm960_vm1, %v2950_v46 }
 0x1dc   : > { %v1749_v29 = vpop.f32.mrf.mxu2 }
 0x1dd   : > { %v2024_v8 = vpop.f32.mrf.mxu3  ;;  %v1783_v16 = vadd.f32 %v1749_v29, %v1345_v40  ;;  %v2369_v55 = vpop.f32.mrf.mxu1  ;;  %v5528_v29 = vld [vmem:[%s5967_s2] ss:$0 sm:$0xff] }
 0x1de   : > { %v2465_v27 = vadd.f32 %v2369_v55, %v6359_v58  ;;  %v3975_v55 = vld [vmem:[%s4181_s25 + $0xa8] sm:$0xff] }
 0x1df   : > { %v2058_v21 = vadd.f32 %v2024_v8, %v1783_v16 }
 0x1e0   : > { %3786 = vmatmul.msk.f32.gmra.mxu1 %vm960_vm1, %v4934_v1  ;;  %v3082_v53 = vpop.f32.mrf.mxu0  ;;  %v6360_v1 = vld [vmem:[#allocation69_spill] sm:$0xff] }
 0x1e1   : > { %v5513_v9 = vadd.f32 %v2181_v50, %v2058_v21  ;;  %3819 = vmatmul.msk.f32.gmra.mxu2 %vm960_vm1, %v2513_v45  ;;  %vm6361_vm8 = vnez %v6360_v1 }
 0x1e2   : > { %3852 = vmatmul.msk.f32.gmra.mxu3 %vm960_vm1, %v4366_v26  ;;  %v2239_v50 = vsel %vm6361_vm8, %v4953_v10, 0.0  ;;  %v2952_v8 = vsel %vm6361_vm8, %v4999_v37, 0.0  ;;  %vm6400_vm8 = vcmask 1045504  }
 0x1e3   : > { %3885 = vmatmul.msk.f32.gmra.mxu0 %vm960_vm1, %v4980_v56 }
 0x1e4   : > { %v2644_v54 = vpop.f32.mrf.mxu2 }
 0x1e5   : > { %v2801_v46 = vpop.f32.mrf.mxu3  ;;  %v2740_v24 = vadd.f32 %v2644_v54, %v2465_v27  ;;  %v2372_v59 = vpop.f32.mrf.mxu1 }
 0x1e6   : > { %v2466_v10 = vadd.f32 %v2372_v59, %v4941_v7 }
 0x1e7   : > { %v2897_v40 = vadd.f32 %v2801_v46, %v2740_v24  ;;  %v6363_v24 = vld [vmem:[#allocation72_spill] sm:$0xff] }
 0x1e8   : > { %3787 = vmatmul.msk.f32.gmra.mxu1 %vm960_vm1, %v2239_v50  ;;  %v3085_v26 = vpop.f32.mrf.mxu0 }
 0x1e9   : > { %v3178_v16 = vadd.f32 %v3082_v53, %v2897_v40  ;;  %3820 = vmatmul.msk.f32.gmra.mxu2 %vm960_vm1, %v3975_v55  ;;  %v6364_v40 = vld [vmem:[#allocation71_spill] sm:$0xff] }
 0x1ea   : > { %3853 = vmatmul.msk.f32.gmra.mxu3 %vm960_vm1, %v4418_v42  ;;  %v3976_v42 = vld [vmem:[%s4181_s25 + $0xb0] sm:$0xff]  ;;  %vm6365_vm11 = vnez %v6364_v40  ;;  %v3978_v40 = vld [vmem:[%s4181_s25 + $0xc0] sm:$0xff] }
 0x1eb   : > { %v3214_v11 = vadd.f32 %v5528_v29, %v3178_v16  ;;  %3886 = vmatmul.msk.f32.gmra.mxu0 %vm960_vm1, %v2952_v8  ;;  %v2515_v58 = vsel %vm6362_vm10, %v3976_v42, 0.0 }
 0x1ec   : > { %v2647_v4 = vpop.f32.mrf.mxu2 }
 0x1ed   : > { %v2804_v45 = vpop.f32.mrf.mxu3  ;;  %3247 = vst.msk [vmem:[%s5541_s17] sm:$0xff] %vm3246_vm9, %v3214_v11  ;;  %v2741_v21 = vadd.f32 %v2647_v4, %v2466_v10  ;;  %v2375_v53 = vpop.f32.mrf.mxu1  ;;  %v3350_v46 = vmul.f32 %v3214_v11, %v3214_v11 }
 0x1ee   : > { %v2467_v59 = vadd.f32 %v2375_v53, %v6363_v24 }
 0x1ef   : > { %v2898_v27 = vadd.f32 %v2804_v45, %v2741_v21  ;;  %v3382_v4 = vsel %vm3246_vm9, %v3350_v46, 0.0 }
 0x1f0   : > { %3788 = vmatmul.msk.f32.gmra.mxu1 %vm960_vm1, %v4980_v56  ;;  %v3088_v7 = vpop.f32.mrf.mxu0  ;;  %v2241_v56 = vsel %vm6365_vm11, %v4999_v37, 0.0 }
 0x1f1   : > { %v3179_v54 = vadd.f32 %v3085_v26, %v2898_v27  ;;  %3821 = vmatmul.msk.f32.gmra.mxu2 %vm960_vm1, %v2515_v58  ;;  %v3279_v26 = vsel %vm3246_vm9, %v3214_v11, 0.0  ;;  %v2954_v11 = vsel %vm6365_vm11, %v5045_v61, 0.0  ;;  %v3977_v58 = vld [vmem:[%s4181_s25 + $0xb8] sm:$0xff]  ;;  %vm6404_vm11 = vmmov %vm6400_vm8 }
 0x1f2   : > { %3854 = vmatmul.msk.f32.gmra.mxu3 %vm960_vm1, %v4457_v62 }
 0x1f3   : > { %v3215_v1 = vadd.f32 %v5528_v29, %v3179_v54  ;;  %3887 = vmatmul.msk.f32.gmra.mxu0 %vm960_vm1, %v5026_v5 }
 0x1f4   : > { %v2650_v52 = vpop.f32.mrf.mxu2 }
 0x1f5   : > { %v2807_v50 = vpop.f32.mrf.mxu3  ;;  %3248 = vst.msk [vmem:[%s5541_s17 + $0x8] sm:$0xff] %vm3246_vm9, %v3215_v1  ;;  %v3280_v62 = vsel %vm3246_vm9, %v3215_v1, 0.0  ;;  %v3351_v8 = vmul.f32 %v3215_v1, %v3215_v1  ;;  %v2742_v16 = vadd.f32 %v2650_v52, %v2467_v59  ;;  %v2378_v55 = vpop.f32.mrf.mxu1 }
 0x1f6   : > { %v3281_v10 = vadd.f32 %v3280_v62, %v3279_v26  ;;  %v2468_v27 = vadd.f32 %v2378_v55, %v4987_v20 }
 0x1f7   : > { %v3383_v45 = vsel %vm3246_vm9, %v3351_v8, 0.0  ;;  %v2899_v21 = vadd.f32 %v2807_v50, %v2742_v16  ;;  %v6367_v16 = vld [vmem:[#allocation74_spill] sm:$0xff] }
 0x1f8   : > { %v3384_v53 = vadd.f32 %v3383_v45, %v3382_v4  ;;  %3789 = vmatmul.msk.f32.gmra.mxu1 %vm960_vm1, %v2241_v56  ;;  %v3091_v37 = vpop.f32.mrf.mxu0 }
 0x1f9   : > { %v3180_v42 = vadd.f32 %v3088_v7, %v2899_v21  ;;  %3822 = vmatmul.msk.f32.gmra.mxu2 %vm960_vm1, %v3977_v58 }
 0x1fa   : > { %3855 = vmatmul.msk.f32.gmra.mxu3 %vm960_vm1, %v4485_v2  ;;  %v2517_v2 = vsel %vm6366_vm12, %v3978_v40, 0.0  ;;  %vm6408_vm12 = vcmask 1046528  }
 0x1fb   : > { %v3216_v54 = vadd.f32 %v5528_v29, %v3180_v42  ;;  %3888 = vmatmul.msk.f32.gmra.mxu0 %vm960_vm1, %v2954_v11 }
 0x1fc   : > { %v2653_v46 = vpop.f32.mrf.mxu2 }
 0x1fd   : > { %v2810_v24 = vpop.f32.mrf.mxu3  ;;  %3249 = vst.msk [vmem:[%s5541_s17 + $0x10] sm:$0xff] %vm3246_vm9, %v3216_v54  ;;  %v3282_v59 = vsel %vm3246_vm9, %v3216_v54, 0.0  ;;  %v3352_v1 = vmul.f32 %v3216_v54, %v3216_v54  ;;  %v2743_v7 = vadd.f32 %v2653_v46, %v2468_v27  ;;  %v2381_v52 = vpop.f32.mrf.mxu1 }
 0x1fe   : > { %v3283_v50 = vadd.f32 %v3282_v59, %v3281_v10  ;;  %v2469_v55 = vadd.f32 %v2381_v52, %v6367_v16  ;;  %v3979_v59 = vld [vmem:[%s4181_s25 + $0xc8] sm:$0xff] }
 0x1ff   : > { %v3385_v20 = vsel %vm3246_vm9, %v3352_v1, 0.0  ;;  %v2900_v56 = vadd.f32 %v2810_v24, %v2743_v7 }
 0x200   : > { %v3386_v26 = vadd.f32 %v3385_v20, %v3384_v53  ;;  %3790 = vmatmul.msk.f32.gmra.mxu1 %vm960_vm1, %v5026_v5  ;;  %v3094_v62 = vpop.f32.mrf.mxu0 }
 0x201   : > { %v3181_v8 = vadd.f32 %v3091_v37, %v2900_v56  ;;  %3823 = vmatmul.msk.f32.gmra.mxu2 %vm960_vm1, %v2517_v2  ;;  %v6368_v37 = vld [vmem:[#allocation73_spill] sm:$0xff] }
 0x202   : > { %3856 = vmatmul.msk.f32.gmra.mxu3 %vm960_vm1, %v4238_v25  ;;  %vm6369_vm13 = vnez %v6368_v37 }
 0x203   : > { %v3217_v10 = vadd.f32 %v5528_v29, %v3181_v8  ;;  %3889 = vmatmul.msk.f32.gmra.mxu0 %vm960_vm1, %v5072_v14  ;;  %v2243_v25 = vsel %vm6369_vm13, %v5045_v61, 0.0  ;;  %v2956_v46 = vsel %vm6369_vm13, %v5091_v23, 0.0  ;;  %vm6409_vm13 = vmmov %vm6400_vm8 }
 0x204   : > { %v2656_v17 = vpop.f32.mrf.mxu2 }
 0x205   : > { %v2813_v4 = vpop.f32.mrf.mxu3  ;;  %3250 = vst.msk [vmem:[%s5541_s17 + $0x18] sm:$0xff] %vm3246_vm9, %v3217_v10  ;;  %v3284_v5 = vsel %vm3246_vm9, %v3217_v10, 0.0  ;;  %v3353_v45 = vmul.f32 %v3217_v10, %v3217_v10  ;;  %v2744_v21 = vadd.f32 %v2656_v17, %v2469_v55  ;;  %v2384_v53 = vpop.f32.mrf.mxu1  ;;  %v6371_v55 = vld [vmem:[#allocation76_spill] sm:$0xff] }
 0x206   : > { %v3285_v11 = vadd.f32 %v3284_v5, %v3283_v50  ;;  %v2470_v61 = vadd.f32 %v2384_v53, %v5033_v49 }
 0x207   : > { %v3387_v42 = vsel %vm3246_vm9, %v3353_v45, 0.0  ;;  %v2901_v58 = vadd.f32 %v2813_v4, %v2744_v21  ;;  %v6372_v21 = vld [vmem:[#allocation75_spill] sm:$0xff] }
 0x208   : > { %v3388_v27 = vadd.f32 %v3387_v42, %v3386_v26  ;;  %3791 = vmatmul.msk.f32.gmra.mxu1 %vm960_vm1, %v2243_v25  ;;  %v3097_v54 = vpop.f32.mrf.mxu0  ;;  %vm6373_vm3 = vnez %v6372_v21 }
 0x209   : > { %v3182_v24 = vadd.f32 %v3094_v62, %v2901_v58  ;;  %3824 = vmatmul.msk.f32.gmra.mxu2 %vm960_vm1, %v3979_v59  ;;  %v2958_v58 = vsel %vm6373_vm3, %v5140_v13, 0.0 }
 0x20a   : > { %3857 = vmatmul.msk.f32.gmra.mxu3 %vm960_vm1, %v4261_v35  ;;  %v2519_v35 = vsel %vm6370_vm14, %v5115_v31, 0.0  ;;  %vm6412_vm14 = vmmov %vm6408_vm12 }
 0x20b   : > { %v3218_v1 = vadd.f32 %v5528_v29, %v3182_v24  ;;  %3890 = vmatmul.msk.f32.gmra.mxu0 %vm960_vm1, %v2956_v46 }
 0x20c   : > { %v2659_v7 = vpop.f32.mrf.mxu2 }
 0x20d   : > { %v2816_v52 = vpop.f32.mrf.mxu3  ;;  %3251 = vst.msk [vmem:[%s5541_s17 + $0x20] sm:$0xff] %vm3246_vm9, %v3218_v1  ;;  %v3286_v50 = vsel %vm3246_vm9, %v3218_v1, 0.0  ;;  %v3354_v40 = vmul.f32 %v3218_v1, %v3218_v1  ;;  %v2745_v2 = vadd.f32 %v2659_v7, %v2470_v61  ;;  %v2387_v20 = vpop.f32.mrf.mxu1 }
 0x20e   : > { %v3287_v56 = vadd.f32 %v3286_v50, %v3285_v11  ;;  %v2471_v10 = vadd.f32 %v2387_v20, %v6371_v55 }
 0x20f   : > { %v3389_v49 = vsel %vm3246_vm9, %v3354_v40, 0.0  ;;  %v2902_v26 = vadd.f32 %v2816_v52, %v2745_v2  ;;  %v6376_v40 = vld [vmem:[#allocation83_spill] sm:$0xff]  ;;  %v6377_v2 = vld [vmem:[#allocation77_spill] sm:$0xff] }
 0x210   : > { %v3390_v62 = vadd.f32 %v3389_v49, %v3388_v27  ;;  %3792 = vmatmul.msk.f32.gmra.mxu1 %vm960_vm1, %v5072_v14  ;;  %v3100_v8 = vpop.f32.mrf.mxu0  ;;  %vm6378_vm2 = vnez %v6377_v2  ;;  %v6389_v2 = vld [vmem:[#allocation12_spill] sm:$0xff] }
 0x211   : > { %v3183_v16 = vadd.f32 %v3097_v54, %v2902_v26  ;;  %3825 = vmatmul.msk.f32.gmra.mxu2 %vm960_vm1, %v2519_v35  ;;  %v6374_v54 = vld [vmem:[#allocation16_spill] sm:$0xff]  ;;  %v2521_v20 = vsel %vm6378_vm2, %v6376_v40, 0.0  ;;  %v6388_v40 = vld [vmem:[#allocation89_spill] sm:$0xff]  ;;  %vm6390_vm5 = vnez %v6389_v2 }
 0x212   : > { %3858 = vmatmul.msk.f32.gmra.mxu3 %vm960_vm1, %v4294_v47  ;;  %v2245_v47 = vsel %vm6373_vm3, %v5091_v23, 0.0  ;;  %v6375_v23 = vld [vmem:[#allocation78_spill] sm:$0xff] }
 0x213   : > { %v3219_v17 = vadd.f32 %v5528_v29, %v3183_v16  ;;  %3891 = vmatmul.msk.f32.gmra.mxu0 %vm960_vm1, %v5121_v63  ;;  %v6380_v16 = vld [vmem:[#allocation80_spill] sm:$0xff] }
 0x214   : > { %v2662_v34 = vpop.f32.mrf.mxu2 }
 0x215   : > { %v2819_v31 = vpop.f32.mrf.mxu3  ;;  %3252 = vst.msk [vmem:[%s5541_s17 + $0x28] sm:$0xff] %vm3246_vm9, %v3219_v17  ;;  %v3288_v14 = vsel %vm3246_vm9, %v3219_v17, 0.0  ;;  %v3355_v4 = vmul.f32 %v3219_v17, %v3219_v17  ;;  %v2746_v5 = vadd.f32 %v2662_v34, %v2471_v10  ;;  %v2390_v45 = vpop.f32.mrf.mxu1  ;;  %v6381_v17 = vld [vmem:[#allocation84_spill] sm:$0xff] }
 0x216   : > { %v3289_v53 = vadd.f32 %v3288_v14, %v3287_v56  ;;  %v2472_v46 = vadd.f32 %v2390_v45, %v6375_v23  ;;  %v6382_v45 = vld [vmem:[#allocation79_spill] sm:$0xff]  ;;  %v6386_v23 = vld [vmem:[#allocation22_spill] sm:$0xff] }
 0x217   : > { %v3391_v37 = vsel %vm3246_vm9, %v3355_v4, 0.0  ;;  %v2903_v25 = vadd.f32 %v2819_v31, %v2746_v5  ;;  %vm6383_vm4 = vnez %v6382_v45 }
 0x218   : > { %v3392_v11 = vadd.f32 %v3391_v37, %v3390_v62  ;;  %3793 = vmatmul.msk.f32.gmra.mxu1 %vm960_vm1, %v2245_v47  ;;  %v3103_v42 = vpop.f32.mrf.mxu0  ;;  %v2247_v21 = vsel %vm6383_vm4, %v5140_v13, 0.0  ;;  %v6387_v13 = vld [vmem:[#allocation14_spill] sm:$0xff] }
 0x219   : > { %v3184_v27 = vadd.f32 %v3100_v8, %v2903_v25  ;;  %3826 = vmatmul.msk.f32.gmra.mxu2 %vm960_vm1, %v5148_v18  ;;  %v6379_v8 = vld [vmem:[#allocation19_spill] sm:$0xff] }
 0x21a   : > { %3859 = vmatmul.msk.f32.gmra.mxu3 %vm960_vm1, %v6374_v54  ;;  %v6385_v54 = vld [vmem:[#allocation87_spill] sm:$0xff] }
 0x21b   : > { %v3220_v24 = vadd.f32 %v5528_v29, %v3184_v27  ;;  %3892 = vmatmul.msk.f32.gmra.mxu0 %vm960_vm1, %v2958_v58 }
 0x21c   : > { %v2665_v59 = vpop.f32.mrf.mxu2 }
 0x21d   : > { %v2822_v61 = vpop.f32.mrf.mxu3  ;;  %3253 = vst.msk [vmem:[%s5541_s17 + $0x30] sm:$0xff] %vm3246_vm9, %v3220_v24  ;;  %v3290_v1 = vsel %vm3246_vm9, %v3220_v24, 0.0  ;;  %v3356_v7 = vmul.f32 %v3220_v24, %v3220_v24  ;;  %v2747_v52 = vadd.f32 %v2665_v59, %v2472_v46  ;;  %v2393_v50 = vpop.f32.mrf.mxu1 }
 0x21e   : > { %v3291_v18 = vadd.f32 %v3290_v1, %v3289_v53  ;;  %v2473_v55 = vadd.f32 %v2393_v50, %v6380_v16  ;;  %v6392_v16 = vld [vmem:[#allocation82_spill] sm:$0xff] }
 0x21f   : > { %v3393_v56 = vsel %vm3246_vm9, %v3356_v7, 0.0  ;;  %v2904_v35 = vadd.f32 %v2822_v61, %v2747_v52 }
 0x220   : > { %v3394_v49 = vadd.f32 %v3393_v56, %v3392_v11  ;;  %3794 = vmatmul.msk.f32.gmra.mxu1 %vm960_vm1, %v5121_v63  ;;  %v3106_v26 = vpop.f32.mrf.mxu0 }
 0x221   : > { %v3185_v62 = vadd.f32 %v3103_v42, %v2904_v35  ;;  %3827 = vmatmul.msk.f32.gmra.mxu2 %vm960_vm1, %v2521_v20  ;;  %v6384_v42 = vld [vmem:[#allocation86_spill] sm:$0xff]  ;;  %v2523_v20 = vsel %vm6390_vm5, %v6388_v40, 0.0 }
 0x222   : > { %3860 = vmatmul.msk.f32.gmra.mxu3 %vm960_vm1, %v6379_v8  ;;  %v2960_v58 = vsel %vm6383_vm4, %v6384_v42, 0.0  ;;  %v6391_v8 = vld [vmem:[#allocation25_spill] sm:$0xff] }
 0x223   : > { %v3221_v10 = vadd.f32 %v5528_v29, %v3185_v62  ;;  %3893 = vmatmul.msk.f32.gmra.mxu0 %vm960_vm1, %v6381_v17 }
 0x224   : > { %v2668_v34 = vpop.f32.mrf.mxu2 }
 0x225   : > { %v2825_v31 = vpop.f32.mrf.mxu3  ;;  %3254 = vst.msk [vmem:[%s5541_s17 + $0x38] sm:$0xff] %vm3246_vm9, %v3221_v10  ;;  %v3292_v63 = vsel %vm3246_vm9, %v3221_v10, 0.0  ;;  %v3357_v14 = vmul.f32 %v3221_v10, %v3221_v10  ;;  %v2748_v4 = vadd.f32 %v2668_v34, %v2473_v55  ;;  %v2396_v5 = vpop.f32.mrf.mxu1 }
 0x226   : > { %v3293_v47 = vadd.f32 %v3292_v63, %v3291_v18  ;;  %v2474_v46 = vadd.f32 %v2396_v5, %v6387_v13  ;;  %v6393_v5 = vld [vmem:[#allocation81_spill] sm:$0xff]  ;;  %v2216_v13 = vrot.slane %v5210_v38, 2 }
 0x227   : > { %v3395_v53 = vsel %vm3246_vm9, %v3357_v14, 0.0  ;;  %v2905_v37 = vadd.f32 %v2825_v31, %v2748_v4  ;;  %vm6394_vm6 = vnez %v6393_v5 }
 0x228   : > { %v3396_v25 = vadd.f32 %v3395_v53, %v3394_v49  ;;  %3795 = vmatmul.msk.f32.gmra.mxu1 %vm960_vm1, %v2247_v21  ;;  %v3109_v11 = vpop.f32.mrf.mxu0  ;;  %v2249_v45 = vsel %vm6394_vm6, %v6384_v42, 0.0  ;;  %v6396_v42 = vld [vmem:[#allocation20_spill] sm:$0xff] }
 0x229   : > { %v3186_v27 = vadd.f32 %v3106_v26, %v2905_v37  ;;  %3828 = vmatmul.msk.f32.gmra.mxu2 %vm960_vm1, %v6385_v54 }
 0x22a   : > { %3861 = vmatmul.msk.f32.gmra.mxu3 %vm960_vm1, %v6386_v23 }
 0x22b   : > { %v3222_v24 = vadd.f32 %v5528_v29, %v3186_v27  ;;  %3894 = vmatmul.msk.f32.gmra.mxu0 %vm960_vm1, %v2960_v58  ;;  %v6395_v27 = vld [vmem:[#allocation28_spill] sm:$0xff] }
 0x22c   : > { %v2671_v59 = vpop.f32.mrf.mxu2 }
 0x22d   : > { %v2828_v61 = vpop.f32.mrf.mxu3  ;;  %3255 = vst.msk [vmem:[%s5541_s17 + $0x40] sm:$0xff] %vm3246_vm9, %v3222_v24  ;;  %v3294_v1 = vsel %vm3246_vm9, %v3222_v24, 0.0  ;;  %v3358_v7 = vmul.f32 %v3222_v24, %v3222_v24  ;;  %v2749_v52 = vadd.f32 %v2671_v59, %v2474_v46  ;;  %v2399_v50 = vpop.f32.mrf.mxu1 }
 0x22e   : > { %v3295_v18 = vadd.f32 %v3294_v1, %v3293_v47  ;;  %v2475_v55 = vadd.f32 %v2399_v50, %v6392_v16  ;;  %v6397_v50 = vld [vmem:[#allocation17_spill] sm:$0xff] }
 0x22f   : > { %v3397_v56 = vsel %vm3246_vm9, %v3358_v7, 0.0  ;;  %v2906_v35 = vadd.f32 %v2828_v61, %v2749_v52  ;;  %v3980_v52 = vld [vmem:[%s4181_s25 + $0x100] sm:$0xff]  ;;  %vm6398_vm7 = vnez %v6397_v50 }
 0x230   : > { %v3398_v49 = vadd.f32 %v3397_v56, %v3396_v25  ;;  %3796 = vmatmul.msk.f32.gmra.mxu1 %vm960_vm1, %v6381_v17  ;;  %v3112_v26 = vpop.f32.mrf.mxu0  ;;  %v6399_v56 = vrot.slane %v6290_v3, 2  ;;  %v6402_v3 = vld [vmem:[#allocation85_spill] sm:$0xff] }
 0x231   : > { %v3187_v62 = vadd.f32 %v3109_v11, %v2906_v35  ;;  %3829 = vmatmul.msk.f32.gmra.mxu2 %vm960_vm1, %v2523_v20  ;;  %v2962_v11 = vsel %vm6394_vm6, %v5257_v6, 0.0  ;;  %vm6403_vm10 = vnez %v6402_v3 }
 0x232   : > { %3862 = vmatmul.msk.f32.gmra.mxu3 %vm960_vm1, %v6391_v8  ;;  %v2217_v35 = vsel %vm6400_vm8, %v6399_v56, %v2216_v13 }
 0x233   : > { %v3223_v10 = vadd.f32 %v5528_v29, %v3187_v62  ;;  %3895 = vmatmul.msk.f32.gmra.mxu0 %vm960_vm1, %v5229_v36  ;;  %v6401_v62 = vld [vmem:[#allocation88_spill] sm:$0xff] }
 0x234   : > { %v2674_v34 = vpop.f32.mrf.mxu2 }
 0x235   : > { %v2831_v31 = vpop.f32.mrf.mxu3  ;;  %3256 = vst.msk [vmem:[%s5541_s17 + $0x48] sm:$0xff] %vm3246_vm9, %v3223_v10  ;;  %v3296_v17 = vsel %vm3246_vm9, %v3223_v10, 0.0  ;;  %v3359_v63 = vmul.f32 %v3223_v10, %v3223_v10  ;;  %v2750_v14 = vadd.f32 %v2674_v34, %v2475_v55  ;;  %v2402_v4 = vpop.f32.mrf.mxu1  ;;  %v2251_v10 = vsel %vm6403_vm10, %v5257_v6, 0.0 }
 0x236   : > { %v3297_v21 = vadd.f32 %v3296_v17, %v3295_v18  ;;  %v2476_v54 = vadd.f32 %v2402_v4, %v6396_v42  ;;  %v2525_v18 = vsel %vm6398_vm7, %v3980_v52, 0.0 }
 0x237   : > { %v3399_v47 = vsel %vm3246_vm9, %v3359_v63, 0.0  ;;  %v2907_v53 = vadd.f32 %v2831_v31, %v2750_v14 }
 0x238   : > { %v3400_v37 = vadd.f32 %v3399_v47, %v3398_v49  ;;  %3797 = vmatmul.msk.f32.gmra.mxu1 %vm960_vm1, %v2249_v45  ;;  %v3115_v25 = vpop.f32.mrf.mxu0  ;;  %v279_v45 = vld [vmem:[%s4181_s25 + $0x118] sm:$0xff] }
 0x239   : > { %v3188_v58 = vadd.f32 %v3112_v26, %v2907_v53  ;;  %3830 = vmatmul.msk.f32.gmra.mxu2 %vm960_vm1, %v5266_v19  ;;  %v2218_v26 = vrot.slane %v5247_v28, 2 }
 0x23a   : > { %3863 = vmatmul.msk.f32.gmra.mxu3 %vm960_vm1, %v6395_v27 }
 0x23b   : > { %v3224_v23 = vadd.f32 %v5528_v29, %v3188_v58  ;;  %3896 = vmatmul.msk.f32.gmra.mxu0 %vm960_vm1, %v2962_v11  ;;  %v2219_v63 = vsel %vm6404_vm11, %v2216_v13, %v2218_v26  ;;  %v6405_v11 = vld [vmem:[#allocation26_spill] sm:$0xff] }
 0x23c   : > { %v2677_v46 = vpop.f32.mrf.mxu2  ;;  %v2964_v47 = vsel %vm6403_vm10, %v2219_v63, 0.0 }
 0x23d   : > { %v2834_v24 = vpop.f32.mrf.mxu3  ;;  %3257 = vst.msk [vmem:[%s5541_s17 + $0x50] sm:$0xff] %vm3246_vm9, %v3224_v23  ;;  %v3298_v59 = vsel %vm3246_vm9, %v3224_v23, 0.0  ;;  %v3360_v61 = vmul.f32 %v3224_v23, %v3224_v23  ;;  %v2751_v1 = vadd.f32 %v2677_v46, %v2476_v54  ;;  %v2405_v19 = vpop.f32.mrf.mxu1  ;;  %v2929_v23 = vrot.slane %v279_v45, 2 }
 0x23e   : > { %v3299_v7 = vadd.f32 %v3298_v59, %v3297_v21  ;;  %v2477_v8 = vadd.f32 %v2405_v19, %v6401_v62 }
 0x23f   : > { %v3401_v40 = vsel %vm3246_vm9, %v3360_v61, 0.0  ;;  %v2908_v2 = vadd.f32 %v2834_v24, %v2751_v1 }
 0x240   : > { %v3402_v20 = vadd.f32 %v3401_v40, %v3400_v37  ;;  %3798 = vmatmul.msk.f32.gmra.mxu1 %vm960_vm1, %v5229_v36  ;;  %v3118_v38 = vpop.f32.mrf.mxu0  ;;  %v3981_v37 = vld [vmem:[%s4181_s25 + $0x108] sm:$0xff]  ;;  %v280_v40 = vld [vmem:[%s4181_s25 + $0x120] sm:$0x3] }
 0x241   : > { %v3189_v49 = vadd.f32 %v3115_v25, %v2908_v2  ;;  %3831 = vmatmul.msk.f32.gmra.mxu2 %vm960_vm1, %v2525_v18  ;;  %v2776_v25 = vrot.slane %v279_v45, 1 }
 0x242   : > { %3864 = vmatmul.msk.f32.gmra.mxu3 %vm960_vm1, %v5239_v57 }
 0x243   : > { %v3225_v16 = vadd.f32 %v5528_v29, %v3189_v49  ;;  %3897 = vmatmul.msk.f32.gmra.mxu0 %vm960_vm1, %v2217_v35  ;;  %v2931_v49 = vrot.slane %v280_v40, 2 }
 0x244   : > { %v2680_v36 = vpop.f32.mrf.mxu2 }
 0x245   : > { %v2837_v55 = vpop.f32.mrf.mxu3  ;;  %3258 = vst.msk [vmem:[%s5541_s17 + $0x58] sm:$0xff] %vm3246_vm9, %v3225_v16  ;;  %v3300_v57 = vsel %vm3246_vm9, %v3225_v16, 0.0  ;;  %v3361_v34 = vmul.f32 %v3225_v16, %v3225_v16  ;;  %v2752_v31 = vadd.f32 %v2680_v36, %v2477_v8  ;;  %v2408_v17 = vpop.f32.mrf.mxu1 }
 0x246   : > { %v3301_v14 = vadd.f32 %v3300_v57, %v3299_v7  ;;  %v2478_v58 = vadd.f32 %v2408_v17, %v6405_v11  ;;  %v6407_v7 = vrot.slane %v5247_v28, 1  ;;  %v2778_v28 = vrot.slane %v280_v40, 1 }
 0x247   : > { %v3403_v4 = vsel %vm3246_vm9, %v3361_v34, 0.0  ;;  %v2909_v5 = vadd.f32 %v2837_v55, %v2752_v31 }
 0x248   : > { %v3404_v21 = vadd.f32 %v3403_v4, %v3402_v20  ;;  %3799 = vmatmul.msk.f32.gmra.mxu1 %vm960_vm1, %v2251_v10  ;;  %v3121_v6 = vpop.f32.mrf.mxu0  ;;  %v2777_v52 = vsel %vm6408_vm12, %v6407_v7, %v2776_v25 }
 0x249   : > { %v3190_v53 = vadd.f32 %v3118_v38, %v2909_v5  ;;  %3832 = vmatmul.msk.f32.gmra.mxu2 %vm960_vm1, %v3981_v37  ;;  %v2930_v38 = vsel %vm6409_vm13, %v2218_v26, %v2929_v23 }
 0x24a   : > { %3865 = vmatmul.msk.f32.gmra.mxu3 %vm960_vm1, %v5273_v30  ;;  %v3982_v30 = vld [vmem:[%s4181_s25 + $0x110] sm:$0xff] }
 0x24b   : > { %v3226_v27 = vadd.f32 %v5528_v29, %v3190_v53  ;;  %3898 = vmatmul.msk.f32.gmra.mxu0 %vm960_vm1, %v2964_v47  ;;  %v2527_v19 = vsel %vm5212_vm15, %v3982_v30, 0.0  ;;  %vm6411_vm15 = vmmov %vm6400_vm8 }
 0x24c   : > { %v2683_v42 = vpop.f32.mrf.mxu2  ;;  %v2932_v34 = vsel %vm6411_vm15, %v2929_v23, %v2931_v49 }
 0x24d   : > { %v2840_v54 = vpop.f32.mrf.mxu3  ;;  %3259 = vst.msk [vmem:[%s5541_s17 + $0x60] sm:$0xff] %vm3246_vm9, %v3226_v27  ;;  %v3302_v13 = vsel %vm3246_vm9, %v3226_v27, 0.0  ;;  %v3362_v46 = vmul.f32 %v3226_v27, %v3226_v27  ;;  %v2753_v24 = vadd.f32 %v2683_v42, %v2478_v58  ;;  %v2411_v59 = vpop.f32.mrf.mxu1  ;;  %v2966_v5 = vsel %vm5250_vm0, %v2932_v34, 0.0 }
 0x24e   : > { %v3303_v61 = vadd.f32 %v3302_v13, %v3301_v14  ;;  %v2479_v62 = vadd.f32 %v2411_v59, %v5275_v48  ;;  %v2779_v48 = vsel %vm6412_vm14, %v2776_v25, %v2778_v28 }
 0x24f   : > { %v3405_v50 = vsel %vm3246_vm9, %v3362_v46, 0.0  ;;  %v2910_v18 = vadd.f32 %v2840_v54, %v2753_v24 }
 0x250   : > { %v3406_v2 = vadd.f32 %v3405_v50, %v3404_v21  ;;  %3800 = vmatmul.msk.f32.gmra.mxu1 %vm960_vm1, %v2217_v35  ;;  %v3124_v20 = vpop.f32.mrf.mxu0  ;;  %v2253_v35 = vsel %vm5250_vm0, %v2219_v63, 0.0 }
 0x251   : > { %v3191_v56 = vadd.f32 %v3121_v6, %v2910_v18  ;;  %3833 = vmatmul.msk.f32.gmra.mxu2 %vm960_vm1, %v2527_v19 }
 0x252   : > { %3866 = vmatmul.msk.f32.gmra.mxu3 %vm960_vm1, %v2777_v52 }
 0x253   : > { %v3227_v8 = vadd.f32 %v5528_v29, %v3191_v56  ;;  %3899 = vmatmul.msk.f32.gmra.mxu0 %vm960_vm1, %v2930_v38 }
 0x254   : > { %v2686_v16 = vpop.f32.mrf.mxu2 }
 0x255   : > { %v2843_v36 = vpop.f32.mrf.mxu3  ;;  %3260 = vst.msk [vmem:[%s5541_s17 + $0x68] sm:$0xff] %vm3246_vm9, %v3227_v8  ;;  %v3304_v26 = vsel %vm3246_vm9, %v3227_v8, 0.0  ;;  %v3363_v3 = vmul.f32 %v3227_v8, %v3227_v8  ;;  %v2754_v10 = vadd.f32 %v2686_v16, %v2479_v62  ;;  %v2414_v57 = vpop.f32.mrf.mxu1 }
 0x256   : > { %v3305_v31 = vadd.f32 %v3304_v26, %v3303_v61  ;;  %v2480_v6 = vadd.f32 %v2414_v57, %v5285_v0 }
 0x257   : > { %v3407_v17 = vsel %vm3246_vm9, %v3363_v3, 0.0  ;;  %v2911_v14 = vadd.f32 %v2843_v36, %v2754_v10 }
 0x258   : > { %v3408_v4 = vadd.f32 %v3407_v17, %v3406_v2  ;;  %3801 = vmatmul.msk.f32.gmra.mxu1 %vm960_vm1, %v2253_v35  ;;  %v3127_v63 = vpop.f32.mrf.mxu0 }
 0x259   : > { %v3192_v21 = vadd.f32 %v3124_v20, %v2911_v14  ;;  %3834 = vmatmul.msk.f32.gmra.mxu2 %vm960_vm1, %v279_v45 }
 0x25a   : > { %3867 = vmatmul.msk.f32.gmra.mxu3 %vm960_vm1, %v2779_v48 }
 0x25b   : > { %v3228_v47 = vadd.f32 %v5528_v29, %v3192_v21  ;;  %3900 = vmatmul.msk.f32.gmra.mxu0 %vm960_vm1, %v2966_v5  ;;  %vm3348_vm1 = vcmask 16384  }
 0x25c   : > { %v2689_v53 = vpop.f32.mrf.mxu2 }
 0x25d   : > { %v2846_v37 = vpop.f32.mrf.mxu3  ;;  %3261 = vst.msk [vmem:[%s5541_s17 + $0x70] sm:$0xff] %vm3246_vm9, %v3228_v47  ;;  %v3306_v25 = vsel %vm3246_vm9, %v3228_v47, 0.0  ;;  %v3364_v11 = vmul.f32 %v3228_v47, %v3228_v47  ;;  %v2755_v58 = vadd.f32 %v2689_v53, %v2480_v6  ;;  %v2417_v27 = vpop.f32.mrf.mxu1 }
 0x25e   : > { %v3307_v42 = vadd.f32 %v3306_v25, %v3305_v31  ;;  %v2481_v46 = vadd.f32 %v2417_v27, %v5304_v41 }
 0x25f   : > { %v3409_v45 = vsel %vm3246_vm9, %v3364_v11, 0.0  ;;  %v2912_v54 = vadd.f32 %v2846_v37, %v2755_v58 }
 0x260   : > { %v3410_v23 = vadd.f32 %v3409_v45, %v3408_v4  ;;  %v3130_v0 = vpop.f32.mrf.mxu0 }
 0x261   : > { %v3193_v13 = vadd.f32 %v3127_v63, %v2912_v54 }
 0x263   : > { %v3229_v24 = vadd.f32 %v5528_v29, %v3193_v13 }
 0x264   : > { %v2692_v59 = vpop.f32.mrf.mxu2 }
 0x265   : > { %v2849_v61 = vpop.f32.mrf.mxu3  ;;  %3262 = vst.msk [vmem:[%s5541_s17 + $0x78] sm:$0xff] %vm3246_vm9, %v3229_v24  ;;  %v3308_v30 = vsel %vm3246_vm9, %v3229_v24, 0.0  ;;  %v3365_v1 = vmul.f32 %v3229_v24, %v3229_v24  ;;  %v2756_v19 = vadd.f32 %v2692_v59, %v2481_v46  ;;  %v2420_v7 = vpop.f32.mrf.mxu1 }
 0x266   : > { %v3309_v52 = vadd.f32 %v3308_v30, %v3307_v42  ;;  %v2482_v41 = vadd.f32 %v2420_v7, %v5317_v22 }
 0x267   : > { %v3411_v50 = vsel %vm3246_vm9, %v3365_v1, 0.0  ;;  %v2913_v18 = vadd.f32 %v2849_v61, %v2756_v19 }
 0x268   : > { %v3412_v40 = vadd.f32 %v3411_v50, %v3410_v23  ;;  %v3133_v2 = vpop.f32.mrf.mxu0 }
 0x269   : > { %v3194_v20 = vadd.f32 %v3130_v0, %v2913_v18 }
 0x26b   : > { %v3230_v38 = vadd.f32 %v5528_v29, %v3194_v20 }
 0x26c   : > { %v2695_v56 = vpop.f32.mrf.mxu2 }
 0x26d   : > { %v2852_v49 = vpop.f32.mrf.mxu3  ;;  %3263 = vst.msk [vmem:[%s5541_s17 + $0x80] sm:$0xff] %vm3246_vm9, %v3230_v38  ;;  %v3310_v28 = vsel %vm3246_vm9, %v3230_v38, 0.0  ;;  %v3366_v62 = vmul.f32 %v3230_v38, %v3230_v38  ;;  %v2757_v8 = vadd.f32 %v2695_v56, %v2482_v41  ;;  %v2423_v16 = vpop.f32.mrf.mxu1 }
 0x26e   : > { %v3311_v36 = vadd.f32 %v3310_v28, %v3309_v52  ;;  %v2483_v22 = vadd.f32 %v2423_v16, %v5332_v15 }
 0x26f   : > { %v3413_v55 = vsel %vm3246_vm9, %v3366_v62, 0.0  ;;  %v2914_v35 = vadd.f32 %v2852_v49, %v2757_v8 }
 0x270   : > { %v3414_v26 = vadd.f32 %v3413_v55, %v3412_v40  ;;  %v3136_v3 = vpop.f32.mrf.mxu0 }
 0x271   : > { %v3195_v10 = vadd.f32 %v3133_v2, %v2914_v35 }
 0x273   : > { %v3231_v57 = vadd.f32 %v5528_v29, %v3195_v10 }
 0x274   : > { %v2698_v34 = vpop.f32.mrf.mxu2 }
 0x275   : > { %v2855_v31 = vpop.f32.mrf.mxu3  ;;  %3264 = vst.msk [vmem:[%s5541_s17 + $0x88] sm:$0xff] %vm3246_vm9, %v3231_v57  ;;  %v3312_v48 = vsel %vm3246_vm9, %v3231_v57, 0.0  ;;  %v3367_v17 = vmul.f32 %v3231_v57, %v3231_v57  ;;  %v2758_v14 = vadd.f32 %v2698_v34, %v2483_v22  ;;  %v2426_v4 = vpop.f32.mrf.mxu1 }
 0x276   : > { %v3313_v63 = vadd.f32 %v3312_v48, %v3311_v36  ;;  %v2484_v15 = vadd.f32 %v2426_v4, %v5345_v12 }
 0x277   : > { %v3415_v5 = vsel %vm3246_vm9, %v3367_v17, 0.0  ;;  %v2915_v21 = vadd.f32 %v2855_v31, %v2758_v14 }
 0x278   : > { %v3416_v6 = vadd.f32 %v3415_v5, %v3414_v26  ;;  %v3139_v47 = vpop.f32.mrf.mxu0 }
 0x279   : > { %v3196_v53 = vadd.f32 %v3136_v3, %v2915_v21 }
 0x27b   : > { %v3232_v37 = vadd.f32 %v5528_v29, %v3196_v53 }
 0x27c   : > { %v2701_v25 = vpop.f32.mrf.mxu2 }
 0x27d   : > { %v2858_v11 = vpop.f32.mrf.mxu3  ;;  %3265 = vst.msk [vmem:[%s5541_s17 + $0x90] sm:$0xff] %vm3246_vm9, %v3232_v37  ;;  %v3314_v58 = vsel %vm3246_vm9, %v3232_v37, 0.0  ;;  %v3368_v27 = vmul.f32 %v3232_v37, %v3232_v37  ;;  %v2759_v42 = vadd.f32 %v2701_v25, %v2484_v15  ;;  %v2429_v45 = vpop.f32.mrf.mxu1 }
 0x27e   : > { %v3315_v54 = vadd.f32 %v3314_v58, %v3313_v63  ;;  %v2485_v12 = vadd.f32 %v2429_v45, %v5360_v44 }
 0x27f   : > { %v3417_v23 = vsel %vm3246_vm9, %v3368_v27, 0.0  ;;  %v2916_v0 = vadd.f32 %v2858_v11, %v2759_v42 }
 0x280   : > { %v3418_v13 = vadd.f32 %v3417_v23, %v3416_v6  ;;  %v3142_v46 = vpop.f32.mrf.mxu0 }
 0x281   : > { %v3197_v24 = vadd.f32 %v3139_v47, %v2916_v0 }
 0x283   : > { %v3233_v59 = vadd.f32 %v5528_v29, %v3197_v24  ;;  %v6414_v24 = vld [vmem:[#allocation34_spill] sm:$0xff] }
 0x284   : > { %v2704_v61 = vpop.f32.mrf.mxu2 }
 0x285   : > { %v2861_v30 = vpop.f32.mrf.mxu3  ;;  %3266 = vst.msk [vmem:[%s5541_s17 + $0x98] sm:$0xff] %vm3246_vm9, %v3233_v59  ;;  %v3316_v1 = vsel %vm3246_vm9, %v3233_v59, 0.0  ;;  %v3369_v19 = vmul.f32 %v3233_v59, %v3233_v59  ;;  %v2760_v7 = vadd.f32 %v2704_v61, %v2485_v12  ;;  %v2432_v52 = vpop.f32.mrf.mxu1 }
 0x286   : > { %v3317_v50 = vadd.f32 %v3316_v1, %v3315_v54  ;;  %v2486_v44 = vadd.f32 %v2432_v52, %v5373_v39 }
 0x287   : > { %v3419_v18 = vsel %vm3246_vm9, %v3369_v19, 0.0  ;;  %v2917_v40 = vadd.f32 %v2861_v30, %v2760_v7 }
 0x288   : > { %v3420_v2 = vadd.f32 %v3419_v18, %v3418_v13  ;;  %v3145_v20 = vpop.f32.mrf.mxu0 }
 0x289   : > { %v3198_v41 = vadd.f32 %v3142_v46, %v2917_v40 }
 0x28b   : > { %v3234_v38 = vadd.f32 %v5528_v29, %v3198_v41 }
 0x28c   : > { %v2707_v56 = vpop.f32.mrf.mxu2 }
 0x28d   : > { %v2864_v49 = vpop.f32.mrf.mxu3  ;;  %3267 = vst.msk [vmem:[%s5541_s17 + $0xa0] sm:$0xff] %vm3246_vm9, %v3234_v38  ;;  %v3318_v28 = vsel %vm3246_vm9, %v3234_v38, 0.0  ;;  %v3370_v62 = vmul.f32 %v3234_v38, %v3234_v38  ;;  %v2761_v8 = vadd.f32 %v2707_v56, %v2486_v44  ;;  %v2435_v16 = vpop.f32.mrf.mxu1  ;;  %v6415_v44 = vld [vmem:[#allocation30_spill] sm:$0xff] }
 0x28e   : > { %v3319_v36 = vadd.f32 %v3318_v28, %v3317_v50  ;;  %v2487_v39 = vadd.f32 %v2435_v16, %v5388_v43  ;;  %v6413_v43 = vld [vmem:[#allocation47_spill] sm:$0xff] }
 0x28f   : > { %v3421_v55 = vsel %vm3246_vm9, %v3370_v62, 0.0  ;;  %v2918_v35 = vadd.f32 %v2864_v49, %v2761_v8 }
 0x290   : > { %v3422_v26 = vadd.f32 %v3421_v55, %v3420_v2  ;;  %v3148_v3 = vpop.f32.mrf.mxu0 }
 0x291   : > { %v3199_v10 = vadd.f32 %v3145_v20, %v2918_v35 }
 0x293   : > { %v3235_v22 = vadd.f32 %v5528_v29, %v3199_v10 }
 0x294   : > { %v2710_v57 = vpop.f32.mrf.mxu2 }
 0x295   : > { %v2867_v34 = vpop.f32.mrf.mxu3  ;;  %3268 = vst.msk [vmem:[%s5541_s17 + $0xa8] sm:$0xff] %vm3246_vm9, %v3235_v22  ;;  %v3320_v31 = vsel %vm3246_vm9, %v3235_v22, 0.0  ;;  %v3371_v48 = vmul.f32 %v3235_v22, %v3235_v22  ;;  %v2762_v17 = vadd.f32 %v2710_v57, %v2487_v39  ;;  %v2438_v14 = vpop.f32.mrf.mxu1 }
 0x296   : > { %v3321_v4 = vadd.f32 %v3320_v31, %v3319_v36  ;;  %v2488_v53 = vadd.f32 %v2438_v14, %v6413_v43 }
 0x297   : > { %v3423_v63 = vsel %vm3246_vm9, %v3371_v48, 0.0  ;;  %v2919_v5 = vadd.f32 %v2867_v34, %v2762_v17 }
 0x298   : > { %v3424_v21 = vadd.f32 %v3423_v63, %v3422_v26  ;;  %v3151_v6 = vpop.f32.mrf.mxu0 }
 0x299   : > { %v3200_v47 = vadd.f32 %v3148_v3, %v2919_v5 }
 0x29b   : > { %v3236_v15 = vadd.f32 %v5528_v29, %v3200_v47 }
 0x29c   : > { %v2713_v37 = vpop.f32.mrf.mxu2 }
 0x29d   : > { %v2870_v25 = vpop.f32.mrf.mxu3  ;;  %3269 = vst.msk [vmem:[%s5541_s17 + $0xb0] sm:$0xff] %vm3246_vm9, %v3236_v15  ;;  %v3322_v11 = vsel %vm3246_vm9, %v3236_v15, 0.0  ;;  %v3372_v58 = vmul.f32 %v3236_v15, %v3236_v15  ;;  %v2763_v27 = vadd.f32 %v2713_v37, %v2488_v53  ;;  %v2441_v42 = vpop.f32.mrf.mxu1 }
 0x29e   : > { %v3323_v45 = vadd.f32 %v3322_v11, %v3321_v4  ;;  %v2489_v12 = vadd.f32 %v2441_v42, %v6414_v24 }
 0x29f   : > { %v3425_v54 = vsel %vm3246_vm9, %v3372_v58, 0.0  ;;  %v2920_v23 = vadd.f32 %v2870_v25, %v2763_v27 }
 0x2a0   : > { %v3426_v0 = vadd.f32 %v3425_v54, %v3424_v21  ;;  %v3154_v13 = vpop.f32.mrf.mxu0 }
 0x2a1   : > { %v3201_v46 = vadd.f32 %v3151_v6, %v2920_v23 }
 0x2a3   : > { %v3237_v59 = vadd.f32 %v5528_v29, %v3201_v46 }
 0x2a4   : > { %v2716_v61 = vpop.f32.mrf.mxu2 }
 0x2a5   : > { %v2873_v30 = vpop.f32.mrf.mxu3  ;;  %3270 = vst.msk [vmem:[%s5541_s17 + $0xb8] sm:$0xff] %vm3246_vm9, %v3237_v59  ;;  %v3324_v1 = vsel %vm3246_vm9, %v3237_v59, 0.0  ;;  %v3373_v19 = vmul.f32 %v3237_v59, %v3237_v59  ;;  %v2764_v7 = vadd.f32 %v2716_v61, %v2489_v12  ;;  %v2444_v52 = vpop.f32.mrf.mxu1 }
 0x2a6   : > { %v3325_v50 = vadd.f32 %v3324_v1, %v3323_v45  ;;  %v2490_v38 = vadd.f32 %v2444_v52, %v6415_v44 }
 0x2a7   : > { %v3427_v18 = vsel %vm3246_vm9, %v3373_v19, 0.0  ;;  %v2921_v40 = vadd.f32 %v2873_v30, %v2764_v7 }
 0x2a8   : > { %v3428_v2 = vadd.f32 %v3427_v18, %v3426_v0  ;;  %v3157_v20 = vpop.f32.mrf.mxu0 }
 0x2a9   : > { %v3202_v41 = vadd.f32 %v3154_v13, %v2921_v40 }
 0x2ab   : > { %v3238_v56 = vadd.f32 %v5528_v29, %v3202_v41 }
 0x2ac   : > { %v2719_v49 = vpop.f32.mrf.mxu2 }
 0x2ad   : > { %v2876_v28 = vpop.f32.mrf.mxu3  ;;  %3271 = vst.msk [vmem:[%s5541_s17 + $0xc0] sm:$0xff] %vm3246_vm9, %v3238_v56  ;;  %v3326_v62 = vsel %vm3246_vm9, %v3238_v56, 0.0  ;;  %v3374_v8 = vmul.f32 %v3238_v56, %v3238_v56  ;;  %v2765_v16 = vadd.f32 %v2719_v49, %v2490_v38  ;;  %v2447_v36 = vpop.f32.mrf.mxu1 }
 0x2ae   : > { %v3327_v55 = vadd.f32 %v3326_v62, %v3325_v50  ;;  %v2491_v22 = vadd.f32 %v2447_v36, %v5444_v32  ;;  %v6416_v32 = vld [vmem:[#allocation36_spill] sm:$0xff] }
 0x2af   : > { %v3429_v35 = vsel %vm3246_vm9, %v3374_v8, 0.0  ;;  %v2922_v26 = vadd.f32 %v2876_v28, %v2765_v16 }
 0x2b0   : > { %v3430_v3 = vadd.f32 %v3429_v35, %v3428_v2  ;;  %v3160_v10 = vpop.f32.mrf.mxu0 }
 0x2b1   : > { %v3203_v39 = vadd.f32 %v3157_v20, %v2922_v26 }
 0x2b3   : > { %v3239_v57 = vadd.f32 %v5528_v29, %v3203_v39 }
 0x2b4   : > { %v2722_v34 = vpop.f32.mrf.mxu2 }
 0x2b5   : > { %v2879_v31 = vpop.f32.mrf.mxu3  ;;  %3272 = vst.msk [vmem:[%s5541_s17 + $0xc8] sm:$0xff] %vm3246_vm9, %v3239_v57  ;;  %v3328_v48 = vsel %vm3246_vm9, %v3239_v57, 0.0  ;;  %v3375_v17 = vmul.f32 %v3239_v57, %v3239_v57  ;;  %v2766_v14 = vadd.f32 %v2722_v34, %v2491_v22  ;;  %v2450_v4 = vpop.f32.mrf.mxu1 }
 0x2b6   : > { %v3329_v63 = vadd.f32 %v3328_v48, %v3327_v55  ;;  %v2492_v53 = vadd.f32 %v2450_v4, %v6416_v32 }
 0x2b7   : > { %v3431_v5 = vsel %vm3246_vm9, %v3375_v17, 0.0  ;;  %v2923_v21 = vadd.f32 %v2879_v31, %v2766_v14 }
 0x2b8   : > { %v3432_v6 = vadd.f32 %v3431_v5, %v3430_v3  ;;  %v3163_v47 = vpop.f32.mrf.mxu0 }
 0x2b9   : > { %v3204_v43 = vadd.f32 %v3160_v10, %v2923_v21 }
 0x2bb   : > { %v3240_v15 = vadd.f32 %v5528_v29, %v3204_v43 }
 0x2bc   : > { %v2725_v37 = vpop.f32.mrf.mxu2 }
 0x2bd   : > { %v2882_v25 = vpop.f32.mrf.mxu3  ;;  %3273 = vst.msk [vmem:[%s5541_s17 + $0xd0] sm:$0xff] %vm3246_vm9, %v3240_v15  ;;  %v3330_v11 = vsel %vm3246_vm9, %v3240_v15, 0.0  ;;  %v3376_v58 = vmul.f32 %v3240_v15, %v3240_v15  ;;  %v2767_v27 = vadd.f32 %v2725_v37, %v2492_v53  ;;  %v2453_v42 = vpop.f32.mrf.mxu1 }
 0x2be   : > { %v3331_v45 = vadd.f32 %v3330_v11, %v3329_v63  ;;  %v2493_v24 = vadd.f32 %v2453_v42, %v5472_v51 }
 0x2bf   : > { %v3433_v54 = vsel %vm3246_vm9, %v3376_v58, 0.0  ;;  %v2924_v23 = vadd.f32 %v2882_v25, %v2767_v27 }
 0x2c0   : > { %v3434_v0 = vadd.f32 %v3433_v54, %v3432_v6  ;;  %v3166_v13 = vpop.f32.mrf.mxu0 }
 0x2c1   : > { %v3205_v46 = vadd.f32 %v3163_v47, %v2924_v23 }
 0x2c3   : > { %v3241_v12 = vadd.f32 %v5528_v29, %v3205_v46  ;;  %v3983_v29 = vld [vmem:[%s5967_s2] ss:$0 sm:$0xff] }
 0x2c4   : > { %v2728_v59 = vpop.f32.mrf.mxu2 }
 0x2c5   : > { %v2885_v61 = vpop.f32.mrf.mxu3  ;;  %3274 = vst.msk [vmem:[%s5541_s17 + $0xd8] sm:$0xff] %vm3246_vm9, %v3241_v12  ;;  %v3332_v30 = vsel %vm3246_vm9, %v3241_v12, 0.0  ;;  %v3377_v1 = vmul.f32 %v3241_v12, %v3241_v12  ;;  %v2768_v19 = vadd.f32 %v2728_v59, %v2493_v24  ;;  %v2456_v7 = vpop.f32.mrf.mxu1 }
 0x2c6   : > { %v3333_v52 = vadd.f32 %v3332_v30, %v3331_v45  ;;  %v2494_v51 = vadd.f32 %v2456_v7, %v5485_v60 }
 0x2c7   : > { %v3435_v50 = vsel %vm3246_vm9, %v3377_v1, 0.0  ;;  %v2925_v18 = vadd.f32 %v2885_v61, %v2768_v19 }
 0x2c8   : > { %v3436_v40 = vadd.f32 %v3435_v50, %v3434_v0  ;;  %v3169_v20 = vpop.f32.mrf.mxu0 }
 0x2c9   : > { %v3206_v2 = vadd.f32 %v3166_v13, %v2925_v18 }
 0x2cb   : > { %v3242_v41 = vadd.f32 %v3983_v29, %v3206_v2 }
 0x2cc   : > { %v2731_v44 = vpop.f32.mrf.mxu2 }
 0x2cd   : > { %v2888_v38 = vpop.f32.mrf.mxu3  ;;  %3275 = vst.msk [vmem:[%s5541_s17 + $0xe0] sm:$0xff] %vm3246_vm9, %v3242_v41  ;;  %v3334_v56 = vsel %vm3246_vm9, %v3242_v41, 0.0  ;;  %v3378_v49 = vmul.f32 %v3242_v41, %v3242_v41  ;;  %v2769_v28 = vadd.f32 %v2731_v44, %v2494_v51  ;;  %v2459_v8 = vpop.f32.mrf.mxu1 }
 0x2ce   : > { %v3335_v62 = vadd.f32 %v3334_v56, %v3333_v52  ;;  %v2495_v35 = vadd.f32 %v2459_v8, %v5500_v33 }
 0x2cf   : > { %v3437_v16 = vsel %vm3246_vm9, %v3378_v49, 0.0  ;;  %v2926_v36 = vadd.f32 %v2888_v38, %v2769_v28 }
 0x2d0   : > { %v3438_v60 = vadd.f32 %v3437_v16, %v3436_v40  ;;  %v3172_v3 = vpop.f32.mrf.mxu0 }
 0x2d1   : > { %v3207_v55 = vadd.f32 %v3169_v20, %v2926_v36 }
 0x2d3   : > { %v3243_v26 = vadd.f32 %v3983_v29, %v3207_v55 }
 0x2d4   : > { %v2734_v10 = vpop.f32.mrf.mxu2 }
 0x2d5   : > { %v2891_v39 = vpop.f32.mrf.mxu3  ;;  %3276 = vst.msk [vmem:[%s5541_s17 + $0xe8] sm:$0xff] %vm3246_vm9, %v3243_v26  ;;  %v3336_v22 = vsel %vm3246_vm9, %v3243_v26, 0.0  ;;  %v3379_v57 = vmul.f32 %v3243_v26, %v3243_v26  ;;  %v2770_v34 = vadd.f32 %v2734_v10, %v2495_v35  ;;  %v2462_v4 = vpop.f32.mrf.mxu1 }
 0x2d6   : > { %v3337_v31 = vadd.f32 %v3336_v22, %v3335_v62  ;;  %v2496_v33 = vadd.f32 %v2462_v4, %v5513_v9 }
 0x2d7   : > { %v3439_v48 = vsel %vm3246_vm9, %v3379_v57, 0.0  ;;  %v2927_v17 = vadd.f32 %v2891_v39, %v2770_v34 }
 0x2d8   : > { %v3440_v14 = vadd.f32 %v3439_v48, %v3438_v60  ;;  %v3175_v15 = vpop.f32.mrf.mxu0 }
 0x2d9   : > { %v3208_v63 = vadd.f32 %v3172_v3, %v2927_v17 }
 0x2db   : > { %v3244_v5 = vadd.f32 %v3983_v29, %v3208_v63 }
 0x2dc   : > { %v2737_v21 = vpop.f32.mrf.mxu2 }
 0x2dd   : > { %v2894_v6 = vpop.f32.mrf.mxu3  ;;  %3277 = vst.msk [vmem:[%s5541_s17 + $0xf0] sm:$0xff] %vm3246_vm9, %v3244_v5  ;;  %v3338_v47 = vsel %vm3246_vm9, %v3244_v5, 0.0  ;;  %v3380_v43 = vmul.f32 %v3244_v5, %v3244_v5  ;;  %v2771_v32 = vadd.f32 %v2737_v21, %v2496_v33 }
 0x2de   : > { %v3339_v53 = vadd.f32 %v3338_v47, %v3337_v31 }
 0x2df   : > { %v3441_v37 = vsel %vm3246_vm9, %v3380_v43, 0.0  ;;  %v2928_v25 = vadd.f32 %v2894_v6, %v2771_v32 }
 0x2e0   : > { %v3442_v11 = vadd.f32 %v3441_v37, %v3440_v14 }
 0x2e1   : > { %v3209_v58 = vadd.f32 %v3175_v15, %v2928_v25 }
 0x2e3   : > { %v3245_v27 = vadd.f32 %v3983_v29, %v3209_v58 }
 0x2e5   : > { %3278 = vst.msk [vmem:[%s5541_s17 + $0xf8] sm:$0xff] %vm3246_vm9, %v3245_v27  ;;  %v3340_v9 = vsel %vm3246_vm9, %v3245_v27, 0.0  ;;  %v3381_v42 = vmul.f32 %v3245_v27, %v3245_v27  ;;  %s3998_s17 = sshra.s32 %s3478_s14, 4  ;;  %s3999_s17 = int_to_ptr.hbm [resolvable:$true] %s3998_s17 }
 0x2e6   : > { %v3341_v45 = vadd.f32 %v3340_v9, %v3339_v53  ;;  %s4000_s23 = scalar_lea.hbm %s3999_s17, 1  ;;  %p4005_p0 = scmp.lt.s32.totalorder %s3999_s17, %s5969_s4 }
 0x2e7   : > { %v3443_v54 = vsel %vm3246_vm9, %v3381_v42, 0.0  ;;  %p4001_p11 = scmp.ne.s32.totalorder %s3999_s17, %s4000_s23  ;;  %p4006_p1 = scmp.lt.s32.totalorder %s4004_s6, %s4000_s23 }
 0x2e8   : > { %v3342_v23 = vrot.slane %v3341_v45, 4  ;;  %v3444_v0 = vadd.f32 %v3443_v54, %v3442_v11 }
 0x2e9   : > { %p4002_p12 = pnand %p4001_p11, %p4148_p5  ;;  %p4007_p2 = por %p4006_p1, %p4005_p0 }
 0x2ea   : > { %v3343_v13 = vadd.f32 %v3342_v23, %v3341_v45  ;;  %v3445_v46 = vrot.slane %v3444_v0, 4 }
 0x2eb   : > { %p4003_p13 = pneg %p4002_p12 }
 0x2ec   : > { %v3344_v24 = vrot.slane %v3343_v13, 2  ;;  %v3446_v12 = vadd.f32 %v3445_v46, %v3444_v0 }
 0x2ed   : > { %p4008_p3 = pnand %p4007_p2, %p4003_p13 }
 0x2ee   : > { %v3345_v59 = vadd.f32 %v3344_v24, %v3343_v13  ;;  %v3447_v61 = vrot.slane %v3446_v12, 2 }
 0x2f0   : > { %v3346_v30 = vrot.slane %v3345_v59, 1  ;;  %v3448_v1 = vadd.f32 %v3447_v61, %v3446_v12 }
 0x2f2   : > { %v3347_v19 = vadd.f32 %v3346_v30, %v3345_v59  ;;  %v3449_v7 = vrot.slane %v3448_v1, 1 }
 0x2f4   : > { %3349 = vst.msk [vmem:[%s227_s11] sm:$0x1] %vm3348_vm1, %v3347_v19  ;;  %v3450_v52 = vadd.f32 %v3449_v7, %v3448_v1 }
 0x2f5   : > { %4011 = shalt.err (!%p4008_p3)
}
 0x2f6   : > { %3908 = dma.vmem_to_hbm [thread:$0]  (%p4148_p5), %s3476_s12, 16, %s3478_s14, %s3458_s22   ;;  %3451 = vst.msk [vmem:[%s233_s15] sm:$0x1] %vm3348_vm1, %v3450_v52 }
 0x2f7   : > { %s3462_s9 = scalar_lea.sflag [#allocation5], %s5894_s26  ;;  %s4026_s10 = sshra.s32 %s3491_s16, 4  ;;  %s4027_s10 = int_to_ptr.hbm [resolvable:$true] %s4026_s10 }
 0x2f8   : > { %s4028_s11 = scalar_lea.hbm %s4027_s10, 1  ;;  %s4032_s25 = scalar_lea.hbm %s5970_s5, 2 }
 0x2f9   : > { %p4029_p4 = scmp.ne.s32.totalorder %s4027_s10, %s4028_s11  ;;  %p4033_p9 = scmp.lt.s32.totalorder %s4027_s10, %s5970_s5 }
 0x2fa   : > { %p4034_p10 = scmp.lt.s32.totalorder %s4032_s25, %s4028_s11 }
 0x2fb   : > { %p4030_p7 = pnand %p4029_p4, %p4148_p5 }
 0x2fc   : > { %p4035_p11 = por %p4034_p10, %p4033_p9 }
 0x2fd   : > { %p4031_p8 = pneg %p4030_p7 }
 0x2ff   : > { %p4036_p12 = pnand %p4035_p11, %p4031_p8 }
 0x301   : > { %4039 = shalt.err (!%p4036_p12)
}
 0x302   : > { %3909 = dma.vmem_to_hbm [thread:$0]  (%p4148_p5), %s3489_s13, 16, %s3491_s16, %s3462_s9  }
 0x303 PF: > { %p3919_p13 = scmp.ge.s32.totalorder %s4078_s21, 2  ;;  %s3510_s26 = sand.u32 1, %s4066_s18  }
 0x304   : > { %s3511_s12 = scalar_lea.sflag [#allocation3], %s3510_s26 }
 0x305   : > { %p3913_p0 = pnand %p3919_p13, %p4152_p6 }
 0x307   : > { %p3914_p1 = pneg %p3913_p0 }
 0x309   : > { %4057 = dma.done.wait (%p3914_p1), %s3511_s12, 16  }
 0x30a   : > { %4059 = vsyncadd (%p3914_p1), %s3511_s12, 4294967280  ;;  %s3520_s14 = scalar_lea.sflag [#allocation5], %s3510_s26 }
 0x30b   : > { %4061 = dma.done.wait (%p3914_p1), %s3520_s14, 16  }
 0x30c   : > { %4063 = vsyncadd (%p3914_p1), %s3520_s14, 4294967280  ;;  %p19_p5 = scmp.ge.s32.totalorder %s4135_s24, 4   ;;  %s6417_s18 = smov %s4070_s19 }
 0x30d   : > { %s6418_s19 = smov %s4074_s20  ;;  %s6419_s20 = smov %s4146_s27 }
 0x30e   : > { %s6420_s21 = smov %s4135_s24  ;;  %21 = sbr.rel (!%p19_p5) target bundleno = 5 (0x5), region = 104 }
 0x313   :  { %3525 = vsyncpa [#allocation3], 1 }
 0x314   :  { %3527 = vsyncpa [#allocation3 + $0x1], 1 }
 0x315   :  { %3528 = vsyncpa [#allocation5], 1 }
 0x316   :  { %3530 = vsyncpa [#allocation5 + $0x1], 1 }

</bundles_post_ra>
